<compile_context>
chip_gen: v7x
topology: tpu7x:2x2x1
jax: 0.10.0
libtpu: 0.0.40
codegen_flags: <defaults>
</compile_context>

<pallas_src>
import math
import numpy as np
import jax
import jax.numpy as jnp
from jax import lax
from jax.experimental import pallas as pl
from jax.experimental.pallas import tpu as pltpu

IMG = 28                    # LeNet geometry: 28x28x1 input (fc_1 expects 16*4*4)
C1, C2 = 6, 16
K = 5
H1 = IMG - K + 1            # 24 (conv1 output)
P1 = H1 // 2                # 12 (pool1 output)
H2 = P1 - K + 1             # 8  (conv2 output)
P2 = H2 // 2                # 4  (pool2 output)
FLAT = C2 * P2 * P2         # 256
FC1, FC2 = 120, 84
LANE = 128

T1_K = 6 * IMG              # 168: six input image rows feed one pooled conv1 row
T1_N = 4 * LANE             # 512: 4 (row-parity, col-parity) blocks of [c*12 + pw]
T2_K = 6 * LANE             # 768: six act1 rows feed one pooled conv2 row
T2_N = 4 * LANE             # 512: 4 blocks of [co*4 + qw]
HNAT = P2 * LANE            # 512: kernel-natural flattened conv2 activation width


def _round_up(n, m):
    return (n + m - 1) // m * m


# ----------------------------- fused Pallas kernel -----------------------------

def lenet_kernel(x_ref, t1_ref, b1_ref, t2_ref, b2_ref,
                 wf1_ref, bf1_ref, wf2_ref, bf2_ref, wf3_ref, bf3_ref,
                 y_ref, h_ref, act1_ref):
    f32 = jnp.float32

    def pool_blocks(a, bias):
        # a: (B, 4*128) -- the 4 (row-parity, col-parity) pooling candidates live in
        # four 128-aligned lane blocks, so 2x2 max-pool is a plain VPU max.
        m = jnp.maximum(jnp.maximum(a[:, 0 * LANE:1 * LANE], a[:, 1 * LANE:2 * LANE]),
                        jnp.maximum(a[:, 2 * LANE:3 * LANE], a[:, 3 * LANE:4 * LANE]))
        return jnp.maximum(m + bias, 0.0)            # bias is uniform across candidates

    # ---- conv1 (1->6, k=5) + maxpool2 + relu: one MXU matmul per pooled row ----
    for ph in range(P1):
        xs = x_ref[:, ph * 2 * IMG: ph * 2 * IMG + T1_K]           # image rows 2ph..2ph+5
        a = jnp.dot(xs, t1_ref[...], preferred_element_type=f32)   # (B, 512)
        act1_ref[:, ph * LANE:(ph + 1) * LANE] = pool_blocks(a, b1_ref[...])

    # ---- conv2 (6->16, k=5) + maxpool2 + relu: one MXU matmul per pooled row ----
    for qh in range(P2):
        A = act1_ref[:, qh * 2 * LANE: qh * 2 * LANE + T2_K]       # act1 rows 2qh..2qh+5
        a = jnp.dot(A, t2_ref[...], preferred_element_type=f32)    # (B, 512)
        # Write into the h output buffer (kernel-natural order); it doubles as the
        # staging buffer for the FC stack.
        h_ref[:, qh * LANE:(qh + 1) * LANE] = pool_blocks(a, b2_ref[...])

    # ---- flatten + FC stack (batch on MXU M; widths padded to 128 lanes) ----
    flat = h_ref[...]                                              # (B, 512)
    z = jnp.maximum(jnp.dot(flat, wf1_ref[...], preferred_element_type=f32)
                    + bf1_ref[...], 0.0)
    z = jnp.maximum(jnp.dot(z, wf2_ref[...], preferred_element_type=f32)
                    + bf2_ref[...], 0.0)
    y_ref[...] = jnp.dot(z, wf3_ref[...], preferred_element_type=f32) + bf3_ref[...]


# ----------------------------- wrapper -----------------------------

def lenet_forward(x_nchw, prep, output_dim, b_tile=128):
    B = x_nchw.shape[0]
    nout = prep["wf3"].shape[-1]
    # Cin == 1, so NCHW -> (B, 784) is a free metadata reshape.
    x = x_nchw.reshape(B, IMG * IMG).astype(jnp.float32)

    bt = min(b_tile, _round_up(B, 8))          # batch tile (sublane-aligned)
    Bp = _round_up(B, bt)
    if Bp != B:
        x = jnp.pad(x, ((0, Bp - B), (0, 0)))

    def rep(shape):
        return pl.BlockSpec(shape, lambda b: (0, 0))   # same (full) block every step

    y_pad, h_nat = pl.pallas_call(
        lenet_kernel,
        out_shape=(jax.ShapeDtypeStruct((Bp, nout), jnp.float32),
                   jax.ShapeDtypeStruct((Bp, HNAT), jnp.float32)),
        grid=(Bp // bt,),
        in_specs=[
            pl.BlockSpec((bt, IMG * IMG), lambda b: (b, 0)),   # batch tile of images
            rep((T1_K, T1_N)), rep((1, LANE)),                 # conv1 Toeplitz + bias
            rep((T2_K, T2_N)), rep((1, LANE)),                 # conv2 Toeplitz + bias
            rep((HNAT, LANE)), rep((1, LANE)),                 # fc1 (perm folded) + bias
            rep((LANE, LANE)), rep((1, LANE)),                 # fc2 + bias
            rep((LANE, nout)), rep((1, nout)),                 # fc3 + bias
        ],
        out_specs=(pl.BlockSpec((bt, nout), lambda b: (b, 0)),
                   pl.BlockSpec((bt, HNAT), lambda b: (b, 0))),
        scratch_shapes=[pltpu.VMEM((bt, P1 * LANE), jnp.float32)],   # act1 staging
        compiler_params=pltpu.CompilerParams(
            dimension_semantics=("parallel",),
            vmem_limit_bytes=32 * 1024 * 1024),
    )(x, prep["t1"], prep["b1"], prep["t2"], prep["b2"],
      prep["wf1"], prep["bf1"], prep["wf2"], prep["bf2"], prep["wf3"], prep["bf3"])

    y = y_pad[:B, :output_dim]
    # Kernel-natural h columns are (qh, co, qw); torch NCHW flatten is (co, qh, qw).
    h = (h_nat[:B].reshape(B, P2, LANE)[:, :, :C2 * P2]
         .reshape(B, P2, C2, P2).transpose(0, 2, 1, 3).reshape(B, FLAT))
    return y, h


# ----------------------------- parameter init / prep -----------------------------

def init_params(key, output_dim):
    """PyTorch-default-style init: U(-1/sqrt(fan_in), +1/sqrt(fan_in))."""
    ks = jax.random.split(key, 10)

    def u(k, shape, fan_in):
        b = 1.0 / math.sqrt(fan_in)
        return jax.random.uniform(k, shape, jnp.float32, -b, b)

    return {
        "conv1_w": u(ks[0], (C1, 1, K, K), 1 * K * K),
        "conv1_b": u(ks[1], (C1,), 1 * K * K),
        "conv2_w": u(ks[2], (C2, C1, K, K), C1 * K * K),
        "conv2_b": u(ks[3], (C2,), C1 * K * K),
        "fc1_w": u(ks[4], (FC1, FLAT), FLAT),
        "fc1_b": u(ks[5], (FC1,), FLAT),
        "fc2_w": u(ks[6], (FC2, FC1), FC1),
        "fc2_b": u(ks[7], (FC2,), FC1),
        "fc3_w": u(ks[8], (output_dim, FC2), FC2),
        "fc3_b": u(ks[9], (output_dim,), FC2),
    }


def prepare_params(p, output_dim):
    """One-time repack (numpy, host-side) into Toeplitz / padded MXU layouts."""
    f32 = np.float32
    w1 = np.asarray(p["conv1_w"], f32)
    b1 = np.asarray(p["conv1_b"], f32)
    w2 = np.asarray(p["conv2_w"], f32)
    b2 = np.asarray(p["conv2_b"], f32)
    fc1_w, fc1_b = np.asarray(p["fc1_w"], f32), np.asarray(p["fc1_b"], f32)
    fc2_w, fc2_b = np.asarray(p["fc2_w"], f32), np.asarray(p["fc2_b"], f32)
    fc3_w, fc3_b = np.asarray(p["fc3_w"], f32), np.asarray(p["fc3_b"], f32)

    # conv1 Toeplitz: rows = (input row r)*28 + w; cols = (rr*2+p)*128 + c*12 + pw.
    # Output col value = conv1(row 2ph+rr, col 2pw+p, chan c) (bias added post-max).
    t1 = np.zeros((T1_K, T1_N), f32)
    b1p = np.zeros((1, LANE), f32)
    for c in range(C1):
        for pw in range(P1):
            b1p[0, c * P1 + pw] = b1[c]
            for rr in range(2):
                for pp in range(2):
                    col = (rr * 2 + pp) * LANE + c * P1 + pw
                    for i in range(K):
                        for j in range(K):
                            t1[(rr + i) * IMG + 2 * pw + pp + j, col] = w1[c, 0, i, j]

    # conv2 Toeplitz: rows = (act1 row r)*128 + c*12 + w_in; cols = block*128 + co*4 + qw.
    t2 = np.zeros((T2_K, T2_N), f32)
    b2p = np.zeros((1, LANE), f32)
    for co in range(C2):
        for qw in range(P2):
            b2p[0, co * P2 + qw] = b2[co]
            for rr in range(2):
                for pp in range(2):
                    col = (rr * 2 + pp) * LANE + co * P2 + qw
                    for c in range(C1):
                        for i in range(K):
                            for j in range(K):
                                row = (rr + i) * LANE + c * P1 + 2 * qw + pp + j
                                t2[row, col] = w2[co, c, i, j]

    # fc1 with the kernel-natural (qh, co, qw) -> torch (co, qh, qw) permutation folded in.
    wf1 = np.zeros((HNAT, LANE), f32)
    for qh in range(P2):
        for co in range(C2):
            for qw in range(P2):
                t = co * P2 * P2 + qh * P2 + qw
                wf1[qh * LANE + co * P2 + qw, :FC1] = fc1_w[:, t]
    bf1 = np.zeros((1, LANE), f32)
    bf1[0, :FC1] = fc1_b

    wf2 = np.zeros((LANE, LANE), f32)
    wf2[:FC1, :FC2] = fc2_w.T
    bf2 = np.zeros((1, LANE), f32)
    bf2[0, :FC2] = fc2_b

    nout = _round_up(output_dim, LANE)
    wf3 = np.zeros((LANE, nout), f32)
    wf3[:FC2, :output_dim] = fc3_w.T
    bf3 = np.zeros((1, nout), f32)
    bf3[0, :output_dim] = fc3_b

    to = jnp.asarray
    return {"t1": to(t1), "b1": to(b1p), "t2": to(t2), "b2": to(b2p),
            "wf1": to(wf1), "bf1": to(bf1), "wf2": to(wf2), "bf2": to(bf2),
            "wf3": to(wf3), "bf3": to(bf3)}


# ----------------------------- plain-JAX reference -----------------------------

def lenet_reference(x_nchw, p):
    B = x_nchw.shape[0]
    x = jnp.transpose(x_nchw, (0, 2, 3, 1)).astype(jnp.float32)   # NHWC

    def conv(v, w, b):
        return lax.conv_general_dilated(
            v, jnp.transpose(w, (2, 3, 1, 0)), (1, 1), "VALID",
            dimension_numbers=("NHWC", "HWIO", "NHWC")) + b

    def pool2(v):
        return jnp.maximum(jnp.maximum(v[:, 0::2, 0::2, :], v[:, 0::2, 1::2, :]),
                           jnp.maximum(v[:, 1::2, 0::2, :], v[:, 1::2, 1::2, :]))

    x = jnp.maximum(pool2(conv(x, p["conv1_w"], p["conv1_b"])), 0.0)
    x = jnp.maximum(pool2(conv(x, p["conv2_w"], p["conv2_b"])), 0.0)
    h = jnp.transpose(x, (0, 3, 1, 2)).reshape(B, -1)
    z = jnp.maximum(h @ p["fc1_w"].T + p["fc1_b"], 0.0)
    z = jnp.maximum(z @ p["fc2_w"].T + p["fc2_b"], 0.0)
    return z @ p["fc3_w"].T + p["fc3_b"], h


# ----------------------------- main -----------------------------

if __name__ == "__main__":
    key = jax.random.PRNGKey(0)
    k_param, k_x = jax.random.split(key)

    output_dim = 10
    params = init_params(k_param, output_dim)
    prep = prepare_params(params, output_dim)

    # LeNet geometry requires 28x28 single-channel input (fc_1 expects 16*4*4).
    x = jax.random.normal(k_x, (2, 1, IMG, IMG), dtype=jnp.float32)

    fwd = jax.jit(lambda xx: lenet_forward(xx, prep, output_dim))
    y, h = fwd(x)
    jax.block_until_ready((y, h))

    assert y.shape == (2, output_dim) and h.shape == (2, FLAT)

    y_ref, h_ref = lenet_reference(x, params)
    assert jnp.allclose(h, h_ref, atol=1e-3, rtol=1e-3), "h mismatch vs reference"
    assert jnp.allclose(y, y_ref, atol=1e-3, rtol=1e-3), "logits mismatch vs reference"

    print("KERNEL_OK")
</pallas_src>

<mosaic_0001>
module attributes {stable_mosaic.version = 11 : i64} {
  func.func @lenet_kernel(%arg0: i32, %arg1: memref<8x784xf32, #tpu.memory_space<vmem>>, %arg2: memref<168x512xf32, #tpu.memory_space<vmem>>, %arg3: memref<1x128xf32, #tpu.memory_space<vmem>>, %arg4: memref<768x512xf32, #tpu.memory_space<vmem>>, %arg5: memref<1x128xf32, #tpu.memory_space<vmem>>, %arg6: memref<512x128xf32, #tpu.memory_space<vmem>>, %arg7: memref<1x128xf32, #tpu.memory_space<vmem>>, %arg8: memref<128x128xf32, #tpu.memory_space<vmem>>, %arg9: memref<1x128xf32, #tpu.memory_space<vmem>>, %arg10: memref<128x128xf32, #tpu.memory_space<vmem>>, %arg11: memref<1x128xf32, #tpu.memory_space<vmem>>, %arg12: memref<8x128xf32, #tpu.memory_space<vmem>>, %arg13: memref<8x512xf32, #tpu.memory_space<vmem>>, %arg14: memref<8x1536xf32, #tpu.memory_space<vmem>>) attributes {dimension_semantics = [#tpu.dimension_semantics<parallel>], iteration_bounds = array<i64: 1>, scalar_prefetch = 0 : i64, scratch_operands = 1 : i64, tpu.core_type = #tpu.core_type<tc>, window_params = [{transform_indices = @transform_0, window_bounds = array<i64: 8, 784>}, {pipeline_mode = #tpu.pipeline_mode<synchronous>, transform_indices = @transform_1, window_bounds = array<i64: 168, 512>}, {pipeline_mode = #tpu.pipeline_mode<synchronous>, transform_indices = @transform_2, window_bounds = array<i64: 1, 128>}, {pipeline_mode = #tpu.pipeline_mode<synchronous>, transform_indices = @transform_3, window_bounds = array<i64: 768, 512>}, {pipeline_mode = #tpu.pipeline_mode<synchronous>, transform_indices = @transform_4, window_bounds = array<i64: 1, 128>}, {pipeline_mode = #tpu.pipeline_mode<synchronous>, transform_indices = @transform_5, window_bounds = array<i64: 512, 128>}, {pipeline_mode = #tpu.pipeline_mode<synchronous>, transform_indices = @transform_6, window_bounds = array<i64: 1, 128>}, {pipeline_mode = #tpu.pipeline_mode<synchronous>, transform_indices = @transform_7, window_bounds = array<i64: 128, 128>}, {pipeline_mode = #tpu.pipeline_mode<synchronous>, transform_indices = @transform_8, window_bounds = array<i64: 1, 128>}, {pipeline_mode = #tpu.pipeline_mode<synchronous>, transform_indices = @transform_9, window_bounds = array<i64: 128, 128>}, {pipeline_mode = #tpu.pipeline_mode<synchronous>, transform_indices = @transform_10, window_bounds = array<i64: 1, 128>}, {transform_indices = @transform_11, window_bounds = array<i64: 8, 128>}, {transform_indices = @transform_12, window_bounds = array<i64: 8, 512>}]} {
    %c0 = arith.constant 0 : index
    %c0_0 = arith.constant 0 : index
    %0 = vector.load %arg1[%c0, %c0_0] : memref<8x784xf32, #tpu.memory_space<vmem>>, vector<8x168xf32>
    %c0_1 = arith.constant 0 : index
    %c0_2 = arith.constant 0 : index
    %1 = vector.load %arg2[%c0_1, %c0_2] : memref<168x512xf32, #tpu.memory_space<vmem>>, vector<168x512xf32>
    %cst = arith.constant dense<0.000000e+00> : vector<8x512xf32>
    %2 = tpu.matmul %0, %1, %cst {dimension_numbers = #tpu.dot_dimension_numbers<[1], [0], [0], [1], [0, 0, 1, 1], [], []>} : vector<8x168xf32>, vector<168x512xf32>, vector<8x512xf32> -> vector<8x512xf32>
    %c0_3 = arith.constant 0 : index
    %c0_4 = arith.constant 0 : index
    %3 = vector.load %arg3[%c0_3, %c0_4] : memref<1x128xf32, #tpu.memory_space<vmem>>, vector<1x128xf32>
    %4 = vector.extract_strided_slice %2 {offsets = [0, 0], sizes = [8, 128], strides = [1, 1]} : vector<8x512xf32> to vector<8x128xf32>
    %5 = vector.extract_strided_slice %2 {offsets = [0, 128], sizes = [8, 128], strides = [1, 1]} : vector<8x512xf32> to vector<8x128xf32>
    %6 = arith.maximumf %4, %5 : vector<8x128xf32>
    %7 = vector.extract_strided_slice %2 {offsets = [0, 256], sizes = [8, 128], strides = [1, 1]} : vector<8x512xf32> to vector<8x128xf32>
    %8 = vector.extract_strided_slice %2 {offsets = [0, 384], sizes = [8, 128], strides = [1, 1]} : vector<8x512xf32> to vector<8x128xf32>
    %9 = arith.maximumf %7, %8 : vector<8x128xf32>
    %10 = arith.maximumf %6, %9 : vector<8x128xf32>
    %11 = vector.broadcast %3 : vector<1x128xf32> to vector<8x128xf32>
    %12 = arith.addf %10, %11 : vector<8x128xf32>
    %cst_5 = arith.constant 0.000000e+00 : f32
    %13 = vector.broadcast %cst_5 : f32 to vector<8x128xf32>
    %14 = arith.maximumf %12, %13 : vector<8x128xf32>
    %c0_6 = arith.constant 0 : index
    %c0_7 = arith.constant 0 : index
    %15 = vector.load %arg14[%c0_6, %c0_7] : memref<8x1536xf32, #tpu.memory_space<vmem>>, vector<8x128xf32>
    tpu.vector_store %arg14[%c0_6, %c0_7], %14 {strides = array<i32>} : memref<8x1536xf32, #tpu.memory_space<vmem>>, vector<8x128xf32>,
    %c0_8 = arith.constant 0 : index
    %c56 = arith.constant 56 : index
    %16 = vector.load %arg1[%c0_8, %c56] : memref<8x784xf32, #tpu.memory_space<vmem>>, vector<8x168xf32>
    %c0_9 = arith.constant 0 : index
    %c0_10 = arith.constant 0 : index
    %17 = vector.load %arg2[%c0_9, %c0_10] : memref<168x512xf32, #tpu.memory_space<vmem>>, vector<168x512xf32>
    %cst_11 = arith.constant dense<0.000000e+00> : vector<8x512xf32>
    %18 = tpu.matmul %16, %17, %cst_11 {dimension_numbers = #tpu.dot_dimension_numbers<[1], [0], [0], [1], [0, 0, 1, 1], [], []>} : vector<8x168xf32>, vector<168x512xf32>, vector<8x512xf32> -> vector<8x512xf32>
    %c0_12 = arith.constant 0 : index
    %c0_13 = arith.constant 0 : index
    %19 = vector.load %arg3[%c0_12, %c0_13] : memref<1x128xf32, #tpu.memory_space<vmem>>, vector<1x128xf32>
    %20 = vector.extract_strided_slice %18 {offsets = [0, 0], sizes = [8, 128], strides = [1, 1]} : vector<8x512xf32> to vector<8x128xf32>
    %21 = vector.extract_strided_slice %18 {offsets = [0, 128], sizes = [8, 128], strides = [1, 1]} : vector<8x512xf32> to vector<8x128xf32>
    %22 = arith.maximumf %20, %21 : vector<8x128xf32>
    %23 = vector.extract_strided_slice %18 {offsets = [0, 256], sizes = [8, 128], strides = [1, 1]} : vector<8x512xf32> to vector<8x128xf32>
    %24 = vector.extract_strided_slice %18 {offsets = [0, 384], sizes = [8, 128], strides = [1, 1]} : vector<8x512xf32> to vector<8x128xf32>
    %25 = arith.maximumf %23, %24 : vector<8x128xf32>
    %26 = arith.maximumf %22, %25 : vector<8x128xf32>
    %27 = vector.broadcast %19 : vector<1x128xf32> to vector<8x128xf32>
    %28 = arith.addf %26, %27 : vector<8x128xf32>
    %cst_14 = arith.constant 0.000000e+00 : f32
    %29 = vector.broadcast %cst_14 : f32 to vector<8x128xf32>
    %30 = arith.maximumf %28, %29 : vector<8x128xf32>
    %c0_15 = arith.constant 0 : index
    %c128 = arith.constant 128 : index
    %31 = vector.load %arg14[%c0_15, %c128] : memref<8x1536xf32, #tpu.memory_space<vmem>>, vector<8x128xf32>
    tpu.vector_store %arg14[%c0_15, %c128], %30 {strides = array<i32>} : memref<8x1536xf32, #tpu.memory_space<vmem>>, vector<8x128xf32>,
    %c0_16 = arith.constant 0 : index
    %c112 = arith.constant 112 : index
    %32 = vector.load %arg1[%c0_16, %c112] : memref<8x784xf32, #tpu.memory_space<vmem>>, vector<8x168xf32>
    %c0_17 = arith.constant 0 : index
    %c0_18 = arith.constant 0 : index
    %33 = vector.load %arg2[%c0_17, %c0_18] : memref<168x512xf32, #tpu.memory_space<vmem>>, vector<168x512xf32>
    %cst_19 = arith.constant dense<0.000000e+00> : vector<8x512xf32>
    %34 = tpu.matmul %32, %33, %cst_19 {dimension_numbers = #tpu.dot_dimension_numbers<[1], [0], [0], [1], [0, 0, 1, 1], [], []>} : vector<8x168xf32>, vector<168x512xf32>, vector<8x512xf32> -> vector<8x512xf32>
    %c0_20 = arith.constant 0 : index
    %c0_21 = arith.constant 0 : index
    %35 = vector.load %arg3[%c0_20, %c0_21] : memref<1x128xf32, #tpu.memory_space<vmem>>, vector<1x128xf32>
    %36 = vector.extract_strided_slice %34 {offsets = [0, 0], sizes = [8, 128], strides = [1, 1]} : vector<8x512xf32> to vector<8x128xf32>
    %37 = vector.extract_strided_slice %34 {offsets = [0, 128], sizes = [8, 128], strides = [1, 1]} : vector<8x512xf32> to vector<8x128xf32>
    %38 = arith.maximumf %36, %37 : vector<8x128xf32>
    %39 = vector.extract_strided_slice %34 {offsets = [0, 256], sizes = [8, 128], strides = [1, 1]} : vector<8x512xf32> to vector<8x128xf32>
    %40 = vector.extract_strided_slice %34 {offsets = [0, 384], sizes = [8, 128], strides = [1, 1]} : vector<8x512xf32> to vector<8x128xf32>
    %41 = arith.maximumf %39, %40 : vector<8x128xf32>
    %42 = arith.maximumf %38, %41 : vector<8x128xf32>
    %43 = vector.broadcast %35 : vector<1x128xf32> to vector<8x128xf32>
    %44 = arith.addf %42, %43 : vector<8x128xf32>
    %cst_22 = arith.constant 0.000000e+00 : f32
    %45 = vector.broadcast %cst_22 : f32 to vector<8x128xf32>
    %46 = arith.maximumf %44, %45 : vector<8x128xf32>
    %c0_23 = arith.constant 0 : index
    %c256 = arith.constant 256 : index
    %47 = vector.load %arg14[%c0_23, %c256] : memref<8x1536xf32, #tpu.memory_space<vmem>>, vector<8x128xf32>
    tpu.vector_store %arg14[%c0_23, %c256], %46 {strides = array<i32>} : memref<8x1536xf32, #tpu.memory_space<vmem>>, vector<8x128xf32>,
    %c0_24 = arith.constant 0 : index
    %c168 = arith.constant 168 : index
    %48 = vector.load %arg1[%c0_24, %c168] : memref<8x784xf32, #tpu.memory_space<vmem>>, vector<8x168xf32>
    %c0_25 = arith.constant 0 : index
    %c0_26 = arith.constant 0 : index
    %49 = vector.load %arg2[%c0_25, %c0_26] : memref<168x512xf32, #tpu.memory_space<vmem>>, vector<168x512xf32>
    %cst_27 = arith.constant dense<0.000000e+00> : vector<8x512xf32>
    %50 = tpu.matmul %48, %49, %cst_27 {dimension_numbers = #tpu.dot_dimension_numbers<[1], [0], [0], [1], [0, 0, 1, 1], [], []>} : vector<8x168xf32>, vector<168x512xf32>, vector<8x512xf32> -> vector<8x512xf32>
    %c0_28 = arith.constant 0 : index
    %c0_29 = arith.constant 0 : index
    %51 = vector.load %arg3[%c0_28, %c0_29] : memref<1x128xf32, #tpu.memory_space<vmem>>, vector<1x128xf32>
    %52 = vector.extract_strided_slice %50 {offsets = [0, 0], sizes = [8, 128], strides = [1, 1]} : vector<8x512xf32> to vector<8x128xf32>
    %53 = vector.extract_strided_slice %50 {offsets = [0, 128], sizes = [8, 128], strides = [1, 1]} : vector<8x512xf32> to vector<8x128xf32>
    %54 = arith.maximumf %52, %53 : vector<8x128xf32>
    %55 = vector.extract_strided_slice %50 {offsets = [0, 256], sizes = [8, 128], strides = [1, 1]} : vector<8x512xf32> to vector<8x128xf32>
    %56 = vector.extract_strided_slice %50 {offsets = [0, 384], sizes = [8, 128], strides = [1, 1]} : vector<8x512xf32> to vector<8x128xf32>
    %57 = arith.maximumf %55, %56 : vector<8x128xf32>
    %58 = arith.maximumf %54, %57 : vector<8x128xf32>
    %59 = vector.broadcast %51 : vector<1x128xf32> to vector<8x128xf32>
    %60 = arith.addf %58, %59 : vector<8x128xf32>
    %cst_30 = arith.constant 0.000000e+00 : f32
    %61 = vector.broadcast %cst_30 : f32 to vector<8x128xf32>
    %62 = arith.maximumf %60, %61 : vector<8x128xf32>
    %c0_31 = arith.constant 0 : index
    %c384 = arith.constant 384 : index
    %63 = vector.load %arg14[%c0_31, %c384] : memref<8x1536xf32, #tpu.memory_space<vmem>>, vector<8x128xf32>
    tpu.vector_store %arg14[%c0_31, %c384], %62 {strides = array<i32>} : memref<8x1536xf32, #tpu.memory_space<vmem>>, vector<8x128xf32>,
    %c0_32 = arith.constant 0 : index
    %c224 = arith.constant 224 : index
    %64 = vector.load %arg1[%c0_32, %c224] : memref<8x784xf32, #tpu.memory_space<vmem>>, vector<8x168xf32>
    %c0_33 = arith.constant 0 : index
    %c0_34 = arith.constant 0 : index
    %65 = vector.load %arg2[%c0_33, %c0_34] : memref<168x512xf32, #tpu.memory_space<vmem>>, vector<168x512xf32>
    %cst_35 = arith.constant dense<0.000000e+00> : vector<8x512xf32>
    %66 = tpu.matmul %64, %65, %cst_35 {dimension_numbers = #tpu.dot_dimension_numbers<[1], [0], [0], [1], [0, 0, 1, 1], [], []>} : vector<8x168xf32>, vector<168x512xf32>, vector<8x512xf32> -> vector<8x512xf32>
    %c0_36 = arith.constant 0 : index
    %c0_37 = arith.constant 0 : index
    %67 = vector.load %arg3[%c0_36, %c0_37] : memref<1x128xf32, #tpu.memory_space<vmem>>, vector<1x128xf32>
    %68 = vector.extract_strided_slice %66 {offsets = [0, 0], sizes = [8, 128], strides = [1, 1]} : vector<8x512xf32> to vector<8x128xf32>
    %69 = vector.extract_strided_slice %66 {offsets = [0, 128], sizes = [8, 128], strides = [1, 1]} : vector<8x512xf32> to vector<8x128xf32>
    %70 = arith.maximumf %68, %69 : vector<8x128xf32>
    %71 = vector.extract_strided_slice %66 {offsets = [0, 256], sizes = [8, 128], strides = [1, 1]} : vector<8x512xf32> to vector<8x128xf32>
    %72 = vector.extract_strided_slice %66 {offsets = [0, 384], sizes = [8, 128], strides = [1, 1]} : vector<8x512xf32> to vector<8x128xf32>
    %73 = arith.maximumf %71, %72 : vector<8x128xf32>
    %74 = arith.maximumf %70, %73 : vector<8x128xf32>
    %75 = vector.broadcast %67 : vector<1x128xf32> to vector<8x128xf32>
    %76 = arith.addf %74, %75 : vector<8x128xf32>
    %cst_38 = arith.constant 0.000000e+00 : f32
    %77 = vector.broadcast %cst_38 : f32 to vector<8x128xf32>
    %78 = arith.maximumf %76, %77 : vector<8x128xf32>
    %c0_39 = arith.constant 0 : index
    %c512 = arith.constant 512 : index
    %79 = vector.load %arg14[%c0_39, %c512] : memref<8x1536xf32, #tpu.memory_space<vmem>>, vector<8x128xf32>
    tpu.vector_store %arg14[%c0_39, %c512], %78 {strides = array<i32>} : memref<8x1536xf32, #tpu.memory_space<vmem>>, vector<8x128xf32>,
    %c0_40 = arith.constant 0 : index
    %c280 = arith.constant 280 : index
    %80 = vector.load %arg1[%c0_40, %c280] : memref<8x784xf32, #tpu.memory_space<vmem>>, vector<8x168xf32>
    %c0_41 = arith.constant 0 : index
    %c0_42 = arith.constant 0 : index
    %81 = vector.load %arg2[%c0_41, %c0_42] : memref<168x512xf32, #tpu.memory_space<vmem>>, vector<168x512xf32>
    %cst_43 = arith.constant dense<0.000000e+00> : vector<8x512xf32>
    %82 = tpu.matmul %80, %81, %cst_43 {dimension_numbers = #tpu.dot_dimension_numbers<[1], [0], [0], [1], [0, 0, 1, 1], [], []>} : vector<8x168xf32>, vector<168x512xf32>, vector<8x512xf32> -> vector<8x512xf32>
    %c0_44 = arith.constant 0 : index
    %c0_45 = arith.constant 0 : index
    %83 = vector.load %arg3[%c0_44, %c0_45] : memref<1x128xf32, #tpu.memory_space<vmem>>, vector<1x128xf32>
    %84 = vector.extract_strided_slice %82 {offsets = [0, 0], sizes = [8, 128], strides = [1, 1]} : vector<8x512xf32> to vector<8x128xf32>
    %85 = vector.extract_strided_slice %82 {offsets = [0, 128], sizes = [8, 128], strides = [1, 1]} : vector<8x512xf32> to vector<8x128xf32>
    %86 = arith.maximumf %84, %85 : vector<8x128xf32>
    %87 = vector.extract_strided_slice %82 {offsets = [0, 256], sizes = [8, 128], strides = [1, 1]} : vector<8x512xf32> to vector<8x128xf32>
    %88 = vector.extract_strided_slice %82 {offsets = [0, 384], sizes = [8, 128], strides = [1, 1]} : vector<8x512xf32> to vector<8x128xf32>
    %89 = arith.maximumf %87, %88 : vector<8x128xf32>
    %90 = arith.maximumf %86, %89 : vector<8x128xf32>
    %91 = vector.broadcast %83 : vector<1x128xf32> to vector<8x128xf32>
    %92 = arith.addf %90, %91 : vector<8x128xf32>
    %cst_46 = arith.constant 0.000000e+00 : f32
    %93 = vector.broadcast %cst_46 : f32 to vector<8x128xf32>
    %94 = arith.maximumf %92, %93 : vector<8x128xf32>
    %c0_47 = arith.constant 0 : index
    %c640 = arith.constant 640 : index
    %95 = vector.load %arg14[%c0_47, %c640] : memref<8x1536xf32, #tpu.memory_space<vmem>>, vector<8x128xf32>
    tpu.vector_store %arg14[%c0_47, %c640], %94 {strides = array<i32>} : memref<8x1536xf32, #tpu.memory_space<vmem>>, vector<8x128xf32>,
    %c0_48 = arith.constant 0 : index
    %c336 = arith.constant 336 : index
    %96 = vector.load %arg1[%c0_48, %c336] : memref<8x784xf32, #tpu.memory_space<vmem>>, vector<8x168xf32>
    %c0_49 = arith.constant 0 : index
    %c0_50 = arith.constant 0 : index
    %97 = vector.load %arg2[%c0_49, %c0_50] : memref<168x512xf32, #tpu.memory_space<vmem>>, vector<168x512xf32>
    %cst_51 = arith.constant dense<0.000000e+00> : vector<8x512xf32>
    %98 = tpu.matmul %96, %97, %cst_51 {dimension_numbers = #tpu.dot_dimension_numbers<[1], [0], [0], [1], [0, 0, 1, 1], [], []>} : vector<8x168xf32>, vector<168x512xf32>, vector<8x512xf32> -> vector<8x512xf32>
    %c0_52 = arith.constant 0 : index
    %c0_53 = arith.constant 0 : index
    %99 = vector.load %arg3[%c0_52, %c0_53] : memref<1x128xf32, #tpu.memory_space<vmem>>, vector<1x128xf32>
    %100 = vector.extract_strided_slice %98 {offsets = [0, 0], sizes = [8, 128], strides = [1, 1]} : vector<8x512xf32> to vector<8x128xf32>
    %101 = vector.extract_strided_slice %98 {offsets = [0, 128], sizes = [8, 128], strides = [1, 1]} : vector<8x512xf32> to vector<8x128xf32>
    %102 = arith.maximumf %100, %101 : vector<8x128xf32>
    %103 = vector.extract_strided_slice %98 {offsets = [0, 256], sizes = [8, 128], strides = [1, 1]} : vector<8x512xf32> to vector<8x128xf32>
    %104 = vector.extract_strided_slice %98 {offsets = [0, 384], sizes = [8, 128], strides = [1, 1]} : vector<8x512xf32> to vector<8x128xf32>
    %105 = arith.maximumf %103, %104 : vector<8x128xf32>
    %106 = arith.maximumf %102, %105 : vector<8x128xf32>
    %107 = vector.broadcast %99 : vector<1x128xf32> to vector<8x128xf32>
    %108 = arith.addf %106, %107 : vector<8x128xf32>
    %cst_54 = arith.constant 0.000000e+00 : f32
    %109 = vector.broadcast %cst_54 : f32 to vector<8x128xf32>
    %110 = arith.maximumf %108, %109 : vector<8x128xf32>
    %c0_55 = arith.constant 0 : index
    %c768 = arith.constant 768 : index
    %111 = vector.load %arg14[%c0_55, %c768] : memref<8x1536xf32, #tpu.memory_space<vmem>>, vector<8x128xf32>
    tpu.vector_store %arg14[%c0_55, %c768], %110 {strides = array<i32>} : memref<8x1536xf32, #tpu.memory_space<vmem>>, vector<8x128xf32>,
    %c0_56 = arith.constant 0 : index
    %c392 = arith.constant 392 : index
    %112 = vector.load %arg1[%c0_56, %c392] : memref<8x784xf32, #tpu.memory_space<vmem>>, vector<8x168xf32>
    %c0_57 = arith.constant 0 : index
    %c0_58 = arith.constant 0 : index
    %113 = vector.load %arg2[%c0_57, %c0_58] : memref<168x512xf32, #tpu.memory_space<vmem>>, vector<168x512xf32>
    %cst_59 = arith.constant dense<0.000000e+00> : vector<8x512xf32>
    %114 = tpu.matmul %112, %113, %cst_59 {dimension_numbers = #tpu.dot_dimension_numbers<[1], [0], [0], [1], [0, 0, 1, 1], [], []>} : vector<8x168xf32>, vector<168x512xf32>, vector<8x512xf32> -> vector<8x512xf32>
    %c0_60 = arith.constant 0 : index
    %c0_61 = arith.constant 0 : index
    %115 = vector.load %arg3[%c0_60, %c0_61] : memref<1x128xf32, #tpu.memory_space<vmem>>, vector<1x128xf32>
    %116 = vector.extract_strided_slice %114 {offsets = [0, 0], sizes = [8, 128], strides = [1, 1]} : vector<8x512xf32> to vector<8x128xf32>
    %117 = vector.extract_strided_slice %114 {offsets = [0, 128], sizes = [8, 128], strides = [1, 1]} : vector<8x512xf32> to vector<8x128xf32>
    %118 = arith.maximumf %116, %117 : vector<8x128xf32>
    %119 = vector.extract_strided_slice %114 {offsets = [0, 256], sizes = [8, 128], strides = [1, 1]} : vector<8x512xf32> to vector<8x128xf32>
    %120 = vector.extract_strided_slice %114 {offsets = [0, 384], sizes = [8, 128], strides = [1, 1]} : vector<8x512xf32> to vector<8x128xf32>
    %121 = arith.maximumf %119, %120 : vector<8x128xf32>
    %122 = arith.maximumf %118, %121 : vector<8x128xf32>
    %123 = vector.broadcast %115 : vector<1x128xf32> to vector<8x128xf32>
    %124 = arith.addf %122, %123 : vector<8x128xf32>
    %cst_62 = arith.constant 0.000000e+00 : f32
    %125 = vector.broadcast %cst_62 : f32 to vector<8x128xf32>
    %126 = arith.maximumf %124, %125 : vector<8x128xf32>
    %c0_63 = arith.constant 0 : index
    %c896 = arith.constant 896 : index
    %127 = vector.load %arg14[%c0_63, %c896] : memref<8x1536xf32, #tpu.memory_space<vmem>>, vector<8x128xf32>
    tpu.vector_store %arg14[%c0_63, %c896], %126 {strides = array<i32>} : memref<8x1536xf32, #tpu.memory_space<vmem>>, vector<8x128xf32>,
    %c0_64 = arith.constant 0 : index
    %c448 = arith.constant 448 : index
    %128 = vector.load %arg1[%c0_64, %c448] : memref<8x784xf32, #tpu.memory_space<vmem>>, vector<8x168xf32>
    %c0_65 = arith.constant 0 : index
    %c0_66 = arith.constant 0 : index
    %129 = vector.load %arg2[%c0_65, %c0_66] : memref<168x512xf32, #tpu.memory_space<vmem>>, vector<168x512xf32>
    %cst_67 = arith.constant dense<0.000000e+00> : vector<8x512xf32>
    %130 = tpu.matmul %128, %129, %cst_67 {dimension_numbers = #tpu.dot_dimension_numbers<[1], [0], [0], [1], [0, 0, 1, 1], [], []>} : vector<8x168xf32>, vector<168x512xf32>, vector<8x512xf32> -> vector<8x512xf32>
    %c0_68 = arith.constant 0 : index
    %c0_69 = arith.constant 0 : index
    %131 = vector.load %arg3[%c0_68, %c0_69] : memref<1x128xf32, #tpu.memory_space<vmem>>, vector<1x128xf32>
    %132 = vector.extract_strided_slice %130 {offsets = [0, 0], sizes = [8, 128], strides = [1, 1]} : vector<8x512xf32> to vector<8x128xf32>
    %133 = vector.extract_strided_slice %130 {offsets = [0, 128], sizes = [8, 128], strides = [1, 1]} : vector<8x512xf32> to vector<8x128xf32>
    %134 = arith.maximumf %132, %133 : vector<8x128xf32>
    %135 = vector.extract_strided_slice %130 {offsets = [0, 256], sizes = [8, 128], strides = [1, 1]} : vector<8x512xf32> to vector<8x128xf32>
    %136 = vector.extract_strided_slice %130 {offsets = [0, 384], sizes = [8, 128], strides = [1, 1]} : vector<8x512xf32> to vector<8x128xf32>
    %137 = arith.maximumf %135, %136 : vector<8x128xf32>
    %138 = arith.maximumf %134, %137 : vector<8x128xf32>
    %139 = vector.broadcast %131 : vector<1x128xf32> to vector<8x128xf32>
    %140 = arith.addf %138, %139 : vector<8x128xf32>
    %cst_70 = arith.constant 0.000000e+00 : f32
    %141 = vector.broadcast %cst_70 : f32 to vector<8x128xf32>
    %142 = arith.maximumf %140, %141 : vector<8x128xf32>
    %c0_71 = arith.constant 0 : index
    %c1024 = arith.constant 1024 : index
    %143 = vector.load %arg14[%c0_71, %c1024] : memref<8x1536xf32, #tpu.memory_space<vmem>>, vector<8x128xf32>
    tpu.vector_store %arg14[%c0_71, %c1024], %142 {strides = array<i32>} : memref<8x1536xf32, #tpu.memory_space<vmem>>, vector<8x128xf32>,
    %c0_72 = arith.constant 0 : index
    %c504 = arith.constant 504 : index
    %144 = vector.load %arg1[%c0_72, %c504] : memref<8x784xf32, #tpu.memory_space<vmem>>, vector<8x168xf32>
    %c0_73 = arith.constant 0 : index
    %c0_74 = arith.constant 0 : index
    %145 = vector.load %arg2[%c0_73, %c0_74] : memref<168x512xf32, #tpu.memory_space<vmem>>, vector<168x512xf32>
    %cst_75 = arith.constant dense<0.000000e+00> : vector<8x512xf32>
    %146 = tpu.matmul %144, %145, %cst_75 {dimension_numbers = #tpu.dot_dimension_numbers<[1], [0], [0], [1], [0, 0, 1, 1], [], []>} : vector<8x168xf32>, vector<168x512xf32>, vector<8x512xf32> -> vector<8x512xf32>
    %c0_76 = arith.constant 0 : index
    %c0_77 = arith.constant 0 : index
    %147 = vector.load %arg3[%c0_76, %c0_77] : memref<1x128xf32, #tpu.memory_space<vmem>>, vector<1x128xf32>
    %148 = vector.extract_strided_slice %146 {offsets = [0, 0], sizes = [8, 128], strides = [1, 1]} : vector<8x512xf32> to vector<8x128xf32>
    %149 = vector.extract_strided_slice %146 {offsets = [0, 128], sizes = [8, 128], strides = [1, 1]} : vector<8x512xf32> to vector<8x128xf32>
    %150 = arith.maximumf %148, %149 : vector<8x128xf32>
    %151 = vector.extract_strided_slice %146 {offsets = [0, 256], sizes = [8, 128], strides = [1, 1]} : vector<8x512xf32> to vector<8x128xf32>
    %152 = vector.extract_strided_slice %146 {offsets = [0, 384], sizes = [8, 128], strides = [1, 1]} : vector<8x512xf32> to vector<8x128xf32>
    %153 = arith.maximumf %151, %152 : vector<8x128xf32>
    %154 = arith.maximumf %150, %153 : vector<8x128xf32>
    %155 = vector.broadcast %147 : vector<1x128xf32> to vector<8x128xf32>
    %156 = arith.addf %154, %155 : vector<8x128xf32>
    %cst_78 = arith.constant 0.000000e+00 : f32
    %157 = vector.broadcast %cst_78 : f32 to vector<8x128xf32>
    %158 = arith.maximumf %156, %157 : vector<8x128xf32>
    %c0_79 = arith.constant 0 : index
    %c1152 = arith.constant 1152 : index
    %159 = vector.load %arg14[%c0_79, %c1152] : memref<8x1536xf32, #tpu.memory_space<vmem>>, vector<8x128xf32>
    tpu.vector_store %arg14[%c0_79, %c1152], %158 {strides = array<i32>} : memref<8x1536xf32, #tpu.memory_space<vmem>>, vector<8x128xf32>,
    %c0_80 = arith.constant 0 : index
    %c560 = arith.constant 560 : index
    %160 = vector.load %arg1[%c0_80, %c560] : memref<8x784xf32, #tpu.memory_space<vmem>>, vector<8x168xf32>
    %c0_81 = arith.constant 0 : index
    %c0_82 = arith.constant 0 : index
    %161 = vector.load %arg2[%c0_81, %c0_82] : memref<168x512xf32, #tpu.memory_space<vmem>>, vector<168x512xf32>
    %cst_83 = arith.constant dense<0.000000e+00> : vector<8x512xf32>
    %162 = tpu.matmul %160, %161, %cst_83 {dimension_numbers = #tpu.dot_dimension_numbers<[1], [0], [0], [1], [0, 0, 1, 1], [], []>} : vector<8x168xf32>, vector<168x512xf32>, vector<8x512xf32> -> vector<8x512xf32>
    %c0_84 = arith.constant 0 : index
    %c0_85 = arith.constant 0 : index
    %163 = vector.load %arg3[%c0_84, %c0_85] : memref<1x128xf32, #tpu.memory_space<vmem>>, vector<1x128xf32>
    %164 = vector.extract_strided_slice %162 {offsets = [0, 0], sizes = [8, 128], strides = [1, 1]} : vector<8x512xf32> to vector<8x128xf32>
    %165 = vector.extract_strided_slice %162 {offsets = [0, 128], sizes = [8, 128], strides = [1, 1]} : vector<8x512xf32> to vector<8x128xf32>
    %166 = arith.maximumf %164, %165 : vector<8x128xf32>
    %167 = vector.extract_strided_slice %162 {offsets = [0, 256], sizes = [8, 128], strides = [1, 1]} : vector<8x512xf32> to vector<8x128xf32>
    %168 = vector.extract_strided_slice %162 {offsets = [0, 384], sizes = [8, 128], strides = [1, 1]} : vector<8x512xf32> to vector<8x128xf32>
    %169 = arith.maximumf %167, %168 : vector<8x128xf32>
    %170 = arith.maximumf %166, %169 : vector<8x128xf32>
    %171 = vector.broadcast %163 : vector<1x128xf32> to vector<8x128xf32>
    %172 = arith.addf %170, %171 : vector<8x128xf32>
    %cst_86 = arith.constant 0.000000e+00 : f32
    %173 = vector.broadcast %cst_86 : f32 to vector<8x128xf32>
    %174 = arith.maximumf %172, %173 : vector<8x128xf32>
    %c0_87 = arith.constant 0 : index
    %c1280 = arith.constant 1280 : index
    %175 = vector.load %arg14[%c0_87, %c1280] : memref<8x1536xf32, #tpu.memory_space<vmem>>, vector<8x128xf32>
    tpu.vector_store %arg14[%c0_87, %c1280], %174 {strides = array<i32>} : memref<8x1536xf32, #tpu.memory_space<vmem>>, vector<8x128xf32>,
    %c0_88 = arith.constant 0 : index
    %c616 = arith.constant 616 : index
    %176 = vector.load %arg1[%c0_88, %c616] : memref<8x784xf32, #tpu.memory_space<vmem>>, vector<8x168xf32>
    %c0_89 = arith.constant 0 : index
    %c0_90 = arith.constant 0 : index
    %177 = vector.load %arg2[%c0_89, %c0_90] : memref<168x512xf32, #tpu.memory_space<vmem>>, vector<168x512xf32>
    %cst_91 = arith.constant dense<0.000000e+00> : vector<8x512xf32>
    %178 = tpu.matmul %176, %177, %cst_91 {dimension_numbers = #tpu.dot_dimension_numbers<[1], [0], [0], [1], [0, 0, 1, 1], [], []>} : vector<8x168xf32>, vector<168x512xf32>, vector<8x512xf32> -> vector<8x512xf32>
    %c0_92 = arith.constant 0 : index
    %c0_93 = arith.constant 0 : index
    %179 = vector.load %arg3[%c0_92, %c0_93] : memref<1x128xf32, #tpu.memory_space<vmem>>, vector<1x128xf32>
    %180 = vector.extract_strided_slice %178 {offsets = [0, 0], sizes = [8, 128], strides = [1, 1]} : vector<8x512xf32> to vector<8x128xf32>
    %181 = vector.extract_strided_slice %178 {offsets = [0, 128], sizes = [8, 128], strides = [1, 1]} : vector<8x512xf32> to vector<8x128xf32>
    %182 = arith.maximumf %180, %181 : vector<8x128xf32>
    %183 = vector.extract_strided_slice %178 {offsets = [0, 256], sizes = [8, 128], strides = [1, 1]} : vector<8x512xf32> to vector<8x128xf32>
    %184 = vector.extract_strided_slice %178 {offsets = [0, 384], sizes = [8, 128], strides = [1, 1]} : vector<8x512xf32> to vector<8x128xf32>
    %185 = arith.maximumf %183, %184 : vector<8x128xf32>
    %186 = arith.maximumf %182, %185 : vector<8x128xf32>
    %187 = vector.broadcast %179 : vector<1x128xf32> to vector<8x128xf32>
    %188 = arith.addf %186, %187 : vector<8x128xf32>
    %cst_94 = arith.constant 0.000000e+00 : f32
    %189 = vector.broadcast %cst_94 : f32 to vector<8x128xf32>
    %190 = arith.maximumf %188, %189 : vector<8x128xf32>
    %c0_95 = arith.constant 0 : index
    %c1408 = arith.constant 1408 : index
    %191 = vector.load %arg14[%c0_95, %c1408] : memref<8x1536xf32, #tpu.memory_space<vmem>>, vector<8x128xf32>
    tpu.vector_store %arg14[%c0_95, %c1408], %190 {strides = array<i32>} : memref<8x1536xf32, #tpu.memory_space<vmem>>, vector<8x128xf32>,
    %c0_96 = arith.constant 0 : index
    %c0_97 = arith.constant 0 : index
    %192 = vector.load %arg14[%c0_96, %c0_97] : memref<8x1536xf32, #tpu.memory_space<vmem>>, vector<8x768xf32>
    %c0_98 = arith.constant 0 : index
    %c0_99 = arith.constant 0 : index
    %193 = vector.load %arg4[%c0_98, %c0_99] : memref<768x512xf32, #tpu.memory_space<vmem>>, vector<768x512xf32>
    %cst_100 = arith.constant dense<0.000000e+00> : vector<8x512xf32>
    %194 = tpu.matmul %192, %193, %cst_100 {dimension_numbers = #tpu.dot_dimension_numbers<[1], [0], [0], [1], [0, 0, 1, 1], [], []>} : vector<8x768xf32>, vector<768x512xf32>, vector<8x512xf32> -> vector<8x512xf32>
    %c0_101 = arith.constant 0 : index
    %c0_102 = arith.constant 0 : index
    %195 = vector.load %arg5[%c0_101, %c0_102] : memref<1x128xf32, #tpu.memory_space<vmem>>, vector<1x128xf32>
    %196 = vector.extract_strided_slice %194 {offsets = [0, 0], sizes = [8, 128], strides = [1, 1]} : vector<8x512xf32> to vector<8x128xf32>
    %197 = vector.extract_strided_slice %194 {offsets = [0, 128], sizes = [8, 128], strides = [1, 1]} : vector<8x512xf32> to vector<8x128xf32>
    %198 = arith.maximumf %196, %197 : vector<8x128xf32>
    %199 = vector.extract_strided_slice %194 {offsets = [0, 256], sizes = [8, 128], strides = [1, 1]} : vector<8x512xf32> to vector<8x128xf32>
    %200 = vector.extract_strided_slice %194 {offsets = [0, 384], sizes = [8, 128], strides = [1, 1]} : vector<8x512xf32> to vector<8x128xf32>
    %201 = arith.maximumf %199, %200 : vector<8x128xf32>
    %202 = arith.maximumf %198, %201 : vector<8x128xf32>
    %203 = vector.broadcast %195 : vector<1x128xf32> to vector<8x128xf32>
    %204 = arith.addf %202, %203 : vector<8x128xf32>
    %cst_103 = arith.constant 0.000000e+00 : f32
    %205 = vector.broadcast %cst_103 : f32 to vector<8x128xf32>
    %206 = arith.maximumf %204, %205 : vector<8x128xf32>
    %c0_104 = arith.constant 0 : index
    %c0_105 = arith.constant 0 : index
    %207 = vector.load %arg13[%c0_104, %c0_105] : memref<8x512xf32, #tpu.memory_space<vmem>>, vector<8x128xf32>
    tpu.vector_store %arg13[%c0_104, %c0_105], %206 {strides = array<i32>} : memref<8x512xf32, #tpu.memory_space<vmem>>, vector<8x128xf32>,
    %c0_106 = arith.constant 0 : index
    %c256_107 = arith.constant 256 : index
    %208 = vector.load %arg14[%c0_106, %c256_107] : memref<8x1536xf32, #tpu.memory_space<vmem>>, vector<8x768xf32>
    %c0_108 = arith.constant 0 : index
    %c0_109 = arith.constant 0 : index
    %209 = vector.load %arg4[%c0_108, %c0_109] : memref<768x512xf32, #tpu.memory_space<vmem>>, vector<768x512xf32>
    %cst_110 = arith.constant dense<0.000000e+00> : vector<8x512xf32>
    %210 = tpu.matmul %208, %209, %cst_110 {dimension_numbers = #tpu.dot_dimension_numbers<[1], [0], [0], [1], [0, 0, 1, 1], [], []>} : vector<8x768xf32>, vector<768x512xf32>, vector<8x512xf32> -> vector<8x512xf32>
    %c0_111 = arith.constant 0 : index
    %c0_112 = arith.constant 0 : index
    %211 = vector.load %arg5[%c0_111, %c0_112] : memref<1x128xf32, #tpu.memory_space<vmem>>, vector<1x128xf32>
    %212 = vector.extract_strided_slice %210 {offsets = [0, 0], sizes = [8, 128], strides = [1, 1]} : vector<8x512xf32> to vector<8x128xf32>
    %213 = vector.extract_strided_slice %210 {offsets = [0, 128], sizes = [8, 128], strides = [1, 1]} : vector<8x512xf32> to vector<8x128xf32>
    %214 = arith.maximumf %212, %213 : vector<8x128xf32>
    %215 = vector.extract_strided_slice %210 {offsets = [0, 256], sizes = [8, 128], strides = [1, 1]} : vector<8x512xf32> to vector<8x128xf32>
    %216 = vector.extract_strided_slice %210 {offsets = [0, 384], sizes = [8, 128], strides = [1, 1]} : vector<8x512xf32> to vector<8x128xf32>
    %217 = arith.maximumf %215, %216 : vector<8x128xf32>
    %218 = arith.maximumf %214, %217 : vector<8x128xf32>
    %219 = vector.broadcast %211 : vector<1x128xf32> to vector<8x128xf32>
    %220 = arith.addf %218, %219 : vector<8x128xf32>
    %cst_113 = arith.constant 0.000000e+00 : f32
    %221 = vector.broadcast %cst_113 : f32 to vector<8x128xf32>
    %222 = arith.maximumf %220, %221 : vector<8x128xf32>
    %c0_114 = arith.constant 0 : index
    %c128_115 = arith.constant 128 : index
    %223 = vector.load %arg13[%c0_114, %c128_115] : memref<8x512xf32, #tpu.memory_space<vmem>>, vector<8x128xf32>
    tpu.vector_store %arg13[%c0_114, %c128_115], %222 {strides = array<i32>} : memref<8x512xf32, #tpu.memory_space<vmem>>, vector<8x128xf32>,
    %c0_116 = arith.constant 0 : index
    %c512_117 = arith.constant 512 : index
    %224 = vector.load %arg14[%c0_116, %c512_117] : memref<8x1536xf32, #tpu.memory_space<vmem>>, vector<8x768xf32>
    %c0_118 = arith.constant 0 : index
    %c0_119 = arith.constant 0 : index
    %225 = vector.load %arg4[%c0_118, %c0_119] : memref<768x512xf32, #tpu.memory_space<vmem>>, vector<768x512xf32>
    %cst_120 = arith.constant dense<0.000000e+00> : vector<8x512xf32>
    %226 = tpu.matmul %224, %225, %cst_120 {dimension_numbers = #tpu.dot_dimension_numbers<[1], [0], [0], [1], [0, 0, 1, 1], [], []>} : vector<8x768xf32>, vector<768x512xf32>, vector<8x512xf32> -> vector<8x512xf32>
    %c0_121 = arith.constant 0 : index
    %c0_122 = arith.constant 0 : index
    %227 = vector.load %arg5[%c0_121, %c0_122] : memref<1x128xf32, #tpu.memory_space<vmem>>, vector<1x128xf32>
    %228 = vector.extract_strided_slice %226 {offsets = [0, 0], sizes = [8, 128], strides = [1, 1]} : vector<8x512xf32> to vector<8x128xf32>
    %229 = vector.extract_strided_slice %226 {offsets = [0, 128], sizes = [8, 128], strides = [1, 1]} : vector<8x512xf32> to vector<8x128xf32>
    %230 = arith.maximumf %228, %229 : vector<8x128xf32>
    %231 = vector.extract_strided_slice %226 {offsets = [0, 256], sizes = [8, 128], strides = [1, 1]} : vector<8x512xf32> to vector<8x128xf32>
    %232 = vector.extract_strided_slice %226 {offsets = [0, 384], sizes = [8, 128], strides = [1, 1]} : vector<8x512xf32> to vector<8x128xf32>
    %233 = arith.maximumf %231, %232 : vector<8x128xf32>
    %234 = arith.maximumf %230, %233 : vector<8x128xf32>
    %235 = vector.broadcast %227 : vector<1x128xf32> to vector<8x128xf32>
    %236 = arith.addf %234, %235 : vector<8x128xf32>
    %cst_123 = arith.constant 0.000000e+00 : f32
    %237 = vector.broadcast %cst_123 : f32 to vector<8x128xf32>
    %238 = arith.maximumf %236, %237 : vector<8x128xf32>
    %c0_124 = arith.constant 0 : index
    %c256_125 = arith.constant 256 : index
    %239 = vector.load %arg13[%c0_124, %c256_125] : memref<8x512xf32, #tpu.memory_space<vmem>>, vector<8x128xf32>
    tpu.vector_store %arg13[%c0_124, %c256_125], %238 {strides = array<i32>} : memref<8x512xf32, #tpu.memory_space<vmem>>, vector<8x128xf32>,
    %c0_126 = arith.constant 0 : index
    %c768_127 = arith.constant 768 : index
    %240 = vector.load %arg14[%c0_126, %c768_127] : memref<8x1536xf32, #tpu.memory_space<vmem>>, vector<8x768xf32>
    %c0_128 = arith.constant 0 : index
    %c0_129 = arith.constant 0 : index
    %241 = vector.load %arg4[%c0_128, %c0_129] : memref<768x512xf32, #tpu.memory_space<vmem>>, vector<768x512xf32>
    %cst_130 = arith.constant dense<0.000000e+00> : vector<8x512xf32>
    %242 = tpu.matmul %240, %241, %cst_130 {dimension_numbers = #tpu.dot_dimension_numbers<[1], [0], [0], [1], [0, 0, 1, 1], [], []>} : vector<8x768xf32>, vector<768x512xf32>, vector<8x512xf32> -> vector<8x512xf32>
    %c0_131 = arith.constant 0 : index
    %c0_132 = arith.constant 0 : index
    %243 = vector.load %arg5[%c0_131, %c0_132] : memref<1x128xf32, #tpu.memory_space<vmem>>, vector<1x128xf32>
    %244 = vector.extract_strided_slice %242 {offsets = [0, 0], sizes = [8, 128], strides = [1, 1]} : vector<8x512xf32> to vector<8x128xf32>
    %245 = vector.extract_strided_slice %242 {offsets = [0, 128], sizes = [8, 128], strides = [1, 1]} : vector<8x512xf32> to vector<8x128xf32>
    %246 = arith.maximumf %244, %245 : vector<8x128xf32>
    %247 = vector.extract_strided_slice %242 {offsets = [0, 256], sizes = [8, 128], strides = [1, 1]} : vector<8x512xf32> to vector<8x128xf32>
    %248 = vector.extract_strided_slice %242 {offsets = [0, 384], sizes = [8, 128], strides = [1, 1]} : vector<8x512xf32> to vector<8x128xf32>
    %249 = arith.maximumf %247, %248 : vector<8x128xf32>
    %250 = arith.maximumf %246, %249 : vector<8x128xf32>
    %251 = vector.broadcast %243 : vector<1x128xf32> to vector<8x128xf32>
    %252 = arith.addf %250, %251 : vector<8x128xf32>
    %cst_133 = arith.constant 0.000000e+00 : f32
    %253 = vector.broadcast %cst_133 : f32 to vector<8x128xf32>
    %254 = arith.maximumf %252, %253 : vector<8x128xf32>
    %c0_134 = arith.constant 0 : index
    %c384_135 = arith.constant 384 : index
    %255 = vector.load %arg13[%c0_134, %c384_135] : memref<8x512xf32, #tpu.memory_space<vmem>>, vector<8x128xf32>
    tpu.vector_store %arg13[%c0_134, %c384_135], %254 {strides = array<i32>} : memref<8x512xf32, #tpu.memory_space<vmem>>, vector<8x128xf32>,
    %c0_136 = arith.constant 0 : index
    %c0_137 = arith.constant 0 : index
    %256 = vector.load %arg13[%c0_136, %c0_137] : memref<8x512xf32, #tpu.memory_space<vmem>>, vector<8x512xf32>
    %c0_138 = arith.constant 0 : index
    %c0_139 = arith.constant 0 : index
    %257 = vector.load %arg6[%c0_138, %c0_139] : memref<512x128xf32, #tpu.memory_space<vmem>>, vector<512x128xf32>
    %cst_140 = arith.constant dense<0.000000e+00> : vector<8x128xf32>
    %258 = tpu.matmul %256, %257, %cst_140 {dimension_numbers = #tpu.dot_dimension_numbers<[1], [0], [0], [1], [0, 0, 1, 1], [], []>} : vector<8x512xf32>, vector<512x128xf32>, vector<8x128xf32> -> vector<8x128xf32>
    %c0_141 = arith.constant 0 : index
    %c0_142 = arith.constant 0 : index
    %259 = vector.load %arg7[%c0_141, %c0_142] : memref<1x128xf32, #tpu.memory_space<vmem>>, vector<1x128xf32>
    %260 = vector.broadcast %259 : vector<1x128xf32> to vector<8x128xf32>
    %261 = arith.addf %258, %260 : vector<8x128xf32>
    %cst_143 = arith.constant 0.000000e+00 : f32
    %262 = vector.broadcast %cst_143 : f32 to vector<8x128xf32>
    %263 = arith.maximumf %261, %262 : vector<8x128xf32>
    %c0_144 = arith.constant 0 : index
    %c0_145 = arith.constant 0 : index
    %264 = vector.load %arg8[%c0_144, %c0_145] : memref<128x128xf32, #tpu.memory_space<vmem>>, vector<128x128xf32>
    %cst_146 = arith.constant dense<0.000000e+00> : vector<8x128xf32>
    %265 = tpu.matmul %263, %264, %cst_146 {dimension_numbers = #tpu.dot_dimension_numbers<[1], [0], [0], [1], [0, 0, 1, 1], [], []>} : vector<8x128xf32>, vector<128x128xf32>, vector<8x128xf32> -> vector<8x128xf32>
    %c0_147 = arith.constant 0 : index
    %c0_148 = arith.constant 0 : index
    %266 = vector.load %arg9[%c0_147, %c0_148] : memref<1x128xf32, #tpu.memory_space<vmem>>, vector<1x128xf32>
    %267 = vector.broadcast %266 : vector<1x128xf32> to vector<8x128xf32>
    %268 = arith.addf %265, %267 : vector<8x128xf32>
    %cst_149 = arith.constant 0.000000e+00 : f32
    %269 = vector.broadcast %cst_149 : f32 to vector<8x128xf32>
    %270 = arith.maximumf %268, %269 : vector<8x128xf32>
    %c0_150 = arith.constant 0 : index
    %c0_151 = arith.constant 0 : index
    %271 = vector.load %arg10[%c0_150, %c0_151] : memref<128x128xf32, #tpu.memory_space<vmem>>, vector<128x128xf32>
    %cst_152 = arith.constant dense<0.000000e+00> : vector<8x128xf32>
    %272 = tpu.matmul %270, %271, %cst_152 {dimension_numbers = #tpu.dot_dimension_numbers<[1], [0], [0], [1], [0, 0, 1, 1], [], []>} : vector<8x128xf32>, vector<128x128xf32>, vector<8x128xf32> -> vector<8x128xf32>
    %c0_153 = arith.constant 0 : index
    %c0_154 = arith.constant 0 : index
    %273 = vector.load %arg11[%c0_153, %c0_154] : memref<1x128xf32, #tpu.memory_space<vmem>>, vector<1x128xf32>
    %274 = vector.broadcast %273 : vector<1x128xf32> to vector<8x128xf32>
    %275 = arith.addf %272, %274 : vector<8x128xf32>
    %c0_155 = arith.constant 0 : index
    %c0_156 = arith.constant 0 : index
    %276 = vector.load %arg12[%c0_155, %c0_156] : memref<8x128xf32, #tpu.memory_space<vmem>>, vector<8x128xf32>
    tpu.vector_store %arg12[%c0_155, %c0_156], %275 {strides = array<i32>} : memref<8x128xf32, #tpu.memory_space<vmem>>, vector<8x128xf32>,
    return
  }
  func.func @transform_0(%arg0: i32) -> (i32, i32) {
    %c0_i32 = arith.constant 0 : i32
    %c0_i32_0 = arith.constant 0 : i32
    return %arg0, %c0_i32 : i32, i32
  }
  func.func @transform_1(%arg0: i32) -> (i32, i32) {
    %c0_i32 = arith.constant 0 : i32
    %c0_i32_0 = arith.constant 0 : i32
    %c0_i32_1 = arith.constant 0 : i32
    return %c0_i32, %c0_i32_0 : i32, i32
  }
  func.func @transform_2(%arg0: i32) -> (i32, i32) {
    %c0_i32 = arith.constant 0 : i32
    %c0_i32_0 = arith.constant 0 : i32
    %c0_i32_1 = arith.constant 0 : i32
    return %c0_i32, %c0_i32_0 : i32, i32
  }
  func.func @transform_3(%arg0: i32) -> (i32, i32) {
    %c0_i32 = arith.constant 0 : i32
    %c0_i32_0 = arith.constant 0 : i32
    %c0_i32_1 = arith.constant 0 : i32
    return %c0_i32, %c0_i32_0 : i32, i32
  }
  func.func @transform_4(%arg0: i32) -> (i32, i32) {
    %c0_i32 = arith.constant 0 : i32
    %c0_i32_0 = arith.constant 0 : i32
    %c0_i32_1 = arith.constant 0 : i32
    return %c0_i32, %c0_i32_0 : i32, i32
  }
  func.func @transform_5(%arg0: i32) -> (i32, i32) {
    %c0_i32 = arith.constant 0 : i32
    %c0_i32_0 = arith.constant 0 : i32
    %c0_i32_1 = arith.constant 0 : i32
    return %c0_i32, %c0_i32_0 : i32, i32
  }
  func.func @transform_6(%arg0: i32) -> (i32, i32) {
    %c0_i32 = arith.constant 0 : i32
    %c0_i32_0 = arith.constant 0 : i32
    %c0_i32_1 = arith.constant 0 : i32
    return %c0_i32, %c0_i32_0 : i32, i32
  }
  func.func @transform_7(%arg0: i32) -> (i32, i32) {
    %c0_i32 = arith.constant 0 : i32
    %c0_i32_0 = arith.constant 0 : i32
    %c0_i32_1 = arith.constant 0 : i32
    return %c0_i32, %c0_i32_0 : i32, i32
  }
  func.func @transform_8(%arg0: i32) -> (i32, i32) {
    %c0_i32 = arith.constant 0 : i32
    %c0_i32_0 = arith.constant 0 : i32
    %c0_i32_1 = arith.constant 0 : i32
    return %c0_i32, %c0_i32_0 : i32, i32
  }
  func.func @transform_9(%arg0: i32) -> (i32, i32) {
    %c0_i32 = arith.constant 0 : i32
    %c0_i32_0 = arith.constant 0 : i32
    %c0_i32_1 = arith.constant 0 : i32
    return %c0_i32, %c0_i32_0 : i32, i32
  }
  func.func @transform_10(%arg0: i32) -> (i32, i32) {
    %c0_i32 = arith.constant 0 : i32
    %c0_i32_0 = arith.constant 0 : i32
    %c0_i32_1 = arith.constant 0 : i32
    return %c0_i32, %c0_i32_0 : i32, i32
  }
  func.func @transform_11(%arg0: i32) -> (i32, i32) {
    %c0_i32 = arith.constant 0 : i32
    %c0_i32_0 = arith.constant 0 : i32
    return %arg0, %c0_i32 : i32, i32
  }
  func.func @transform_12(%arg0: i32) -> (i32, i32) {
    %c0_i32 = arith.constant 0 : i32
    %c0_i32_0 = arith.constant 0 : i32
    return %arg0, %c0_i32 : i32, i32
  }
}

</mosaic_0001>

<bundles_post_ra>
// kernel: _lambda_.1
= control target key start
LH: loop header
LB: loop body
LE: loop exit
PB: predicated region body
PF: predicated region fallthrough
CT: control target
= control target key end

     0   :  { %18 = vsyncpa [#allocation4], 0  ;;  %s11444_s0 = inlined_call_operand.vmem [shape: f32[8,784], index: 0, kind: input, shape index: {}]   ;;  %s11445_s1 = inlined_call_operand.hbm [shape: f32[168,512], index: 1, kind: input, shape index: {}]   ;;  %s11446_s2 = inlined_call_operand.hbm [shape: f32[1,128], index: 2, kind: input, shape index: {}]   ;;  %s11447_s3 = inlined_call_operand.hbm [shape: f32[768,512], index: 3, kind: input, shape index: {}]   ;;  %s11448_s4 = inlined_call_operand.hbm [shape: f32[1,128], index: 4, kind: input, shape index: {}]   ;;  %s11449_s5 = inlined_call_operand.hbm [shape: f32[512,128], index: 5, kind: input, shape index: {}]   ;;  %s11450_s6 = inlined_call_operand.hbm [shape: f32[1,128], index: 6, kind: input, shape index: {}]   ;;  %s11451_s7 = inlined_call_operand.hbm [shape: f32[128,128], index: 7, kind: input, shape index: {}]   ;;  %s11452_s8 = inlined_call_operand.hbm [shape: f32[1,128], index: 8, kind: input, shape index: {}]   ;;  %s11453_s9 = inlined_call_operand.hbm [shape: f32[128,128], index: 9, kind: input, shape index: {}]   ;;  %s11454_s10 = inlined_call_operand.hbm [shape: f32[1,128], index: 10, kind: input, shape index: {}]   ;;  %s11455_s11 = inlined_call_operand.vmem [shape: f32[8,128], index: 11, kind: output, shape index: {0}]   ;;  %s11456_s12 = inlined_call_operand.vmem [shape: f32[8,512], index: 12, kind: output, shape index: {1}]  }
   0x1   :  { %19 = vsyncpa [#allocation6], 0 }
   0x2   :  { %20 = vsyncpa [#allocation9], 0 }
   0x3   :  { %21 = vsyncpa [#allocation12], 0 }
   0x4   :  { %22 = vsyncpa [#allocation15], 0 }
   0x5   :  { %23 = vsyncpa [#allocation18], 0  ;;  %s10057_s21 = smov [#allocation5]   ;;  %s10058_s23 = smov [#allocation8]  }
   0x6   :  { %s44_s22 = sshll.u32 %s10057_s21, 4  ;;  %s66_s24 = sshll.u32 %s10058_s23, 4  ;;  %s45_s22 = int_to_ptr.vmem [resolvable:$true] %s44_s22  ;;  %s67_s24 = int_to_ptr.vmem [resolvable:$true] %s66_s24 }
   0x7   :  { %s9825_s27 = scalar_lea.hbm %s11446_s2, 16 }
   0x8   :  { %p9826_p0 = scmp.ne.s32.totalorder %s11446_s2, %s9825_s27  ;;  %p9829_p1 = scmp.lt.u32.totalorder %s9825_s27, %s11446_s2 }
   0xa   :  { %p9831_p2 = pnand %p9829_p1, %p9826_p0 }
   0xc   :  { %9834 = shalt.err (!%p9831_p2)
}
   0xd   :  { %s9835_s14 = scalar_lea.vmem %s45_s22, 16  ;;  %s9839_s15 = scalar_lea.vmem %s45_s22, 32 }
   0xe   :  { %p9836_p3 = scmp.ne.s32.totalorder %s45_s22, %s9835_s14  ;;  %p9840_p4 = scmp.lt.s32.totalorder %s45_s22, %s45_s22 }
   0xf   :  { %p9841_p5 = scmp.lt.s32.totalorder %s9839_s15, %s9835_s14 }
  0x11   :  { %p9842_p6 = por %p9841_p5, %p9840_p4 }
  0x13   :  { %p9843_p7 = pnand %p9842_p6, %p9836_p3 }
  0x15   :  { %9846 = shalt.err (!%p9843_p7)
}
  0x16   :  { %47 = dma.hbm_to_vmem [thread:$0]  %s11446_s2, 16, %s45_s22, [#allocation6]  }
  0x17   :  { %s9847_s20 = scalar_lea.hbm %s11448_s4, 16 }
  0x18   :  { %p9848_p8 = scmp.ne.s32.totalorder %s11448_s4, %s9847_s20  ;;  %p9851_p9 = scmp.lt.u32.totalorder %s9847_s20, %s11448_s4 }
  0x1a   :  { %p9853_p10 = pnand %p9851_p9, %p9848_p8 }
  0x1c   :  { %9856 = shalt.err (!%p9853_p10)
}
  0x1d   :  { %s9857_s27 = scalar_lea.vmem %s67_s24, 16  ;;  %s9861_s28 = scalar_lea.vmem %s67_s24, 32 }
  0x1e   :  { %p9858_p11 = scmp.ne.s32.totalorder %s67_s24, %s9857_s27  ;;  %p9862_p12 = scmp.lt.s32.totalorder %s67_s24, %s67_s24 }
  0x1f   :  { %p9863_p13 = scmp.lt.s32.totalorder %s9861_s28, %s9857_s27 }
  0x21   :  { %p9864_p0 = por %p9863_p13, %p9862_p12 }
  0x23   :  { %p9865_p1 = pnand %p9864_p0, %p9858_p11 }
  0x25   :  { %9868 = shalt.err (!%p9865_p1)
}
  0x26   :  { %69 = dma.hbm_to_vmem [thread:$0]  %s11448_s4, 16, %s67_s24, [#allocation9]  }
  0x27   :  { %s10059_s29 = smov [#allocation11]   ;;  %s10060_s13 = smov [#allocation14]  }
  0x28   :  { %s88_s30 = sshll.u32 %s10059_s29, 4  ;;  %s110_s14 = sshll.u32 %s10060_s13, 4  ;;  %s89_s30 = int_to_ptr.vmem [resolvable:$true] %s88_s30  ;;  %s111_s14 = int_to_ptr.vmem [resolvable:$true] %s110_s14 }
  0x29   :  { %s9869_s17 = scalar_lea.hbm %s11450_s6, 16 }
  0x2a   :  { %p9870_p2 = scmp.ne.s32.totalorder %s11450_s6, %s9869_s17  ;;  %p9873_p3 = scmp.lt.u32.totalorder %s9869_s17, %s11450_s6 }
  0x2c   :  { %p9875_p4 = pnand %p9873_p3, %p9870_p2 }
  0x2e   :  { %9878 = shalt.err (!%p9875_p4)
}
  0x2f   :  { %s9879_s4 = scalar_lea.vmem %s89_s30, 16  ;;  %s9883_s24 = scalar_lea.vmem %s89_s30, 32 }
  0x30   :  { %p9880_p5 = scmp.ne.s32.totalorder %s89_s30, %s9879_s4  ;;  %p9884_p6 = scmp.lt.s32.totalorder %s89_s30, %s89_s30 }
  0x31   :  { %p9885_p7 = scmp.lt.s32.totalorder %s9883_s24, %s9879_s4 }
  0x33   :  { %p9886_p8 = por %p9885_p7, %p9884_p6 }
  0x35   :  { %p9887_p9 = pnand %p9886_p8, %p9880_p5 }
  0x37   :  { %9890 = shalt.err (!%p9887_p9)
}
  0x38   :  { %91 = dma.hbm_to_vmem [thread:$0]  %s11450_s6, 16, %s89_s30, [#allocation12]  }
  0x39   :  { %s9891_s28 = scalar_lea.hbm %s11452_s8, 16 }
  0x3a   :  { %p9892_p10 = scmp.ne.s32.totalorder %s11452_s8, %s9891_s28  ;;  %p9895_p11 = scmp.lt.u32.totalorder %s9891_s28, %s11452_s8 }
  0x3c   :  { %p9897_p12 = pnand %p9895_p11, %p9892_p10 }
  0x3e   :  { %9900 = shalt.err (!%p9897_p12)
}
  0x3f   :  { %s9901_s15 = scalar_lea.vmem %s111_s14, 16  ;;  %s9905_s16 = scalar_lea.vmem %s111_s14, 32 }
  0x40   :  { %p9902_p13 = scmp.ne.s32.totalorder %s111_s14, %s9901_s15  ;;  %p9906_p0 = scmp.lt.s32.totalorder %s111_s14, %s111_s14 }
  0x41   :  { %p9907_p1 = scmp.lt.s32.totalorder %s9905_s16, %s9901_s15 }
  0x43   :  { %p9908_p2 = por %p9907_p1, %p9906_p0 }
  0x45   :  { %p9909_p3 = pnand %p9908_p2, %p9902_p13 }
  0x47   :  { %9912 = shalt.err (!%p9909_p3)
}
  0x48   :  { %113 = dma.hbm_to_vmem [thread:$0]  %s11452_s8, 16, %s111_s14, [#allocation15]  }
  0x49   :  { %s10061_s17 = smov [#allocation3]   ;;  %s9913_s21 = scalar_lea.hbm %s11445_s1, 10752 }
  0x4a   :  { %s31_s18 = sshll.u32 %s10061_s17, 4  ;;  %p9914_p4 = scmp.ne.s32.totalorder %s11445_s1, %s9913_s21  ;;  %s32_s18 = int_to_ptr.vmem [resolvable:$true] %s31_s18 }
  0x4b   :  { %p9917_p5 = scmp.lt.u32.totalorder %s9913_s21, %s11445_s1 }
  0x4d   :  { %p9919_p6 = pnand %p9917_p5, %p9914_p4 }
  0x4f   :  { %9922 = shalt.err (!%p9919_p6)
}
  0x50   :  { %s9923_s26 = scalar_lea.vmem %s32_s18, 10752  ;;  %p9928_p8 = scmp.lt.s32.totalorder %s32_s18, %s32_s18 }
  0x51   :  { %p9924_p7 = scmp.ne.s32.totalorder %s32_s18, %s9923_s26  ;;  %p9929_p9 = scmp.lt.s32.totalorder %s9923_s26, %s9923_s26 }
  0x53   :  { %p9930_p10 = por %p9929_p9, %p9928_p8 }
  0x55   :  { %p9931_p11 = pnand %p9930_p10, %p9924_p7 }
  0x57   :  { %9934 = shalt.err (!%p9931_p11)
}
  0x58   :  { %s10062_s8 = smov 512   ;;  %s10063_s14 = smov 32  }
  0x59   :  { %37 = dma.hbm_to_vmem [thread:$0]  %s11445_s1, 10752, %s32_s18, [#allocation4], %s10062_s8, %s10062_s8, %s10063_s14  }
  0x5a   :  { %s10064_s2 = smov [#allocation7]   ;;  %s10065_s29 = smov [#allocation10]  }
  0x5b   :  { %s53_s22 = sshll.u32 %s10064_s2, 4  ;;  %s75_s13 = sshll.u32 %s10065_s29, 4  ;;  %s54_s22 = int_to_ptr.vmem [resolvable:$true] %s53_s22  ;;  %s76_s13 = int_to_ptr.vmem [resolvable:$true] %s75_s13 }
  0x5c   :  { %s9935_s6 = scalar_lea.hbm %s11447_s3, 49152 }
  0x5d   :  { %p9936_p12 = scmp.ne.s32.totalorder %s11447_s3, %s9935_s6  ;;  %p9939_p13 = scmp.lt.u32.totalorder %s9935_s6, %s11447_s3 }
  0x5f   :  { %p9941_p0 = pnand %p9939_p13, %p9936_p12 }
  0x61   :  { %9944 = shalt.err (!%p9941_p0)
}
  0x62   :  { %s9945_s1 = scalar_lea.vmem %s54_s22, 49152  ;;  %p9950_p2 = scmp.lt.s32.totalorder %s54_s22, %s54_s22 }
  0x63   :  { %p9946_p1 = scmp.ne.s32.totalorder %s54_s22, %s9945_s1  ;;  %p9951_p3 = scmp.lt.s32.totalorder %s9945_s1, %s9945_s1 }
  0x65   :  { %p9952_p4 = por %p9951_p3, %p9950_p2 }
  0x67   :  { %p9953_p5 = pnand %p9952_p4, %p9946_p1 }
  0x69   :  { %9956 = shalt.err (!%p9953_p5)
}
  0x6a   :  { %59 = dma.hbm_to_vmem [thread:$0]  %s11447_s3, 49152, %s54_s22, [#allocation6], %s10062_s8, %s10062_s8, %s10063_s14  }
  0x6b   :  { %s9957_s23 = scalar_lea.hbm %s11449_s5, 8192 }
  0x6c   :  { %p9958_p6 = scmp.ne.s32.totalorder %s11449_s5, %s9957_s23  ;;  %p9961_p7 = scmp.lt.u32.totalorder %s9957_s23, %s11449_s5 }
  0x6e   :  { %p9963_p8 = pnand %p9961_p7, %p9958_p6 }
  0x70   :  { %9966 = shalt.err (!%p9963_p8)
}
  0x71   :  { %s9967_s2 = scalar_lea.vmem %s76_s13, 8192  ;;  %p9972_p10 = scmp.lt.s32.totalorder %s76_s13, %s76_s13 }
  0x72   :  { %p9968_p9 = scmp.ne.s32.totalorder %s76_s13, %s9967_s2  ;;  %p9973_p11 = scmp.lt.s32.totalorder %s9967_s2, %s9967_s2 }
  0x74   :  { %p9974_p12 = por %p9973_p11, %p9972_p10 }
  0x76   :  { %p9975_p13 = pnand %p9974_p12, %p9968_p9 }
  0x78   :  { %9978 = shalt.err (!%p9975_p13)
}
  0x79   :  { %s10066_s3 = smov 128   ;;  %s10067_s8 = smov 8  }
  0x7a   :  { %81 = dma.hbm_to_vmem [thread:$0]  %s11449_s5, 8192, %s76_s13, [#allocation9], %s10066_s3, %s10066_s3, %s10067_s8  }
  0x7b   :  { %s10068_s15 = smov [#allocation13]   ;;  %s10069_s6 = smov [#allocation16]  }
  0x7c   :  { %s97_s16 = sshll.u32 %s10068_s15, 4  ;;  %s119_s30 = sshll.u32 %s10069_s6, 4  ;;  %s98_s16 = int_to_ptr.vmem [resolvable:$true] %s97_s16  ;;  %s120_s30 = int_to_ptr.vmem [resolvable:$true] %s119_s30 }
  0x7d   :  { %s9979_s20 = scalar_lea.hbm %s11451_s7, 2048 }
  0x7e   :  { %p9980_p0 = scmp.ne.s32.totalorder %s11451_s7, %s9979_s20  ;;  %p9983_p1 = scmp.lt.u32.totalorder %s9979_s20, %s11451_s7 }
  0x80   :  { %p9985_p2 = pnand %p9983_p1, %p9980_p0 }
  0x82   :  { %9988 = shalt.err (!%p9985_p2)
}
  0x83   :  { %s9989_s5 = scalar_lea.vmem %s98_s16, 2048  ;;  %p9994_p4 = scmp.lt.s32.totalorder %s98_s16, %s98_s16 }
  0x84   :  { %p9990_p3 = scmp.ne.s32.totalorder %s98_s16, %s9989_s5  ;;  %p9995_p5 = scmp.lt.s32.totalorder %s9989_s5, %s9989_s5 }
  0x86   :  { %p9996_p6 = por %p9995_p5, %p9994_p4 }
  0x88   :  { %p9997_p7 = pnand %p9996_p6, %p9990_p3 }
  0x8a   :  { %10000 = shalt.err (!%p9997_p7)
}
  0x8b   :  { %103 = dma.hbm_to_vmem [thread:$0]  %s11451_s7, 2048, %s98_s16, [#allocation12], %s10066_s3, %s10066_s3, %s10067_s8  }
  0x8c   :  { %s10001_s26 = scalar_lea.hbm %s11453_s9, 2048 }
  0x8d   :  { %p10002_p8 = scmp.ne.s32.totalorder %s11453_s9, %s10001_s26  ;;  %p10005_p9 = scmp.lt.u32.totalorder %s10001_s26, %s11453_s9 }
  0x8f   :  { %p10007_p10 = pnand %p10005_p9, %p10002_p8 }
  0x91   :  { %10010 = shalt.err (!%p10007_p10)
}
  0x92   :  { %s10011_s29 = scalar_lea.vmem %s120_s30, 2048  ;;  %p10016_p12 = scmp.lt.s32.totalorder %s120_s30, %s120_s30 }
  0x93   :  { %p10012_p11 = scmp.ne.s32.totalorder %s120_s30, %s10011_s29  ;;  %p10017_p13 = scmp.lt.s32.totalorder %s10011_s29, %s10011_s29 }
  0x95   :  { %p10018_p0 = por %p10017_p13, %p10016_p12 }
  0x97   :  { %p10019_p1 = pnand %p10018_p0, %p10012_p11 }
  0x99   :  { %10022 = shalt.err (!%p10019_p1)
}
  0x9a   :  { %125 = dma.hbm_to_vmem [thread:$0]  %s11453_s9, 2048, %s120_s30, [#allocation15], %s10066_s3, %s10066_s3, %s10067_s8  }
  0x9b   :  { %s10070_s16 = smov [#allocation17]   ;;  %s10023_s20 = scalar_lea.hbm %s11454_s10, 16 }
  0x9c   :  { %s132_s6 = sshll.u32 %s10070_s16, 4  ;;  %p10024_p2 = scmp.ne.s32.totalorder %s11454_s10, %s10023_s20  ;;  %s133_s6 = int_to_ptr.vmem [resolvable:$true] %s132_s6 }
  0x9d   :  { %p10027_p3 = scmp.lt.u32.totalorder %s10023_s20, %s11454_s10 }
  0x9f   :  { %p10029_p4 = pnand %p10027_p3, %p10024_p2 }
  0xa1   :  { %10032 = shalt.err (!%p10029_p4)
}
  0xa2   :  { %s10033_s5 = scalar_lea.vmem %s133_s6, 16  ;;  %s10037_s9 = scalar_lea.vmem %s133_s6, 32 }
  0xa3   :  { %p10034_p5 = scmp.ne.s32.totalorder %s133_s6, %s10033_s5  ;;  %p10038_p6 = scmp.lt.s32.totalorder %s133_s6, %s133_s6 }
  0xa4   :  { %p10039_p7 = scmp.lt.s32.totalorder %s10037_s9, %s10033_s5 }
  0xa6   :  { %p10040_p8 = por %p10039_p7, %p10038_p6 }
  0xa8   :  { %p10041_p9 = pnand %p10040_p8, %p10034_p5 }
  0xaa   :  { %10044 = shalt.err (!%p10041_p9)
}
  0xab   :  { %135 = dma.hbm_to_vmem [thread:$0]  %s11454_s10, 16, %s133_s6, [#allocation18]  }
  0xac   :  { %10045 = dma.done.wait [#allocation4], 10752  }
  0xad   :  { %10046 = vsyncadd [#allocation4], 4294956544 }
  0xae   :  { %10047 = dma.done.wait [#allocation6], 49168  }
  0xaf   :  { %10048 = vsyncadd [#allocation6], 4294918128 }
  0xb0   :  { %10049 = dma.done.wait [#allocation9], 8208  }
  0xb1   :  { %10050 = vsyncadd [#allocation9], 4294959088 }
  0xb2   :  { %10051 = dma.done.wait [#allocation12], 2064  }
  0xb3   :  { %10052 = vsyncadd [#allocation12], 4294965232 }
  0xb4   :  { %10053 = dma.done.wait [#allocation15], 2064  }
  0xb5   :  { %10054 = vsyncadd [#allocation15], 4294965232 }
  0xb6   :  { %10055 = dma.done.wait [#allocation18], 16  }
  0xb7   :  { %10056 = vsyncadd [#allocation18], 4294967280  ;;  %vm252_vm0 = vcmask 326656   ;;  %v10282_v0 = vld [vmem:[%s11444_s0] sm:$0xff]  ;;  %v10287_v1 = vld [vmem:[%s11444_s0 + $0x8] sm:$0xff]  ;;  %s10071_s25 = smov 72  }
  0xb8   :  { %v169_v2 = vld [vmem:[#allocation3 + $0x8] sm:$0xff]  ;;  %499 = vrot.lane.b32.xlu0 %v10282_v0, %s10071_s25  ;;  %v171_v4 = vld [vmem:[#allocation3 + $0x18] sm:$0xff]  ;;  %s10072_s26 = smov 16   ;;  %v168_v8 = vld [vmem:[#allocation3] sm:$0xff]  ;;  %6937 = vmatprep.mubr.msk.f32.mxu0 %vm252_vm0, %v10287_v1  ;;  %s10073_s2 = smov 88   ;;  %vm503_vm1 = vcmask 588800  }
  0xb9   :  { %v173_v3 = vld [vmem:[#allocation3 + $0x28] sm:$0xff]  ;;  %v175_v5 = vld [vmem:[#allocation3 + $0x38] sm:$0xff]  ;;  %755 = vrot.lane.b32.xlu1 %v10287_v1, %s10072_s26  ;;  %v172_v9 = vld [vmem:[#allocation3 + $0x20] sm:$0xff]  ;;  %6938 = vmatprep.mubr.msk.f32.mxu1 %vm252_vm0, %v10287_v1  ;;  %s10074_s15 = smov 104   ;;  %s10075_s16 = smov 48   ;;  %vm759_vm2 = vcmask 130048  }
  0xba   :  { %v10292_v6 = vpack.c.bf16 %v173_v3, %v169_v2  ;;  %v10294_v7 = vpack.c.bf16 %v175_v5, %v171_v4  ;;  %v170_v10 = vld [vmem:[#allocation3 + $0x10] sm:$0xff]  ;;  %v10300_v11 = vpack.c.bf16 %v172_v9, %v168_v8  ;;  %v177_v13 = vld [vmem:[#allocation3 + $0x48] sm:$0xff]  ;;  %v179_v17 = vld [vmem:[#allocation3 + $0x58] sm:$0xff]  ;;  %s10076_s1 = smov 120   ;;  %s10077_s18 = smov 64   ;;  %vm1012_vm3 = vcmask 719872  }
  0xbb   :  { %v174_v12 = vld [vmem:[#allocation3 + $0x30] sm:$0xff]  ;;  %v181_v14 = vld [vmem:[#allocation3 + $0x68] sm:$0xff]  ;;  %v183_v18 = vld [vmem:[#allocation3 + $0x78] sm:$0xff]  ;;  %vm1268_vm4 = vcmask 261120   ;;  %s10078_s9 = smov 80   ;;  %vm1521_vm5 = vcmask 850944  }
  0xbc   :  { %7155 = vmatprep.subr.bf16.mxu0 %v10292_v6  ;;  %7195 = vmatprep.subr.bf16.mxu1 %v10294_v7  ;;  %v10304_v15 = vpack.c.bf16 %v174_v12, %v170_v10  ;;  %v10306_v16 = vpack.c.bf16 %v181_v14, %v177_v13  ;;  %v176_v19 = vld [vmem:[#allocation3 + $0x40] sm:$0xff]  ;;  %v10310_v20 = vpack.c.bf16 %v183_v18, %v179_v17  ;;  %v178_v22 = vld [vmem:[#allocation3 + $0x50] sm:$0xff]  ;;  %v185_v27 = vld [vmem:[#allocation3 + $0x88] sm:$0xff]  ;;  %s10079_s3 = smov 24   ;;  %vm1773_vm6 = vcmask 392192  }
  0xbd   :  { %501 = vrot.lane.b32.xlu0 %v10287_v1, %s10071_s25  ;;  %7157 = vmatpush1.bf16.msra.mxu0 %v10300_v11  ;;  %v180_v21 = vld [vmem:[#allocation3 + $0x60] sm:$0xff]  ;;  %v182_v23 = vld [vmem:[#allocation3 + $0x70] sm:$0xff]  ;;  %v189_v28 = vld [vmem:[#allocation3 + $0xa8] sm:$0xff]  ;;  %vm2025_vm7 = vcmask 982016   ;;  %vm2277_vm8 = vcmask 523264   ;;  %vm2533_vm9 = vcmask 64512  }
  0xbe   :  { %7197 = vmatpush1.bf16.msra.mxu1 %v10304_v15  ;;  %7159 = vmatprep.subr.bf16.mxu0 %v10306_v16  ;;  %v10314_v24 = vpack.c.bf16 %v180_v21, %v176_v19  ;;  %v10316_v25 = vpack.c.bf16 %v182_v23, %v178_v22  ;;  %v665_v26 = vld [vmem:[%s11444_s0 + $0x10] sm:$0xff]  ;;  %v10323_v29 = vpack.c.bf16 %v189_v28, %v185_v27  ;;  %v187_v30 = vld [vmem:[#allocation3 + $0x98] sm:$0xff]  ;;  %v184_v32 = vld [vmem:[#allocation3 + $0x80] sm:$0xff]  ;;  %vm2786_vm10 = vcmask 654336  }
  0xbf   :  { %7199 = vmatprep.subr.bf16.mxu1 %v10310_v20  ;;  %757 = vrot.lane.b32.xlu1 %v665_v26, %s10072_s26  ;;  %v191_v31 = vld [vmem:[#allocation3 + $0xb8] sm:$0xff]  ;;  %v188_v34 = vld [vmem:[#allocation3 + $0xa0] sm:$0xff]  ;;  %v186_v35 = vld [vmem:[#allocation3 + $0x90] sm:$0xff]  ;;  %vm3042_vm11 = vcmask 195584   ;;  %vm10081_vm12 = vmmov 0  }
  0xc0   :  { %v10325_v33 = vpack.c.bf16 %v191_v31, %v187_v30  ;;  %v190_v36 = vld [vmem:[#allocation3 + $0xb0] sm:$0xff]  ;;  %v10330_v37 = vpack.c.bf16 %v188_v34, %v184_v32  ;;  %v193_v38 = vld [vmem:[#allocation3 + $0xc8] sm:$0xff]  ;;  %v195_v40 = vld [vmem:[#allocation3 + $0xd8] sm:$0xff] }
  0xc1   :  { %7161 = vmatpush1.bf16.msra.mxu0 %v10314_v24  ;;  %753 = vrot.lane.b32.xlu0 %v10282_v0, %s10072_s26  ;;  %v197_v39 = vld [vmem:[#allocation3 + $0xe8] sm:$0xff]  ;;  %v10334_v41 = vpack.c.bf16 %v190_v36, %v186_v35  ;;  %v199_v43 = vld [vmem:[#allocation3 + $0xf8] sm:$0xff]  ;;  %v192_v44 = vld [vmem:[#allocation3 + $0xc0] sm:$0xff] }
  0xc2   :  { %7201 = vmatpush1.bf16.msra.mxu1 %v10316_v25  ;;  %7163 = vmatprep.subr.bf16.mxu0 %v10323_v29  ;;  %v10336_v42 = vpack.c.bf16 %v197_v39, %v193_v38  ;;  %v196_v45 = vld [vmem:[#allocation3 + $0xe0] sm:$0xff]  ;;  %v10339_v46 = vpack.c.bf16 %v199_v43, %v195_v40  ;;  %v194_v47 = vld [vmem:[#allocation3 + $0xd0] sm:$0xff]  ;;  %v201_v49 = vld [vmem:[#allocation3 + $0x108] sm:$0xff] }
  0xc3   :  { %7203 = vmatprep.subr.bf16.mxu1 %v10325_v33  ;;  %v198_v48 = vld [vmem:[#allocation3 + $0xf0] sm:$0xff]  ;;  %1008 = vrot.lane.b32.xlu1 %v10287_v1, %s10073_s2  ;;  %v205_v50 = vld [vmem:[#allocation3 + $0x128] sm:$0xff]  ;;  %v203_v51 = vld [vmem:[#allocation3 + $0x118] sm:$0xff]  ;;  %v10343_v53 = vpack.c.bf16 %v196_v45, %v192_v44 }
  0xc4   :  { %v207_v52 = vld [vmem:[#allocation3 + $0x138] sm:$0xff]  ;;  %v10347_v54 = vpack.c.bf16 %v198_v48, %v194_v47  ;;  %v10349_v55 = vpack.c.bf16 %v205_v50, %v201_v49  ;;  %v200_v56 = vld [vmem:[#allocation3 + $0x100] sm:$0xff]  ;;  %v202_v58 = vld [vmem:[#allocation3 + $0x110] sm:$0xff] }
  0xc5   :  { %7165 = vmatpush1.bf16.msra.mxu0 %v10330_v37  ;;  %1010 = vrot.lane.b32.xlu0 %v665_v26, %s10073_s2  ;;  %v204_v57 = vld [vmem:[#allocation3 + $0x120] sm:$0xff]  ;;  %v10352_v59 = vpack.c.bf16 %v207_v52, %v203_v51  ;;  %v206_v60 = vld [vmem:[#allocation3 + $0x130] sm:$0xff]  ;;  %v209_v61 = vld [vmem:[#allocation3 + $0x148] sm:$0xff] }
  0xc6   :  { %7205 = vmatpush1.bf16.msra.mxu1 %v10334_v41  ;;  %7167 = vmatprep.subr.bf16.mxu0 %v10336_v42  ;;  %v213_v62 = vld [vmem:[#allocation3 + $0x168] sm:$0xff]  ;;  %v211_v63 = vld [vmem:[#allocation3 + $0x158] sm:$0xff]  ;;  %v10356_v3 = vpack.c.bf16 %v204_v57, %v200_v56  ;;  %v10360_v4 = vpack.c.bf16 %v206_v60, %v202_v58  ;;  %v208_v8 = vld [vmem:[#allocation3 + $0x140] sm:$0xff] }
  0xc7   :  { %7207 = vmatprep.subr.bf16.mxu1 %v10339_v46  ;;  %1264 = vrot.lane.b32.xlu1 %v665_v26, %s10063_s14  ;;  %v215_v2 = vld [vmem:[#allocation3 + $0x178] sm:$0xff]  ;;  %v10362_v5 = vpack.c.bf16 %v213_v62, %v209_v61  ;;  %v212_v9 = vld [vmem:[#allocation3 + $0x160] sm:$0xff]  ;;  %v210_v10 = vld [vmem:[#allocation3 + $0x150] sm:$0xff] }
  0xc8   :  { %v10365_v12 = vpack.c.bf16 %v215_v2, %v211_v63  ;;  %v214_v13 = vld [vmem:[#allocation3 + $0x170] sm:$0xff]  ;;  %v217_v14 = vld [vmem:[#allocation3 + $0x188] sm:$0xff]  ;;  %v219_v18 = vld [vmem:[#allocation3 + $0x198] sm:$0xff]  ;;  %v10370_v21 = vpack.c.bf16 %v212_v9, %v208_v8 }
  0xc9   :  { %7169 = vmatpush1.bf16.msra.mxu0 %v10343_v53  ;;  %v221_v17 = vld [vmem:[#allocation3 + $0x1a8] sm:$0xff]  ;;  %v223_v19 = vld [vmem:[#allocation3 + $0x1b8] sm:$0xff]  ;;  %v10374_v22 = vpack.c.bf16 %v214_v13, %v210_v10  ;;  %v216_v26 = vld [vmem:[#allocation3 + $0x180] sm:$0xff] }
  0xca   :  { %7209 = vmatpush1.bf16.msra.mxu1 %v10347_v54  ;;  %7171 = vmatprep.subr.bf16.mxu0 %v10349_v55  ;;  %v10376_v23 = vpack.c.bf16 %v221_v17, %v217_v14  ;;  %v220_v27 = vld [vmem:[#allocation3 + $0x1a0] sm:$0xff]  ;;  %v218_v28 = vld [vmem:[#allocation3 + $0x190] sm:$0xff]  ;;  %v225_v31 = vld [vmem:[#allocation3 + $0x1c8] sm:$0xff] }
  0xcb   :  { %7211 = vmatprep.subr.bf16.mxu1 %v10352_v59  ;;  %1262 = vrot.lane.b32.xlu1 %v10287_v1, %s10063_s14  ;;  %v10379_v1 = vpack.c.bf16 %v223_v19, %v219_v18  ;;  %v222_v30 = vld [vmem:[#allocation3 + $0x1b0] sm:$0xff]  ;;  %v229_v32 = vld [vmem:[#allocation3 + $0x1e8] sm:$0xff]  ;;  %v227_v34 = vld [vmem:[#allocation3 + $0x1d8] sm:$0xff]  ;;  %v10382_v36 = vpack.c.bf16 %v220_v27, %v216_v26 }
  0xcc   :  { %v231_v35 = vld [vmem:[#allocation3 + $0x1f8] sm:$0xff]  ;;  %v10386_v38 = vpack.c.bf16 %v222_v30, %v218_v28  ;;  %v10388_v39 = vpack.c.bf16 %v229_v32, %v225_v31  ;;  %v224_v40 = vld [vmem:[#allocation3 + $0x1c0] sm:$0xff]  ;;  %v226_v44 = vld [vmem:[#allocation3 + $0x1d0] sm:$0xff] }
  0xcd   :  { %7173 = vmatpush1.bf16.msra.mxu0 %v10356_v3  ;;  %v228_v43 = vld [vmem:[#allocation3 + $0x1e0] sm:$0xff]  ;;  %v10391_v45 = vpack.c.bf16 %v231_v35, %v227_v34  ;;  %v230_v47 = vld [vmem:[#allocation3 + $0x1f0] sm:$0xff]  ;;  %v233_v48 = vld [vmem:[#allocation3 + $0x208] sm:$0xff] }
  0xce   :  { %7213 = vmatpush1.bf16.msra.mxu1 %v10360_v4  ;;  %7175 = vmatprep.subr.bf16.mxu0 %v10362_v5  ;;  %v237_v49 = vld [vmem:[#allocation3 + $0x228] sm:$0xff]  ;;  %v235_v50 = vld [vmem:[#allocation3 + $0x218] sm:$0xff]  ;;  %v10394_v52 = vpack.c.bf16 %v228_v43, %v224_v40  ;;  %v10403_v57 = vpack.c.bf16 %v230_v47, %v226_v44  ;;  %v232_v60 = vld [vmem:[#allocation3 + $0x200] sm:$0xff] }
  0xcf   :  { %7215 = vmatprep.subr.bf16.mxu1 %v10365_v12  ;;  %v239_v51 = vld [vmem:[#allocation3 + $0x238] sm:$0xff]  ;;  %v10405_v58 = vpack.c.bf16 %v237_v49, %v233_v48  ;;  %v236_v61 = vld [vmem:[#allocation3 + $0x220] sm:$0xff]  ;;  %v234_v62 = vld [vmem:[#allocation3 + $0x210] sm:$0xff] }
  0xd0   :  { %v10399_v56 = vld [vmem:[%s11444_s0 + $0x18] sm:$0xff]  ;;  %v10408_v63 = vpack.c.bf16 %v239_v51, %v235_v50  ;;  %v238_v2 = vld [vmem:[#allocation3 + $0x230] sm:$0xff]  ;;  %v241_v8 = vld [vmem:[#allocation3 + $0x248] sm:$0xff]  ;;  %v10413_v14 = vpack.c.bf16 %v236_v61, %v232_v60 }
  0xd1   :  { %7177 = vmatpush1.bf16.msra.mxu0 %v10370_v21  ;;  %v245_v9 = vld [vmem:[#allocation3 + $0x268] sm:$0xff]  ;;  %1266 = vrot.lane.b32.xlu0 %v10399_v56, %s10063_s14  ;;  %v243_v10 = vld [vmem:[#allocation3 + $0x258] sm:$0xff]  ;;  %v10417_v17 = vpack.c.bf16 %v238_v2, %v234_v62  ;;  %v240_v19 = vld [vmem:[#allocation3 + $0x240] sm:$0xff] }
  0xd2   :  { %7217 = vmatpush1.bf16.msra.mxu1 %v10374_v22  ;;  %7179 = vmatprep.subr.bf16.mxu0 %v10376_v23  ;;  %v247_v13 = vld [vmem:[#allocation3 + $0x278] sm:$0xff]  ;;  %v10419_v18 = vpack.c.bf16 %v245_v9, %v241_v8  ;;  %v244_v26 = vld [vmem:[#allocation3 + $0x260] sm:$0xff]  ;;  %v242_v28 = vld [vmem:[#allocation3 + $0x250] sm:$0xff] }
  0xd3   :  { %7219 = vmatprep.subr.bf16.mxu1 %v10379_v1  ;;  %v10422_v27 = vpack.c.bf16 %v247_v13, %v243_v10  ;;  %v246_v30 = vld [vmem:[#allocation3 + $0x270] sm:$0xff]  ;;  %v10425_v31 = vpack.c.bf16 %v244_v26, %v240_v19  ;;  %v10432_v34 = vld [vmem:[#allocation3 + $0x288] sm:$0xff]  ;;  %v10434_v35 = vld [vmem:[#allocation3 + $0x298] sm:$0xff]  ;;  %1519 = vrot.lane.b32.xlu1 %v10399_v56, %s10074_s15 }
  0xd4   :  { %v10429_v32 = vpack.c.bf16 %v246_v30, %v242_v28  ;;  %v10439_v40 = vld [vmem:[#allocation3 + $0x280] sm:$0xff]  ;;  %v10442_v43 = vld [vmem:[#allocation3 + $0x290] sm:$0xff]  ;;  %v941_v50 = vld [vmem:[#allocation3 + $0x98] sm:$0xff] }
  0xd5   :  { %7181 = vmatpush1.bf16.msra.mxu0 %v10382_v36  ;;  %v1429_v44 = vld [vmem:[%s11444_s0 + $0x10] sm:$0xff]  ;;  %v945_v51 = vld [vmem:[#allocation3 + $0xb8] sm:$0xff]  ;;  %v942_v60 = vld [vmem:[#allocation3 + $0xa0] sm:$0xff] }
  0xd6   :  { %7221 = vmatpush1.bf16.msra.mxu1 %v10386_v38  ;;  %7183 = vmatprep.subr.bf16.mxu0 %v10388_v39  ;;  %v10589_v62 = vpack.c.bf16 %v945_v51, %v941_v50  ;;  %v944_v2 = vld [vmem:[#allocation3 + $0xb0] sm:$0xff]  ;;  %v947_v8 = vld [vmem:[#allocation3 + $0xc8] sm:$0xff]  ;;  %v949_v10 = vld [vmem:[#allocation3 + $0xd8] sm:$0xff] }
  0xd7   :  { %7223 = vmatprep.subr.bf16.mxu1 %v10391_v45  ;;  %1517 = vrot.lane.b32.xlu0 %v1429_v44, %s10074_s15  ;;  %v951_v9 = vld [vmem:[#allocation3 + $0xe8] sm:$0xff]  ;;  %v953_v13 = vld [vmem:[#allocation3 + $0xf8] sm:$0xff]  ;;  %v950_v19 = vld [vmem:[#allocation3 + $0xe0] sm:$0xff] }
  0xd8   :  { %1771 = vrot.lane.b32.xlu1 %v10399_v56, %s10075_s16  ;;  %v10603_v26 = vpack.c.bf16 %v951_v9, %v947_v8  ;;  %v948_v28 = vld [vmem:[#allocation3 + $0xd0] sm:$0xff] }
  0xd9   :  { %7185 = vmatpush1.bf16.msra.mxu0 %v10394_v52  ;;  %v952_v30 = vld [vmem:[#allocation3 + $0xf0] sm:$0xff] }
  0xda   :  { %7225 = vmatpush1.bf16.msra.mxu1 %v10403_v57  ;;  %7187 = vmatprep.subr.bf16.mxu0 %v10405_v58  ;;  %v972_v51 = vld [vmem:[#allocation3 + $0x190] sm:$0xff] }
  0xdb   :  { %7227 = vmatprep.subr.bf16.mxu1 %v10408_v63  ;;  %1769 = vrot.lane.b32.xlu0 %v1429_v44, %s10075_s16  ;;  %v954_v44 = vld [vmem:[#allocation3 + $0x100] sm:$0xff] }
  0xdd   :  { %7189 = vmatpush1.bf16.msra.mxu0 %v10413_v14 }
  0xde   :  { %7229 = vmatpush1.bf16.msra.mxu1 %v10417_v17  ;;  %7191 = vmatprep.subr.bf16.mxu0 %v10419_v18 }
  0xdf   :  { %7231 = vmatprep.subr.bf16.mxu1 %v10422_v27 }
  0xe1   :  { %7193 = vmatpush1.bf16.msra.mxu0 %v10425_v31 }
  0xe2   :  { %7233 = vmatpush1.bf16.msra.mxu1 %v10429_v32  ;;  %296 = vmatprep.subr.mxu0 %v10432_v34 }
  0xe3   :  { %367 = vmatprep.subr.mxu1 %v10434_v35 }
  0xe5   :  { %297 = vmatpush1.msra.mxu0 %v10439_v40 }
  0xe6   :  { %368 = vmatpush1.msra.mxu1 %v10442_v43  ;;  %321 = vmatmul.mubr.f32.vlgmr.msra.gmra.mrb[0].mxu0 %v10282_v0 }
  0xe7   :  { %392 = vmatmul.mubr.f32.vlgmr.msra.gmra.mrb[0].mxu1 %v10282_v0  ;;  %7235 = vmatprep.subr.bf16.mxu0 %v10292_v6 }
  0xe8   :  { %7275 = vmatprep.subr.bf16.mxu1 %v10294_v7  ;;  %7237 = vmatpush1.bf16.msra.mxu0 %v10300_v11 }
  0xe9   :  { %7277 = vmatpush1.bf16.msra.mxu1 %v10304_v15  ;;  %7239 = vmatprep.subr.bf16.mxu0 %v10306_v16 }
  0xea   :  { %7279 = vmatprep.subr.bf16.mxu1 %v10310_v20 }
  0xec   :  { %7241 = vmatpush1.bf16.msra.mxu0 %v10314_v24 }
  0xed   :  { %7281 = vmatpush1.bf16.msra.mxu1 %v10316_v25  ;;  %7243 = vmatprep.subr.bf16.mxu0 %v10323_v29 }
  0xee   :  { %7283 = vmatprep.subr.bf16.mxu1 %v10325_v33 }
  0xf0   :  { %7245 = vmatpush1.bf16.msra.mxu0 %v10330_v37 }
  0xf1   :  { %7285 = vmatpush1.bf16.msra.mxu1 %v10334_v41  ;;  %7247 = vmatprep.subr.bf16.mxu0 %v10336_v42 }
  0xf2   :  { %7287 = vmatprep.subr.bf16.mxu1 %v10339_v46 }
  0xf4   :  { %7249 = vmatpush1.bf16.msra.mxu0 %v10343_v53 }
  0xf5   :  { %7289 = vmatpush1.bf16.msra.mxu1 %v10347_v54  ;;  %7251 = vmatprep.subr.bf16.mxu0 %v10349_v55 }
  0xf6   :  { %7291 = vmatprep.subr.bf16.mxu1 %v10352_v59 }
  0xf8   :  { %7253 = vmatpush1.bf16.msra.mxu0 %v10356_v3 }
  0xf9   :  { %7293 = vmatpush1.bf16.msra.mxu1 %v10360_v4  ;;  %7255 = vmatprep.subr.bf16.mxu0 %v10362_v5 }
  0xfa   :  { %7295 = vmatprep.subr.bf16.mxu1 %v10365_v12 }
  0xfc   :  { %7257 = vmatpush1.bf16.msra.mxu0 %v10370_v21 }
  0xfd   :  { %7297 = vmatpush1.bf16.msra.mxu1 %v10374_v22  ;;  %7259 = vmatprep.subr.bf16.mxu0 %v10376_v23 }
  0xfe   :  { %7299 = vmatprep.subr.bf16.mxu1 %v10379_v1 }
 0x100   :  { %7261 = vmatpush1.bf16.msra.mxu0 %v10382_v36 }
 0x101   :  { %7301 = vmatpush1.bf16.msra.mxu1 %v10386_v38  ;;  %7263 = vmatprep.subr.bf16.mxu0 %v10388_v39 }
 0x102   :  { %7303 = vmatprep.subr.bf16.mxu1 %v10391_v45 }
 0x104   :  { %7265 = vmatpush1.bf16.msra.mxu0 %v10394_v52 }
 0x105   :  { %7305 = vmatpush1.bf16.msra.mxu1 %v10403_v57  ;;  %7267 = vmatprep.subr.bf16.mxu0 %v10405_v58 }
 0x106   :  { %7307 = vmatprep.subr.bf16.mxu1 %v10408_v63 }
 0x108   :  { %7269 = vmatpush1.bf16.msra.mxu0 %v10413_v14 }
 0x109   :  { %7309 = vmatpush1.bf16.msra.mxu1 %v10417_v17  ;;  %7271 = vmatprep.subr.bf16.mxu0 %v10419_v18 }
 0x10a   :  { %7311 = vmatprep.subr.bf16.mxu1 %v10422_v27 }
 0x10c   :  { %7273 = vmatpush1.bf16.msra.mxu0 %v10425_v31 }
 0x10d   :  { %7313 = vmatpush1.bf16.msra.mxu1 %v10429_v32  ;;  %548 = vmatprep.subr.mxu0 %v10432_v34 }
 0x10e   :  { %619 = vmatprep.subr.mxu1 %v10434_v35 }
 0x110   :  { %549 = vmatpush1.msra.mxu0 %v10439_v40 }
 0x111   :  { %620 = vmatpush1.msra.mxu1 %v10442_v43  ;;  %7315 = vmatprep.subr.bf16.mxu0 %v10292_v6 }
 0x112   :  { %7355 = vmatprep.subr.bf16.mxu1 %v10294_v7 }
 0x12a   :  { %v500_v0 = vpop.permute.xlu0 %499 }
 0x12b   :  { %v10499_v47 = vpop.permute.xlu1 %755 }
 0x12f   :  { %v502_v48 = vpop.permute.xlu0 %501 }
 0x130   :  { %6940 = vmatprep.mubr.msk.f32.mxu0 %vm252_vm0, %v502_v48  ;;  %6941 = vmatprep.mubr.msk.f32.mxu1 %vm252_vm0, %v502_v48  ;;  %v504_v49 = vsel %vm503_vm1, %v500_v0, %v502_v48  ;;  %v958_v0 = vld [vmem:[#allocation3 + $0x120] sm:$0xff] }
 0x131   :  { %573 = vmatmul.mubr.f32.vlgmr.msra.gmra.mrb[2].mxu0 %v504_v49  ;;  %644 = vmatmul.mubr.f32.vlgmr.msra.gmra.mrb[2].mxu1 %v504_v49  ;;  %v758_v6 = vpop.permute.xlu1 %757  ;;  %v956_v49 = vld [vmem:[#allocation3 + $0x110] sm:$0xff] }
 0x132   :  { %7317 = vmatpush1.bf16.msra.mxu0 %v10300_v11  ;;  %7357 = vmatpush1.bf16.msra.mxu1 %v10304_v15  ;;  %v761_v7 = vsel %vm759_vm2, %v10499_v47, %v758_v6  ;;  %v10522_v11 = vld [vmem:[%s11444_s0 + $0x20] sm:$0xff]  ;;  %v10527_v15 = vld [vmem:[%s11444_s0 + $0x18] sm:$0xff]  ;;  %v960_v6 = vld [vmem:[#allocation3 + $0x130] sm:$0xff] }
 0x133   :  { %7319 = vmatprep.subr.bf16.mxu0 %v10306_v16  ;;  %7359 = vmatprep.subr.bf16.mxu1 %v10310_v20  ;;  %v923_v16 = vld [vmem:[#allocation3 + $0x8] sm:$0xff] }
 0x134   :  { %6943 = vmatprep.mubr.msk.f32.mxu0 %vm252_vm0, %v761_v7  ;;  %6944 = vmatprep.mubr.msk.f32.mxu1 %vm252_vm0, %v761_v7  ;;  %v927_v20 = vld [vmem:[#allocation3 + $0x28] sm:$0xff] }
 0x135   :  { %2023 = vrot.lane.b32.xlu1 %v10522_v11, %s10076_s1  ;;  %2021 = vrot.lane.b32.xlu0 %v10527_v15, %s10076_s1  ;;  %v963_v7 = vld [vmem:[#allocation3 + $0x148] sm:$0xff] }
 0x136   :  { %7321 = vmatpush1.bf16.msra.mxu0 %v10314_v24  ;;  %7361 = vmatpush1.bf16.msra.mxu1 %v10316_v25  ;;  %v925_v24 = vld [vmem:[#allocation3 + $0x18] sm:$0xff] }
 0x137   :  { %7323 = vmatprep.subr.bf16.mxu0 %v10323_v29  ;;  %7363 = vmatprep.subr.bf16.mxu1 %v10325_v33  ;;  %v929_v25 = vld [vmem:[#allocation3 + $0x38] sm:$0xff]  ;;  %v922_v29 = vld [vmem:[#allocation3] sm:$0xff] }
 0x138   :  { %v926_v33 = vld [vmem:[#allocation3 + $0x20] sm:$0xff] }
 0x139   :  { %2275 = vrot.lane.b32.xlu1 %v10522_v11, %s10077_s18  ;;  %2273 = vrot.lane.b32.xlu0 %v10527_v15, %s10077_s18 }
 0x13a   :  { %7325 = vmatpush1.bf16.msra.mxu0 %v10330_v37  ;;  %7365 = vmatpush1.bf16.msra.mxu1 %v10334_v41  ;;  %v924_v37 = vld [vmem:[#allocation3 + $0x10] sm:$0xff] }
 0x13b   :  { %7327 = vmatprep.subr.bf16.mxu0 %v10336_v42  ;;  %7367 = vmatprep.subr.bf16.mxu1 %v10339_v46  ;;  %v928_v41 = vld [vmem:[#allocation3 + $0x30] sm:$0xff]  ;;  %v931_v42 = vld [vmem:[#allocation3 + $0x48] sm:$0xff]  ;;  %v754_v46 = vpop.permute.xlu0 %753 }
 0x13d   :  { %2529 = vrot.lane.b32.xlu0 %v10522_v11, %s10067_s8  ;;  %v976_v11 = vld [vmem:[#allocation3 + $0x1b0] sm:$0xff] }
 0x13e   :  { %7329 = vmatpush1.bf16.msra.mxu0 %v10343_v53  ;;  %7369 = vmatpush1.bf16.msra.mxu1 %v10347_v54  ;;  %v935_v53 = vld [vmem:[#allocation3 + $0x68] sm:$0xff]  ;;  %v933_v54 = vld [vmem:[#allocation3 + $0x58] sm:$0xff]  ;;  %v10653_v9 = vpack.c.bf16 %v976_v11, %v972_v51  ;;  %v1000_v51 = vld [vmem:[#allocation3 + $0x270] sm:$0xff] }
 0x13f   :  { %7331 = vmatprep.subr.bf16.mxu0 %v10349_v55  ;;  %7371 = vmatprep.subr.bf16.mxu1 %v10352_v59  ;;  %v937_v55 = vld [vmem:[#allocation3 + $0x78] sm:$0xff]  ;;  %v10559_v59 = vpack.c.bf16 %v927_v20, %v923_v16  ;;  %v967_v16 = vld [vmem:[#allocation3 + $0x168] sm:$0xff] }
 0x140   :  { %v965_v20 = vld [vmem:[#allocation3 + $0x158] sm:$0xff] }
 0x141   :  { %2527 = vrot.lane.b32.xlu0 %v10527_v15, %s10067_s8  ;;  %v984_v15 = vld [vmem:[#allocation3 + $0x1f0] sm:$0xff] }
 0x142   :  { %7333 = vmatpush1.bf16.msra.mxu0 %v10356_v3  ;;  %7373 = vmatpush1.bf16.msra.mxu1 %v10360_v4  ;;  %v10561_v3 = vpack.c.bf16 %v929_v25, %v925_v24  ;;  %v10563_v4 = vpack.c.bf16 %v926_v33, %v922_v29  ;;  %v969_v24 = vld [vmem:[#allocation3 + $0x178] sm:$0xff]  ;;  %v10623_v25 = vpack.c.bf16 %v958_v0, %v954_v44  ;;  %v962_v33 = vld [vmem:[#allocation3 + $0x140] sm:$0xff] }
 0x143   :  { %7335 = vmatprep.subr.bf16.mxu0 %v10362_v5  ;;  %7375 = vmatprep.subr.bf16.mxu1 %v10365_v12  ;;  %v10565_v5 = vpack.c.bf16 %v928_v41, %v924_v37  ;;  %v930_v12 = vld [vmem:[#allocation3 + $0x40] sm:$0xff]  ;;  %v10625_v29 = vpack.c.bf16 %v960_v6, %v956_v49  ;;  %v10629_v41 = vpack.c.bf16 %v967_v16, %v963_v7  ;;  %v988_v16 = vld [vmem:[#allocation3 + $0x210] sm:$0xff] }
 0x144   :  { %v966_v37 = vld [vmem:[#allocation3 + $0x160] sm:$0xff] }
 0x145   :  { %v986_v0 = vld [vmem:[#allocation3 + $0x200] sm:$0xff] }
 0x146   :  { %7337 = vmatpush1.bf16.msra.mxu0 %v10370_v21  ;;  %7377 = vmatpush1.bf16.msra.mxu1 %v10374_v22  ;;  %v934_v21 = vld [vmem:[#allocation3 + $0x60] sm:$0xff]  ;;  %v760_v22 = vsel %vm759_vm2, %v754_v46, %v10499_v47  ;;  %v964_v46 = vld [vmem:[#allocation3 + $0x150] sm:$0xff] }
 0x147   :  { %7339 = vmatprep.subr.bf16.mxu0 %v10376_v23  ;;  %7379 = vmatprep.subr.bf16.mxu1 %v10379_v1  ;;  %v10571_v23 = vpack.c.bf16 %v935_v53, %v931_v42  ;;  %v10573_v1 = vpack.c.bf16 %v937_v55, %v933_v54  ;;  %v10581_v56 = vpack.c.bf16 %v934_v21, %v930_v12  ;;  %v968_v53 = vld [vmem:[#allocation3 + $0x170] sm:$0xff]  ;;  %v971_v54 = vld [vmem:[#allocation3 + $0x188] sm:$0xff]  ;;  %v973_v12 = vld [vmem:[#allocation3 + $0x198] sm:$0xff] }
 0x148   :  { %v10631_v42 = vpack.c.bf16 %v969_v24, %v965_v20  ;;  %v975_v55 = vld [vmem:[#allocation3 + $0x1a8] sm:$0xff]  ;;  %v977_v21 = vld [vmem:[#allocation3 + $0x1b8] sm:$0xff]  ;;  %v990_v49 = vld [vmem:[#allocation3 + $0x220] sm:$0xff] }
 0x149   :  { %v10645_v50 = vpack.c.bf16 %v977_v21, %v973_v12  ;;  %v992_v20 = vld [vmem:[#allocation3 + $0x230] sm:$0xff]  ;;  %v995_v24 = vld [vmem:[#allocation3 + $0x248] sm:$0xff] }
 0x14a   :  { %7341 = vmatpush1.bf16.msra.mxu0 %v10382_v36  ;;  %7381 = vmatpush1.bf16.msra.mxu1 %v10386_v38  ;;  %v932_v36 = vld [vmem:[#allocation3 + $0x50] sm:$0xff] }
 0x14b   :  { %7343 = vmatprep.subr.bf16.mxu0 %v10388_v39  ;;  %7383 = vmatprep.subr.bf16.mxu1 %v10391_v45  ;;  %v936_v38 = vld [vmem:[#allocation3 + $0x70] sm:$0xff]  ;;  %v939_v39 = vld [vmem:[#allocation3 + $0x88] sm:$0xff] }
 0x14c   :  { %v943_v45 = vld [vmem:[#allocation3 + $0xa8] sm:$0xff] }
 0x14d   :  { %v10587_v61 = vpack.c.bf16 %v943_v45, %v939_v39  ;;  %v974_v39 = vld [vmem:[#allocation3 + $0x1a0] sm:$0xff]  ;;  %v10643_v45 = vpack.c.bf16 %v975_v55, %v971_v54  ;;  %v10677_v54 = vpack.c.bf16 %v992_v20, %v988_v16  ;;  %v1706_v16 = vld [vmem:[#allocation3 + $0xb8] sm:$0xff] }
 0x14e   :  { %7345 = vmatpush1.bf16.msra.mxu0 %v10394_v52  ;;  %7385 = vmatpush1.bf16.msra.mxu1 %v10403_v57  ;;  %v10577_v52 = vpop.permute.xlu0 %1010  ;;  %v10583_v57 = vpack.c.bf16 %v936_v38, %v932_v36  ;;  %v10639_v36 = vpack.c.bf16 %v968_v53, %v964_v46  ;;  %v970_v38 = vld [vmem:[#allocation3 + $0x180] sm:$0xff]  ;;  %v1001_v46 = vld [vmem:[#allocation3 + $0x278] sm:$0xff]  ;;  %v10675_v53 = vpack.c.bf16 %v990_v49, %v986_v0  ;;  %v1700_v49 = vld [vmem:[#allocation3 + $0x88] sm:$0xff] }
 0x14f   :  { %7347 = vmatprep.subr.bf16.mxu0 %v10405_v58  ;;  %7387 = vmatprep.subr.bf16.mxu1 %v10408_v63  ;;  %v938_v58 = vld [vmem:[#allocation3 + $0x80] sm:$0xff]  ;;  %v940_v63 = vld [vmem:[#allocation3 + $0x90] sm:$0xff]  ;;  %v10651_v8 = vpack.c.bf16 %v974_v39, %v970_v38 }
 0x150   :  { %v994_v55 = vld [vmem:[#allocation3 + $0x240] sm:$0xff]  ;;  %v996_v39 = vld [vmem:[#allocation3 + $0x250] sm:$0xff] }
 0x151   :  { %v998_v38 = vld [vmem:[#allocation3 + $0x260] sm:$0xff] }
 0x152   :  { %7349 = vmatpush1.bf16.msra.mxu0 %v10413_v14  ;;  %7389 = vmatpush1.bf16.msra.mxu1 %v10417_v17  ;;  %v10597_v14 = vpack.c.bf16 %v942_v60, %v938_v58  ;;  %v10599_v17 = vpack.c.bf16 %v944_v2, %v940_v63  ;;  %v979_v58 = vld [vmem:[#allocation3 + $0x1c8] sm:$0xff]  ;;  %v981_v63 = vld [vmem:[#allocation3 + $0x1d8] sm:$0xff]  ;;  %v10687_v11 = vpack.c.bf16 %v998_v38, %v994_v55  ;;  %v1701_v55 = vld [vmem:[#allocation3 + $0x90] sm:$0xff] }
 0x153   :  { %7351 = vmatprep.subr.bf16.mxu0 %v10419_v18  ;;  %7391 = vmatprep.subr.bf16.mxu1 %v10422_v27  ;;  %v946_v18 = vld [vmem:[#allocation3 + $0xc0] sm:$0xff]  ;;  %v10605_v27 = vpack.c.bf16 %v953_v13, %v949_v10  ;;  %v983_v60 = vld [vmem:[#allocation3 + $0x1e8] sm:$0xff]  ;;  %v985_v2 = vld [vmem:[#allocation3 + $0x1f8] sm:$0xff] }
 0x154   :  { %v978_v10 = vld [vmem:[#allocation3 + $0x1c0] sm:$0xff]  ;;  %v1712_v38 = vld [vmem:[#allocation3 + $0xe8] sm:$0xff] }
 0x155   :  { %v982_v13 = vld [vmem:[#allocation3 + $0x1e0] sm:$0xff] }
 0x156   :  { %7353 = vmatpush1.bf16.msra.mxu0 %v10425_v31  ;;  %7393 = vmatpush1.bf16.msra.mxu1 %v10429_v32  ;;  %v955_v31 = vld [vmem:[#allocation3 + $0x108] sm:$0xff] }
 0x157   :  { %805 = vmatprep.subr.mxu0 %v10432_v34  ;;  %876 = vmatprep.subr.mxu1 %v10434_v35  ;;  %v959_v32 = vld [vmem:[#allocation3 + $0x128] sm:$0xff]  ;;  %v957_v34 = vld [vmem:[#allocation3 + $0x118] sm:$0xff] }
 0x158   :  { %v961_v35 = vld [vmem:[#allocation3 + $0x138] sm:$0xff]  ;;  %v10615_v47 = vpack.c.bf16 %v959_v32, %v955_v31  ;;  %v991_v31 = vld [vmem:[#allocation3 + $0x228] sm:$0xff] }
 0x159   :  { %v10617_v48 = vpack.c.bf16 %v961_v35, %v957_v34  ;;  %v989_v32 = vld [vmem:[#allocation3 + $0x218] sm:$0xff]  ;;  %v10663_v35 = vpack.c.bf16 %v982_v13, %v978_v10  ;;  %v10701_v10 = vld [vmem:[#allocation3 + $0x280] sm:$0xff]  ;;  %v10703_v13 = vld [vmem:[#allocation3 + $0x290] sm:$0xff] }
 0x15a   :  { %806 = vmatpush1.msra.mxu0 %v10439_v40  ;;  %877 = vmatpush1.msra.mxu1 %v10442_v43  ;;  %v10609_v40 = vpack.c.bf16 %v950_v19, %v946_v18  ;;  %v10611_v43 = vpack.c.bf16 %v952_v30, %v948_v28  ;;  %v10657_v18 = vpack.c.bf16 %v983_v60, %v979_v58  ;;  %v980_v28 = vld [vmem:[#allocation3 + $0x1d0] sm:$0xff]  ;;  %v987_v30 = vld [vmem:[#allocation3 + $0x208] sm:$0xff]  ;;  %v993_v34 = vld [vmem:[#allocation3 + $0x238] sm:$0xff] }
 0x15b   :  { %830 = vmatmul.mubr.f32.vlgmr.msra.gmra.mrb[4].mxu0 %v760_v22  ;;  %901 = vmatmul.mubr.f32.vlgmr.msra.gmra.mrb[4].mxu1 %v760_v22  ;;  %v10637_v22 = vpack.c.bf16 %v966_v37, %v962_v33  ;;  %v10659_v19 = vpack.c.bf16 %v985_v2, %v981_v63  ;;  %v10665_v44 = vpack.c.bf16 %v984_v15, %v980_v28  ;;  %v999_v33 = vld [vmem:[#allocation3 + $0x268] sm:$0xff]  ;;  %v997_v37 = vld [vmem:[#allocation3 + $0x258] sm:$0xff]  ;;  %v1009_v2 = vpop.permute.xlu1 %1008  ;;  %v1267_v15 = vpop.permute.xlu0 %1266 }
 0x15c   :  { %7395 = vmatprep.subr.bf16.mxu0 %v10559_v59  ;;  %7435 = vmatprep.subr.bf16.mxu1 %v10561_v3  ;;  %v10669_v6 = vpack.c.bf16 %v991_v31, %v987_v30  ;;  %v10671_v7 = vpack.c.bf16 %v993_v34, %v989_v32  ;;  %v10681_v12 = vpack.c.bf16 %v999_v33, %v995_v24  ;;  %v10693_v60 = vld [vmem:[#allocation3 + $0x288] sm:$0xff]  ;;  %v10695_v63 = vld [vmem:[#allocation3 + $0x298] sm:$0xff] }
 0x15d   :  { %7397 = vmatpush1.bf16.msra.mxu0 %v10563_v4  ;;  %7437 = vmatpush1.bf16.msra.mxu1 %v10565_v5  ;;  %v10683_v21 = vpack.c.bf16 %v1001_v46, %v997_v37  ;;  %v10689_v58 = vpack.c.bf16 %v1000_v51, %v996_v39  ;;  %v1013_v28 = vsel %vm1012_vm3, %v1009_v2, %v10577_v52  ;;  %v1699_v37 = vld [vmem:[#allocation3 + $0x80] sm:$0xff]  ;;  %v1710_v39 = vld [vmem:[#allocation3 + $0xd8] sm:$0xff]  ;;  %v1709_v2 = vld [vmem:[#allocation3 + $0xd0] sm:$0xff] }
 0x15e   :  { %7399 = vmatprep.subr.bf16.mxu0 %v10571_v23  ;;  %7439 = vmatprep.subr.bf16.mxu1 %v10573_v1  ;;  %v1703_v46 = vld [vmem:[#allocation3 + $0xa0] sm:$0xff]  ;;  %v1714_v51 = vld [vmem:[#allocation3 + $0xf8] sm:$0xff] }
 0x15f   :  { %6946 = vmatprep.mubr.msk.f32.mxu0 %vm252_vm0, %v10577_v52  ;;  %6947 = vmatprep.mubr.msk.f32.mxu1 %vm252_vm0, %v10577_v52  ;;  %v1265_v30 = vpop.permute.xlu1 %1264  ;;  %v10724_v52 = vld [vmem:[%s11444_s0 + $0x28] sm:$0xff] }
 0x160   :  { %v1270_v31 = vsel %vm1268_vm4, %v1265_v30, %v1267_v15  ;;  %2531 = vrot.lane.b32.xlu1 %v10724_v52, %s10067_s8  ;;  %2784 = vrot.lane.b32.xlu0 %v10724_v52, %s10078_s9  ;;  %v1716_v15 = vld [vmem:[#allocation3 + $0x108] sm:$0xff] }
 0x161   :  { %7401 = vmatpush1.bf16.msra.mxu0 %v10581_v56  ;;  %7441 = vmatpush1.bf16.msra.mxu1 %v10583_v57 }
 0x162   :  { %7403 = vmatprep.subr.bf16.mxu0 %v10587_v61  ;;  %7443 = vmatprep.subr.bf16.mxu1 %v10589_v62 }
 0x163   :  { %v1263_v32 = vpop.permute.xlu1 %1262 }
 0x164   :  { %v1269_v34 = vsel %vm1268_vm4, %v1263_v32, %v1265_v30  ;;  %v2948_v30 = vld [vmem:[%s11444_s0 + $0x30] sm:$0xff]  ;;  %v1722_v32 = vld [vmem:[#allocation3 + $0x138] sm:$0xff] }
 0x165   :  { %7405 = vmatpush1.bf16.msra.mxu0 %v10597_v14  ;;  %7445 = vmatpush1.bf16.msra.mxu1 %v10599_v17 }
 0x166   :  { %7407 = vmatprep.subr.bf16.mxu0 %v10603_v26  ;;  %7447 = vmatprep.subr.bf16.mxu1 %v10605_v27 }
 0x167   :  { %v10765_v0 = vpop.permute.xlu1 %1519  ;;  %3040 = vrot.lane.b32.xlu0 %v2948_v30, %s10079_s3  ;;  %v1748_v30 = vld [vmem:[#allocation3 + $0x208] sm:$0xff] }
 0x169   :  { %7409 = vmatpush1.bf16.msra.mxu0 %v10609_v40  ;;  %7449 = vmatpush1.bf16.msra.mxu1 %v10611_v43 }
 0x16a   :  { %7411 = vmatprep.subr.bf16.mxu0 %v10615_v47  ;;  %7451 = vmatprep.subr.bf16.mxu1 %v10617_v48 }
 0x16b   :  { %v10837_v20 = vpop.permute.xlu1 %1771 }
 0x16d   :  { %7413 = vmatpush1.bf16.msra.mxu0 %v10623_v25  ;;  %7453 = vmatpush1.bf16.msra.mxu1 %v10625_v29 }
 0x16e   :  { %7415 = vmatprep.subr.bf16.mxu0 %v10629_v41  ;;  %7455 = vmatprep.subr.bf16.mxu1 %v10631_v42 }
 0x171   :  { %7417 = vmatpush1.bf16.msra.mxu0 %v10637_v22  ;;  %7457 = vmatpush1.bf16.msra.mxu1 %v10639_v36 }
 0x172   :  { %7419 = vmatprep.subr.bf16.mxu0 %v10643_v45  ;;  %7459 = vmatprep.subr.bf16.mxu1 %v10645_v50 }
 0x175   :  { %7421 = vmatpush1.bf16.msra.mxu0 %v10651_v8  ;;  %7461 = vmatpush1.bf16.msra.mxu1 %v10653_v9 }
 0x176   :  { %7423 = vmatprep.subr.bf16.mxu0 %v10657_v18  ;;  %7463 = vmatprep.subr.bf16.mxu1 %v10659_v19 }
 0x179   :  { %7425 = vmatpush1.bf16.msra.mxu0 %v10663_v35  ;;  %7465 = vmatpush1.bf16.msra.mxu1 %v10665_v44 }
 0x17a   :  { %7427 = vmatprep.subr.bf16.mxu0 %v10669_v6  ;;  %7467 = vmatprep.subr.bf16.mxu1 %v10671_v7 }
 0x17d   :  { %7429 = vmatpush1.bf16.msra.mxu0 %v10675_v53  ;;  %7469 = vmatpush1.bf16.msra.mxu1 %v10677_v54 }
 0x17e   :  { %7431 = vmatprep.subr.bf16.mxu0 %v10681_v12  ;;  %7471 = vmatprep.subr.bf16.mxu1 %v10683_v21 }
 0x181   :  { %7433 = vmatpush1.bf16.msra.mxu0 %v10687_v11  ;;  %7473 = vmatpush1.bf16.msra.mxu1 %v10689_v58 }
 0x182   :  { %1057 = vmatprep.subr.mxu0 %v10693_v60  ;;  %1128 = vmatprep.subr.mxu1 %v10695_v63 }
 0x185   :  { %1058 = vmatpush1.msra.mxu0 %v10701_v10  ;;  %1129 = vmatpush1.msra.mxu1 %v10703_v13 }
 0x186   :  { %1082 = vmatmul.mubr.f32.vlgmr.msra.gmra.mrb[6].mxu0 %v1013_v28  ;;  %1153 = vmatmul.mubr.f32.vlgmr.msra.gmra.mrb[6].mxu1 %v1013_v28  ;;  %v1713_v28 = vld [vmem:[#allocation3 + $0xf0] sm:$0xff] }
 0x187   :  { %7475 = vmatprep.subr.bf16.mxu0 %v10559_v59  ;;  %7515 = vmatprep.subr.bf16.mxu1 %v10561_v3 }
 0x188   :  { %7477 = vmatpush1.bf16.msra.mxu0 %v10563_v4  ;;  %7517 = vmatpush1.bf16.msra.mxu1 %v10565_v5 }
 0x189   :  { %7479 = vmatprep.subr.bf16.mxu0 %v10571_v23  ;;  %7519 = vmatprep.subr.bf16.mxu1 %v10573_v1 }
 0x18a   :  { %6949 = vmatprep.mubr.msk.f32.mxu0 %vm252_vm0, %v1270_v31  ;;  %6950 = vmatprep.mubr.msk.f32.mxu1 %vm252_vm0, %v1270_v31  ;;  %v1720_v31 = vld [vmem:[#allocation3 + $0x128] sm:$0xff] }
 0x18c   :  { %7481 = vmatpush1.bf16.msra.mxu0 %v10581_v56  ;;  %7521 = vmatpush1.bf16.msra.mxu1 %v10583_v57 }
 0x18d   :  { %7483 = vmatprep.subr.bf16.mxu0 %v10587_v61  ;;  %7523 = vmatprep.subr.bf16.mxu1 %v10589_v62 }
 0x190   :  { %7485 = vmatpush1.bf16.msra.mxu0 %v10597_v14  ;;  %7525 = vmatpush1.bf16.msra.mxu1 %v10599_v17 }
 0x191   :  { %7487 = vmatprep.subr.bf16.mxu0 %v10603_v26  ;;  %7527 = vmatprep.subr.bf16.mxu1 %v10605_v27 }
 0x194   :  { %7489 = vmatpush1.bf16.msra.mxu0 %v10609_v40  ;;  %7529 = vmatpush1.bf16.msra.mxu1 %v10611_v43 }
 0x195   :  { %7491 = vmatprep.subr.bf16.mxu0 %v10615_v47  ;;  %7531 = vmatprep.subr.bf16.mxu1 %v10617_v48 }
 0x198   :  { %7493 = vmatpush1.bf16.msra.mxu0 %v10623_v25  ;;  %7533 = vmatpush1.bf16.msra.mxu1 %v10625_v29 }
 0x199   :  { %7495 = vmatprep.subr.bf16.mxu0 %v10629_v41  ;;  %7535 = vmatprep.subr.bf16.mxu1 %v10631_v42 }
 0x19c   :  { %7497 = vmatpush1.bf16.msra.mxu0 %v10637_v22  ;;  %7537 = vmatpush1.bf16.msra.mxu1 %v10639_v36 }
 0x19d   :  { %7499 = vmatprep.subr.bf16.mxu0 %v10643_v45  ;;  %7539 = vmatprep.subr.bf16.mxu1 %v10645_v50 }
 0x1a0   :  { %7501 = vmatpush1.bf16.msra.mxu0 %v10651_v8  ;;  %7541 = vmatpush1.bf16.msra.mxu1 %v10653_v9 }
 0x1a1   :  { %7503 = vmatprep.subr.bf16.mxu0 %v10657_v18  ;;  %7543 = vmatprep.subr.bf16.mxu1 %v10659_v19 }
 0x1a4   :  { %7505 = vmatpush1.bf16.msra.mxu0 %v10663_v35  ;;  %7545 = vmatpush1.bf16.msra.mxu1 %v10665_v44 }
 0x1a5   :  { %7507 = vmatprep.subr.bf16.mxu0 %v10669_v6  ;;  %7547 = vmatprep.subr.bf16.mxu1 %v10671_v7 }
 0x1a8   :  { %7509 = vmatpush1.bf16.msra.mxu0 %v10675_v53  ;;  %7549 = vmatpush1.bf16.msra.mxu1 %v10677_v54 }
 0x1a9   :  { %7511 = vmatprep.subr.bf16.mxu0 %v10681_v12  ;;  %7551 = vmatprep.subr.bf16.mxu1 %v10683_v21 }
 0x1ac   :  { %7513 = vmatpush1.bf16.msra.mxu0 %v10687_v11  ;;  %7553 = vmatpush1.bf16.msra.mxu1 %v10689_v58 }
 0x1ad   :  { %1314 = vmatprep.subr.mxu0 %v10693_v60  ;;  %1385 = vmatprep.subr.mxu1 %v10695_v63 }
 0x1b0   :  { %1315 = vmatpush1.msra.mxu0 %v10701_v10  ;;  %1386 = vmatpush1.msra.mxu1 %v10703_v13 }
 0x1b1   :  { %1339 = vmatmul.mubr.f32.vlgmr.msra.gmra.mrb[8].mxu0 %v1269_v34  ;;  %1410 = vmatmul.mubr.f32.vlgmr.msra.gmra.mrb[8].mxu1 %v1269_v34 }
 0x1b2   :  { %7555 = vmatprep.subr.bf16.mxu0 %v10559_v59  ;;  %7595 = vmatprep.subr.bf16.mxu1 %v10561_v3 }
 0x1b3   :  { %7557 = vmatpush1.bf16.msra.mxu0 %v10563_v4  ;;  %7597 = vmatpush1.bf16.msra.mxu1 %v10565_v5 }
 0x1b4   :  { %7559 = vmatprep.subr.bf16.mxu0 %v10571_v23  ;;  %7599 = vmatprep.subr.bf16.mxu1 %v10573_v1 }
 0x1b5   :  { %6952 = vmatprep.mubr.msk.f32.mxu0 %vm252_vm0, %v10765_v0  ;;  %6953 = vmatprep.mubr.msk.f32.mxu1 %vm252_vm0, %v10765_v0 }
 0x1b7   :  { %7561 = vmatpush1.bf16.msra.mxu0 %v10581_v56  ;;  %7601 = vmatpush1.bf16.msra.mxu1 %v10583_v57  ;;  %v10786_v56 = vld [vmem:[%s11444_s0 + $0x20] sm:$0xff] }
 0x1b8   :  { %7563 = vmatprep.subr.bf16.mxu0 %v10587_v61  ;;  %7603 = vmatprep.subr.bf16.mxu1 %v10589_v62  ;;  %v1684_v61 = vld [vmem:[#allocation3 + $0x8] sm:$0xff] }
 0x1b9   :  { %v322_v59 = vpop.f32.mrb[0].mxu0  ;;  %2782 = vrot.lane.b32.xlu1 %v10786_v56, %s10078_s9  ;;  %v1688_v62 = vld [vmem:[#allocation3 + $0x28] sm:$0xff] }
 0x1ba   :  { %v393_v3 = vpop.f32.mrb[0].mxu1  ;;  %v324_v4 = vpop.f32.mrb[1].mxu0 }
 0x1bb   :  { %7565 = vmatpush1.bf16.msra.mxu0 %v10597_v14  ;;  %7605 = vmatpush1.bf16.msra.mxu1 %v10599_v17  ;;  %v399_v5 = vmax.f32 %v322_v59, %v324_v4  ;;  %v395_v23 = vpop.f32.mrb[1].mxu1  ;;  %v1686_v14 = vld [vmem:[#allocation3 + $0x18] sm:$0xff]  ;;  %v1518_v17 = vpop.permute.xlu0 %1517  ;;  %v1715_v59 = vld [vmem:[#allocation3 + $0x100] sm:$0xff]  ;;  %v10880_v4 = vpack.c.bf16 %v1720_v31, %v1716_v15  ;;  %v1745_v15 = vld [vmem:[#allocation3 + $0x1f0] sm:$0xff] }
 0x1bc   :  { %7567 = vmatprep.subr.bf16.mxu0 %v10603_v26  ;;  %7607 = vmatprep.subr.bf16.mxu1 %v10605_v27  ;;  %v400_v1 = vmax.f32 %v393_v3, %v395_v23  ;;  %v1690_v26 = vld [vmem:[#allocation3 + $0x38] sm:$0xff]  ;;  %v1683_v27 = vld [vmem:[#allocation3] sm:$0xff]  ;;  %v1717_v23 = vld [vmem:[#allocation3 + $0x110] sm:$0xff] }
 0x1bd   :  { %3038 = vrot.lane.b32.xlu1 %v10724_v52, %s10079_s3  ;;  %v1718_v52 = vld [vmem:[#allocation3 + $0x118] sm:$0xff]  ;;  %v1719_v3 = vld [vmem:[#allocation3 + $0x120] sm:$0xff]  ;;  %v1752_v31 = vld [vmem:[#allocation3 + $0x228] sm:$0xff] }
 0x1be   :  { %v10790_v57 = vmax.f32 %v399_v5, %v400_v1  ;;  %v10882_v5 = vpack.c.bf16 %v1722_v32, %v1718_v52  ;;  %v1721_v1 = vld [vmem:[#allocation3 + $0x130] sm:$0xff]  ;;  %v1750_v52 = vld [vmem:[#allocation3 + $0x218] sm:$0xff] }
 0x1bf   :  { %7569 = vmatpush1.bf16.msra.mxu0 %v10609_v40  ;;  %7609 = vmatpush1.bf16.msra.mxu1 %v10611_v43  ;;  %v1687_v40 = vld [vmem:[#allocation3 + $0x20] sm:$0xff]  ;;  %v1685_v43 = vld [vmem:[#allocation3 + $0x10] sm:$0xff]  ;;  %v1754_v32 = vld [vmem:[#allocation3 + $0x238] sm:$0xff] }
 0x1c0   :  { %7571 = vmatprep.subr.bf16.mxu0 %v10615_v47  ;;  %7611 = vmatprep.subr.bf16.mxu1 %v10617_v48  ;;  %v1689_v47 = vld [vmem:[#allocation3 + $0x30] sm:$0xff]  ;;  %v1692_v48 = vld [vmem:[#allocation3 + $0x48] sm:$0xff] }
 0x1c1   :  { %3036 = vrot.lane.b32.xlu1 %v10786_v56, %s10079_s3  ;;  %v1724_v56 = vld [vmem:[#allocation3 + $0x148] sm:$0xff] }
 0x1c3   :  { %7573 = vmatpush1.bf16.msra.mxu0 %v10623_v25  ;;  %7613 = vmatpush1.bf16.msra.mxu1 %v10625_v29  ;;  %v1696_v25 = vld [vmem:[#allocation3 + $0x68] sm:$0xff]  ;;  %v1694_v29 = vld [vmem:[#allocation3 + $0x58] sm:$0xff] }
 0x1c4   :  { %7575 = vmatprep.subr.bf16.mxu0 %v10629_v41  ;;  %7615 = vmatprep.subr.bf16.mxu1 %v10631_v42  ;;  %v1698_v41 = vld [vmem:[#allocation3 + $0x78] sm:$0xff]  ;;  %v1522_v42 = vsel %vm1521_vm5, %v1518_v17, %v10765_v0  ;;  %v10876_v0 = vpack.c.bf16 %v1713_v28, %v1709_v2  ;;  %v10886_v17 = vpack.c.bf16 %v1719_v3, %v1715_v59  ;;  %v1741_v28 = vld [vmem:[#allocation3 + $0x1d0] sm:$0xff] }
 0x1c5   :  { %v10924_v3 = vpack.c.bf16 %v1745_v15, %v1741_v28  ;;  %v10962_v28 = vld [vmem:[#allocation3 + $0x290] sm:$0xff] }
 0x1c7   :  { %7577 = vmatpush1.bf16.msra.mxu0 %v10637_v22  ;;  %7617 = vmatpush1.bf16.msra.mxu1 %v10639_v36  ;;  %v10821_v22 = vpack.c.bf16 %v1688_v62, %v1684_v61  ;;  %v10823_v36 = vpack.c.bf16 %v1690_v26, %v1686_v14  ;;  %v1728_v61 = vld [vmem:[#allocation3 + $0x168] sm:$0xff]  ;;  %v1726_v62 = vld [vmem:[#allocation3 + $0x158] sm:$0xff]  ;;  %v10888_v26 = vpack.c.bf16 %v1721_v1, %v1717_v23  ;;  %v1747_v23 = vld [vmem:[#allocation3 + $0x200] sm:$0xff] }
 0x1c8   :  { %7579 = vmatprep.subr.bf16.mxu0 %v10643_v45  ;;  %7619 = vmatprep.subr.bf16.mxu1 %v10645_v50  ;;  %v10825_v45 = vpack.c.bf16 %v1687_v40, %v1683_v27  ;;  %v10827_v50 = vpack.c.bf16 %v1689_v47, %v1685_v43  ;;  %v1730_v14 = vld [vmem:[#allocation3 + $0x178] sm:$0xff]  ;;  %v1723_v27 = vld [vmem:[#allocation3 + $0x140] sm:$0xff]  ;;  %v10892_v43 = vpack.c.bf16 %v1728_v61, %v1724_v56 }
 0x1c9   :  { %v1727_v40 = vld [vmem:[#allocation3 + $0x160] sm:$0xff]  ;;  %v10894_v47 = vpack.c.bf16 %v1730_v14, %v1726_v62  ;;  %v10928_v56 = vpack.c.bf16 %v1752_v31, %v1748_v30  ;;  %v10930_v61 = vpack.c.bf16 %v1754_v32, %v1750_v52  ;;  %v1749_v62 = vld [vmem:[#allocation3 + $0x210] sm:$0xff] }
 0x1ca   :  { %v1751_v1 = vld [vmem:[#allocation3 + $0x220] sm:$0xff]  ;;  %v1753_v14 = vld [vmem:[#allocation3 + $0x230] sm:$0xff] }
 0x1cb   :  { %7581 = vmatpush1.bf16.msra.mxu0 %v10651_v8  ;;  %7621 = vmatpush1.bf16.msra.mxu1 %v10653_v9  ;;  %v1691_v8 = vld [vmem:[#allocation3 + $0x40] sm:$0xff] }
 0x1cc   :  { %7583 = vmatprep.subr.bf16.mxu0 %v10657_v18  ;;  %7623 = vmatprep.subr.bf16.mxu1 %v10659_v19  ;;  %v1695_v9 = vld [vmem:[#allocation3 + $0x60] sm:$0xff]  ;;  %v10831_v18 = vpack.c.bf16 %v1696_v25, %v1692_v48  ;;  %v10833_v19 = vpack.c.bf16 %v1698_v41, %v1694_v29  ;;  %v1725_v48 = vld [vmem:[#allocation3 + $0x150] sm:$0xff]  ;;  %v1732_v29 = vld [vmem:[#allocation3 + $0x188] sm:$0xff] }
 0x1cd   :  { %v10841_v24 = vpack.c.bf16 %v1695_v9, %v1691_v8  ;;  %v1729_v25 = vld [vmem:[#allocation3 + $0x170] sm:$0xff]  ;;  %v1736_v41 = vld [vmem:[#allocation3 + $0x1a8] sm:$0xff]  ;;  %v1738_v8 = vld [vmem:[#allocation3 + $0x1b8] sm:$0xff]  ;;  %v10898_v9 = vpack.c.bf16 %v1727_v40, %v1723_v27 }
 0x1ce   :  { %v1756_v27 = vld [vmem:[#allocation3 + $0x248] sm:$0xff] }
 0x1cf   :  { %7585 = vmatpush1.bf16.msra.mxu0 %v10663_v35  ;;  %7625 = vmatpush1.bf16.msra.mxu1 %v10665_v44  ;;  %v1693_v35 = vld [vmem:[#allocation3 + $0x50] sm:$0xff]  ;;  %v1760_v40 = vld [vmem:[#allocation3 + $0x268] sm:$0xff] }
 0x1d0   :  { %7587 = vmatprep.subr.bf16.mxu0 %v10669_v6  ;;  %7627 = vmatprep.subr.bf16.mxu1 %v10671_v7  ;;  %v1697_v44 = vld [vmem:[#allocation3 + $0x70] sm:$0xff]  ;;  %v1704_v6 = vld [vmem:[#allocation3 + $0xa8] sm:$0xff]  ;;  %v1702_v7 = vld [vmem:[#allocation3 + $0x98] sm:$0xff] }
 0x1d1   :  { %v10843_v33 = vpack.c.bf16 %v1697_v44, %v1693_v35  ;;  %v10900_v35 = vpack.c.bf16 %v1729_v25, %v1725_v48  ;;  %v1731_v44 = vld [vmem:[#allocation3 + $0x180] sm:$0xff]  ;;  %v1758_v48 = vld [vmem:[#allocation3 + $0x258] sm:$0xff] }
 0x1d2   :  { %v1762_v25 = vld [vmem:[#allocation3 + $0x278] sm:$0xff] }
 0x1d3   :  { %7589 = vmatpush1.bf16.msra.mxu0 %v10675_v53  ;;  %7629 = vmatpush1.bf16.msra.mxu1 %v10677_v54  ;;  %v10847_v53 = vpack.c.bf16 %v1704_v6, %v1700_v49  ;;  %v10849_v54 = vpack.c.bf16 %v1706_v16, %v1702_v7  ;;  %v1735_v49 = vld [vmem:[#allocation3 + $0x1a0] sm:$0xff]  ;;  %v10904_v6 = vpack.c.bf16 %v1736_v41, %v1732_v29  ;;  %v1733_v16 = vld [vmem:[#allocation3 + $0x190] sm:$0xff] }
 0x1d4   :  { %7591 = vmatprep.subr.bf16.mxu0 %v10681_v12  ;;  %7631 = vmatprep.subr.bf16.mxu1 %v10683_v21  ;;  %v1705_v12 = vld [vmem:[#allocation3 + $0xb0] sm:$0xff]  ;;  %v1708_v21 = vld [vmem:[#allocation3 + $0xc8] sm:$0xff]  ;;  %v10934_v29 = vpack.c.bf16 %v1751_v1, %v1747_v23  ;;  %v10936_v41 = vpack.c.bf16 %v1753_v14, %v1749_v62  ;;  %v2024_v14 = vpop.permute.xlu1 %2023 }
 0x1d7   :  { %7593 = vmatpush1.bf16.msra.mxu0 %v10687_v11  ;;  %7633 = vmatpush1.bf16.msra.mxu1 %v10689_v58  ;;  %v10858_v11 = vpack.c.bf16 %v1703_v46, %v1699_v37  ;;  %v10860_v58 = vpack.c.bf16 %v1705_v12, %v1701_v55  ;;  %v1737_v37 = vld [vmem:[#allocation3 + $0x1b0] sm:$0xff]  ;;  %v1740_v46 = vld [vmem:[#allocation3 + $0x1c8] sm:$0xff]  ;;  %v1742_v12 = vld [vmem:[#allocation3 + $0x1d8] sm:$0xff] }
 0x1d8   :  { %1566 = vmatprep.subr.mxu0 %v10693_v60  ;;  %1637 = vmatprep.subr.mxu1 %v10695_v63  ;;  %v1707_v60 = vld [vmem:[#allocation3 + $0xc0] sm:$0xff]  ;;  %v1744_v55 = vld [vmem:[#allocation3 + $0x1e8] sm:$0xff] }
 0x1d9   :  { %v1711_v63 = vld [vmem:[#allocation3 + $0xe0] sm:$0xff] }
 0x1da   :  { %v10874_v34 = vpack.c.bf16 %v1711_v63, %v1707_v60  ;;  %v1743_v60 = vld [vmem:[#allocation3 + $0x1e0] sm:$0xff]  ;;  %v10916_v63 = vpack.c.bf16 %v1744_v55, %v1740_v46 }
 0x1db   :  { %1567 = vmatpush1.msra.mxu0 %v10701_v10  ;;  %1638 = vmatpush1.msra.mxu1 %v10703_v13  ;;  %v10864_v10 = vpack.c.bf16 %v1712_v38, %v1708_v21  ;;  %v10866_v13 = vpack.c.bf16 %v1714_v51, %v1710_v39  ;;  %v1746_v21 = vld [vmem:[#allocation3 + $0x1f8] sm:$0xff]  ;;  %v10910_v38 = vpack.c.bf16 %v1735_v49, %v1731_v44  ;;  %v1739_v51 = vld [vmem:[#allocation3 + $0x1c0] sm:$0xff] }
 0x1dc   :  { %1591 = vmatmul.mubr.f32.vlgmr.msra.gmra.mrb[10].mxu0 %v1522_v42  ;;  %1662 = vmatmul.mubr.f32.vlgmr.msra.gmra.mrb[10].mxu1 %v1522_v42  ;;  %v1734_v42 = vld [vmem:[#allocation3 + $0x198] sm:$0xff]  ;;  %v10912_v39 = vpack.c.bf16 %v1737_v37, %v1733_v16  ;;  %v10918_v2 = vpack.c.bf16 %v1746_v21, %v1742_v12  ;;  %v10922_v59 = vpack.c.bf16 %v1743_v60, %v1739_v51  ;;  %v1759_v49 = vld [vmem:[#allocation3 + $0x260] sm:$0xff]  ;;  %v1757_v16 = vld [vmem:[#allocation3 + $0x250] sm:$0xff]  ;;  %v1770_v51 = vpop.permute.xlu0 %1769 }
 0x1dd   :  { %7635 = vmatprep.subr.bf16.mxu0 %v10821_v22  ;;  %7675 = vmatprep.subr.bf16.mxu1 %v10823_v36  ;;  %v10906_v7 = vpack.c.bf16 %v1738_v8, %v1734_v42  ;;  %v1755_v42 = vld [vmem:[#allocation3 + $0x240] sm:$0xff]  ;;  %v10940_v8 = vpack.c.bf16 %v1760_v40, %v1756_v27  ;;  %v10942_v44 = vpack.c.bf16 %v1762_v25, %v1758_v48  ;;  %v1761_v37 = vld [vmem:[#allocation3 + $0x270] sm:$0xff]  ;;  %v10952_v12 = vld [vmem:[#allocation3 + $0x288] sm:$0xff] }
 0x1de   :  { %7637 = vmatpush1.bf16.msra.mxu0 %v10825_v45  ;;  %7677 = vmatpush1.bf16.msra.mxu1 %v10827_v50  ;;  %v10946_v46 = vpack.c.bf16 %v1759_v49, %v1755_v42  ;;  %v10948_v55 = vpack.c.bf16 %v1761_v37, %v1757_v16  ;;  %v10954_v21 = vld [vmem:[#allocation3 + $0x298] sm:$0xff]  ;;  %v10960_v60 = vld [vmem:[#allocation3 + $0x280] sm:$0xff]  ;;  %v1774_v15 = vsel %vm1773_vm6, %v1770_v51, %v10837_v20 }
 0x1df   :  { %7639 = vmatprep.subr.bf16.mxu0 %v10831_v18  ;;  %7679 = vmatprep.subr.bf16.mxu1 %v10833_v19  ;;  %v6939_v51 = vld [vmem:[#allocation5] ss:$0 sm:$0xff] }
 0x1e0   :  { %6955 = vmatprep.mubr.msk.f32.mxu0 %vm252_vm0, %v10837_v20  ;;  %6956 = vmatprep.mubr.msk.f32.mxu1 %vm252_vm0, %v10837_v20  ;;  %v2022_v20 = vpop.permute.xlu0 %2021 }
 0x1e1   :  { %v2026_v48 = vsel %vm2025_vm7, %v2022_v20, %v2024_v14 }
 0x1e2   :  { %7641 = vmatpush1.bf16.msra.mxu0 %v10841_v24  ;;  %7681 = vmatpush1.bf16.msra.mxu1 %v10843_v33 }
 0x1e3   :  { %7643 = vmatprep.subr.bf16.mxu0 %v10847_v53  ;;  %7683 = vmatprep.subr.bf16.mxu1 %v10849_v54 }
 0x1e6   :  { %7645 = vmatpush1.bf16.msra.mxu0 %v10858_v11  ;;  %7685 = vmatpush1.bf16.msra.mxu1 %v10860_v58 }
 0x1e7   :  { %7647 = vmatprep.subr.bf16.mxu0 %v10864_v10  ;;  %7687 = vmatprep.subr.bf16.mxu1 %v10866_v13 }
 0x1ea   :  { %7649 = vmatpush1.bf16.msra.mxu0 %v10874_v34  ;;  %7689 = vmatpush1.bf16.msra.mxu1 %v10876_v0 }
 0x1eb   :  { %7651 = vmatprep.subr.bf16.mxu0 %v10880_v4  ;;  %7691 = vmatprep.subr.bf16.mxu1 %v10882_v5 }
 0x1ee   :  { %7653 = vmatpush1.bf16.msra.mxu0 %v10886_v17  ;;  %7693 = vmatpush1.bf16.msra.mxu1 %v10888_v26 }
 0x1ef   :  { %7655 = vmatprep.subr.bf16.mxu0 %v10892_v43  ;;  %7695 = vmatprep.subr.bf16.mxu1 %v10894_v47 }
 0x1f2   :  { %7657 = vmatpush1.bf16.msra.mxu0 %v10898_v9  ;;  %7697 = vmatpush1.bf16.msra.mxu1 %v10900_v35 }
 0x1f3   :  { %7659 = vmatprep.subr.bf16.mxu0 %v10904_v6  ;;  %7699 = vmatprep.subr.bf16.mxu1 %v10906_v7 }
 0x1f6   :  { %7661 = vmatpush1.bf16.msra.mxu0 %v10910_v38  ;;  %7701 = vmatpush1.bf16.msra.mxu1 %v10912_v39 }
 0x1f7   :  { %7663 = vmatprep.subr.bf16.mxu0 %v10916_v63  ;;  %7703 = vmatprep.subr.bf16.mxu1 %v10918_v2 }
 0x1fa   :  { %7665 = vmatpush1.bf16.msra.mxu0 %v10922_v59  ;;  %7705 = vmatpush1.bf16.msra.mxu1 %v10924_v3 }
 0x1fb   :  { %7667 = vmatprep.subr.bf16.mxu0 %v10928_v56  ;;  %7707 = vmatprep.subr.bf16.mxu1 %v10930_v61 }
 0x1fe   :  { %7669 = vmatpush1.bf16.msra.mxu0 %v10934_v29  ;;  %7709 = vmatpush1.bf16.msra.mxu1 %v10936_v41 }
 0x1ff   :  { %7671 = vmatprep.subr.bf16.mxu0 %v10940_v8  ;;  %7711 = vmatprep.subr.bf16.mxu1 %v10942_v44 }
 0x202   :  { %7673 = vmatpush1.bf16.msra.mxu0 %v10946_v46  ;;  %7713 = vmatpush1.bf16.msra.mxu1 %v10948_v55 }
 0x203   :  { %1818 = vmatprep.subr.mxu0 %v10952_v12  ;;  %1889 = vmatprep.subr.mxu1 %v10954_v21 }
 0x204   :  { %v574_v30 = vpop.f32.mrb[2].mxu0  ;;  %v645_v31 = vpop.f32.mrb[2].mxu1 }
 0x205   :  { %v576_v52 = vpop.f32.mrb[3].mxu0  ;;  %v647_v32 = vpop.f32.mrb[3].mxu1 }
 0x206   :  { %1819 = vmatpush1.msra.mxu0 %v10960_v60  ;;  %1890 = vmatpush1.msra.mxu1 %v10962_v28  ;;  %v651_v23 = vmax.f32 %v574_v30, %v576_v52  ;;  %v652_v1 = vmax.f32 %v645_v31, %v647_v32  ;;  %v2458_v31 = vld [vmem:[#allocation3 + $0x90] sm:$0xff]  ;;  %v2465_v32 = vld [vmem:[#allocation3 + $0xc8] sm:$0xff] }
 0x207   :  { %1843 = vmatmul.mubr.f32.vlgmr.msra.gmra.mrb[12].mxu0 %v1774_v15  ;;  %1914 = vmatmul.mubr.f32.vlgmr.msra.gmra.mrb[12].mxu1 %v1774_v15  ;;  %v2276_v15 = vpop.permute.xlu1 %2275  ;;  %v2462_v52 = vld [vmem:[#allocation3 + $0xb0] sm:$0xff] }
 0x208   :  { %7715 = vmatprep.subr.bf16.mxu0 %v10821_v22  ;;  %7755 = vmatprep.subr.bf16.mxu1 %v10823_v36  ;;  %v10969_v62 = vmax.f32 %v651_v23, %v652_v1  ;;  %v2469_v23 = vld [vmem:[#allocation3 + $0xe8] sm:$0xff]  ;;  %v2467_v1 = vld [vmem:[#allocation3 + $0xd8] sm:$0xff] }
 0x209   :  { %7717 = vmatpush1.bf16.msra.mxu0 %v10825_v45  ;;  %7757 = vmatpush1.bf16.msra.mxu1 %v10827_v50 }
 0x20a   :  { %7719 = vmatprep.subr.bf16.mxu0 %v10831_v18  ;;  %7759 = vmatprep.subr.bf16.mxu1 %v10833_v19 }
 0x20b   :  { %6958 = vmatprep.mubr.msk.f32.mxu0 %vm252_vm0, %v2024_v14  ;;  %6959 = vmatprep.mubr.msk.f32.mxu1 %vm252_vm0, %v2024_v14  ;;  %v2471_v14 = vld [vmem:[#allocation3 + $0xf8] sm:$0xff] }
 0x20d   :  { %7721 = vmatpush1.bf16.msra.mxu0 %v10841_v24  ;;  %7761 = vmatpush1.bf16.msra.mxu1 %v10843_v33 }
 0x20e   :  { %7723 = vmatprep.subr.bf16.mxu0 %v10847_v53  ;;  %7763 = vmatprep.subr.bf16.mxu1 %v10849_v54 }
 0x211   :  { %7725 = vmatpush1.bf16.msra.mxu0 %v10858_v11  ;;  %7765 = vmatpush1.bf16.msra.mxu1 %v10860_v58 }
 0x212   :  { %7727 = vmatprep.subr.bf16.mxu0 %v10864_v10  ;;  %7767 = vmatprep.subr.bf16.mxu1 %v10866_v13 }
 0x215   :  { %7729 = vmatpush1.bf16.msra.mxu0 %v10874_v34  ;;  %7769 = vmatpush1.bf16.msra.mxu1 %v10876_v0 }
 0x216   :  { %7731 = vmatprep.subr.bf16.mxu0 %v10880_v4  ;;  %7771 = vmatprep.subr.bf16.mxu1 %v10882_v5 }
 0x219   :  { %7733 = vmatpush1.bf16.msra.mxu0 %v10886_v17  ;;  %7773 = vmatpush1.bf16.msra.mxu1 %v10888_v26 }
 0x21a   :  { %7735 = vmatprep.subr.bf16.mxu0 %v10892_v43  ;;  %7775 = vmatprep.subr.bf16.mxu1 %v10894_v47 }
 0x21d   :  { %7737 = vmatpush1.bf16.msra.mxu0 %v10898_v9  ;;  %7777 = vmatpush1.bf16.msra.mxu1 %v10900_v35 }
 0x21e   :  { %7739 = vmatprep.subr.bf16.mxu0 %v10904_v6  ;;  %7779 = vmatprep.subr.bf16.mxu1 %v10906_v7 }
 0x221   :  { %7741 = vmatpush1.bf16.msra.mxu0 %v10910_v38  ;;  %7781 = vmatpush1.bf16.msra.mxu1 %v10912_v39 }
 0x222   :  { %7743 = vmatprep.subr.bf16.mxu0 %v10916_v63  ;;  %7783 = vmatprep.subr.bf16.mxu1 %v10918_v2 }
 0x225   :  { %7745 = vmatpush1.bf16.msra.mxu0 %v10922_v59  ;;  %7785 = vmatpush1.bf16.msra.mxu1 %v10924_v3 }
 0x226   :  { %7747 = vmatprep.subr.bf16.mxu0 %v10928_v56  ;;  %7787 = vmatprep.subr.bf16.mxu1 %v10930_v61 }
 0x229   :  { %7749 = vmatpush1.bf16.msra.mxu0 %v10934_v29  ;;  %7789 = vmatpush1.bf16.msra.mxu1 %v10936_v41 }
 0x22a   :  { %7751 = vmatprep.subr.bf16.mxu0 %v10940_v8  ;;  %7791 = vmatprep.subr.bf16.mxu1 %v10942_v44 }
 0x22d   :  { %7753 = vmatpush1.bf16.msra.mxu0 %v10946_v46  ;;  %7793 = vmatpush1.bf16.msra.mxu1 %v10948_v55 }
 0x22e   :  { %2070 = vmatprep.subr.mxu0 %v10952_v12  ;;  %2141 = vmatprep.subr.mxu1 %v10954_v21  ;;  %v831_v27 = vpop.f32.mrb[4].mxu0  ;;  %v902_v40 = vpop.f32.mrb[4].mxu1 }
 0x22f   :  { %v833_v25 = vpop.f32.mrb[5].mxu0  ;;  %v904_v42 = vpop.f32.mrb[5].mxu1 }
 0x230   :  { %v908_v49 = vmax.f32 %v831_v27, %v833_v25  ;;  %v909_v16 = vmax.f32 %v902_v40, %v904_v42  ;;  %v11102_v27 = vpack.c.bf16 %v2462_v52, %v2458_v31  ;;  %v2464_v40 = vld [vmem:[#allocation3 + $0xc0] sm:$0xff]  ;;  %v11106_v25 = vpack.c.bf16 %v2469_v23, %v2465_v32  ;;  %v2494_v31 = vld [vmem:[#allocation3 + $0x1b0] sm:$0xff]  ;;  %v2497_v52 = vld [vmem:[#allocation3 + $0x1c8] sm:$0xff] }
 0x231   :  { %2071 = vmatpush1.msra.mxu0 %v10960_v60  ;;  %2142 = vmatpush1.msra.mxu1 %v10962_v28  ;;  %v11108_v42 = vpack.c.bf16 %v2471_v14, %v2467_v1  ;;  %v2501_v32 = vld [vmem:[#allocation3 + $0x1e8] sm:$0xff]  ;;  %v2499_v23 = vld [vmem:[#allocation3 + $0x1d8] sm:$0xff] }
 0x232   :  { %2095 = vmatmul.mubr.f32.vlgmr.msra.gmra.mrb[14].mxu0 %v2026_v48  ;;  %2166 = vmatmul.mubr.f32.vlgmr.msra.gmra.mrb[14].mxu1 %v2026_v48  ;;  %v910_v37 = vmax.f32 %v908_v49, %v909_v16  ;;  %v2468_v48 = vld [vmem:[#allocation3 + $0xe0] sm:$0xff]  ;;  %v2466_v49 = vld [vmem:[#allocation3 + $0xd0] sm:$0xff]  ;;  %v2503_v1 = vld [vmem:[#allocation3 + $0x1f8] sm:$0xff] }
 0x233   :  { %7795 = vmatprep.subr.bf16.mxu0 %v10821_v22  ;;  %7835 = vmatprep.subr.bf16.mxu1 %v10823_v36  ;;  %v2441_v22 = vld [vmem:[#allocation3 + $0x8] sm:$0xff]  ;;  %v2470_v16 = vld [vmem:[#allocation3 + $0xf0] sm:$0xff] }
 0x234   :  { %7797 = vmatpush1.bf16.msra.mxu0 %v10825_v45  ;;  %7837 = vmatpush1.bf16.msra.mxu1 %v10827_v50  ;;  %v11019_v30 = vadd.f32 %v6939_v51, %v910_v37  ;;  %v2445_v36 = vld [vmem:[#allocation3 + $0x28] sm:$0xff]  ;;  %v2443_v45 = vld [vmem:[#allocation3 + $0x18] sm:$0xff]  ;;  %v2274_v50 = vpop.permute.xlu0 %2273 }
 0x235   :  { %7799 = vmatprep.subr.bf16.mxu0 %v10831_v18  ;;  %7839 = vmatprep.subr.bf16.mxu1 %v10833_v19  ;;  %v2447_v18 = vld [vmem:[#allocation3 + $0x38] sm:$0xff]  ;;  %v2440_v19 = vld [vmem:[#allocation3] sm:$0xff]  ;;  %v2473_v37 = vld [vmem:[#allocation3 + $0x108] sm:$0xff] }
 0x236   :  { %6961 = vmatprep.mubr.msk.f32.mxu0 %vm252_vm0, %v2276_v15  ;;  %6962 = vmatprep.mubr.msk.f32.mxu1 %vm252_vm0, %v2276_v15  ;;  %v2477_v51 = vld [vmem:[#allocation3 + $0x128] sm:$0xff] }
 0x238   :  { %7801 = vmatpush1.bf16.msra.mxu0 %v10841_v24  ;;  %7841 = vmatpush1.bf16.msra.mxu1 %v10843_v33  ;;  %v2444_v24 = vld [vmem:[#allocation3 + $0x20] sm:$0xff]  ;;  %v2442_v33 = vld [vmem:[#allocation3 + $0x10] sm:$0xff] }
 0x239   :  { %7803 = vmatprep.subr.bf16.mxu0 %v10847_v53  ;;  %7843 = vmatprep.subr.bf16.mxu1 %v10849_v54  ;;  %v2446_v53 = vld [vmem:[#allocation3 + $0x30] sm:$0xff]  ;;  %v2449_v54 = vld [vmem:[#allocation3 + $0x48] sm:$0xff] }
 0x23c   :  { %7805 = vmatpush1.bf16.msra.mxu0 %v10858_v11  ;;  %7845 = vmatpush1.bf16.msra.mxu1 %v10860_v58 }
 0x23d   :  { %7807 = vmatprep.subr.bf16.mxu0 %v10864_v10  ;;  %7847 = vmatprep.subr.bf16.mxu1 %v10866_v13  ;;  %v2453_v10 = vld [vmem:[#allocation3 + $0x68] sm:$0xff]  ;;  %v2451_v13 = vld [vmem:[#allocation3 + $0x58] sm:$0xff] }
 0x240   :  { %7809 = vmatpush1.bf16.msra.mxu0 %v10874_v34  ;;  %7849 = vmatpush1.bf16.msra.mxu1 %v10876_v0  ;;  %v2455_v34 = vld [vmem:[#allocation3 + $0x78] sm:$0xff]  ;;  %v2278_v0 = vsel %vm2277_vm8, %v2274_v50, %v2276_v15  ;;  %v2472_v50 = vld [vmem:[#allocation3 + $0x100] sm:$0xff] }
 0x241   :  { %7811 = vmatprep.subr.bf16.mxu0 %v10880_v4  ;;  %7851 = vmatprep.subr.bf16.mxu1 %v10882_v5  ;;  %v11062_v4 = vpack.c.bf16 %v2445_v36, %v2441_v22  ;;  %v11064_v5 = vpack.c.bf16 %v2447_v18, %v2443_v45  ;;  %v2475_v15 = vld [vmem:[#allocation3 + $0x118] sm:$0xff]  ;;  %v11112_v36 = vpack.c.bf16 %v2468_v48, %v2464_v40  ;;  %v2476_v18 = vld [vmem:[#allocation3 + $0x120] sm:$0xff] }
 0x242   :  { %v2479_v22 = vld [vmem:[#allocation3 + $0x138] sm:$0xff]  ;;  %v11114_v45 = vpack.c.bf16 %v2470_v16, %v2466_v49  ;;  %v2496_v48 = vld [vmem:[#allocation3 + $0x1c0] sm:$0xff]  ;;  %v11154_v16 = vpack.c.bf16 %v2501_v32, %v2497_v52  ;;  %v2514_v32 = vld [vmem:[#allocation3 + $0x250] sm:$0xff] }
 0x243   :  { %v2500_v49 = vld [vmem:[#allocation3 + $0x1e0] sm:$0xff] }
 0x244   :  { %7813 = vmatpush1.bf16.msra.mxu0 %v10886_v17  ;;  %7853 = vmatpush1.bf16.msra.mxu1 %v10888_v26  ;;  %v11066_v17 = vpack.c.bf16 %v2444_v24, %v2440_v19  ;;  %v11118_v19 = vpack.c.bf16 %v2477_v51, %v2473_v37  ;;  %v11120_v24 = vpack.c.bf16 %v2479_v22, %v2475_v15  ;;  %v2498_v51 = vld [vmem:[#allocation3 + $0x1d0] sm:$0xff]  ;;  %v2505_v22 = vld [vmem:[#allocation3 + $0x208] sm:$0xff]  ;;  %v2516_v52 = vld [vmem:[#allocation3 + $0x260] sm:$0xff] }
 0x245   :  { %7815 = vmatprep.subr.bf16.mxu0 %v10892_v43  ;;  %7855 = vmatprep.subr.bf16.mxu1 %v10894_v47  ;;  %v11068_v47 = vpack.c.bf16 %v2446_v53, %v2442_v33  ;;  %v2474_v33 = vld [vmem:[#allocation3 + $0x110] sm:$0xff]  ;;  %v11156_v37 = vpack.c.bf16 %v2503_v1, %v2499_v23 }
 0x246   :  { %v2478_v53 = vld [vmem:[#allocation3 + $0x130] sm:$0xff] }
 0x247   :  { %v2502_v15 = vld [vmem:[#allocation3 + $0x1f0] sm:$0xff] }
 0x248   :  { %7817 = vmatpush1.bf16.msra.mxu0 %v10898_v9  ;;  %7857 = vmatpush1.bf16.msra.mxu1 %v10900_v35  ;;  %v2518_v23 = vld [vmem:[#allocation3 + $0x270] sm:$0xff] }
 0x249   :  { %7819 = vmatprep.subr.bf16.mxu0 %v10904_v6  ;;  %7859 = vmatprep.subr.bf16.mxu1 %v10906_v7  ;;  %v2448_v6 = vld [vmem:[#allocation3 + $0x40] sm:$0xff] }
 0x24a   :  { %v2452_v7 = vld [vmem:[#allocation3 + $0x60] sm:$0xff] }
 0x24c   :  { %7821 = vmatpush1.bf16.msra.mxu0 %v10910_v38  ;;  %7861 = vmatpush1.bf16.msra.mxu1 %v10912_v39  ;;  %v2532_v38 = vpop.permute.xlu1 %2531  ;;  %v11072_v39 = vpack.c.bf16 %v2453_v10, %v2449_v54  ;;  %v2481_v54 = vld [vmem:[#allocation3 + $0x148] sm:$0xff]  ;;  %v2487_v10 = vld [vmem:[#allocation3 + $0x178] sm:$0xff] }
 0x24d   :  { %7823 = vmatprep.subr.bf16.mxu0 %v10916_v63  ;;  %7863 = vmatprep.subr.bf16.mxu1 %v10918_v2  ;;  %v11074_v63 = vpack.c.bf16 %v2455_v34, %v2451_v13  ;;  %v2450_v2 = vld [vmem:[#allocation3 + $0x50] sm:$0xff]  ;;  %v11124_v13 = vpack.c.bf16 %v2476_v18, %v2472_v50  ;;  %v11126_v34 = vpack.c.bf16 %v2478_v53, %v2474_v33  ;;  %v2509_v50 = vld [vmem:[#allocation3 + $0x228] sm:$0xff]  ;;  %v2507_v18 = vld [vmem:[#allocation3 + $0x218] sm:$0xff] }
 0x24e   :  { %v2511_v33 = vld [vmem:[#allocation3 + $0x238] sm:$0xff]  ;;  %v11160_v53 = vpack.c.bf16 %v2500_v49, %v2496_v48  ;;  %v11186_v48 = vpack.c.bf16 %v2518_v23, %v2514_v32  ;;  %v11190_v49 = vld [vmem:[#allocation3 + $0x288] sm:$0xff] }
 0x250   :  { %7825 = vmatpush1.bf16.msra.mxu0 %v10922_v59  ;;  %7865 = vmatpush1.bf16.msra.mxu1 %v10924_v3  ;;  %v2454_v59 = vld [vmem:[#allocation3 + $0x70] sm:$0xff]  ;;  %v2457_v3 = vld [vmem:[#allocation3 + $0x88] sm:$0xff] }
 0x251   :  { %7827 = vmatprep.subr.bf16.mxu0 %v10928_v56  ;;  %7867 = vmatprep.subr.bf16.mxu1 %v10930_v61  ;;  %v2461_v61 = vld [vmem:[#allocation3 + $0xa8] sm:$0xff] }
 0x254   :  { %7829 = vmatpush1.bf16.msra.mxu0 %v10934_v29  ;;  %7869 = vmatpush1.bf16.msra.mxu1 %v10936_v41  ;;  %v2459_v29 = vld [vmem:[#allocation3 + $0x98] sm:$0xff] }
 0x255   :  { %7831 = vmatprep.subr.bf16.mxu0 %v10940_v8  ;;  %7871 = vmatprep.subr.bf16.mxu1 %v10942_v44  ;;  %v2463_v41 = vld [vmem:[#allocation3 + $0xb8] sm:$0xff]  ;;  %v11078_v8 = vpop.permute.xlu0 %2529 }
 0x256   :  { %v2535_v44 = vsel %vm2533_vm9, %v11078_v8, %v2532_v38  ;;  %v2493_v38 = vld [vmem:[#allocation3 + $0x1a8] sm:$0xff] }
 0x258   :  { %7833 = vmatpush1.bf16.msra.mxu0 %v10946_v46  ;;  %7873 = vmatpush1.bf16.msra.mxu1 %v10948_v55  ;;  %v11086_v46 = vpack.c.bf16 %v2452_v7, %v2448_v6  ;;  %v11088_v55 = vpack.c.bf16 %v2454_v59, %v2450_v2  ;;  %v2486_v6 = vld [vmem:[#allocation3 + $0x170] sm:$0xff]  ;;  %v2489_v7 = vld [vmem:[#allocation3 + $0x188] sm:$0xff]  ;;  %v2491_v2 = vld [vmem:[#allocation3 + $0x198] sm:$0xff] }
 0x259   :  { %2322 = vmatprep.subr.mxu0 %v10952_v12  ;;  %2393 = vmatprep.subr.mxu1 %v10954_v21  ;;  %v1083_v11 = vpop.f32.mrb[6].mxu0  ;;  %v1154_v58 = vpop.f32.mrb[6].mxu1  ;;  %v2456_v12 = vld [vmem:[#allocation3 + $0x80] sm:$0xff]  ;;  %v2495_v59 = vld [vmem:[#allocation3 + $0x1b8] sm:$0xff] }
 0x25a   :  { %v1085_v26 = vpop.f32.mrb[7].mxu0  ;;  %v1156_v43 = vpop.f32.mrb[7].mxu1  ;;  %v2460_v21 = vld [vmem:[#allocation3 + $0xa0] sm:$0xff] }
 0x25b   :  { %v1160_v9 = vmax.f32 %v1083_v11, %v1085_v26  ;;  %v1161_v35 = vmax.f32 %v1154_v58, %v1156_v43  ;;  %v11100_v20 = vpack.c.bf16 %v2460_v21, %v2456_v12  ;;  %v2485_v11 = vld [vmem:[#allocation3 + $0x168] sm:$0xff]  ;;  %v2483_v58 = vld [vmem:[#allocation3 + $0x158] sm:$0xff]  ;;  %v2484_v26 = vld [vmem:[#allocation3 + $0x160] sm:$0xff]  ;;  %v11144_v12 = vpack.c.bf16 %v2495_v59, %v2491_v2 }
 0x25c   :  { %2323 = vmatpush1.msra.mxu0 %v10960_v60  ;;  %2394 = vmatpush1.msra.mxu1 %v10962_v28  ;;  %v11092_v60 = vpack.c.bf16 %v2461_v61, %v2457_v3  ;;  %v11094_v28 = vpack.c.bf16 %v2463_v41, %v2459_v29  ;;  %v11130_v43 = vpack.c.bf16 %v2485_v11, %v2481_v54  ;;  %v2488_v29 = vld [vmem:[#allocation3 + $0x180] sm:$0xff]  ;;  %v2490_v21 = vld [vmem:[#allocation3 + $0x190] sm:$0xff]  ;;  %v2519_v2 = vld [vmem:[#allocation3 + $0x278] sm:$0xff] }
 0x25d   :  { %2347 = vmatmul.mubr.f32.vlgmr.msra.gmra.mrb[16].mxu0 %v2278_v0  ;;  %2418 = vmatmul.mubr.f32.vlgmr.msra.gmra.mrb[16].mxu1 %v2278_v0  ;;  %v11076_v56 = vmax.f32 %v1160_v9, %v1161_v35  ;;  %v2480_v0 = vld [vmem:[#allocation3 + $0x140] sm:$0xff]  ;;  %v11132_v9 = vpack.c.bf16 %v2487_v10, %v2483_v58  ;;  %v2482_v35 = vld [vmem:[#allocation3 + $0x150] sm:$0xff]  ;;  %v11150_v40 = vpack.c.bf16 %v2494_v31, %v2490_v21 }
 0x25e   :  { %7875 = vmatprep.subr.bf16.mxu0 %v11062_v4  ;;  %7915 = vmatprep.subr.bf16.mxu1 %v11064_v5  ;;  %v11136_v3 = vpack.c.bf16 %v2484_v26, %v2480_v0  ;;  %v11138_v61 = vpack.c.bf16 %v2486_v6, %v2482_v35  ;;  %v2492_v41 = vld [vmem:[#allocation3 + $0x1a0] sm:$0xff]  ;;  %v11162_v54 = vpack.c.bf16 %v2502_v15, %v2498_v51  ;;  %v2506_v26 = vld [vmem:[#allocation3 + $0x210] sm:$0xff]  ;;  %v2513_v6 = vld [vmem:[#allocation3 + $0x248] sm:$0xff]  ;;  %v2528_v15 = vpop.permute.xlu0 %2527 }
 0x25f   :  { %7877 = vmatpush1.bf16.msra.mxu0 %v11066_v17  ;;  %7917 = vmatpush1.bf16.msra.mxu1 %v11068_v47  ;;  %v11148_v14 = vpack.c.bf16 %v2492_v41, %v2488_v29  ;;  %v2504_v11 = vld [vmem:[#allocation3 + $0x200] sm:$0xff]  ;;  %v11166_v10 = vpack.c.bf16 %v2509_v50, %v2505_v22  ;;  %v11168_v0 = vpack.c.bf16 %v2511_v33, %v2507_v18  ;;  %v2510_v35 = vld [vmem:[#allocation3 + $0x230] sm:$0xff]  ;;  %v11192_v51 = vld [vmem:[#allocation3 + $0x298] sm:$0xff] }
 0x260   :  { %7879 = vmatprep.subr.bf16.mxu0 %v11072_v39  ;;  %7919 = vmatprep.subr.bf16.mxu1 %v11074_v63  ;;  %v2508_v58 = vld [vmem:[#allocation3 + $0x220] sm:$0xff]  ;;  %v11174_v29 = vpack.c.bf16 %v2510_v35, %v2506_v26  ;;  %v11200_v50 = vld [vmem:[#allocation3 + $0x290] sm:$0xff] }
 0x261   :  { %6964 = vmatprep.mubr.msk.f32.mxu0 %vm252_vm0, %v2535_v44  ;;  %6965 = vmatprep.mubr.msk.f32.mxu1 %vm252_vm0, %v2535_v44  ;;  %v11142_v44 = vpack.c.bf16 %v2493_v38, %v2489_v7  ;;  %v2517_v7 = vld [vmem:[#allocation3 + $0x268] sm:$0xff]  ;;  %v2515_v38 = vld [vmem:[#allocation3 + $0x258] sm:$0xff]  ;;  %v11172_v59 = vpack.c.bf16 %v2508_v58, %v2504_v11  ;;  %v2512_v41 = vld [vmem:[#allocation3 + $0x240] sm:$0xff] }
 0x262   :  { %v11178_v21 = vpack.c.bf16 %v2517_v7, %v2513_v6  ;;  %v11180_v31 = vpack.c.bf16 %v2519_v2, %v2515_v38  ;;  %v11184_v1 = vpack.c.bf16 %v2516_v52, %v2512_v41  ;;  %v11198_v22 = vld [vmem:[#allocation3 + $0x280] sm:$0xff]  ;;  %v2534_v6 = vsel %vm2533_vm9, %v2528_v15, %v11078_v8  ;;  %v2785_v38 = vpop.permute.xlu0 %2784  ;;  %v2783_v8 = vpop.permute.xlu1 %2782 }
 0x263   :  { %7881 = vmatpush1.bf16.msra.mxu0 %v11086_v46  ;;  %7921 = vmatpush1.bf16.msra.mxu1 %v11088_v55  ;;  %v2787_v52 = vsel %vm2786_vm10, %v2783_v8, %v2785_v38  ;;  %v3236_v8 = vld [vmem:[#allocation7 + $0xd8] sm:$0xff] }
 0x264   :  { %7883 = vmatprep.subr.bf16.mxu0 %v11092_v60  ;;  %7923 = vmatprep.subr.bf16.mxu1 %v11094_v28 }
 0x267   :  { %7885 = vmatpush1.bf16.msra.mxu0 %v11100_v20  ;;  %7925 = vmatpush1.bf16.msra.mxu1 %v11102_v27 }
 0x268   :  { %7887 = vmatprep.subr.bf16.mxu0 %v11106_v25  ;;  %7927 = vmatprep.subr.bf16.mxu1 %v11108_v42 }
 0x26b   :  { %7889 = vmatpush1.bf16.msra.mxu0 %v11112_v36  ;;  %7929 = vmatpush1.bf16.msra.mxu1 %v11114_v45 }
 0x26c   :  { %7891 = vmatprep.subr.bf16.mxu0 %v11118_v19  ;;  %7931 = vmatprep.subr.bf16.mxu1 %v11120_v24 }
 0x26f   :  { %7893 = vmatpush1.bf16.msra.mxu0 %v11124_v13  ;;  %7933 = vmatpush1.bf16.msra.mxu1 %v11126_v34 }
 0x270   :  { %7895 = vmatprep.subr.bf16.mxu0 %v11130_v43  ;;  %7935 = vmatprep.subr.bf16.mxu1 %v11132_v9 }
 0x273   :  { %7897 = vmatpush1.bf16.msra.mxu0 %v11136_v3  ;;  %7937 = vmatpush1.bf16.msra.mxu1 %v11138_v61 }
 0x274   :  { %7899 = vmatprep.subr.bf16.mxu0 %v11142_v44  ;;  %7939 = vmatprep.subr.bf16.mxu1 %v11144_v12 }
 0x277   :  { %7901 = vmatpush1.bf16.msra.mxu0 %v11148_v14  ;;  %7941 = vmatpush1.bf16.msra.mxu1 %v11150_v40 }
 0x278   :  { %7903 = vmatprep.subr.bf16.mxu0 %v11154_v16  ;;  %7943 = vmatprep.subr.bf16.mxu1 %v11156_v37 }
 0x27b   :  { %7905 = vmatpush1.bf16.msra.mxu0 %v11160_v53  ;;  %7945 = vmatpush1.bf16.msra.mxu1 %v11162_v54 }
 0x27c   :  { %7907 = vmatprep.subr.bf16.mxu0 %v11166_v10  ;;  %7947 = vmatprep.subr.bf16.mxu1 %v11168_v0 }
 0x27f   :  { %7909 = vmatpush1.bf16.msra.mxu0 %v11172_v59  ;;  %7949 = vmatpush1.bf16.msra.mxu1 %v11174_v29 }
 0x280   :  { %7911 = vmatprep.subr.bf16.mxu0 %v11178_v21  ;;  %7951 = vmatprep.subr.bf16.mxu1 %v11180_v31 }
 0x283   :  { %7913 = vmatpush1.bf16.msra.mxu0 %v11184_v1  ;;  %7953 = vmatpush1.bf16.msra.mxu1 %v11186_v48 }
 0x284   :  { %2579 = vmatprep.subr.mxu0 %v11190_v49  ;;  %2650 = vmatprep.subr.mxu1 %v11192_v51  ;;  %v1340_v18 = vpop.f32.mrb[8].mxu0  ;;  %v1411_v33 = vpop.f32.mrb[8].mxu1 }
 0x285   :  { %v1342_v11 = vpop.f32.mrb[9].mxu0  ;;  %v1413_v58 = vpop.f32.mrb[9].mxu1 }
 0x286   :  { %v1417_v26 = vmax.f32 %v1340_v18, %v1342_v11  ;;  %v1418_v35 = vmax.f32 %v1411_v33, %v1413_v58  ;;  %v3041_v33 = vpop.permute.xlu0 %3040  ;;  %v11256_v58 = vpop.permute.xlu1 %3038 }
 0x287   :  { %2580 = vmatpush1.msra.mxu0 %v11198_v22  ;;  %2651 = vmatpush1.msra.mxu1 %v11200_v50 }
 0x288   :  { %2604 = vmatmul.mubr.f32.vlgmr.msra.gmra.mrb[18].mxu0 %v2534_v6  ;;  %2675 = vmatmul.mubr.f32.vlgmr.msra.gmra.mrb[18].mxu1 %v2534_v6  ;;  %v11206_v7 = vmax.f32 %v1417_v26, %v1418_v35  ;;  %v3044_v26 = vsel %vm3042_vm11, %v11256_v58, %v3041_v33  ;;  %v3231_v35 = vld [vmem:[#allocation7 + $0xb0] sm:$0xff]  ;;  %v3234_v6 = vld [vmem:[#allocation7 + $0xc8] sm:$0xff] }
 0x289   :  { %7955 = vmatprep.subr.bf16.mxu0 %v11062_v4  ;;  %7995 = vmatprep.subr.bf16.mxu1 %v11064_v5 }
 0x28a   :  { %7957 = vmatpush1.bf16.msra.mxu0 %v11066_v17  ;;  %7997 = vmatpush1.bf16.msra.mxu1 %v11068_v47 }
 0x28b   :  { %7959 = vmatprep.subr.bf16.mxu0 %v11072_v39  ;;  %7999 = vmatprep.subr.bf16.mxu1 %v11074_v63 }
 0x28c   :  { %6967 = vmatprep.mubr.msk.f32.mxu0 %vm252_vm0, %v2785_v38  ;;  %6968 = vmatprep.mubr.msk.f32.mxu1 %vm252_vm0, %v2785_v38  ;;  %v3238_v38 = vld [vmem:[#allocation7 + $0xe8] sm:$0xff] }
 0x28e   :  { %7961 = vmatpush1.bf16.msra.mxu0 %v11086_v46  ;;  %8001 = vmatpush1.bf16.msra.mxu1 %v11088_v55 }
 0x28f   :  { %7963 = vmatprep.subr.bf16.mxu0 %v11092_v60  ;;  %8003 = vmatprep.subr.bf16.mxu1 %v11094_v28 }
 0x292   :  { %7965 = vmatpush1.bf16.msra.mxu0 %v11100_v20  ;;  %8005 = vmatpush1.bf16.msra.mxu1 %v11102_v27 }
 0x293   :  { %7967 = vmatprep.subr.bf16.mxu0 %v11106_v25  ;;  %8007 = vmatprep.subr.bf16.mxu1 %v11108_v42 }
 0x296   :  { %7969 = vmatpush1.bf16.msra.mxu0 %v11112_v36  ;;  %8009 = vmatpush1.bf16.msra.mxu1 %v11114_v45 }
 0x297   :  { %7971 = vmatprep.subr.bf16.mxu0 %v11118_v19  ;;  %8011 = vmatprep.subr.bf16.mxu1 %v11120_v24 }
 0x29a   :  { %7973 = vmatpush1.bf16.msra.mxu0 %v11124_v13  ;;  %8013 = vmatpush1.bf16.msra.mxu1 %v11126_v34 }
 0x29b   :  { %7975 = vmatprep.subr.bf16.mxu0 %v11130_v43  ;;  %8015 = vmatprep.subr.bf16.mxu1 %v11132_v9 }
 0x29e   :  { %7977 = vmatpush1.bf16.msra.mxu0 %v11136_v3  ;;  %8017 = vmatpush1.bf16.msra.mxu1 %v11138_v61 }
 0x29f   :  { %7979 = vmatprep.subr.bf16.mxu0 %v11142_v44  ;;  %8019 = vmatprep.subr.bf16.mxu1 %v11144_v12 }
 0x2a2   :  { %7981 = vmatpush1.bf16.msra.mxu0 %v11148_v14  ;;  %8021 = vmatpush1.bf16.msra.mxu1 %v11150_v40 }
 0x2a3   :  { %7983 = vmatprep.subr.bf16.mxu0 %v11154_v16  ;;  %8023 = vmatprep.subr.bf16.mxu1 %v11156_v37 }
 0x2a6   :  { %7985 = vmatpush1.bf16.msra.mxu0 %v11160_v53  ;;  %8025 = vmatpush1.bf16.msra.mxu1 %v11162_v54 }
 0x2a7   :  { %7987 = vmatprep.subr.bf16.mxu0 %v11166_v10  ;;  %8027 = vmatprep.subr.bf16.mxu1 %v11168_v0 }
 0x2aa   :  { %7989 = vmatpush1.bf16.msra.mxu0 %v11172_v59  ;;  %8029 = vmatpush1.bf16.msra.mxu1 %v11174_v29 }
 0x2ab   :  { %7991 = vmatprep.subr.bf16.mxu0 %v11178_v21  ;;  %8031 = vmatprep.subr.bf16.mxu1 %v11180_v31 }
 0x2ae   :  { %7993 = vmatpush1.bf16.msra.mxu0 %v11184_v1  ;;  %8033 = vmatpush1.bf16.msra.mxu1 %v11186_v48 }
 0x2af   :  { %2831 = vmatprep.subr.mxu0 %v11190_v49  ;;  %2902 = vmatprep.subr.mxu1 %v11192_v51  ;;  %v1592_v2 = vpop.f32.mrb[10].mxu0  ;;  %v1663_v41 = vpop.f32.mrb[10].mxu1 }
 0x2b0   :  { %v1594_v32 = vpop.f32.mrb[11].mxu0  ;;  %v1665_v23 = vpop.f32.mrb[11].mxu1 }
 0x2b1   :  { %v1669_v15 = vmax.f32 %v1592_v2, %v1594_v32  ;;  %v1670_v18 = vmax.f32 %v1663_v41, %v1665_v23  ;;  %v3240_v2 = vld [vmem:[#allocation7 + $0xf8] sm:$0xff]  ;;  %v8126_v32 = vpack.c.bf16 %v3238_v38, %v3234_v6  ;;  %v3233_v23 = vld [vmem:[#allocation7 + $0xc0] sm:$0xff]  ;;  %v3271_v38 = vld [vmem:[#allocation7 + $0x1f0] sm:$0xff] }
 0x2b2   :  { %2832 = vmatpush1.msra.mxu0 %v11198_v22  ;;  %2903 = vmatpush1.msra.mxu1 %v11200_v50  ;;  %v8318_v33 = vpack.c.bf16 %v3240_v2, %v3236_v8  ;;  %v3274_v8 = vld [vmem:[#allocation7 + $0x208] sm:$0xff] }
 0x2b3   :  { %2856 = vmatmul.mubr.f32.vlgmr.msra.gmra.mrb[20].mxu0 %v2787_v52  ;;  %2927 = vmatmul.mubr.f32.vlgmr.msra.gmra.mrb[20].mxu1 %v2787_v52  ;;  %v11254_v11 = vmax.f32 %v1669_v15, %v1670_v18  ;;  %v3237_v15 = vld [vmem:[#allocation7 + $0xe0] sm:$0xff]  ;;  %v3235_v18 = vld [vmem:[#allocation7 + $0xd0] sm:$0xff]  ;;  %v3278_v2 = vld [vmem:[#allocation7 + $0x228] sm:$0xff] }
 0x2b4   :  { %8035 = vmatprep.subr.bf16.mxu0 %v11062_v4  ;;  %8075 = vmatprep.subr.bf16.mxu1 %v11064_v5  ;;  %v3210_v4 = vld [vmem:[#allocation7 + $0x8] sm:$0xff]  ;;  %v6942_v5 = vld [vmem:[#allocation5] ss:$0 sm:$0xff] }
 0x2b5   :  { %8037 = vmatpush1.bf16.msra.mxu0 %v11066_v17  ;;  %8077 = vmatpush1.bf16.msra.mxu1 %v11068_v47  ;;  %v3214_v17 = vld [vmem:[#allocation7 + $0x28] sm:$0xff]  ;;  %v3212_v47 = vld [vmem:[#allocation7 + $0x18] sm:$0xff] }
 0x2b6   :  { %8039 = vmatprep.subr.bf16.mxu0 %v11072_v39  ;;  %8079 = vmatprep.subr.bf16.mxu1 %v11074_v63  ;;  %v3216_v39 = vld [vmem:[#allocation7 + $0x38] sm:$0xff]  ;;  %v3037_v63 = vpop.permute.xlu1 %3036 }
 0x2b7   :  { %6970 = vmatprep.mubr.msk.f32.mxu0 %vm252_vm0, %v3044_v26  ;;  %6971 = vmatprep.mubr.msk.f32.mxu1 %vm252_vm0, %v3044_v26  ;;  %v3242_v26 = vld [vmem:[#allocation7 + $0x108] sm:$0xff] }
 0x2b9   :  { %8041 = vmatpush1.bf16.msra.mxu0 %v11086_v46  ;;  %8081 = vmatpush1.bf16.msra.mxu1 %v11088_v55  ;;  %v3209_v46 = vld [vmem:[#allocation7] sm:$0xff] }
 0x2ba   :  { %8043 = vmatprep.subr.bf16.mxu0 %v11092_v60  ;;  %8083 = vmatprep.subr.bf16.mxu1 %v11094_v28  ;;  %v3213_v55 = vld [vmem:[#allocation7 + $0x20] sm:$0xff] }
 0x2bd   :  { %8045 = vmatpush1.bf16.msra.mxu0 %v11100_v20  ;;  %8085 = vmatpush1.bf16.msra.mxu1 %v11102_v27  ;;  %v660_v20 = vadd.f32 %v6942_v5, %v10969_v62  ;;  %v3211_v27 = vld [vmem:[#allocation7 + $0x10] sm:$0xff]  ;;  %v3244_v5 = vld [vmem:[#allocation7 + $0x118] sm:$0xff] }
 0x2be   :  { %8047 = vmatprep.subr.bf16.mxu0 %v11106_v25  ;;  %8087 = vmatprep.subr.bf16.mxu1 %v11108_v42  ;;  %v3215_v25 = vld [vmem:[#allocation7 + $0x30] sm:$0xff]  ;;  %v3218_v42 = vld [vmem:[#allocation7 + $0x48] sm:$0xff] }
 0x2bf   :  { %v8308_v62 = vpack.c.bf16 %v3215_v25, %v3211_v27  ;;  %v3250_v27 = vld [vmem:[#allocation7 + $0x148] sm:$0xff] }
 0x2c0   :  { %v3254_v25 = vld [vmem:[#allocation7 + $0x168] sm:$0xff] }
 0x2c1   :  { %8049 = vmatpush1.bf16.msra.mxu0 %v11112_v36  ;;  %8089 = vmatpush1.bf16.msra.mxu1 %v11114_v45  ;;  %v8114_v36 = vpack.c.bf16 %v3214_v17, %v3210_v4  ;;  %v8306_v45 = vpack.c.bf16 %v3216_v39, %v3212_v47  ;;  %v3246_v4 = vld [vmem:[#allocation7 + $0x128] sm:$0xff]  ;;  %v3248_v17 = vld [vmem:[#allocation7 + $0x138] sm:$0xff]  ;;  %v8128_v47 = vpack.c.bf16 %v3237_v15, %v3233_v23 }
 0x2c2   :  { %8051 = vmatprep.subr.bf16.mxu0 %v11118_v19  ;;  %8091 = vmatprep.subr.bf16.mxu1 %v11120_v24  ;;  %v8146_v15 = vpack.c.bf16 %v3278_v2, %v3274_v8 }
 0x2c5   :  { %8053 = vmatpush1.bf16.msra.mxu0 %v11124_v13  ;;  %8093 = vmatpush1.bf16.msra.mxu1 %v11126_v34  ;;  %v3222_v13 = vld [vmem:[#allocation7 + $0x68] sm:$0xff]  ;;  %v3220_v34 = vld [vmem:[#allocation7 + $0x58] sm:$0xff] }
 0x2c6   :  { %8055 = vmatprep.subr.bf16.mxu0 %v11130_v43  ;;  %8095 = vmatprep.subr.bf16.mxu1 %v11132_v9  ;;  %v3224_v43 = vld [vmem:[#allocation7 + $0x78] sm:$0xff]  ;;  %v8116_v9 = vpack.c.bf16 %v3213_v55, %v3209_v46  ;;  %v3241_v46 = vld [vmem:[#allocation7 + $0x100] sm:$0xff] }
 0x2c7   :  { %v3245_v55 = vld [vmem:[#allocation7 + $0x120] sm:$0xff] }
 0x2c9   :  { %8057 = vmatpush1.bf16.msra.mxu0 %v11136_v3  ;;  %8097 = vmatpush1.bf16.msra.mxu1 %v11138_v61 }
 0x2ca   :  { %8059 = vmatprep.subr.bf16.mxu0 %v11142_v44  ;;  %8099 = vmatprep.subr.bf16.mxu1 %v11144_v12  ;;  %v3043_v44 = vsel %vm3042_vm11, %v3037_v63, %v11256_v58  ;;  %v3217_v12 = vld [vmem:[#allocation7 + $0x40] sm:$0xff]  ;;  %v3239_v58 = vld [vmem:[#allocation7 + $0xf0] sm:$0xff]  ;;  %v8130_v63 = vpack.c.bf16 %v3246_v4, %v3242_v26 }
 0x2cb   :  { %v8320_v39 = vpack.c.bf16 %v3239_v58, %v3235_v18  ;;  %v3273_v18 = vld [vmem:[#allocation7 + $0x200] sm:$0xff]  ;;  %v3275_v58 = vld [vmem:[#allocation7 + $0x210] sm:$0xff] }
 0x2cc   :  { %v3279_v4 = vld [vmem:[#allocation7 + $0x230] sm:$0xff] }
 0x2cd   :  { %8061 = vmatpush1.bf16.msra.mxu0 %v11148_v14  ;;  %8101 = vmatpush1.bf16.msra.mxu1 %v11150_v40  ;;  %v3221_v14 = vld [vmem:[#allocation7 + $0x60] sm:$0xff]  ;;  %v3219_v40 = vld [vmem:[#allocation7 + $0x50] sm:$0xff] }
 0x2ce   :  { %8063 = vmatprep.subr.bf16.mxu0 %v11154_v16  ;;  %8103 = vmatprep.subr.bf16.mxu1 %v11156_v37  ;;  %v661_v16 = vmax.f32 %v660_v20, 0.0  ;;  %v3247_v20 = vld [vmem:[#allocation7 + $0x130] sm:$0xff] }
 0x2d1   :  { %8065 = vmatpush1.bf16.msra.mxu0 %v11160_v53  ;;  %8105 = vmatpush1.bf16.msra.mxu1 %v11162_v54  ;;  %v8118_v53 = vpack.c.bf16 %v3222_v13, %v3218_v42  ;;  %v8310_v54 = vpack.c.bf16 %v3224_v43, %v3220_v34  ;;  %v3252_v42 = vld [vmem:[#allocation7 + $0x158] sm:$0xff]  ;;  %v3249_v13 = vld [vmem:[#allocation7 + $0x140] sm:$0xff]  ;;  %v3251_v43 = vld [vmem:[#allocation7 + $0x150] sm:$0xff] }
 0x2d2   :  { %8067 = vmatprep.subr.bf16.mxu0 %v11166_v10  ;;  %8107 = vmatprep.subr.bf16.mxu1 %v11168_v0  ;;  %v3223_v10 = vld [vmem:[#allocation7 + $0x70] sm:$0xff]  ;;  %v3226_v0 = vld [vmem:[#allocation7 + $0x88] sm:$0xff]  ;;  %v3253_v34 = vld [vmem:[#allocation7 + $0x160] sm:$0xff] }
 0x2d5   :  { %8069 = vmatpush1.bf16.msra.mxu0 %v11172_v59  ;;  %8109 = vmatpush1.bf16.msra.mxu1 %v11174_v29  ;;  %v3230_v59 = vld [vmem:[#allocation7 + $0xa8] sm:$0xff]  ;;  %v3228_v29 = vld [vmem:[#allocation7 + $0x98] sm:$0xff] }
 0x2d6   :  { %8071 = vmatprep.subr.bf16.mxu0 %v11178_v21  ;;  %8111 = vmatprep.subr.bf16.mxu1 %v11180_v31  ;;  %v3232_v21 = vld [vmem:[#allocation7 + $0xb8] sm:$0xff]  ;;  %v8120_v31 = vpack.c.bf16 %v3221_v14, %v3217_v12  ;;  %v8136_v14 = vpack.c.bf16 %v3253_v34, %v3249_v13 }
 0x2d7   :  { %v3264_v12 = vld [vmem:[#allocation7 + $0x1b8] sm:$0xff] }
 0x2d9   :  { %8073 = vmatpush1.bf16.msra.mxu0 %v11184_v1  ;;  %8113 = vmatpush1.bf16.msra.mxu1 %v11186_v48  ;;  %v8312_v1 = vpack.c.bf16 %v3223_v10, %v3219_v40  ;;  %v8122_v48 = vpack.c.bf16 %v3230_v59, %v3226_v0  ;;  %v3259_v10 = vld [vmem:[#allocation7 + $0x190] sm:$0xff] }
 0x2da   :  { %3088 = vmatprep.subr.mxu0 %v11190_v49  ;;  %3159 = vmatprep.subr.mxu1 %v11192_v51  ;;  %v1844_v60 = vpop.f32.mrb[12].mxu0  ;;  %v1915_v28 = vpop.f32.mrb[12].mxu1  ;;  %v3225_v49 = vld [vmem:[#allocation7 + $0x80] sm:$0xff]  ;;  %v3263_v59 = vld [vmem:[#allocation7 + $0x1b0] sm:$0xff] }
 0x2db   :  { %v1846_v19 = vpop.f32.mrb[13].mxu0  ;;  %v1917_v24 = vpop.f32.mrb[13].mxu1  ;;  %v3229_v51 = vld [vmem:[#allocation7 + $0xa0] sm:$0xff] }
 0x2dc   :  { %v1921_v3 = vmax.f32 %v1844_v60, %v1846_v19  ;;  %v1922_v61 = vmax.f32 %v1915_v28, %v1917_v24  ;;  %v8124_v41 = vpack.c.bf16 %v3229_v51, %v3225_v49  ;;  %v3243_v60 = vld [vmem:[#allocation7 + $0x110] sm:$0xff]  ;;  %v8322_v28 = vpack.c.bf16 %v3248_v17, %v3244_v5  ;;  %v3282_v5 = vld [vmem:[#allocation7 + $0x248] sm:$0xff] }
 0x2dd   :  { %3089 = vmatpush1.msra.mxu0 %v11198_v22  ;;  %3160 = vmatpush1.msra.mxu1 %v11200_v50  ;;  %v3227_v22 = vld [vmem:[#allocation7 + $0x90] sm:$0xff]  ;;  %v8314_v50 = vpack.c.bf16 %v3232_v21, %v3228_v29  ;;  %v8324_v19 = vpack.c.bf16 %v3247_v20, %v3243_v60  ;;  %v8134_v24 = vpack.c.bf16 %v3254_v25, %v3250_v27  ;;  %v3266_v29 = vld [vmem:[#allocation7 + $0x1c8] sm:$0xff]  ;;  %v3281_v60 = vld [vmem:[#allocation7 + $0x240] sm:$0xff] }
 0x2de   :  { %3113 = vmatmul.mubr.f32.vlgmr.msra.gmra.mrb[22].mxu0 %v3043_v44  ;;  %3184 = vmatmul.mubr.f32.vlgmr.msra.gmra.mrb[22].mxu1 %v3043_v44  ;;  %v11309_v37 = vmax.f32 %v1921_v3, %v1922_v61  ;;  %v8316_v52 = vpack.c.bf16 %v3231_v35, %v3227_v22  ;;  %v3255_v3 = vld [vmem:[#allocation7 + $0x170] sm:$0xff]  ;;  %v3258_v61 = vld [vmem:[#allocation7 + $0x188] sm:$0xff]  ;;  %v8332_v49 = vpack.c.bf16 %v3263_v59, %v3259_v10  ;;  %v3265_v22 = vld [vmem:[#allocation7 + $0x1c0] sm:$0xff] }
 0x2df   :  { %8115 = vmatprep.subr.bf16.mxu0 %v8114_v36  ;;  %8307 = vmatprep.subr.bf16.mxu1 %v8306_v45  ;;  %v3256_v36 = vld [vmem:[#allocation7 + $0x178] sm:$0xff]  ;;  %v8132_v45 = vpack.c.bf16 %v3245_v55, %v3241_v46  ;;  %v3262_v44 = vld [vmem:[#allocation7 + $0x1a8] sm:$0xff]  ;;  %v8328_v40 = vpack.c.bf16 %v3255_v3, %v3251_v43  ;;  %v3267_v35 = vld [vmem:[#allocation7 + $0x1d0] sm:$0xff]  ;;  %v8340_v46 = vpack.c.bf16 %v3279_v4, %v3275_v58 }
 0x2e0   :  { %8117 = vmatpush1.bf16.msra.mxu0 %v8116_v9  ;;  %3657 = vmatprep.mubr.f32.mxu0 %v661_v16  ;;  %v8326_v9 = vpack.c.bf16 %v3256_v36, %v3252_v42  ;;  %v3270_v21 = vld [vmem:[#allocation7 + $0x1e8] sm:$0xff]  ;;  %v8336_v23 = vpack.c.bf16 %v3271_v38, %v3267_v35  ;;  %v3283_v20 = vld [vmem:[#allocation7 + $0x250] sm:$0xff]  ;;  %v3289_v43 = vld [vmem:[#allocation7 + $0x280] sm:$0xff] }
 0x2e1   :  { %8309 = vmatpush1.bf16.msra.mxu1 %v8308_v62  ;;  %3870 = vmatprep.mubr.f32.mxu1 %v661_v16  ;;  %v3260_v62 = vld [vmem:[#allocation7 + $0x198] sm:$0xff]  ;;  %v8138_v16 = vpack.c.bf16 %v3262_v44, %v3258_v61  ;;  %v8142_v51 = vpack.c.bf16 %v3270_v21, %v3266_v29  ;;  %v3286_v17 = vld [vmem:[#allocation7 + $0x268] sm:$0xff]  ;;  %v3287_v25 = vld [vmem:[#allocation7 + $0x270] sm:$0xff] }
 0x2e2   :  { %8119 = vmatprep.subr.bf16.mxu0 %v8118_v53  ;;  %8311 = vmatprep.subr.bf16.mxu1 %v8310_v54  ;;  %v3257_v53 = vld [vmem:[#allocation7 + $0x180] sm:$0xff]  ;;  %v8330_v0 = vpack.c.bf16 %v3264_v12, %v3260_v62  ;;  %v8150_v55 = vpack.c.bf16 %v3286_v17, %v3282_v5  ;;  %v3290_v42 = vld [vmem:[#allocation7 + $0x288] sm:$0xff]  ;;  %v8344_v13 = vpack.c.bf16 %v3287_v25, %v3283_v20  ;;  %v3291_v3 = vld [vmem:[#allocation7 + $0x290] sm:$0xff] }
 0x2e3   :  { %v3261_v54 = vld [vmem:[#allocation7 + $0x1a0] sm:$0xff]  ;;  %v3294_v36 = vld [vmem:[#allocation7 + $0x2a8] sm:$0xff]  ;;  %v3295_v44 = vld [vmem:[#allocation7 + $0x2b0] sm:$0xff] }
 0x2e4   :  { %8121 = vmatpush1.bf16.msra.mxu0 %v8120_v31  ;;  %v3268_v31 = vld [vmem:[#allocation7 + $0x1d8] sm:$0xff]  ;;  %v8154_v34 = vpack.c.bf16 %v3294_v36, %v3290_v42  ;;  %v3298_v62 = vld [vmem:[#allocation7 + $0x2c8] sm:$0xff]  ;;  %v3297_v59 = vld [vmem:[#allocation7 + $0x2c0] sm:$0xff] }
 0x2e5   :  { %8313 = vmatpush1.bf16.msra.mxu1 %v8312_v1  ;;  %8123 = vmatprep.subr.bf16.mxu0 %v8122_v48  ;;  %v3272_v1 = vld [vmem:[#allocation7 + $0x1f8] sm:$0xff]  ;;  %v8140_v48 = vpack.c.bf16 %v3261_v54, %v3257_v53  ;;  %v3302_v12 = vld [vmem:[#allocation7 + $0x2e8] sm:$0xff]  ;;  %v8348_v53 = vpack.c.bf16 %v3295_v44, %v3291_v3  ;;  %v3301_v29 = vld [vmem:[#allocation7 + $0x2e0] sm:$0xff] }
 0x2e6   :  { %8315 = vmatprep.subr.bf16.mxu1 %v8314_v50  ;;  %v3269_v50 = vld [vmem:[#allocation7 + $0x1e0] sm:$0xff]  ;;  %v8334_v6 = vpack.c.bf16 %v3272_v1, %v3268_v31  ;;  %v3299_v21 = vld [vmem:[#allocation7 + $0x2d0] sm:$0xff]  ;;  %v3312_v38 = vld [vmem:[#allocation7 + $0x338] sm:$0xff]  ;;  %v8160_v8 = vpack.c.bf16 %v3301_v29, %v3297_v59 }
 0x2e7   :  { %v3314_v58 = vld [vmem:[#allocation7 + $0x348] sm:$0xff]  ;;  %v3316_v4 = vld [vmem:[#allocation7 + $0x358] sm:$0xff] }
 0x2e8   :  { %8125 = vmatpush1.bf16.msra.mxu0 %v8124_v41  ;;  %v3276_v41 = vld [vmem:[#allocation7 + $0x218] sm:$0xff]  ;;  %v3322_v20 = vld [vmem:[#allocation7 + $0x388] sm:$0xff] }
 0x2e9   :  { %8317 = vmatpush1.bf16.msra.mxu1 %v8316_v52  ;;  %8127 = vmatprep.subr.bf16.mxu0 %v8126_v32  ;;  %v3280_v52 = vld [vmem:[#allocation7 + $0x238] sm:$0xff]  ;;  %v8144_v32 = vpack.c.bf16 %v3269_v50, %v3265_v22  ;;  %v3310_v22 = vld [vmem:[#allocation7 + $0x328] sm:$0xff] }
 0x2ea   :  { %8319 = vmatprep.subr.bf16.mxu1 %v8318_v33  ;;  %v3277_v33 = vld [vmem:[#allocation7 + $0x220] sm:$0xff]  ;;  %v8338_v26 = vpack.c.bf16 %v3280_v52, %v3276_v41  ;;  %v3320_v5 = vld [vmem:[#allocation7 + $0x378] sm:$0xff]  ;;  %v3330_v3 = vld [vmem:[#allocation7 + $0x3c8] sm:$0xff] }
 0x2eb   :  { %v3324_v25 = vld [vmem:[#allocation7 + $0x398] sm:$0xff]  ;;  %v3338_v59 = vld [vmem:[#allocation7 + $0x408] sm:$0xff] }
 0x2ec   :  { %8129 = vmatpush1.bf16.msra.mxu0 %v8128_v47  ;;  %v3284_v47 = vld [vmem:[#allocation7 + $0x258] sm:$0xff]  ;;  %v3342_v29 = vld [vmem:[#allocation7 + $0x428] sm:$0xff] }
 0x2ed   :  { %8321 = vmatpush1.bf16.msra.mxu1 %v8320_v39  ;;  %8131 = vmatprep.subr.bf16.mxu0 %v8130_v63  ;;  %v3288_v39 = vld [vmem:[#allocation7 + $0x278] sm:$0xff]  ;;  %v8148_v63 = vpack.c.bf16 %v3277_v33, %v3273_v18  ;;  %v3311_v33 = vld [vmem:[#allocation7 + $0x330] sm:$0xff] }
 0x2ee   :  { %8323 = vmatprep.subr.bf16.mxu1 %v8322_v28  ;;  %v3285_v28 = vld [vmem:[#allocation7 + $0x260] sm:$0xff]  ;;  %v8342_v27 = vpack.c.bf16 %v3288_v39, %v3284_v47  ;;  %v3328_v42 = vld [vmem:[#allocation7 + $0x3b8] sm:$0xff] }
 0x2ef   :  { %v3332_v44 = vld [vmem:[#allocation7 + $0x3d8] sm:$0xff] }
 0x2f0   :  { %8133 = vmatpush1.bf16.msra.mxu0 %v8132_v45  ;;  %v3292_v45 = vld [vmem:[#allocation7 + $0x298] sm:$0xff] }
 0x2f1   :  { %8325 = vmatpush1.bf16.msra.mxu1 %v8324_v19  ;;  %8135 = vmatprep.subr.bf16.mxu0 %v8134_v24  ;;  %v3296_v19 = vld [vmem:[#allocation7 + $0x2b8] sm:$0xff]  ;;  %v8152_v24 = vpack.c.bf16 %v3285_v28, %v3281_v60  ;;  %v8358_v60 = vpack.c.bf16 %v3320_v5, %v3316_v4  ;;  %v3319_v28 = vld [vmem:[#allocation7 + $0x370] sm:$0xff]  ;;  %v3349_v4 = vld [vmem:[#allocation7 + $0x460] sm:$0xff] }
 0x2f2   :  { %8327 = vmatprep.subr.bf16.mxu1 %v8326_v9  ;;  %v3293_v9 = vld [vmem:[#allocation7 + $0x2a0] sm:$0xff]  ;;  %v8346_v61 = vpack.c.bf16 %v3296_v19, %v3292_v45  ;;  %v3347_v5 = vld [vmem:[#allocation7 + $0x450] sm:$0xff] }
 0x2f4   :  { %8137 = vmatpush1.bf16.msra.mxu0 %v8136_v14  ;;  %v3300_v14 = vld [vmem:[#allocation7 + $0x2d8] sm:$0xff] }
 0x2f5   :  { %8329 = vmatpush1.bf16.msra.mxu1 %v8328_v40  ;;  %8139 = vmatprep.subr.bf16.mxu0 %v8138_v16  ;;  %v3304_v40 = vld [vmem:[#allocation7 + $0x2f8] sm:$0xff]  ;;  %v8156_v16 = vpack.c.bf16 %v3293_v9, %v3289_v43  ;;  %v8362_v43 = vpack.c.bf16 %v3328_v42, %v3324_v25  ;;  %v3327_v9 = vld [vmem:[#allocation7 + $0x3b0] sm:$0xff]  ;;  %v3353_v25 = vld [vmem:[#allocation7 + $0x480] sm:$0xff] }
 0x2f6   :  { %8331 = vmatprep.subr.bf16.mxu1 %v8330_v0  ;;  %v8158_v0 = vpack.c.bf16 %v3302_v12, %v3298_v62  ;;  %v3336_v62 = vld [vmem:[#allocation7 + $0x3f8] sm:$0xff]  ;;  %v3357_v42 = vld [vmem:[#allocation7 + $0x4a0] sm:$0xff] }
 0x2f8   :  { %8141 = vmatpush1.bf16.msra.mxu0 %v8140_v48  ;;  %v8350_v48 = vpack.c.bf16 %v3304_v40, %v3300_v14 }
 0x2f9   :  { %8333 = vmatpush1.bf16.msra.mxu1 %v8332_v49  ;;  %8143 = vmatprep.subr.bf16.mxu0 %v8142_v51  ;;  %v3303_v49 = vld [vmem:[#allocation7 + $0x2f0] sm:$0xff]  ;;  %v3306_v51 = vld [vmem:[#allocation7 + $0x308] sm:$0xff] }
 0x2fa   :  { %8335 = vmatprep.subr.bf16.mxu1 %v8334_v6  ;;  %v3308_v6 = vld [vmem:[#allocation7 + $0x318] sm:$0xff]  ;;  %v8352_v41 = vpack.c.bf16 %v3303_v49, %v3299_v21  ;;  %v8162_v52 = vpack.c.bf16 %v3310_v22, %v3306_v51 }
 0x2fb   :  { %v8354_v18 = vpack.c.bf16 %v3312_v38, %v3308_v6  ;;  %v3340_v21 = vld [vmem:[#allocation7 + $0x418] sm:$0xff]  ;;  %v3341_v6 = vld [vmem:[#allocation7 + $0x420] sm:$0xff] }
 0x2fc   :  { %8145 = vmatpush1.bf16.msra.mxu0 %v8144_v32  ;;  %v3305_v32 = vld [vmem:[#allocation7 + $0x300] sm:$0xff]  ;;  %v9820_v49 = vld [vmem:[#allocation5] ss:$0 sm:$0xff] }
 0x2fd   :  { %8337 = vmatpush1.bf16.msra.mxu1 %v8336_v23  ;;  %8147 = vmatprep.subr.bf16.mxu0 %v8146_v15  ;;  %v3309_v23 = vld [vmem:[#allocation7 + $0x320] sm:$0xff]  ;;  %v3307_v15 = vld [vmem:[#allocation7 + $0x310] sm:$0xff]  ;;  %v408_v51 = vadd.f32 %v9820_v49, %v10790_v57 }
 0x2fe   :  { %8339 = vmatprep.subr.bf16.mxu1 %v8338_v26  ;;  %v3318_v26 = vld [vmem:[#allocation7 + $0x368] sm:$0xff]  ;;  %v8164_v17 = vpack.c.bf16 %v3309_v23, %v3305_v32  ;;  %v8356_v47 = vpack.c.bf16 %v3311_v33, %v3307_v15  ;;  %v3352_v33 = vld [vmem:[#allocation7 + $0x478] sm:$0xff] }
 0x2ff   :  { %v8166_v39 = vpack.c.bf16 %v3318_v26, %v3314_v58  ;;  %v3346_v32 = vld [vmem:[#allocation7 + $0x448] sm:$0xff]  ;;  %v409_v57 = vmax.f32 %v408_v51, 0.0  ;;  %v3345_v26 = vld [vmem:[#allocation7 + $0x440] sm:$0xff]  ;;  %v3375_v51 = vld [vmem:[#allocation7 + $0x530] sm:$0xff] }
 0x300   :  { %8149 = vmatpush1.bf16.msra.mxu0 %v8148_v63  ;;  %v3313_v63 = vld [vmem:[#allocation7 + $0x340] sm:$0xff]  ;;  %v3350_v23 = vld [vmem:[#allocation7 + $0x468] sm:$0xff] }
 0x301   :  { %8341 = vmatpush1.bf16.msra.mxu1 %v8340_v46  ;;  %8151 = vmatprep.subr.bf16.mxu0 %v8150_v55  ;;  %v3317_v46 = vld [vmem:[#allocation7 + $0x360] sm:$0xff]  ;;  %v3315_v55 = vld [vmem:[#allocation7 + $0x350] sm:$0xff] }
 0x302   :  { %8343 = vmatprep.subr.bf16.mxu1 %v8342_v27  ;;  %v3326_v27 = vld [vmem:[#allocation7 + $0x3a8] sm:$0xff]  ;;  %v8168_v36 = vpack.c.bf16 %v3317_v46, %v3313_v63  ;;  %v8360_v45 = vpack.c.bf16 %v3319_v28, %v3315_v55  ;;  %v3356_v55 = vld [vmem:[#allocation7 + $0x498] sm:$0xff]  ;;  %v8184_v28 = vpack.c.bf16 %v3349_v4, %v3345_v26 }
 0x303   :  { %v8170_v19 = vpack.c.bf16 %v3326_v27, %v3322_v20  ;;  %v3358_v63 = vld [vmem:[#allocation7 + $0x4a8] sm:$0xff]  ;;  %v3392_v26 = vld [vmem:[#allocation7 + $0x5b8] sm:$0xff] }
 0x304   :  { %8153 = vmatpush1.bf16.msra.mxu0 %v8152_v24  ;;  %v3321_v24 = vld [vmem:[#allocation7 + $0x380] sm:$0xff] }
 0x305   :  { %8345 = vmatpush1.bf16.msra.mxu1 %v8344_v13  ;;  %8155 = vmatprep.subr.bf16.mxu0 %v8154_v34  ;;  %v2096_v54 = vpop.f32.mrb[14].mxu0  ;;  %v2167_v10 = vpop.f32.mrb[14].mxu1  ;;  %v3325_v13 = vld [vmem:[#allocation7 + $0x3a0] sm:$0xff]  ;;  %v3323_v34 = vld [vmem:[#allocation7 + $0x390] sm:$0xff] }
 0x306   :  { %8347 = vmatprep.subr.bf16.mxu1 %v8346_v61  ;;  %v2098_v31 = vpop.f32.mrb[15].mxu0  ;;  %v2169_v1 = vpop.f32.mrb[15].mxu1  ;;  %v3334_v61 = vld [vmem:[#allocation7 + $0x3e8] sm:$0xff]  ;;  %v8172_v12 = vpack.c.bf16 %v3325_v13, %v3321_v24  ;;  %v8364_v14 = vpack.c.bf16 %v3327_v9, %v3323_v34  ;;  %v3364_v34 = vld [vmem:[#allocation7 + $0x4d8] sm:$0xff]  ;;  %v8188_v9 = vpack.c.bf16 %v3357_v42, %v3353_v25  ;;  %v3391_v42 = vld [vmem:[#allocation7 + $0x5b0] sm:$0xff] }
 0x307   :  { %v2173_v50 = vmax.f32 %v2096_v54, %v2098_v31  ;;  %v2174_v35 = vmax.f32 %v2167_v10, %v2169_v1  ;;  %v8174_v40 = vpack.c.bf16 %v3334_v61, %v3330_v3  ;;  %v3331_v54 = vld [vmem:[#allocation7 + $0x3d0] sm:$0xff]  ;;  %v8366_v10 = vpack.c.bf16 %v3336_v62, %v3332_v44  ;;  %v3344_v31 = vld [vmem:[#allocation7 + $0x438] sm:$0xff]  ;;  %v3362_v24 = vld [vmem:[#allocation7 + $0x4c8] sm:$0xff] }
 0x308   :  { %8157 = vmatpush1.bf16.msra.mxu0 %v8156_v16  ;;  %v3329_v16 = vld [vmem:[#allocation7 + $0x3c0] sm:$0xff]  ;;  %v11313_v1 = vld [vmem:[#allocation5] ss:$0 sm:$0xff]  ;;  %v8370_v38 = vpack.c.bf16 %v3344_v31, %v3340_v21  ;;  %v3366_v13 = vld [vmem:[#allocation7 + $0x4e8] sm:$0xff] }
 0x309   :  { %8349 = vmatpush1.bf16.msra.mxu1 %v8348_v53  ;;  %v11311_v2 = vmax.f32 %v2173_v50, %v2174_v35  ;;  %8159 = vmatprep.subr.bf16.mxu0 %v8158_v0  ;;  %v3333_v53 = vld [vmem:[#allocation7 + $0x3e0] sm:$0xff]  ;;  %v3335_v0 = vld [vmem:[#allocation7 + $0x3f0] sm:$0xff]  ;;  %v8178_v50 = vpack.c.bf16 %v3342_v29, %v3338_v59  ;;  %v8190_v61 = vpack.c.bf16 %v3366_v13, %v3362_v24  ;;  %v3400_v24 = vld [vmem:[#allocation7 + $0x5f8] sm:$0xff] }
 0x30a   :  { %8351 = vmatprep.subr.bf16.mxu1 %v8350_v48  ;;  %v8176_v48 = vpack.c.bf16 %v3333_v53, %v3329_v16  ;;  %v8368_v22 = vpack.c.bf16 %v3335_v0, %v3331_v54  ;;  %v3337_v35 = vld [vmem:[#allocation7 + $0x400] sm:$0xff]  ;;  %v3370_v16 = vld [vmem:[#allocation7 + $0x508] sm:$0xff]  ;;  %v3372_v54 = vld [vmem:[#allocation7 + $0x518] sm:$0xff] }
 0x30b   :  { %v8180_v15 = vpack.c.bf16 %v3341_v6, %v3337_v35  ;;  %v3361_v44 = vld [vmem:[#allocation7 + $0x4c0] sm:$0xff]  ;;  %v3374_v53 = vld [vmem:[#allocation7 + $0x528] sm:$0xff]  ;;  %v3380_v35 = vld [vmem:[#allocation7 + $0x558] sm:$0xff] }
 0x30c   :  { %8161 = vmatpush1.bf16.msra.mxu0 %v8160_v8  ;;  %v3339_v8 = vld [vmem:[#allocation7 + $0x410] sm:$0xff]  ;;  %v3365_v62 = vld [vmem:[#allocation7 + $0x4e0] sm:$0xff]  ;;  %v8194_v29 = vpack.c.bf16 %v3374_v53, %v3370_v16  ;;  %v3384_v6 = vld [vmem:[#allocation7 + $0x578] sm:$0xff] }
 0x30d   :  { %8353 = vmatpush1.bf16.msra.mxu1 %v8352_v41  ;;  %8163 = vmatprep.subr.bf16.mxu0 %v8162_v52  ;;  %v3343_v41 = vld [vmem:[#allocation7 + $0x430] sm:$0xff]  ;;  %v1169_v52 = vadd.f32 %v11313_v1, %v11076_v56  ;;  %v8192_v0 = vpack.c.bf16 %v3365_v62, %v3361_v44  ;;  %v3369_v21 = vld [vmem:[#allocation7 + $0x500] sm:$0xff]  ;;  %v3404_v16 = vld [vmem:[#allocation7 + $0x618] sm:$0xff] }
 0x30e   :  { %8355 = vmatprep.subr.bf16.mxu1 %v8354_v18  ;;  %v3348_v18 = vld [vmem:[#allocation7 + $0x458] sm:$0xff]  ;;  %v8372_v58 = vpack.c.bf16 %v3343_v41, %v3339_v8  ;;  %v3373_v31 = vld [vmem:[#allocation7 + $0x520] sm:$0xff]  ;;  %v3395_v44 = vld [vmem:[#allocation7 + $0x5d0] sm:$0xff] }
 0x30f   :  { %v11318_v46 = vmax.f32 %v1169_v52, 0.0  ;;  %v8374_v56 = vpack.c.bf16 %v3352_v33, %v3348_v18  ;;  %v3377_v52 = vld [vmem:[#allocation7 + $0x540] sm:$0xff]  ;;  %v3383_v18 = vld [vmem:[#allocation7 + $0x570] sm:$0xff]  ;;  %v3386_v33 = vld [vmem:[#allocation7 + $0x588] sm:$0xff] }
 0x310   :  { %8165 = vmatpush1.bf16.msra.mxu0 %v8164_v17  ;;  %v8182_v17 = vpack.c.bf16 %v3350_v23, %v3346_v32  ;;  %v3381_v32 = vld [vmem:[#allocation7 + $0x560] sm:$0xff]  ;;  %v3379_v23 = vld [vmem:[#allocation7 + $0x550] sm:$0xff]  ;;  %v3408_v53 = vld [vmem:[#allocation7 + $0x638] sm:$0xff] }
 0x311   :  { %8357 = vmatpush1.bf16.msra.mxu1 %v8356_v47  ;;  %8167 = vmatprep.subr.bf16.mxu0 %v8166_v39  ;;  %v3351_v47 = vld [vmem:[#allocation7 + $0x470] sm:$0xff]  ;;  %v3354_v39 = vld [vmem:[#allocation7 + $0x488] sm:$0xff] }
 0x312   :  { %8359 = vmatprep.subr.bf16.mxu1 %v8358_v60  ;;  %v3360_v60 = vld [vmem:[#allocation7 + $0x4b8] sm:$0xff]  ;;  %v8376_v20 = vpack.c.bf16 %v3351_v47, %v3347_v5  ;;  %v8186_v27 = vpack.c.bf16 %v3358_v63, %v3354_v39  ;;  %v8392_v47 = vpack.c.bf16 %v3383_v18, %v3379_v23  ;;  %v3415_v23 = vld [vmem:[#allocation7 + $0x670] sm:$0xff]  ;;  %v3422_v18 = vld [vmem:[#allocation7 + $0x6a8] sm:$0xff] }
 0x314   :  { %8169 = vmatpush1.bf16.msra.mxu0 %v8168_v36  ;;  %v3355_v36 = vld [vmem:[#allocation7 + $0x490] sm:$0xff] }
 0x315   :  { %8361 = vmatpush1.bf16.msra.mxu1 %v8360_v45  ;;  %8171 = vmatprep.subr.bf16.mxu0 %v8170_v19  ;;  %v8378_v45 = vpack.c.bf16 %v3360_v60, %v3356_v55  ;;  %v3359_v19 = vld [vmem:[#allocation7 + $0x4b0] sm:$0xff]  ;;  %v3385_v55 = vld [vmem:[#allocation7 + $0x580] sm:$0xff] }
 0x316   :  { %8363 = vmatprep.subr.bf16.mxu1 %v8362_v43  ;;  %v3368_v43 = vld [vmem:[#allocation7 + $0x4f8] sm:$0xff]  ;;  %v8380_v3 = vpack.c.bf16 %v3359_v19, %v3355_v36  ;;  %v3389_v60 = vld [vmem:[#allocation7 + $0x5a0] sm:$0xff]  ;;  %v3394_v36 = vld [vmem:[#allocation7 + $0x5c8] sm:$0xff] }
 0x317   :  { %v3396_v19 = vld [vmem:[#allocation7 + $0x5d8] sm:$0xff] }
 0x318   :  { %8173 = vmatpush1.bf16.msra.mxu0 %v8172_v12  ;;  %v3363_v12 = vld [vmem:[#allocation7 + $0x4d0] sm:$0xff]  ;;  %v8398_v62 = vpack.c.bf16 %v3400_v24, %v3396_v19 }
 0x319   :  { %8365 = vmatpush1.bf16.msra.mxu1 %v8364_v14  ;;  %8175 = vmatprep.subr.bf16.mxu0 %v8174_v40  ;;  %v8382_v14 = vpack.c.bf16 %v3368_v43, %v3364_v34  ;;  %v3367_v40 = vld [vmem:[#allocation7 + $0x4f0] sm:$0xff]  ;;  %v8204_v34 = vpack.c.bf16 %v3389_v60, %v3385_v55  ;;  %v3430_v55 = vld [vmem:[#allocation7 + $0x6e8] sm:$0xff]  ;;  %v3428_v60 = vld [vmem:[#allocation7 + $0x6d8] sm:$0xff] }
 0x31a   :  { %8367 = vmatprep.subr.bf16.mxu1 %v8366_v10  ;;  %v3376_v10 = vld [vmem:[#allocation7 + $0x538] sm:$0xff]  ;;  %v8384_v59 = vpack.c.bf16 %v3367_v40, %v3363_v12  ;;  %v3399_v12 = vld [vmem:[#allocation7 + $0x5f0] sm:$0xff]  ;;  %v3406_v40 = vld [vmem:[#allocation7 + $0x628] sm:$0xff] }
 0x31b   :  { %v8386_v49 = vpack.c.bf16 %v3376_v10, %v3372_v54  ;;  %v8400_v10 = vpack.c.bf16 %v3399_v12, %v3395_v44  ;;  %v3431_v24 = vld [vmem:[#allocation7 + $0x6f0] sm:$0xff]  ;;  %v3433_v12 = vld [vmem:[#allocation7 + $0x700] sm:$0xff] }
 0x31c   :  { %8177 = vmatpush1.bf16.msra.mxu0 %v8176_v48  ;;  %v3371_v48 = vld [vmem:[#allocation7 + $0x510] sm:$0xff] }
 0x31d   :  { %8369 = vmatpush1.bf16.msra.mxu1 %v8368_v22  ;;  %8179 = vmatprep.subr.bf16.mxu0 %v8178_v50  ;;  %v3378_v22 = vld [vmem:[#allocation7 + $0x548] sm:$0xff]  ;;  %v8388_v8 = vpack.c.bf16 %v3375_v51, %v3371_v48  ;;  %v3407_v48 = vld [vmem:[#allocation7 + $0x630] sm:$0xff] }
 0x31e   :  { %8371 = vmatprep.subr.bf16.mxu1 %v8370_v38  ;;  %v3382_v50 = vld [vmem:[#allocation7 + $0x568] sm:$0xff]  ;;  %v8196_v38 = vpack.c.bf16 %v3373_v31, %v3369_v21  ;;  %v3403_v21 = vld [vmem:[#allocation7 + $0x610] sm:$0xff]  ;;  %v8402_v31 = vpack.c.bf16 %v3408_v53, %v3404_v16 }
 0x31f   :  { %3658 = vmatmul.mubr.f32.vlgmr.msra.gmra.mrb[24].mxu0 %v409_v57  ;;  %v8198_v41 = vpack.c.bf16 %v3382_v50, %v3378_v22  ;;  %v3414_v51 = vld [vmem:[#allocation7 + $0x668] sm:$0xff]  ;;  %v3412_v22 = vld [vmem:[#allocation7 + $0x658] sm:$0xff]  ;;  %v3439_v53 = vld [vmem:[#allocation7 + $0x730] sm:$0xff] }
 0x320   :  { %3871 = vmatmul.mubr.f32.vlgmr.msra.gmra.mrb[24].mxu1 %v409_v57  ;;  %8181 = vmatpush1.bf16.msra.mxu0 %v8180_v15  ;;  %v8390_v15 = vpack.c.bf16 %v3384_v6, %v3380_v35  ;;  %v3390_v57 = vld [vmem:[#allocation7 + $0x5a8] sm:$0xff]  ;;  %v3416_v50 = vld [vmem:[#allocation7 + $0x678] sm:$0xff]  ;;  %v8404_v6 = vpack.c.bf16 %v3407_v48, %v3403_v21  ;;  %v3441_v48 = vld [vmem:[#allocation7 + $0x740] sm:$0xff] }
 0x321   :  { %3728 = vmatprep.mubr.f32.mxu0 %v11318_v46  ;;  %8373 = vmatpush1.bf16.msra.mxu1 %v8372_v58  ;;  %v3388_v58 = vld [vmem:[#allocation7 + $0x598] sm:$0xff] }
 0x322   :  { %3941 = vmatprep.mubr.f32.mxu1 %v11318_v46  ;;  %8183 = vmatprep.subr.bf16.mxu0 %v8182_v17  ;;  %v8200_v17 = vpack.c.bf16 %v3381_v32, %v3377_v52  ;;  %v8394_v25 = vpack.c.bf16 %v3392_v26, %v3388_v58  ;;  %v3411_v52 = vld [vmem:[#allocation7 + $0x650] sm:$0xff]  ;;  %v8406_v32 = vpack.c.bf16 %v3416_v50, %v3412_v22 }
 0x323   :  { %8375 = vmatprep.subr.bf16.mxu1 %v8374_v56  ;;  %v8202_v56 = vpack.c.bf16 %v3390_v57, %v3386_v33  ;;  %v3420_v33 = vld [vmem:[#allocation7 + $0x698] sm:$0xff]  ;;  %v8408_v26 = vpack.c.bf16 %v3415_v23, %v3411_v52  ;;  %v3447_v50 = vld [vmem:[#allocation7 + $0x770] sm:$0xff]  ;;  %v3449_v23 = vld [vmem:[#allocation7 + $0x780] sm:$0xff] }
 0x324   :  { %8185 = vmatpush1.bf16.msra.mxu0 %v8184_v28  ;;  %v3387_v28 = vld [vmem:[#allocation7 + $0x590] sm:$0xff]  ;;  %v3424_v57 = vld [vmem:[#allocation7 + $0x6b8] sm:$0xff] }
 0x325   :  { %8377 = vmatpush1.bf16.msra.mxu1 %v8376_v20  ;;  %8187 = vmatprep.subr.bf16.mxu0 %v8186_v27  ;;  %v8396_v43 = vpack.c.bf16 %v3391_v42, %v3387_v28  ;;  %v3432_v28 = vld [vmem:[#allocation7 + $0x6f8] sm:$0xff]  ;;  %v3425_v42 = vld [vmem:[#allocation7 + $0x6c0] sm:$0xff] }
 0x326   :  { %8379 = vmatprep.subr.bf16.mxu1 %v8378_v45  ;;  %v3398_v45 = vld [vmem:[#allocation7 + $0x5e8] sm:$0xff]  ;;  %v8414_v19 = vpack.c.bf16 %v3432_v28, %v3428_v60  ;;  %v3463_v28 = vld [vmem:[#allocation7 + $0x7f0] sm:$0xff] }
 0x328   :  { %8189 = vmatpush1.bf16.msra.mxu0 %v8188_v9  ;;  %v8206_v9 = vpack.c.bf16 %v3398_v45, %v3394_v36  ;;  %v3429_v36 = vld [vmem:[#allocation7 + $0x6e0] sm:$0xff]  ;;  %v3427_v45 = vld [vmem:[#allocation7 + $0x6d0] sm:$0xff] }
 0x329   :  { %8381 = vmatpush1.bf16.msra.mxu1 %v8380_v3  ;;  %8191 = vmatprep.subr.bf16.mxu0 %v8190_v61  ;;  %v3393_v3 = vld [vmem:[#allocation7 + $0x5c0] sm:$0xff]  ;;  %v8416_v44 = vpack.c.bf16 %v3431_v24, %v3427_v45 }
 0x32a   :  { %8383 = vmatprep.subr.bf16.mxu1 %v8382_v14  ;;  %v3397_v61 = vld [vmem:[#allocation7 + $0x5e0] sm:$0xff]  ;;  %v3402_v14 = vld [vmem:[#allocation7 + $0x608] sm:$0xff] }
 0x32b   :  { %v8208_v54 = vpack.c.bf16 %v3397_v61, %v3393_v3  ;;  %v3440_v3 = vld [vmem:[#allocation7 + $0x738] sm:$0xff]  ;;  %v8224_v61 = vpack.c.bf16 %v3429_v36, %v3425_v42  ;;  %v3465_v24 = vld [vmem:[#allocation7 + $0x800] sm:$0xff] }
 0x32c   :  { %8193 = vmatpush1.bf16.msra.mxu0 %v8192_v0  ;;  %v8210_v0 = vpack.c.bf16 %v3406_v40, %v3402_v14  ;;  %v3437_v14 = vld [vmem:[#allocation7 + $0x720] sm:$0xff]  ;;  %v3435_v40 = vld [vmem:[#allocation7 + $0x710] sm:$0xff]  ;;  %v3472_v42 = vld [vmem:[#allocation7 + $0x838] sm:$0xff] }
 0x32d   :  { %8385 = vmatpush1.bf16.msra.mxu1 %v8384_v59  ;;  %8195 = vmatprep.subr.bf16.mxu0 %v8194_v29  ;;  %v3401_v59 = vld [vmem:[#allocation7 + $0x600] sm:$0xff]  ;;  %v8420_v21 = vpack.c.bf16 %v3439_v53, %v3435_v40 }
 0x32e   :  { %8387 = vmatprep.subr.bf16.mxu1 %v8386_v49  ;;  %v3405_v29 = vld [vmem:[#allocation7 + $0x620] sm:$0xff]  ;;  %v3410_v49 = vld [vmem:[#allocation7 + $0x648] sm:$0xff] }
 0x32f   :  { %v8212_v35 = vpack.c.bf16 %v3405_v29, %v3401_v59  ;;  %v3448_v59 = vld [vmem:[#allocation7 + $0x778] sm:$0xff]  ;;  %v8228_v29 = vpack.c.bf16 %v3437_v14, %v3433_v12  ;;  %v3474_v12 = vld [vmem:[#allocation7 + $0x848] sm:$0xff] }
 0x330   :  { %8197 = vmatpush1.bf16.msra.mxu0 %v8196_v38  ;;  %v2348_v4 = vpop.f32.mrb[16].mxu0  ;;  %v2419_v5 = vpop.f32.mrb[16].mxu1  ;;  %v8214_v38 = vpack.c.bf16 %v3414_v51, %v3410_v49  ;;  %v3445_v49 = vld [vmem:[#allocation7 + $0x760] sm:$0xff]  ;;  %v3443_v51 = vld [vmem:[#allocation7 + $0x750] sm:$0xff]  ;;  %v3478_v14 = vld [vmem:[#allocation7 + $0x868] sm:$0xff] }
 0x331   :  { %8389 = vmatpush1.bf16.msra.mxu1 %v8388_v8  ;;  %8199 = vmatprep.subr.bf16.mxu0 %v8198_v41  ;;  %v2350_v39 = vpop.f32.mrb[17].mxu0  ;;  %v2421_v63 = vpop.f32.mrb[17].mxu1  ;;  %v3409_v8 = vld [vmem:[#allocation7 + $0x640] sm:$0xff]  ;;  %v8424_v52 = vpack.c.bf16 %v3447_v50, %v3443_v51  ;;  %v3482_v51 = vld [vmem:[#allocation7 + $0x888] sm:$0xff] }
 0x332   :  { %8391 = vmatprep.subr.bf16.mxu1 %v8390_v15  ;;  %v2425_v20 = vmax.f32 %v2348_v4, %v2350_v39  ;;  %v2426_v27 = vmax.f32 %v2419_v5, %v2421_v63  ;;  %v3413_v41 = vld [vmem:[#allocation7 + $0x660] sm:$0xff]  ;;  %v3418_v15 = vld [vmem:[#allocation7 + $0x688] sm:$0xff]  ;;  %v8410_v39 = vpack.c.bf16 %v3424_v57, %v3420_v33  ;;  %v3423_v63 = vld [vmem:[#allocation7 + $0x6b0] sm:$0xff] }
 0x333   :  { %v8216_v58 = vpack.c.bf16 %v3413_v41, %v3409_v8  ;;  %v8218_v4 = vpack.c.bf16 %v3422_v18, %v3418_v15  ;;  %v3417_v5 = vld [vmem:[#allocation7 + $0x680] sm:$0xff]  ;;  %v3456_v8 = vld [vmem:[#allocation7 + $0x7b8] sm:$0xff]  ;;  %v8232_v41 = vpack.c.bf16 %v3445_v49, %v3441_v48  ;;  %v3451_v18 = vld [vmem:[#allocation7 + $0x790] sm:$0xff]  ;;  %v8246_v48 = vpack.c.bf16 %v3478_v14, %v3474_v12 }
 0x334   :  { %8201 = vmatpush1.bf16.msra.mxu0 %v8200_v17  ;;  %v11322_v13 = vmax.f32 %v2425_v20, %v2426_v27  ;;  %v3421_v17 = vld [vmem:[#allocation7 + $0x6a0] sm:$0xff]  ;;  %v3455_v57 = vld [vmem:[#allocation7 + $0x7b0] sm:$0xff] }
 0x335   :  { %8393 = vmatpush1.bf16.msra.mxu1 %v8392_v47  ;;  %8203 = vmatprep.subr.bf16.mxu0 %v8202_v56  ;;  %v3419_v47 = vld [vmem:[#allocation7 + $0x690] sm:$0xff]  ;;  %v3426_v56 = vld [vmem:[#allocation7 + $0x6c8] sm:$0xff]  ;;  %v8220_v20 = vpack.c.bf16 %v3421_v17, %v3417_v5  ;;  %v3453_v15 = vld [vmem:[#allocation7 + $0x7a0] sm:$0xff] }
 0x336   :  { %8395 = vmatprep.subr.bf16.mxu1 %v8394_v25  ;;  %v8412_v27 = vpack.c.bf16 %v3423_v63, %v3419_v47  ;;  %v8222_v25 = vpack.c.bf16 %v3430_v55, %v3426_v56  ;;  %v3464_v5 = vld [vmem:[#allocation7 + $0x7f8] sm:$0xff]  ;;  %v8236_v17 = vpack.c.bf16 %v3453_v15, %v3449_v23  ;;  %v8428_v47 = vpack.c.bf16 %v3455_v57, %v3451_v18  ;;  %v3457_v63 = vld [vmem:[#allocation7 + $0x7c0] sm:$0xff]  ;;  %v3459_v55 = vld [vmem:[#allocation7 + $0x7d0] sm:$0xff] }
 0x337   :  { %v3461_v56 = vld [vmem:[#allocation7 + $0x7e0] sm:$0xff]  ;;  %v8432_v45 = vpack.c.bf16 %v3463_v28, %v3459_v55  ;;  %v3479_v49 = vld [vmem:[#allocation7 + $0x870] sm:$0xff]  ;;  %v3490_v57 = vld [vmem:[#allocation7 + $0x8c8] sm:$0xff] }
 0x338   :  { %8205 = vmatpush1.bf16.msra.mxu0 %v8204_v34  ;;  %v3434_v34 = vld [vmem:[#allocation7 + $0x708] sm:$0xff]  ;;  %v8240_v36 = vpack.c.bf16 %v3461_v56, %v3457_v63  ;;  %v3485_v23 = vld [vmem:[#allocation7 + $0x8a0] sm:$0xff]  ;;  %v3483_v15 = vld [vmem:[#allocation7 + $0x890] sm:$0xff] }
 0x339   :  { %8397 = vmatpush1.bf16.msra.mxu1 %v8396_v43  ;;  %8207 = vmatprep.subr.bf16.mxu0 %v8206_v9  ;;  %v3438_v43 = vld [vmem:[#allocation7 + $0x728] sm:$0xff]  ;;  %v3436_v9 = vld [vmem:[#allocation7 + $0x718] sm:$0xff]  ;;  %v3493_v63 = vld [vmem:[#allocation7 + $0x8e0] sm:$0xff] }
 0x33a   :  { %8399 = vmatprep.subr.bf16.mxu1 %v8398_v62  ;;  %v8226_v62 = vpack.c.bf16 %v3438_v43, %v3434_v34  ;;  %v8418_v16 = vpack.c.bf16 %v3440_v3, %v3436_v9  ;;  %v3469_v34 = vld [vmem:[#allocation7 + $0x820] sm:$0xff]  ;;  %v3467_v9 = vld [vmem:[#allocation7 + $0x810] sm:$0xff]  ;;  %v3498_v28 = vld [vmem:[#allocation7 + $0x908] sm:$0xff] }
 0x33b   :  { %v3471_v3 = vld [vmem:[#allocation7 + $0x830] sm:$0xff]  ;;  %v8244_v53 = vpack.c.bf16 %v3469_v34, %v3465_v24  ;;  %v3501_v24 = vld [vmem:[#allocation7 + $0x920] sm:$0xff] }
 0x33c   :  { %8209 = vmatpush1.bf16.msra.mxu0 %v8208_v54  ;;  %v3442_v54 = vld [vmem:[#allocation7 + $0x748] sm:$0xff]  ;;  %v3491_v56 = vld [vmem:[#allocation7 + $0x8d0] sm:$0xff] }
 0x33d   :  { %8401 = vmatpush1.bf16.msra.mxu1 %v8400_v10  ;;  %8211 = vmatprep.subr.bf16.mxu0 %v8210_v0  ;;  %v3446_v10 = vld [vmem:[#allocation7 + $0x768] sm:$0xff]  ;;  %v3444_v0 = vld [vmem:[#allocation7 + $0x758] sm:$0xff]  ;;  %v3499_v34 = vld [vmem:[#allocation7 + $0x910] sm:$0xff] }
 0x33e   :  { %8403 = vmatprep.subr.bf16.mxu1 %v8402_v31  ;;  %v8230_v31 = vpack.c.bf16 %v3446_v10, %v3442_v54  ;;  %v8422_v22 = vpack.c.bf16 %v3448_v59, %v3444_v0  ;;  %v3476_v54 = vld [vmem:[#allocation7 + $0x858] sm:$0xff]  ;;  %v11327_v0 = vmax.f32 %v11019_v30, 0.0 }
 0x33f   :  { %v3480_v10 = vld [vmem:[#allocation7 + $0x878] sm:$0xff] }
 0x340   :  { %8213 = vmatpush1.bf16.msra.mxu0 %v8212_v35  ;;  %v3450_v35 = vld [vmem:[#allocation7 + $0x788] sm:$0xff]  ;;  %v8438_v30 = vpack.c.bf16 %v3480_v10, %v3476_v54  ;;  %v3507_v54 = vld [vmem:[#allocation7 + $0x950] sm:$0xff] }
 0x341   :  { %8405 = vmatpush1.bf16.msra.mxu1 %v8404_v6  ;;  %8215 = vmatprep.subr.bf16.mxu0 %v8214_v38  ;;  %v3454_v6 = vld [vmem:[#allocation7 + $0x7a8] sm:$0xff]  ;;  %v3452_v38 = vld [vmem:[#allocation7 + $0x798] sm:$0xff] }
 0x342   :  { %8407 = vmatprep.subr.bf16.mxu1 %v8406_v32  ;;  %v8234_v32 = vpack.c.bf16 %v3454_v6, %v3450_v35  ;;  %v8426_v33 = vpack.c.bf16 %v3456_v8, %v3452_v38  ;;  %v3484_v6 = vld [vmem:[#allocation7 + $0x898] sm:$0xff] }
 0x343   :  { %v3488_v38 = vld [vmem:[#allocation7 + $0x8b8] sm:$0xff] }
 0x344   :  { %8217 = vmatpush1.bf16.msra.mxu0 %v8216_v58  ;;  %v3458_v58 = vld [vmem:[#allocation7 + $0x7c8] sm:$0xff]  ;;  %v8442_v18 = vpack.c.bf16 %v3488_v38, %v3484_v6  ;;  %v3519_v38 = vld [vmem:[#allocation7 + $0x9b0] sm:$0xff] }
 0x345   :  { %8409 = vmatpush1.bf16.msra.mxu1 %v8408_v26  ;;  %8219 = vmatprep.subr.bf16.mxu0 %v8218_v4  ;;  %v3462_v26 = vld [vmem:[#allocation7 + $0x7e8] sm:$0xff]  ;;  %v3460_v4 = vld [vmem:[#allocation7 + $0x7d8] sm:$0xff] }
 0x346   :  { %8411 = vmatprep.subr.bf16.mxu1 %v8410_v39  ;;  %v8238_v39 = vpack.c.bf16 %v3462_v26, %v3458_v58  ;;  %v8430_v60 = vpack.c.bf16 %v3464_v5, %v3460_v4  ;;  %v3494_v58 = vld [vmem:[#allocation7 + $0x8e8] sm:$0xff]  ;;  %v3492_v26 = vld [vmem:[#allocation7 + $0x8d8] sm:$0xff] }
 0x347   :  { %v3496_v4 = vld [vmem:[#allocation7 + $0x8f8] sm:$0xff] }
 0x348   :  { %8221 = vmatpush1.bf16.msra.mxu0 %v8220_v20  ;;  %v3466_v20 = vld [vmem:[#allocation7 + $0x808] sm:$0xff]  ;;  %v8446_v55 = vpack.c.bf16 %v3496_v4, %v3492_v26  ;;  %v3527_v4 = vld [vmem:[#allocation7 + $0x9f0] sm:$0xff] }
 0x349   :  { %8413 = vmatpush1.bf16.msra.mxu1 %v8412_v27  ;;  %8223 = vmatprep.subr.bf16.mxu0 %v8222_v25  ;;  %v3470_v27 = vld [vmem:[#allocation7 + $0x828] sm:$0xff]  ;;  %v3468_v25 = vld [vmem:[#allocation7 + $0x818] sm:$0xff] }
 0x34a   :  { %8415 = vmatprep.subr.bf16.mxu1 %v8414_v19  ;;  %v8242_v19 = vpack.c.bf16 %v3470_v27, %v3466_v20  ;;  %v8434_v43 = vpack.c.bf16 %v3472_v42, %v3468_v25  ;;  %v3502_v20 = vld [vmem:[#allocation7 + $0x928] sm:$0xff]  ;;  %v3500_v27 = vld [vmem:[#allocation7 + $0x918] sm:$0xff] }
 0x34b   :  { %v3504_v25 = vld [vmem:[#allocation7 + $0x938] sm:$0xff] }
 0x34c   :  { %8225 = vmatpush1.bf16.msra.mxu0 %v8224_v61  ;;  %v1678_v61 = vadd.f32 %v11313_v1, %v11254_v11  ;;  %v3477_v11 = vld [vmem:[#allocation7 + $0x860] sm:$0xff]  ;;  %v3475_v1 = vld [vmem:[#allocation7 + $0x850] sm:$0xff] }
 0x34d   :  { %8417 = vmatpush1.bf16.msra.mxu1 %v8416_v44  ;;  %8227 = vmatprep.subr.bf16.mxu0 %v8226_v62 }
 0x34e   :  { %8419 = vmatprep.subr.bf16.mxu1 %v8418_v16  ;;  %v11329_v50 = vmax.f32 %v1678_v61, 0.0  ;;  %v3510_v61 = vld [vmem:[#allocation7 + $0x968] sm:$0xff] }
 0x350   :  { %8229 = vmatpush1.bf16.msra.mxu0 %v8228_v29 }
 0x351   :  { %8421 = vmatpush1.bf16.msra.mxu1 %v8420_v21  ;;  %8231 = vmatprep.subr.bf16.mxu0 %v8230_v31  ;;  %v8436_v21 = vpack.c.bf16 %v3471_v3, %v3467_v9  ;;  %v3473_v31 = vld [vmem:[#allocation7 + $0x840] sm:$0xff]  ;;  %v3503_v9 = vld [vmem:[#allocation7 + $0x930] sm:$0xff]  ;;  %v3506_v3 = vld [vmem:[#allocation7 + $0x948] sm:$0xff] }
 0x352   :  { %8423 = vmatprep.subr.bf16.mxu1 %v8422_v22  ;;  %v3486_v22 = vld [vmem:[#allocation7 + $0x8a8] sm:$0xff]  ;;  %v8248_v8 = vpack.c.bf16 %v3477_v11, %v3473_v31  ;;  %v8452_v14 = vpack.c.bf16 %v3503_v9, %v3499_v34  ;;  %v3516_v31 = vld [vmem:[#allocation7 + $0x998] sm:$0xff]  ;;  %v3537_v9 = vld [vmem:[#allocation7 + $0xa40] sm:$0xff] }
 0x353   :  { %v3520_v11 = vld [vmem:[#allocation7 + $0x9b8] sm:$0xff] }
 0x354   :  { %8233 = vmatpush1.bf16.msra.mxu0 %v8232_v41  ;;  %v8440_v41 = vpack.c.bf16 %v3479_v49, %v3475_v1  ;;  %v8458_v6 = vpack.c.bf16 %v3520_v11, %v3516_v31  ;;  %v3551_v11 = vld [vmem:[#allocation7 + $0xab0] sm:$0xff] }
 0x355   :  { %8425 = vmatpush1.bf16.msra.mxu1 %v8424_v52  ;;  %8235 = vmatprep.subr.bf16.mxu0 %v8234_v32  ;;  %v8250_v52 = vpack.c.bf16 %v3486_v22, %v3482_v51  ;;  %v3481_v32 = vld [vmem:[#allocation7 + $0x880] sm:$0xff] }
 0x356   :  { %8427 = vmatprep.subr.bf16.mxu1 %v8426_v33  ;;  %v3487_v33 = vld [vmem:[#allocation7 + $0x8b0] sm:$0xff]  ;;  %v8252_v5 = vpack.c.bf16 %v3485_v23, %v3481_v32  ;;  %v3513_v51 = vld [vmem:[#allocation7 + $0x980] sm:$0xff]  ;;  %v3528_v32 = vld [vmem:[#allocation7 + $0x9f8] sm:$0xff] }
 0x357   :  { %v3517_v22 = vld [vmem:[#allocation7 + $0x9a0] sm:$0xff] }
 0x358   :  { %8237 = vmatpush1.bf16.msra.mxu0 %v8236_v17  ;;  %v8444_v17 = vpack.c.bf16 %v3487_v33, %v3483_v15  ;;  %v8268_v23 = vpack.c.bf16 %v3517_v22, %v3513_v51  ;;  %v3521_v33 = vld [vmem:[#allocation7 + $0x9c0] sm:$0xff]  ;;  %v3560_v51 = vld [vmem:[#allocation7 + $0xaf8] sm:$0xff] }
 0x359   :  { %8429 = vmatpush1.bf16.msra.mxu1 %v8428_v47  ;;  %8239 = vmatprep.subr.bf16.mxu0 %v8238_v39  ;;  %v8254_v47 = vpack.c.bf16 %v3494_v58, %v3490_v57  ;;  %v3489_v39 = vld [vmem:[#allocation7 + $0x8c0] sm:$0xff]  ;;  %v3523_v58 = vld [vmem:[#allocation7 + $0x9d0] sm:$0xff] }
 0x35a   :  { %8431 = vmatprep.subr.bf16.mxu1 %v8430_v60  ;;  %v3495_v60 = vld [vmem:[#allocation7 + $0x8f0] sm:$0xff]  ;;  %v8256_v42 = vpack.c.bf16 %v3493_v63, %v3489_v39  ;;  %v3525_v57 = vld [vmem:[#allocation7 + $0x9e0] sm:$0xff]  ;;  %v3536_v39 = vld [vmem:[#allocation7 + $0xa38] sm:$0xff] }
 0x35b   :  { %v2605_v44 = vpop.f32.mrb[18].mxu0  ;;  %v2676_v62 = vpop.f32.mrb[18].mxu1  ;;  %v8272_v63 = vpack.c.bf16 %v3525_v57, %v3521_v33  ;;  %v3566_v33 = vld [vmem:[#allocation7 + $0xb28] sm:$0xff] }
 0x35c   :  { %8241 = vmatpush1.bf16.msra.mxu0 %v8240_v36  ;;  %v2607_v40 = vpop.f32.mrb[19].mxu0  ;;  %v2678_v16 = vpop.f32.mrb[19].mxu1  ;;  %v8448_v36 = vpack.c.bf16 %v3495_v60, %v3491_v56  ;;  %v8464_v56 = vpack.c.bf16 %v3527_v4, %v3523_v58  ;;  %v3529_v60 = vld [vmem:[#allocation7 + $0xa00] sm:$0xff]  ;;  %v3568_v4 = vld [vmem:[#allocation7 + $0xb38] sm:$0xff] }
 0x35d   :  { %8433 = vmatpush1.bf16.msra.mxu1 %v8432_v45  ;;  %v2682_v59 = vmax.f32 %v2605_v44, %v2607_v40  ;;  %v2683_v29 = vmax.f32 %v2676_v62, %v2678_v16  ;;  %8243 = vmatprep.subr.bf16.mxu0 %v8242_v19  ;;  %v8258_v45 = vpack.c.bf16 %v3502_v20, %v3498_v28  ;;  %v3497_v19 = vld [vmem:[#allocation7 + $0x900] sm:$0xff]  ;;  %v3508_v44 = vld [vmem:[#allocation7 + $0x958] sm:$0xff]  ;;  %v3531_v20 = vld [vmem:[#allocation7 + $0xa10] sm:$0xff] }
 0x35e   :  { %8435 = vmatprep.subr.bf16.mxu1 %v8434_v43  ;;  %v8450_v43 = vpack.c.bf16 %v3504_v25, %v3500_v27  ;;  %v3512_v62 = vld [vmem:[#allocation7 + $0x978] sm:$0xff]  ;;  %v8260_v12 = vpack.c.bf16 %v3501_v24, %v3497_v19  ;;  %v8262_v40 = vpack.c.bf16 %v3510_v61, %v3506_v3  ;;  %v3505_v16 = vld [vmem:[#allocation7 + $0x940] sm:$0xff]  ;;  %v3535_v25 = vld [vmem:[#allocation7 + $0xa30] sm:$0xff] }
 0x35f   :  { %v11331_v35 = vmax.f32 %v2682_v59, %v2683_v29  ;;  %3729 = vmatmul.mubr.f32.vlgmr.msra.gmra.mrb[24].mxu0 %v11327_v0  ;;  %v8454_v10 = vpack.c.bf16 %v3512_v62, %v3508_v44  ;;  %v3511_v59 = vld [vmem:[#allocation7 + $0x970] sm:$0xff]  ;;  %v3514_v29 = vld [vmem:[#allocation7 + $0x988] sm:$0xff]  ;;  %v3533_v28 = vld [vmem:[#allocation7 + $0xa20] sm:$0xff]  ;;  %v8468_v34 = vpack.c.bf16 %v3535_v25, %v3531_v20 }
 0x360   :  { %3942 = vmatmul.mubr.f32.vlgmr.msra.gmra.mrb[24].mxu1 %v11327_v0  ;;  %8245 = vmatpush1.bf16.msra.mxu0 %v8244_v53  ;;  %v3509_v53 = vld [vmem:[#allocation7 + $0x960] sm:$0xff]  ;;  %v3544_v19 = vld [vmem:[#allocation7 + $0xa78] sm:$0xff]  ;;  %v8276_v24 = vpack.c.bf16 %v3533_v28, %v3529_v60  ;;  %v3539_v61 = vld [vmem:[#allocation7 + $0xa50] sm:$0xff] }
 0x361   :  { %3799 = vmatprep.mubr.f32.mxu0 %v11329_v50  ;;  %8437 = vmatpush1.bf16.msra.mxu1 %v8436_v21  ;;  %v3518_v21 = vld [vmem:[#allocation7 + $0x9a8] sm:$0xff]  ;;  %v8264_v1 = vpack.c.bf16 %v3509_v53, %v3505_v16  ;;  %v3541_v3 = vld [vmem:[#allocation7 + $0xa60] sm:$0xff]  ;;  %v3543_v62 = vld [vmem:[#allocation7 + $0xa70] sm:$0xff] }
 0x362   :  { %4012 = vmatprep.mubr.f32.mxu1 %v11329_v50  ;;  %8247 = vmatprep.subr.bf16.mxu0 %v8246_v48  ;;  %v8456_v48 = vpack.c.bf16 %v3511_v59, %v3507_v54  ;;  %v8266_v49 = vpack.c.bf16 %v3518_v21, %v3514_v29  ;;  %v3552_v16 = vld [vmem:[#allocation7 + $0xab8] sm:$0xff]  ;;  %v8280_v53 = vpack.c.bf16 %v3541_v3, %v3537_v9  ;;  %v3545_v59 = vld [vmem:[#allocation7 + $0xa80] sm:$0xff]  ;;  %v3547_v21 = vld [vmem:[#allocation7 + $0xa90] sm:$0xff] }
 0x363   :  { %8439 = vmatprep.subr.bf16.mxu1 %v8438_v30  ;;  %v3515_v30 = vld [vmem:[#allocation7 + $0x990] sm:$0xff]  ;;  %v8472_v54 = vpack.c.bf16 %v3543_v62, %v3539_v61  ;;  %v3549_v29 = vld [vmem:[#allocation7 + $0xaa0] sm:$0xff]  ;;  %v3570_v25 = vld [vmem:[#allocation7 + $0xb48] sm:$0xff] }
 0x364   :  { %8249 = vmatpush1.bf16.msra.mxu0 %v8248_v8  ;;  %v3522_v8 = vld [vmem:[#allocation7 + $0x9c8] sm:$0xff]  ;;  %v8460_v15 = vpack.c.bf16 %v3519_v38, %v3515_v30  ;;  %v8284_v22 = vpack.c.bf16 %v3549_v29, %v3545_v59  ;;  %v8476_v30 = vpack.c.bf16 %v3551_v11, %v3547_v21  ;;  %v3553_v38 = vld [vmem:[#allocation7 + $0xac0] sm:$0xff]  ;;  %v3563_v60 = vld [vmem:[#allocation7 + $0xb10] sm:$0xff] }
 0x365   :  { %8441 = vmatpush1.bf16.msra.mxu1 %v8440_v41  ;;  %8251 = vmatprep.subr.bf16.mxu0 %v8250_v52  ;;  %v3526_v41 = vld [vmem:[#allocation7 + $0x9e8] sm:$0xff]  ;;  %v3524_v52 = vld [vmem:[#allocation7 + $0x9d8] sm:$0xff]  ;;  %v3569_v3 = vld [vmem:[#allocation7 + $0xb40] sm:$0xff] }
 0x366   :  { %8443 = vmatprep.subr.bf16.mxu1 %v8442_v18  ;;  %v8270_v18 = vpack.c.bf16 %v3526_v41, %v3522_v8  ;;  %v8462_v26 = vpack.c.bf16 %v3528_v32, %v3524_v52  ;;  %v3557_v8 = vld [vmem:[#allocation7 + $0xae0] sm:$0xff]  ;;  %v3555_v41 = vld [vmem:[#allocation7 + $0xad0] sm:$0xff] }
 0x367   :  { %v3573_v61 = vld [vmem:[#allocation7 + $0xb60] sm:$0xff] }
 0x368   :  { %8253 = vmatpush1.bf16.msra.mxu0 %v8252_v5  ;;  %v3530_v5 = vld [vmem:[#allocation7 + $0xa08] sm:$0xff]  ;;  %v3577_v29 = vld [vmem:[#allocation7 + $0xb80] sm:$0xff] }
 0x369   :  { %8445 = vmatpush1.bf16.msra.mxu1 %v8444_v17  ;;  %8255 = vmatprep.subr.bf16.mxu0 %v8254_v47  ;;  %v3534_v17 = vld [vmem:[#allocation7 + $0xa28] sm:$0xff]  ;;  %v3532_v47 = vld [vmem:[#allocation7 + $0xa18] sm:$0xff]  ;;  %v3581_v21 = vld [vmem:[#allocation7 + $0xba0] sm:$0xff] }
 0x36a   :  { %8447 = vmatprep.subr.bf16.mxu1 %v8446_v55  ;;  %v8274_v55 = vpack.c.bf16 %v3534_v17, %v3530_v5  ;;  %v8466_v27 = vpack.c.bf16 %v3536_v39, %v3532_v47  ;;  %v8288_v47 = vpack.c.bf16 %v3557_v8, %v3553_v38  ;;  %v3585_v8 = vld [vmem:[#allocation7 + $0xbc0] sm:$0xff] }
 0x36c   :  { %8257 = vmatpush1.bf16.msra.mxu0 %v8256_v42  ;;  %v3538_v42 = vld [vmem:[#allocation7 + $0xa48] sm:$0xff] }
 0x36d   :  { %8449 = vmatpush1.bf16.msra.mxu1 %v8448_v36  ;;  %8259 = vmatprep.subr.bf16.mxu0 %v8258_v45  ;;  %v3542_v36 = vld [vmem:[#allocation7 + $0xa68] sm:$0xff]  ;;  %v3540_v45 = vld [vmem:[#allocation7 + $0xa58] sm:$0xff] }
 0x36e   :  { %8451 = vmatprep.subr.bf16.mxu1 %v8450_v43  ;;  %v8278_v43 = vpack.c.bf16 %v3542_v36, %v3538_v42  ;;  %v8470_v44 = vpack.c.bf16 %v3544_v19, %v3540_v45  ;;  %v3574_v42 = vld [vmem:[#allocation7 + $0xb68] sm:$0xff]  ;;  %v6966_v36 = vld [vmem:[#allocation5] ss:$0 sm:$0xff] }
 0x36f   :  { %v3572_v45 = vld [vmem:[#allocation7 + $0xb58] sm:$0xff]  ;;  %v8294_v9 = vpack.c.bf16 %v3574_v42, %v3570_v25 }
 0x370   :  { %8261 = vmatpush1.bf16.msra.mxu0 %v8260_v12  ;;  %v3546_v12 = vld [vmem:[#allocation7 + $0xa88] sm:$0xff]  ;;  %v3576_v19 = vld [vmem:[#allocation7 + $0xb78] sm:$0xff] }
 0x371   :  { %8453 = vmatpush1.bf16.msra.mxu1 %v8452_v14  ;;  %8263 = vmatprep.subr.bf16.mxu0 %v8262_v40  ;;  %v3550_v14 = vld [vmem:[#allocation7 + $0xaa8] sm:$0xff]  ;;  %v3548_v40 = vld [vmem:[#allocation7 + $0xa98] sm:$0xff]  ;;  %v8486_v62 = vpack.c.bf16 %v3576_v19, %v3572_v45  ;;  %v4050_v45 = vld [vmem:[#allocation7 + $0x60] sm:$0xff] }
 0x372   :  { %8455 = vmatprep.subr.bf16.mxu1 %v8454_v10  ;;  %v8282_v10 = vpack.c.bf16 %v3550_v14, %v3546_v12  ;;  %v8474_v31 = vpack.c.bf16 %v3552_v16, %v3548_v40  ;;  %v3575_v12 = vld [vmem:[#allocation7 + $0xb70] sm:$0xff]  ;;  %v3578_v14 = vld [vmem:[#allocation7 + $0xb88] sm:$0xff]  ;;  %v3580_v16 = vld [vmem:[#allocation7 + $0xb98] sm:$0xff] }
 0x373   :  { %v3582_v40 = vld [vmem:[#allocation7 + $0xba8] sm:$0xff]  ;;  %v4053_v25 = vld [vmem:[#allocation7 + $0x78] sm:$0xff]  ;;  %v4048_v19 = vld [vmem:[#allocation7 + $0x50] sm:$0xff] }
 0x374   :  { %8265 = vmatpush1.bf16.msra.mxu0 %v8264_v1  ;;  %v3554_v1 = vld [vmem:[#allocation7 + $0xac8] sm:$0xff]  ;;  %v8298_v59 = vpack.c.bf16 %v3582_v40, %v3578_v14 }
 0x375   :  { %8457 = vmatpush1.bf16.msra.mxu1 %v8456_v48  ;;  %8267 = vmatprep.subr.bf16.mxu0 %v8266_v49  ;;  %v3558_v48 = vld [vmem:[#allocation7 + $0xae8] sm:$0xff]  ;;  %v3556_v49 = vld [vmem:[#allocation7 + $0xad8] sm:$0xff] }
 0x376   :  { %8459 = vmatprep.subr.bf16.mxu1 %v8458_v6  ;;  %v8286_v6 = vpack.c.bf16 %v3558_v48, %v3554_v1  ;;  %v3583_v1 = vld [vmem:[#allocation7 + $0xbb0] sm:$0xff]  ;;  %v3586_v48 = vld [vmem:[#allocation7 + $0xbc8] sm:$0xff] }
 0x378   :  { %8269 = vmatpush1.bf16.msra.mxu0 %v8268_v23  ;;  %v8478_v23 = vpack.c.bf16 %v3560_v51, %v3556_v49  ;;  %v3590_v49 = vld [vmem:[#allocation7 + $0xbe8] sm:$0xff]  ;;  %v3588_v51 = vld [vmem:[#allocation7 + $0xbd8] sm:$0xff] }
 0x379   :  { %8461 = vmatpush1.bf16.msra.mxu1 %v8460_v15  ;;  %8271 = vmatprep.subr.bf16.mxu0 %v8270_v18  ;;  %v3559_v15 = vld [vmem:[#allocation7 + $0xaf0] sm:$0xff]  ;;  %v3562_v18 = vld [vmem:[#allocation7 + $0xb08] sm:$0xff]  ;;  %v8302_v38 = vpack.c.bf16 %v3590_v49, %v3586_v48 }
 0x37a   :  { %8463 = vmatprep.subr.bf16.mxu1 %v8462_v26  ;;  %v3564_v26 = vld [vmem:[#allocation7 + $0xb18] sm:$0xff]  ;;  %v8480_v39 = vpack.c.bf16 %v3559_v15, %v3555_v41  ;;  %v3589_v41 = vld [vmem:[#allocation7 + $0xbe0] sm:$0xff]  ;;  %v4039_v15 = vld [vmem:[#allocation7 + $0x8] sm:$0xff] }
 0x37b   :  { %v8482_v20 = vpack.c.bf16 %v3568_v4, %v3564_v26  ;;  %v9821_v26 = vld [vmem:[#allocation5] ss:$0 sm:$0xff] }
 0x37c   :  { %8273 = vmatpush1.bf16.msra.mxu0 %v8272_v63  ;;  %v8290_v63 = vpack.c.bf16 %v3566_v33, %v3562_v18  ;;  %v4043_v18 = vld [vmem:[#allocation7 + $0x28] sm:$0xff]  ;;  %v4041_v33 = vld [vmem:[#allocation7 + $0x18] sm:$0xff]  ;;  %v1426_v4 = vadd.f32 %v9821_v26, %v11206_v7  ;;  %v4076_v26 = vld [vmem:[#allocation7 + $0x130] sm:$0xff] }
 0x37d   :  { %8465 = vmatpush1.bf16.msra.mxu1 %v8464_v56  ;;  %8275 = vmatprep.subr.bf16.mxu0 %v8274_v55  ;;  %v3561_v56 = vld [vmem:[#allocation7 + $0xb00] sm:$0xff] }
 0x37e   :  { %8467 = vmatprep.subr.bf16.mxu1 %v8466_v27  ;;  %v3565_v55 = vld [vmem:[#allocation7 + $0xb20] sm:$0xff]  ;;  %v3567_v27 = vld [vmem:[#allocation7 + $0xb30] sm:$0xff]  ;;  %v11340_v42 = vmax.f32 %v1426_v4, 0.0  ;;  %v4079_v4 = vld [vmem:[#allocation7 + $0x148] sm:$0xff] }
 0x380   :  { %8277 = vmatpush1.bf16.msra.mxu0 %v8276_v24 }
 0x381   :  { %8469 = vmatpush1.bf16.msra.mxu1 %v8468_v34  ;;  %8279 = vmatprep.subr.bf16.mxu0 %v8278_v43  ;;  %v8292_v34 = vpack.c.bf16 %v3565_v55, %v3561_v56  ;;  %v8484_v43 = vpack.c.bf16 %v3567_v27, %v3563_v60  ;;  %v4040_v56 = vld [vmem:[#allocation7 + $0x10] sm:$0xff]  ;;  %v4047_v60 = vld [vmem:[#allocation7 + $0x48] sm:$0xff]  ;;  %v4049_v27 = vld [vmem:[#allocation7 + $0x58] sm:$0xff] }
 0x382   :  { %8471 = vmatprep.subr.bf16.mxu1 %v8470_v44  ;;  %v3571_v44 = vld [vmem:[#allocation7 + $0xb50] sm:$0xff] }
 0x383   :  { %v4044_v55 = vld [vmem:[#allocation7 + $0x30] sm:$0xff] }
 0x384   :  { %8281 = vmatpush1.bf16.msra.mxu0 %v8280_v53  ;;  %v3584_v53 = vld [vmem:[#allocation7 + $0xbb8] sm:$0xff]  ;;  %v8692_v7 = vpack.c.bf16 %v4044_v55, %v4040_v56  ;;  %v4078_v55 = vld [vmem:[#allocation7 + $0x140] sm:$0xff] }
 0x385   :  { %8473 = vmatpush1.bf16.msra.mxu1 %v8472_v54  ;;  %8283 = vmatprep.subr.bf16.mxu0 %v8282_v10  ;;  %v8296_v54 = vpack.c.bf16 %v3573_v61, %v3569_v3  ;;  %v8488_v10 = vpack.c.bf16 %v3575_v12, %v3571_v44  ;;  %v8490_v11 = vpack.c.bf16 %v3584_v53, %v3580_v16  ;;  %v4059_v3 = vld [vmem:[#allocation7 + $0xa8] sm:$0xff]  ;;  %v4057_v44 = vld [vmem:[#allocation7 + $0x98] sm:$0xff]  ;;  %v4054_v16 = vld [vmem:[#allocation7 + $0x80] sm:$0xff] }
 0x386   :  { %8475 = vmatprep.subr.bf16.mxu1 %v8474_v31  ;;  %v2857_v52 = vpop.f32.mrb[20].mxu0  ;;  %v2928_v32 = vpop.f32.mrb[20].mxu1  ;;  %v3579_v31 = vld [vmem:[#allocation7 + $0xb90] sm:$0xff]  ;;  %v8694_v61 = vpack.c.bf16 %v4053_v25, %v4049_v27  ;;  %v4058_v53 = vld [vmem:[#allocation7 + $0xa0] sm:$0xff]  ;;  %v4087_v25 = vld [vmem:[#allocation7 + $0x188] sm:$0xff] }
 0x387   :  { %v2859_v57 = vpop.f32.mrb[21].mxu0  ;;  %v2930_v58 = vpop.f32.mrb[21].mxu1  ;;  %v4084_v27 = vld [vmem:[#allocation7 + $0x170] sm:$0xff] }
 0x388   :  { %8285 = vmatpush1.bf16.msra.mxu0 %v8284_v22  ;;  %v2934_v5 = vmax.f32 %v2857_v52, %v2859_v57  ;;  %v2935_v17 = vmax.f32 %v2928_v32, %v2930_v58  ;;  %v3592_v22 = vld [vmem:[#allocation7 + $0xbf8] sm:$0xff]  ;;  %v3587_v52 = vld [vmem:[#allocation7 + $0xbd0] sm:$0xff]  ;;  %v8304_v58 = vpack.c.bf16 %v3589_v41, %v3585_v8  ;;  %v4075_v8 = vld [vmem:[#allocation7 + $0x128] sm:$0xff] }
 0x389   :  { %8477 = vmatpush1.bf16.msra.mxu1 %v8476_v30  ;;  %8287 = vmatprep.subr.bf16.mxu0 %v8286_v6  ;;  %v8300_v30 = vpack.c.bf16 %v3581_v21, %v3577_v29  ;;  %v8492_v6 = vpack.c.bf16 %v3583_v1, %v3579_v31  ;;  %v8494_v32 = vpack.c.bf16 %v3592_v22, %v3588_v51  ;;  %v4045_v57 = vld [vmem:[#allocation7 + $0x38] sm:$0xff]  ;;  %v4063_v29 = vld [vmem:[#allocation7 + $0xc8] sm:$0xff]  ;;  %v4062_v51 = vld [vmem:[#allocation7 + $0xc0] sm:$0xff] }
 0x38a   :  { %v2936_v28 = vmax.f32 %v2934_v5, %v2935_v17  ;;  %8479 = vmatprep.subr.bf16.mxu1 %v8478_v23  ;;  %v3591_v23 = vld [vmem:[#allocation7 + $0xbf0] sm:$0xff]  ;;  %v8498_v17 = vpack.c.bf16 %v4043_v18, %v4039_v15  ;;  %v4067_v21 = vld [vmem:[#allocation7 + $0xe8] sm:$0xff]  ;;  %v4065_v31 = vld [vmem:[#allocation7 + $0xd8] sm:$0xff]  ;;  %v8508_v1 = vpack.c.bf16 %v4058_v53, %v4054_v16 }
 0x38b   :  { %v8496_v5 = vpack.c.bf16 %v3591_v23, %v3587_v52  ;;  %v8510_v49 = vpack.c.bf16 %v4067_v21, %v4063_v29  ;;  %v4066_v22 = vld [vmem:[#allocation7 + $0xe0] sm:$0xff]  ;;  %v4073_v41 = vld [vmem:[#allocation7 + $0x118] sm:$0xff]  ;;  %v4092_v16 = vld [vmem:[#allocation7 + $0x1b0] sm:$0xff] }
 0x38c   :  { %v11337_v24 = vadd.f32 %v6966_v36, %v2936_v28  ;;  %8289 = vmatpush1.bf16.msra.mxu0 %v8288_v47  ;;  %v4038_v47 = vld [vmem:[#allocation7] sm:$0xff]  ;;  %v4051_v28 = vld [vmem:[#allocation7 + $0x68] sm:$0xff]  ;;  %v4077_v52 = vld [vmem:[#allocation7 + $0x138] sm:$0xff] }
 0x38d   :  { %8481 = vmatpush1.bf16.msra.mxu1 %v8480_v39  ;;  %8291 = vmatprep.subr.bf16.mxu0 %v8290_v63  ;;  %v4042_v39 = vld [vmem:[#allocation7 + $0x20] sm:$0xff]  ;;  %v8690_v63 = vpack.c.bf16 %v4045_v57, %v4041_v33  ;;  %v4072_v57 = vld [vmem:[#allocation7 + $0x110] sm:$0xff]  ;;  %v4095_v53 = vld [vmem:[#allocation7 + $0x1c8] sm:$0xff] }
 0x38e   :  { %8483 = vmatprep.subr.bf16.mxu1 %v8482_v20  ;;  %v8500_v20 = vpack.c.bf16 %v4042_v39, %v4038_v47  ;;  %v4046_v36 = vld [vmem:[#allocation7 + $0x40] sm:$0xff]  ;;  %v4085_v47 = vld [vmem:[#allocation7 + $0x178] sm:$0xff] }
 0x38f   :  { %v8504_v12 = vpack.c.bf16 %v4050_v45, %v4046_v36  ;;  %v4070_v18 = vld [vmem:[#allocation7 + $0x100] sm:$0xff]  ;;  %v4089_v36 = vld [vmem:[#allocation7 + $0x198] sm:$0xff] }
 0x390   :  { %8293 = vmatpush1.bf16.msra.mxu0 %v8292_v34  ;;  %v8502_v34 = vpack.c.bf16 %v4051_v28, %v4047_v60  ;;  %v4074_v33 = vld [vmem:[#allocation7 + $0x120] sm:$0xff]  ;;  %v4080_v28 = vld [vmem:[#allocation7 + $0x150] sm:$0xff]  ;;  %v4093_v45 = vld [vmem:[#allocation7 + $0x1b8] sm:$0xff] }
 0x391   :  { %8485 = vmatpush1.bf16.msra.mxu1 %v8484_v43  ;;  %8295 = vmatprep.subr.bf16.mxu0 %v8294_v9  ;;  %v4052_v43 = vld [vmem:[#allocation7 + $0x70] sm:$0xff]  ;;  %v4055_v9 = vld [vmem:[#allocation7 + $0x88] sm:$0xff]  ;;  %v8516_v39 = vpack.c.bf16 %v4074_v33, %v4070_v18  ;;  %v4082_v60 = vld [vmem:[#allocation7 + $0x160] sm:$0xff] }
 0x392   :  { %8487 = vmatprep.subr.bf16.mxu1 %v8486_v62  ;;  %v4061_v62 = vld [vmem:[#allocation7 + $0xb8] sm:$0xff]  ;;  %v8696_v14 = vpack.c.bf16 %v4052_v43, %v4048_v19  ;;  %v8506_v40 = vpack.c.bf16 %v4059_v3, %v4055_v9  ;;  %v8520_v19 = vpack.c.bf16 %v4082_v60, %v4078_v55  ;;  %v8712_v9 = vpack.c.bf16 %v4084_v27, %v4080_v28  ;;  %v4106_v18 = vld [vmem:[#allocation7 + $0x220] sm:$0xff]  ;;  %v4104_v33 = vld [vmem:[#allocation7 + $0x210] sm:$0xff] }
 0x393   :  { %v4097_v29 = vld [vmem:[#allocation7 + $0x1d8] sm:$0xff]  ;;  %v4114_v55 = vld [vmem:[#allocation7 + $0x260] sm:$0xff]  ;;  %v4112_v60 = vld [vmem:[#allocation7 + $0x250] sm:$0xff] }
 0x394   :  { %8297 = vmatpush1.bf16.msra.mxu0 %v8296_v54  ;;  %v4056_v54 = vld [vmem:[#allocation7 + $0x90] sm:$0xff]  ;;  %v4101_v21 = vld [vmem:[#allocation7 + $0x1f8] sm:$0xff]  ;;  %v4119_v27 = vld [vmem:[#allocation7 + $0x288] sm:$0xff] }
 0x395   :  { %8489 = vmatpush1.bf16.msra.mxu1 %v8488_v10  ;;  %8299 = vmatprep.subr.bf16.mxu0 %v8298_v59  ;;  %v8698_v10 = vpack.c.bf16 %v4061_v62, %v4057_v44  ;;  %v4060_v59 = vld [vmem:[#allocation7 + $0xb0] sm:$0xff]  ;;  %v4090_v44 = vld [vmem:[#allocation7 + $0x1a0] sm:$0xff] }
 0x396   :  { %8491 = vmatprep.subr.bf16.mxu1 %v8490_v11  ;;  %v4069_v11 = vld [vmem:[#allocation7 + $0xf8] sm:$0xff]  ;;  %v8700_v48 = vpack.c.bf16 %v4060_v59, %v4056_v54  ;;  %v4088_v62 = vld [vmem:[#allocation7 + $0x190] sm:$0xff]  ;;  %v4099_v54 = vld [vmem:[#allocation7 + $0x1e8] sm:$0xff] }
 0x398   :  { %8301 = vmatpush1.bf16.msra.mxu0 %v8300_v30  ;;  %v4064_v30 = vld [vmem:[#allocation7 + $0xd0] sm:$0xff] }
 0x399   :  { %8493 = vmatpush1.bf16.msra.mxu1 %v8492_v6  ;;  %8303 = vmatprep.subr.bf16.mxu0 %v8302_v38  ;;  %v8702_v6 = vpack.c.bf16 %v4069_v11, %v4065_v31  ;;  %v4071_v38 = vld [vmem:[#allocation7 + $0x108] sm:$0xff] }
 0x39a   :  { %8495 = vmatprep.subr.bf16.mxu1 %v8494_v32  ;;  %v8512_v32 = vpack.c.bf16 %v4066_v22, %v4062_v51  ;;  %v8514_v15 = vpack.c.bf16 %v4075_v8, %v4071_v38  ;;  %v4098_v51 = vld [vmem:[#allocation7 + $0x1e0] sm:$0xff]  ;;  %v4096_v22 = vld [vmem:[#allocation7 + $0x1d0] sm:$0xff]  ;;  %v4107_v38 = vld [vmem:[#allocation7 + $0x228] sm:$0xff] }
 0x39b   :  { %v4105_v8 = vld [vmem:[#allocation7 + $0x218] sm:$0xff] }
 0x39c   :  { %8305 = vmatpush1.bf16.msra.mxu0 %v8304_v58  ;;  %v8706_v58 = vpack.c.bf16 %v4077_v52, %v4073_v41  ;;  %v4109_v41 = vld [vmem:[#allocation7 + $0x238] sm:$0xff] }
 0x39d   :  { %8497 = vmatpush1.bf16.msra.mxu1 %v8496_v5  ;;  %8499 = vmatprep.subr.bf16.mxu0 %v8498_v17  ;;  %v4083_v5 = vld [vmem:[#allocation7 + $0x168] sm:$0xff]  ;;  %v4081_v17 = vld [vmem:[#allocation7 + $0x158] sm:$0xff] }
 0x39e   :  { %8691 = vmatprep.subr.bf16.mxu1 %v8690_v63  ;;  %v8708_v63 = vpack.c.bf16 %v4076_v26, %v4072_v57  ;;  %v8518_v56 = vpack.c.bf16 %v4083_v5, %v4079_v4  ;;  %v8722_v57 = vpack.c.bf16 %v4109_v41, %v4105_v8  ;;  %v4111_v26 = vld [vmem:[#allocation7 + $0x248] sm:$0xff]  ;;  %v4113_v5 = vld [vmem:[#allocation7 + $0x258] sm:$0xff]  ;;  %v4136_v8 = vld [vmem:[#allocation7 + $0x310] sm:$0xff] }
 0x39f   :  { %3800 = vmatmul.mubr.f32.vlgmr.msra.gmra.mrb[24].mxu0 %v11340_v42  ;;  %v4115_v4 = vld [vmem:[#allocation7 + $0x268] sm:$0xff] }
 0x3a0   :  { %4013 = vmatmul.mubr.f32.vlgmr.msra.gmra.mrb[24].mxu1 %v11340_v42  ;;  %8501 = vmatpush1.bf16.msra.mxu0 %v8500_v20  ;;  %v8710_v20 = vpack.c.bf16 %v4085_v47, %v4081_v17  ;;  %v4117_v17 = vld [vmem:[#allocation7 + $0x278] sm:$0xff] }
 0x3a1   :  { %4486 = vmatprep.mubr.f32.mxu0 %v11318_v46  ;;  %8693 = vmatpush1.bf16.msra.mxu1 %v8692_v7  ;;  %v4091_v7 = vld [vmem:[#allocation7 + $0x1a8] sm:$0xff]  ;;  %v8726_v28 = vpack.c.bf16 %v4117_v17, %v4113_v5  ;;  %v4144_v5 = vld [vmem:[#allocation7 + $0x350] sm:$0xff] }
 0x3a2   :  { %4699 = vmatprep.mubr.f32.mxu1 %v11318_v46  ;;  %8503 = vmatprep.subr.bf16.mxu0 %v8502_v34  ;;  %v4068_v46 = vld [vmem:[#allocation7 + $0xf0] sm:$0xff]  ;;  %v8522_v3 = vpack.c.bf16 %v4091_v7, %v4087_v25  ;;  %v4123_v25 = vld [vmem:[#allocation7 + $0x2a8] sm:$0xff]  ;;  %v4121_v7 = vld [vmem:[#allocation7 + $0x298] sm:$0xff] }
 0x3a3   :  { %8695 = vmatprep.subr.bf16.mxu1 %v8694_v61  ;;  %v8704_v23 = vpack.c.bf16 %v4068_v46, %v4064_v30  ;;  %v4086_v61 = vld [vmem:[#allocation7 + $0x180] sm:$0xff]  ;;  %v8718_v30 = vpack.c.bf16 %v4101_v21, %v4097_v29  ;;  %v4103_v46 = vld [vmem:[#allocation7 + $0x208] sm:$0xff]  ;;  %v4128_v29 = vld [vmem:[#allocation7 + $0x2d0] sm:$0xff] }
 0x3a4   :  { %8505 = vmatpush1.bf16.msra.mxu0 %v8504_v12  ;;  %v8524_v31 = vpack.c.bf16 %v4090_v44, %v4086_v61  ;;  %v4124_v44 = vld [vmem:[#allocation7 + $0x2b0] sm:$0xff] }
 0x3a5   :  { %8697 = vmatpush1.bf16.msra.mxu1 %v8696_v14  ;;  %8507 = vmatprep.subr.bf16.mxu0 %v8506_v40  ;;  %v8714_v40 = vpack.c.bf16 %v4093_v45, %v4089_v36  ;;  %v4125_v36 = vld [vmem:[#allocation7 + $0x2b8] sm:$0xff] }
 0x3a6   :  { %8699 = vmatprep.subr.bf16.mxu1 %v8698_v10  ;;  %v8730_v61 = vpack.c.bf16 %v4125_v36, %v4121_v7  ;;  %v4152_v7 = vld [vmem:[#allocation7 + $0x390] sm:$0xff] }
 0x3a8   :  { %8509 = vmatpush1.bf16.msra.mxu0 %v8508_v1  ;;  %v8716_v1 = vpack.c.bf16 %v4092_v16, %v4088_v62  ;;  %v4127_v62 = vld [vmem:[#allocation7 + $0x2c8] sm:$0xff] }
 0x3a9   :  { %8701 = vmatpush1.bf16.msra.mxu1 %v8700_v48  ;;  %8511 = vmatprep.subr.bf16.mxu0 %v8510_v49  ;;  %v8526_v48 = vpack.c.bf16 %v4099_v54, %v4095_v53  ;;  %v4094_v49 = vld [vmem:[#allocation7 + $0x1c0] sm:$0xff] }
 0x3aa   :  { %8703 = vmatprep.subr.bf16.mxu1 %v8702_v6  ;;  %v4100_v6 = vld [vmem:[#allocation7 + $0x1f0] sm:$0xff]  ;;  %v8528_v52 = vpack.c.bf16 %v4098_v51, %v4094_v49  ;;  %v4137_v49 = vld [vmem:[#allocation7 + $0x318] sm:$0xff] }
 0x3ab   :  { %v4141_v51 = vld [vmem:[#allocation7 + $0x338] sm:$0xff] }
 0x3ac   :  { %8513 = vmatpush1.bf16.msra.mxu0 %v8512_v32  ;;  %v8720_v32 = vpack.c.bf16 %v4100_v6, %v4096_v22  ;;  %v8738_v41 = vpack.c.bf16 %v4141_v51, %v4137_v49  ;;  %v4168_v51 = vld [vmem:[#allocation7 + $0x410] sm:$0xff] }
 0x3ad   :  { %8705 = vmatpush1.bf16.msra.mxu1 %v8704_v23  ;;  %8515 = vmatprep.subr.bf16.mxu0 %v8514_v15  ;;  %v8530_v23 = vpack.c.bf16 %v4107_v38, %v4103_v46  ;;  %v4102_v15 = vld [vmem:[#allocation7 + $0x200] sm:$0xff] }
 0x3ae   :  { %8707 = vmatprep.subr.bf16.mxu1 %v8706_v58  ;;  %v4108_v58 = vld [vmem:[#allocation7 + $0x230] sm:$0xff]  ;;  %v8532_v47 = vpack.c.bf16 %v4106_v18, %v4102_v15  ;;  %v4134_v46 = vld [vmem:[#allocation7 + $0x300] sm:$0xff]  ;;  %v4145_v15 = vld [vmem:[#allocation7 + $0x358] sm:$0xff] }
 0x3af   :  { %v4138_v38 = vld [vmem:[#allocation7 + $0x320] sm:$0xff]  ;;  %v4149_v18 = vld [vmem:[#allocation7 + $0x378] sm:$0xff] }
 0x3b0   :  { %8517 = vmatpush1.bf16.msra.mxu0 %v8516_v39  ;;  %v8724_v39 = vpack.c.bf16 %v4108_v58, %v4104_v33  ;;  %v8548_v33 = vpack.c.bf16 %v4138_v38, %v4134_v46  ;;  %v8742_v17 = vpack.c.bf16 %v4149_v18, %v4145_v15  ;;  %v4177_v38 = vld [vmem:[#allocation7 + $0x458] sm:$0xff]  ;;  %v4180_v18 = vld [vmem:[#allocation7 + $0x470] sm:$0xff] }
 0x3b1   :  { %8709 = vmatpush1.bf16.msra.mxu1 %v8708_v63  ;;  %v3114_v34 = vpop.f32.mrb[22].mxu0  ;;  %v3185_v43 = vpop.f32.mrb[22].mxu1  ;;  %8519 = vmatprep.subr.bf16.mxu0 %v8518_v56  ;;  %v8534_v63 = vpack.c.bf16 %v4115_v4, %v4111_v26  ;;  %v4110_v56 = vld [vmem:[#allocation7 + $0x240] sm:$0xff] }
 0x3b2   :  { %v3116_v12 = vpop.f32.mrb[23].mxu0  ;;  %v3187_v14 = vpop.f32.mrb[23].mxu1  ;;  %8711 = vmatprep.subr.bf16.mxu1 %v8710_v20  ;;  %v4116_v20 = vld [vmem:[#allocation7 + $0x270] sm:$0xff]  ;;  %v8536_v45 = vpack.c.bf16 %v4114_v55, %v4110_v56  ;;  %v4142_v26 = vld [vmem:[#allocation7 + $0x340] sm:$0xff]  ;;  %v4153_v56 = vld [vmem:[#allocation7 + $0x398] sm:$0xff] }
 0x3b3   :  { %v3191_v10 = vmax.f32 %v3114_v34, %v3116_v12  ;;  %v3192_v59 = vmax.f32 %v3185_v43, %v3187_v14  ;;  %v8538_v34 = vpack.c.bf16 %v4123_v25, %v4119_v27  ;;  %v4118_v43 = vld [vmem:[#allocation7 + $0x280] sm:$0xff]  ;;  %v4131_v12 = vld [vmem:[#allocation7 + $0x2e8] sm:$0xff]  ;;  %v4129_v14 = vld [vmem:[#allocation7 + $0x2d8] sm:$0xff] }
 0x3b4   :  { %8521 = vmatpush1.bf16.msra.mxu0 %v8520_v19  ;;  %v8728_v19 = vpack.c.bf16 %v4116_v20, %v4112_v60  ;;  %v8542_v54 = vpack.c.bf16 %v4131_v12, %v4127_v62  ;;  %v4146_v4 = vld [vmem:[#allocation7 + $0x360] sm:$0xff]  ;;  %v4157_v55 = vld [vmem:[#allocation7 + $0x3b8] sm:$0xff] }
 0x3b5   :  { %v11346_v11 = vmax.f32 %v3191_v10, %v3192_v59  ;;  %8713 = vmatpush1.bf16.msra.mxu1 %v8712_v9  ;;  %8523 = vmatprep.subr.bf16.mxu0 %v8522_v3  ;;  %v4122_v9 = vld [vmem:[#allocation7 + $0x2a0] sm:$0xff]  ;;  %v4120_v3 = vld [vmem:[#allocation7 + $0x290] sm:$0xff]  ;;  %v8552_v60 = vpack.c.bf16 %v4146_v4, %v4142_v26  ;;  %v8746_v36 = vpack.c.bf16 %v4157_v55, %v4153_v56  ;;  %v4185_v26 = vld [vmem:[#allocation7 + $0x498] sm:$0xff] }
 0x3b6   :  { %8715 = vmatprep.subr.bf16.mxu1 %v8714_v40  ;;  %v4133_v40 = vld [vmem:[#allocation7 + $0x2f8] sm:$0xff]  ;;  %v8540_v16 = vpack.c.bf16 %v4122_v9, %v4118_v43  ;;  %v8732_v53 = vpack.c.bf16 %v4124_v44, %v4120_v3  ;;  %v4126_v10 = vld [vmem:[#allocation7 + $0x2c0] sm:$0xff]  ;;  %v4184_v56 = vld [vmem:[#allocation7 + $0x490] sm:$0xff] }
 0x3b7   :  { %v4130_v59 = vld [vmem:[#allocation7 + $0x2e0] sm:$0xff]  ;;  %v8734_v21 = vpack.c.bf16 %v4133_v40, %v4129_v14  ;;  %v4161_v43 = vld [vmem:[#allocation7 + $0x3d8] sm:$0xff]  ;;  %v4160_v14 = vld [vmem:[#allocation7 + $0x3d0] sm:$0xff] }
 0x3b8   :  { %8525 = vmatpush1.bf16.msra.mxu0 %v8524_v31  ;;  %v4132_v31 = vld [vmem:[#allocation7 + $0x2f0] sm:$0xff]  ;;  %v8544_v22 = vpack.c.bf16 %v4130_v59, %v4126_v10  ;;  %v4150_v27 = vld [vmem:[#allocation7 + $0x380] sm:$0xff]  ;;  %v4165_v9 = vld [vmem:[#allocation7 + $0x3f8] sm:$0xff] }
 0x3b9   :  { %8717 = vmatpush1.bf16.msra.mxu1 %v8716_v1  ;;  %8527 = vmatprep.subr.bf16.mxu0 %v8526_v48  ;;  %v4135_v1 = vld [vmem:[#allocation7 + $0x308] sm:$0xff]  ;;  %v4154_v25 = vld [vmem:[#allocation7 + $0x3a0] sm:$0xff]  ;;  %v8750_v40 = vpack.c.bf16 %v4165_v9, %v4161_v43  ;;  %v4169_v10 = vld [vmem:[#allocation7 + $0x418] sm:$0xff] }
 0x3ba   :  { %8719 = vmatprep.subr.bf16.mxu1 %v8718_v30  ;;  %v4139_v48 = vld [vmem:[#allocation7 + $0x328] sm:$0xff]  ;;  %v8736_v30 = vpack.c.bf16 %v4132_v31, %v4128_v29  ;;  %v8556_v3 = vpack.c.bf16 %v4154_v25, %v4150_v27  ;;  %v4158_v62 = vld [vmem:[#allocation7 + $0x3c0] sm:$0xff]  ;;  %v4173_v59 = vld [vmem:[#allocation7 + $0x438] sm:$0xff] }
 0x3bb   :  { %v8546_v6 = vpack.c.bf16 %v4139_v48, %v4135_v1  ;;  %v4162_v12 = vld [vmem:[#allocation7 + $0x3e0] sm:$0xff]  ;;  %v8754_v49 = vpack.c.bf16 %v4173_v59, %v4169_v10  ;;  %v4189_v4 = vld [vmem:[#allocation7 + $0x4b8] sm:$0xff]  ;;  %v4196_v9 = vld [vmem:[#allocation7 + $0x4f0] sm:$0xff] }
 0x3bc   :  { %8529 = vmatpush1.bf16.msra.mxu0 %v8528_v52  ;;  %v4140_v52 = vld [vmem:[#allocation7 + $0x330] sm:$0xff]  ;;  %v8560_v29 = vpack.c.bf16 %v4162_v12, %v4158_v62  ;;  %v4166_v1 = vld [vmem:[#allocation7 + $0x400] sm:$0xff]  ;;  %v8762_v55 = vpack.c.bf16 %v4189_v4, %v4185_v26  ;;  %v4193_v27 = vld [vmem:[#allocation7 + $0x4d8] sm:$0xff] }
 0x3bd   :  { %8721 = vmatpush1.bf16.msra.mxu1 %v8720_v32  ;;  %8531 = vmatprep.subr.bf16.mxu0 %v8530_v23  ;;  %v4143_v32 = vld [vmem:[#allocation7 + $0x348] sm:$0xff]  ;;  %v4170_v48 = vld [vmem:[#allocation7 + $0x420] sm:$0xff]  ;;  %v4205_v62 = vld [vmem:[#allocation7 + $0x538] sm:$0xff] }
 0x3be   :  { %8723 = vmatprep.subr.bf16.mxu1 %v8722_v57  ;;  %v4147_v23 = vld [vmem:[#allocation7 + $0x368] sm:$0xff]  ;;  %v8740_v57 = vpack.c.bf16 %v4140_v52, %v4136_v8  ;;  %v8564_v46 = vpack.c.bf16 %v4170_v48, %v4166_v1  ;;  %v4181_v8 = vld [vmem:[#allocation7 + $0x478] sm:$0xff]  ;;  %v4174_v52 = vld [vmem:[#allocation7 + $0x440] sm:$0xff] }
 0x3bf   :  { %v8550_v58 = vpack.c.bf16 %v4147_v23, %v4143_v32  ;;  %v4178_v32 = vld [vmem:[#allocation7 + $0x460] sm:$0xff]  ;;  %v4176_v23 = vld [vmem:[#allocation7 + $0x450] sm:$0xff]  ;;  %v4213_v1 = vld [vmem:[#allocation7 + $0x578] sm:$0xff] }
 0x3c0   :  { %8533 = vmatpush1.bf16.msra.mxu0 %v8532_v47  ;;  %v4148_v47 = vld [vmem:[#allocation7 + $0x370] sm:$0xff] }
 0x3c1   :  { %8725 = vmatpush1.bf16.msra.mxu1 %v8724_v39  ;;  %8535 = vmatprep.subr.bf16.mxu0 %v8534_v63  ;;  %v4151_v39 = vld [vmem:[#allocation7 + $0x388] sm:$0xff]  ;;  %v4204_v59 = vld [vmem:[#allocation7 + $0x530] sm:$0xff] }
 0x3c2   :  { %8727 = vmatprep.subr.bf16.mxu1 %v8726_v28  ;;  %v4155_v63 = vld [vmem:[#allocation7 + $0x3a8] sm:$0xff]  ;;  %v8744_v28 = vpack.c.bf16 %v4148_v47, %v4144_v5  ;;  %v8568_v5 = vpack.c.bf16 %v4178_v32, %v4174_v52  ;;  %v4217_v52 = vld [vmem:[#allocation7 + $0x598] sm:$0xff]  ;;  %v4220_v4 = vld [vmem:[#allocation7 + $0x5b0] sm:$0xff] }
 0x3c3   :  { %v8554_v20 = vpack.c.bf16 %v4155_v63, %v4151_v39  ;;  %v4182_v39 = vld [vmem:[#allocation7 + $0x480] sm:$0xff]  ;;  %v4221_v32 = vld [vmem:[#allocation7 + $0x5b8] sm:$0xff] }
 0x3c4   :  { %8537 = vmatpush1.bf16.msra.mxu0 %v8536_v45  ;;  %v4156_v45 = vld [vmem:[#allocation7 + $0x3b0] sm:$0xff]  ;;  %v4186_v63 = vld [vmem:[#allocation7 + $0x4a0] sm:$0xff]  ;;  %v8778_v26 = vpack.c.bf16 %v4221_v32, %v4217_v52 }
 0x3c5   :  { %8729 = vmatpush1.bf16.msra.mxu1 %v8728_v19  ;;  %8539 = vmatprep.subr.bf16.mxu0 %v8538_v34  ;;  %v4159_v19 = vld [vmem:[#allocation7 + $0x3c8] sm:$0xff]  ;;  %v8572_v25 = vpack.c.bf16 %v4186_v63, %v4182_v39  ;;  %v4229_v39 = vld [vmem:[#allocation7 + $0x5f8] sm:$0xff]  ;;  %v4252_v32 = vld [vmem:[#allocation7 + $0x6b0] sm:$0xff] }
 0x3c6   :  { %8731 = vmatprep.subr.bf16.mxu1 %v8730_v61  ;;  %v4163_v34 = vld [vmem:[#allocation7 + $0x3e8] sm:$0xff]  ;;  %v8748_v61 = vpack.c.bf16 %v4156_v45, %v4152_v7  ;;  %v4190_v45 = vld [vmem:[#allocation7 + $0x4c0] sm:$0xff] }
 0x3c7   :  { %v8558_v44 = vpack.c.bf16 %v4163_v34, %v4159_v19  ;;  %v4194_v19 = vld [vmem:[#allocation7 + $0x4e0] sm:$0xff]  ;;  %v4192_v34 = vld [vmem:[#allocation7 + $0x4d0] sm:$0xff] }
 0x3c8   :  { %8541 = vmatpush1.bf16.msra.mxu0 %v8540_v16  ;;  %v4164_v16 = vld [vmem:[#allocation7 + $0x3f0] sm:$0xff]  ;;  %v8576_v12 = vpack.c.bf16 %v4194_v19, %v4190_v45  ;;  %v4237_v45 = vld [vmem:[#allocation7 + $0x638] sm:$0xff] }
 0x3c9   :  { %8733 = vmatpush1.bf16.msra.mxu1 %v8732_v53  ;;  %8543 = vmatprep.subr.bf16.mxu0 %v8542_v54  ;;  %v4167_v53 = vld [vmem:[#allocation7 + $0x408] sm:$0xff] }
 0x3ca   :  { %8735 = vmatprep.subr.bf16.mxu1 %v8734_v21  ;;  %v4171_v54 = vld [vmem:[#allocation7 + $0x428] sm:$0xff]  ;;  %v8752_v21 = vpack.c.bf16 %v4164_v16, %v4160_v14  ;;  %v8768_v14 = vpack.c.bf16 %v4196_v9, %v4192_v34  ;;  %v4198_v16 = vld [vmem:[#allocation7 + $0x500] sm:$0xff] }
 0x3cb   :  { %v8562_v31 = vpack.c.bf16 %v4171_v54, %v4167_v53  ;;  %v4202_v53 = vld [vmem:[#allocation7 + $0x520] sm:$0xff]  ;;  %v4200_v54 = vld [vmem:[#allocation7 + $0x510] sm:$0xff] }
 0x3cc   :  { %8545 = vmatpush1.bf16.msra.mxu0 %v8544_v22  ;;  %v4172_v22 = vld [vmem:[#allocation7 + $0x430] sm:$0xff]  ;;  %v8580_v48 = vpack.c.bf16 %v4202_v53, %v4198_v16  ;;  %v4230_v9 = vld [vmem:[#allocation7 + $0x600] sm:$0xff]  ;;  %v4245_v16 = vld [vmem:[#allocation7 + $0x678] sm:$0xff] }
 0x3cd   :  { %8737 = vmatpush1.bf16.msra.mxu1 %v8736_v30  ;;  %8547 = vmatprep.subr.bf16.mxu0 %v8546_v6  ;;  %v4175_v30 = vld [vmem:[#allocation7 + $0x448] sm:$0xff] }
 0x3ce   :  { %8739 = vmatprep.subr.bf16.mxu1 %v8738_v41  ;;  %v4179_v6 = vld [vmem:[#allocation7 + $0x468] sm:$0xff]  ;;  %v8756_v41 = vpack.c.bf16 %v4172_v22, %v4168_v51  ;;  %v4206_v22 = vld [vmem:[#allocation7 + $0x540] sm:$0xff] }
 0x3cf   :  { %v8566_v15 = vpack.c.bf16 %v4179_v6, %v4175_v30  ;;  %v4210_v30 = vld [vmem:[#allocation7 + $0x560] sm:$0xff]  ;;  %v4208_v6 = vld [vmem:[#allocation7 + $0x550] sm:$0xff] }
 0x3d0   :  { %8549 = vmatpush1.bf16.msra.mxu0 %v8548_v33  ;;  %v4183_v33 = vld [vmem:[#allocation7 + $0x488] sm:$0xff] }
 0x3d1   :  { %8741 = vmatpush1.bf16.msra.mxu1 %v8740_v57  ;;  %8551 = vmatprep.subr.bf16.mxu0 %v8550_v58  ;;  %v4187_v57 = vld [vmem:[#allocation7 + $0x4a8] sm:$0xff]  ;;  %v8758_v58 = vpack.c.bf16 %v4181_v8, %v4177_v38  ;;  %v4212_v38 = vld [vmem:[#allocation7 + $0x570] sm:$0xff] }
 0x3d2   :  { %8743 = vmatprep.subr.bf16.mxu1 %v8742_v17  ;;  %v8760_v17 = vpack.c.bf16 %v4180_v18, %v4176_v23  ;;  %v8570_v47 = vpack.c.bf16 %v4187_v57, %v4183_v33  ;;  %v4215_v8 = vld [vmem:[#allocation7 + $0x588] sm:$0xff]  ;;  %v8584_v23 = vpack.c.bf16 %v4210_v30, %v4206_v22  ;;  %v4214_v33 = vld [vmem:[#allocation7 + $0x580] sm:$0xff]  ;;  %v4253_v22 = vld [vmem:[#allocation7 + $0x6b8] sm:$0xff] }
 0x3d3   :  { %v4218_v57 = vld [vmem:[#allocation7 + $0x5a0] sm:$0xff] }
 0x3d4   :  { %8553 = vmatpush1.bf16.msra.mxu0 %v8552_v60  ;;  %v4188_v60 = vld [vmem:[#allocation7 + $0x4b0] sm:$0xff]  ;;  %v8588_v63 = vpack.c.bf16 %v4218_v57, %v4214_v33  ;;  %v4261_v33 = vld [vmem:[#allocation7 + $0x6f8] sm:$0xff] }
 0x3d5   :  { %8745 = vmatpush1.bf16.msra.mxu1 %v8744_v28  ;;  %8555 = vmatprep.subr.bf16.mxu0 %v8554_v20  ;;  %v4191_v28 = vld [vmem:[#allocation7 + $0x4c8] sm:$0xff]  ;;  %v8764_v7 = vpack.c.bf16 %v4188_v60, %v4184_v56  ;;  %v4222_v60 = vld [vmem:[#allocation7 + $0x5c0] sm:$0xff] }
 0x3d6   :  { %8747 = vmatprep.subr.bf16.mxu1 %v8746_v36  ;;  %v4195_v20 = vld [vmem:[#allocation7 + $0x4e8] sm:$0xff] }
 0x3d7   :  { %v8574_v36 = vpack.c.bf16 %v4195_v20, %v4191_v28  ;;  %v4226_v28 = vld [vmem:[#allocation7 + $0x5e0] sm:$0xff]  ;;  %v4224_v20 = vld [vmem:[#allocation7 + $0x5d0] sm:$0xff] }
 0x3d8   :  { %8557 = vmatpush1.bf16.msra.mxu0 %v8556_v3  ;;  %v4199_v3 = vld [vmem:[#allocation7 + $0x508] sm:$0xff]  ;;  %v8592_v19 = vpack.c.bf16 %v4226_v28, %v4222_v60  ;;  %v4269_v60 = vld [vmem:[#allocation7 + $0x738] sm:$0xff] }
 0x3d9   :  { %8749 = vmatpush1.bf16.msra.mxu1 %v8748_v61  ;;  %8559 = vmatprep.subr.bf16.mxu0 %v8558_v44  ;;  %v4203_v61 = vld [vmem:[#allocation7 + $0x528] sm:$0xff]  ;;  %v4201_v44 = vld [vmem:[#allocation7 + $0x518] sm:$0xff] }
 0x3da   :  { %8751 = vmatprep.subr.bf16.mxu1 %v8750_v40  ;;  %v8578_v40 = vpack.c.bf16 %v4203_v61, %v4199_v3  ;;  %v8770_v10 = vpack.c.bf16 %v4205_v62, %v4201_v44  ;;  %v4234_v3 = vld [vmem:[#allocation7 + $0x620] sm:$0xff]  ;;  %v4232_v61 = vld [vmem:[#allocation7 + $0x610] sm:$0xff] }
 0x3db   :  { %v4236_v62 = vld [vmem:[#allocation7 + $0x630] sm:$0xff]  ;;  %v8596_v53 = vpack.c.bf16 %v4234_v3, %v4230_v9  ;;  %v4277_v9 = vld [vmem:[#allocation7 + $0x778] sm:$0xff] }
 0x3dc   :  { %8561 = vmatpush1.bf16.msra.mxu0 %v8560_v29  ;;  %v4207_v29 = vld [vmem:[#allocation7 + $0x548] sm:$0xff] }
 0x3dd   :  { %8753 = vmatpush1.bf16.msra.mxu1 %v8752_v21  ;;  %8563 = vmatprep.subr.bf16.mxu0 %v8562_v31  ;;  %v4211_v21 = vld [vmem:[#allocation7 + $0x568] sm:$0xff]  ;;  %v4209_v31 = vld [vmem:[#allocation7 + $0x558] sm:$0xff] }
 0x3de   :  { %8755 = vmatprep.subr.bf16.mxu1 %v8754_v49  ;;  %v8772_v49 = vpack.c.bf16 %v4204_v59, %v4200_v54  ;;  %v8582_v51 = vpack.c.bf16 %v4211_v21, %v4207_v29  ;;  %v8788_v54 = vpack.c.bf16 %v4236_v62, %v4232_v61  ;;  %v4238_v59 = vld [vmem:[#allocation7 + $0x640] sm:$0xff]  ;;  %v4240_v21 = vld [vmem:[#allocation7 + $0x650] sm:$0xff] }
 0x3df   :  { %4487 = vmatmul.mubr.f32.vlgmr.msra.gmra.mrb[26].mxu0 %v11327_v0  ;;  %v4242_v29 = vld [vmem:[#allocation7 + $0x660] sm:$0xff] }
 0x3e0   :  { %4700 = vmatmul.mubr.f32.vlgmr.msra.gmra.mrb[26].mxu1 %v11327_v0  ;;  %8565 = vmatpush1.bf16.msra.mxu0 %v8564_v46  ;;  %v4197_v0 = vld [vmem:[#allocation7 + $0x4f8] sm:$0xff]  ;;  %v8774_v46 = vpack.c.bf16 %v4213_v1, %v4209_v31  ;;  %v4244_v1 = vld [vmem:[#allocation7 + $0x670] sm:$0xff]  ;;  %v8600_v30 = vpack.c.bf16 %v4242_v29, %v4238_v59  ;;  %v4270_v62 = vld [vmem:[#allocation7 + $0x740] sm:$0xff] }
 0x3e1   :  { %4557 = vmatprep.mubr.f32.mxu0 %v11329_v50  ;;  %8757 = vmatpush1.bf16.msra.mxu1 %v8756_v41  ;;  %v8766_v43 = vpack.c.bf16 %v4197_v0, %v4193_v27  ;;  %v4219_v41 = vld [vmem:[#allocation7 + $0x5a8] sm:$0xff]  ;;  %v4228_v0 = vld [vmem:[#allocation7 + $0x5f0] sm:$0xff]  ;;  %v4285_v59 = vld [vmem:[#allocation7 + $0x7b8] sm:$0xff] }
 0x3e2   :  { %4770 = vmatprep.mubr.f32.mxu1 %v11329_v50  ;;  %8567 = vmatprep.subr.bf16.mxu0 %v8566_v15  ;;  %v8776_v15 = vpack.c.bf16 %v4212_v38, %v4208_v6  ;;  %v8586_v18 = vpack.c.bf16 %v4219_v41, %v4215_v8  ;;  %v8784_v34 = vpack.c.bf16 %v4228_v0, %v4224_v20  ;;  %v4246_v38 = vld [vmem:[#allocation7 + $0x680] sm:$0xff]  ;;  %v4248_v41 = vld [vmem:[#allocation7 + $0x690] sm:$0xff] }
 0x3e3   :  { %8759 = vmatprep.subr.bf16.mxu1 %v8758_v58  ;;  %v4216_v58 = vld [vmem:[#allocation7 + $0x590] sm:$0xff]  ;;  %v8792_v6 = vpack.c.bf16 %v4244_v1, %v4240_v21  ;;  %v4250_v8 = vld [vmem:[#allocation7 + $0x6a0] sm:$0xff] }
 0x3e4   :  { %8569 = vmatpush1.bf16.msra.mxu0 %v8568_v5  ;;  %v4223_v5 = vld [vmem:[#allocation7 + $0x5c8] sm:$0xff]  ;;  %v8780_v56 = vpack.c.bf16 %v4220_v4, %v4216_v58  ;;  %v8604_v57 = vpack.c.bf16 %v4250_v8, %v4246_v38  ;;  %v8796_v58 = vpack.c.bf16 %v4252_v32, %v4248_v41  ;;  %v4254_v4 = vld [vmem:[#allocation7 + $0x6c0] sm:$0xff]  ;;  %v4293_v38 = vld [vmem:[#allocation7 + $0x7f8] sm:$0xff] }
 0x3e5   :  { %8761 = vmatpush1.bf16.msra.mxu1 %v8760_v17  ;;  %8571 = vmatprep.subr.bf16.mxu0 %v8570_v47  ;;  %v4227_v17 = vld [vmem:[#allocation7 + $0x5e8] sm:$0xff]  ;;  %v4225_v47 = vld [vmem:[#allocation7 + $0x5d8] sm:$0xff]  ;;  %v4262_v0 = vld [vmem:[#allocation7 + $0x700] sm:$0xff] }
 0x3e6   :  { %8763 = vmatprep.subr.bf16.mxu1 %v8762_v55  ;;  %v8590_v55 = vpack.c.bf16 %v4227_v17, %v4223_v5  ;;  %v8782_v27 = vpack.c.bf16 %v4229_v39, %v4225_v47  ;;  %v4258_v5 = vld [vmem:[#allocation7 + $0x6e0] sm:$0xff]  ;;  %v4256_v17 = vld [vmem:[#allocation7 + $0x6d0] sm:$0xff] }
 0x3e7   :  { %v4260_v39 = vld [vmem:[#allocation7 + $0x6f0] sm:$0xff]  ;;  %v8608_v28 = vpack.c.bf16 %v4258_v5, %v4254_v4  ;;  %v4278_v1 = vld [vmem:[#allocation7 + $0x780] sm:$0xff]  ;;  %v4301_v4 = vld [vmem:[#allocation7 + $0x838] sm:$0xff] }
 0x3e8   :  { %8573 = vmatpush1.bf16.msra.mxu0 %v8572_v25  ;;  %v4231_v25 = vld [vmem:[#allocation7 + $0x608] sm:$0xff]  ;;  %v8800_v20 = vpack.c.bf16 %v4260_v39, %v4256_v17  ;;  %v4286_v32 = vld [vmem:[#allocation7 + $0x7c0] sm:$0xff] }
 0x3e9   :  { %8765 = vmatpush1.bf16.msra.mxu1 %v8764_v7  ;;  %8575 = vmatprep.subr.bf16.mxu0 %v8574_v36  ;;  %v4235_v7 = vld [vmem:[#allocation7 + $0x628] sm:$0xff]  ;;  %v4233_v36 = vld [vmem:[#allocation7 + $0x618] sm:$0xff]  ;;  %v4294_v39 = vld [vmem:[#allocation7 + $0x800] sm:$0xff] }
 0x3ea   :  { %8767 = vmatprep.subr.bf16.mxu1 %v8766_v43  ;;  %v8594_v43 = vpack.c.bf16 %v4235_v7, %v4231_v25  ;;  %v8786_v44 = vpack.c.bf16 %v4237_v45, %v4233_v36  ;;  %v4266_v25 = vld [vmem:[#allocation7 + $0x720] sm:$0xff]  ;;  %v4264_v7 = vld [vmem:[#allocation7 + $0x710] sm:$0xff] }
 0x3eb   :  { %v4268_v45 = vld [vmem:[#allocation7 + $0x730] sm:$0xff]  ;;  %v8612_v3 = vpack.c.bf16 %v4266_v25, %v4262_v0  ;;  %v4307_v0 = vld [vmem:[#allocation7 + $0x868] sm:$0xff] }
 0x3ec   :  { %8577 = vmatpush1.bf16.msra.mxu0 %v8576_v12  ;;  %v4239_v12 = vld [vmem:[#allocation7 + $0x648] sm:$0xff]  ;;  %v8804_v61 = vpack.c.bf16 %v4268_v45, %v4264_v7  ;;  %v4305_v7 = vld [vmem:[#allocation7 + $0x858] sm:$0xff] }
 0x3ed   :  { %8769 = vmatpush1.bf16.msra.mxu1 %v8768_v14  ;;  %8579 = vmatprep.subr.bf16.mxu0 %v8578_v40  ;;  %v4243_v14 = vld [vmem:[#allocation7 + $0x668] sm:$0xff]  ;;  %v4241_v40 = vld [vmem:[#allocation7 + $0x658] sm:$0xff] }
 0x3ee   :  { %8771 = vmatprep.subr.bf16.mxu1 %v8770_v10  ;;  %v8598_v10 = vpack.c.bf16 %v4243_v14, %v4239_v12  ;;  %v8790_v31 = vpack.c.bf16 %v4245_v16, %v4241_v40  ;;  %v4274_v12 = vld [vmem:[#allocation7 + $0x760] sm:$0xff]  ;;  %v4272_v14 = vld [vmem:[#allocation7 + $0x750] sm:$0xff] }
 0x3ef   :  { %v4276_v16 = vld [vmem:[#allocation7 + $0x770] sm:$0xff]  ;;  %v8616_v29 = vpack.c.bf16 %v4274_v12, %v4270_v62  ;;  %v4313_v12 = vld [vmem:[#allocation7 + $0x898] sm:$0xff] }
 0x3f0   :  { %8581 = vmatpush1.bf16.msra.mxu0 %v8580_v48  ;;  %v4247_v48 = vld [vmem:[#allocation7 + $0x688] sm:$0xff]  ;;  %v8808_v21 = vpack.c.bf16 %v4276_v16, %v4272_v14  ;;  %v4317_v14 = vld [vmem:[#allocation7 + $0x8b8] sm:$0xff] }
 0x3f1   :  { %8773 = vmatpush1.bf16.msra.mxu1 %v8772_v49  ;;  %8583 = vmatprep.subr.bf16.mxu0 %v8582_v51  ;;  %v4251_v49 = vld [vmem:[#allocation7 + $0x6a8] sm:$0xff]  ;;  %v4249_v51 = vld [vmem:[#allocation7 + $0x698] sm:$0xff] }
 0x3f2   :  { %8775 = vmatprep.subr.bf16.mxu1 %v8774_v46  ;;  %v8602_v46 = vpack.c.bf16 %v4251_v49, %v4247_v48  ;;  %v8794_v52 = vpack.c.bf16 %v4253_v22, %v4249_v51  ;;  %v4282_v48 = vld [vmem:[#allocation7 + $0x7a0] sm:$0xff]  ;;  %v4280_v49 = vld [vmem:[#allocation7 + $0x790] sm:$0xff] }
 0x3f3   :  { %v4284_v22 = vld [vmem:[#allocation7 + $0x7b0] sm:$0xff]  ;;  %v8620_v8 = vpack.c.bf16 %v4282_v48, %v4278_v1  ;;  %v4323_v1 = vld [vmem:[#allocation7 + $0x8e8] sm:$0xff]  ;;  %v4321_v48 = vld [vmem:[#allocation7 + $0x8d8] sm:$0xff] }
 0x3f4   :  { %8585 = vmatpush1.bf16.msra.mxu0 %v8584_v23  ;;  %v4255_v23 = vld [vmem:[#allocation7 + $0x6c8] sm:$0xff]  ;;  %v8812_v41 = vpack.c.bf16 %v4284_v22, %v4280_v49  ;;  %v4325_v49 = vld [vmem:[#allocation7 + $0x8f8] sm:$0xff] }
 0x3f5   :  { %8777 = vmatpush1.bf16.msra.mxu1 %v8776_v15  ;;  %8587 = vmatprep.subr.bf16.mxu0 %v8586_v18  ;;  %v4259_v15 = vld [vmem:[#allocation7 + $0x6e8] sm:$0xff]  ;;  %v4257_v18 = vld [vmem:[#allocation7 + $0x6d8] sm:$0xff] }
 0x3f6   :  { %8779 = vmatprep.subr.bf16.mxu1 %v8778_v26  ;;  %v8606_v26 = vpack.c.bf16 %v4259_v15, %v4255_v23  ;;  %v8798_v47 = vpack.c.bf16 %v4261_v33, %v4257_v18  ;;  %v4290_v23 = vld [vmem:[#allocation7 + $0x7e0] sm:$0xff]  ;;  %v4288_v15 = vld [vmem:[#allocation7 + $0x7d0] sm:$0xff] }
 0x3f7   :  { %v4292_v33 = vld [vmem:[#allocation7 + $0x7f0] sm:$0xff]  ;;  %v8624_v5 = vpack.c.bf16 %v4290_v23, %v4286_v32  ;;  %v4331_v32 = vld [vmem:[#allocation7 + $0x928] sm:$0xff]  ;;  %v4329_v23 = vld [vmem:[#allocation7 + $0x918] sm:$0xff] }
 0x3f8   :  { %8589 = vmatpush1.bf16.msra.mxu0 %v8588_v63  ;;  %v4263_v63 = vld [vmem:[#allocation7 + $0x708] sm:$0xff]  ;;  %v8816_v17 = vpack.c.bf16 %v4292_v33, %v4288_v15  ;;  %v4333_v15 = vld [vmem:[#allocation7 + $0x938] sm:$0xff] }
 0x3f9   :  { %8781 = vmatpush1.bf16.msra.mxu1 %v8780_v56  ;;  %8591 = vmatprep.subr.bf16.mxu0 %v8590_v55  ;;  %v4267_v56 = vld [vmem:[#allocation7 + $0x728] sm:$0xff]  ;;  %v4265_v55 = vld [vmem:[#allocation7 + $0x718] sm:$0xff] }
 0x3fa   :  { %8783 = vmatprep.subr.bf16.mxu1 %v8782_v27  ;;  %v8610_v27 = vpack.c.bf16 %v4267_v56, %v4263_v63  ;;  %v8802_v36 = vpack.c.bf16 %v4269_v60, %v4265_v55  ;;  %v4298_v63 = vld [vmem:[#allocation7 + $0x820] sm:$0xff]  ;;  %v4296_v55 = vld [vmem:[#allocation7 + $0x810] sm:$0xff] }
 0x3fb   :  { %v4300_v60 = vld [vmem:[#allocation7 + $0x830] sm:$0xff]  ;;  %v8628_v25 = vpack.c.bf16 %v4298_v63, %v4294_v39  ;;  %v4339_v39 = vld [vmem:[#allocation7 + $0x968] sm:$0xff]  ;;  %v4337_v63 = vld [vmem:[#allocation7 + $0x958] sm:$0xff] }
 0x3fc   :  { %8593 = vmatpush1.bf16.msra.mxu0 %v8592_v19  ;;  %v4271_v19 = vld [vmem:[#allocation7 + $0x748] sm:$0xff]  ;;  %v8820_v45 = vpack.c.bf16 %v4300_v60, %v4296_v55 }
 0x3fd   :  { %8785 = vmatpush1.bf16.msra.mxu1 %v8784_v34  ;;  %8595 = vmatprep.subr.bf16.mxu0 %v8594_v43  ;;  %v4275_v34 = vld [vmem:[#allocation7 + $0x768] sm:$0xff]  ;;  %v4273_v43 = vld [vmem:[#allocation7 + $0x758] sm:$0xff] }
 0x3fe   :  { %8787 = vmatprep.subr.bf16.mxu1 %v8786_v44  ;;  %v8614_v44 = vpack.c.bf16 %v4275_v34, %v4271_v19  ;;  %v8806_v40 = vpack.c.bf16 %v4277_v9, %v4273_v43  ;;  %v4302_v19 = vld [vmem:[#allocation7 + $0x840] sm:$0xff]  ;;  %v4304_v43 = vld [vmem:[#allocation7 + $0x850] sm:$0xff] }
 0x3ff   :  { %v4306_v34 = vld [vmem:[#allocation7 + $0x860] sm:$0xff] }
 0x400   :  { %8597 = vmatpush1.bf16.msra.mxu0 %v8596_v53  ;;  %v4279_v53 = vld [vmem:[#allocation7 + $0x788] sm:$0xff] }
 0x401   :  { %8789 = vmatpush1.bf16.msra.mxu1 %v8788_v54  ;;  %8599 = vmatprep.subr.bf16.mxu0 %v8598_v10  ;;  %v4283_v54 = vld [vmem:[#allocation7 + $0x7a8] sm:$0xff]  ;;  %v4281_v10 = vld [vmem:[#allocation7 + $0x798] sm:$0xff] }
 0x402   :  { %8791 = vmatprep.subr.bf16.mxu1 %v8790_v31  ;;  %v8618_v31 = vpack.c.bf16 %v4283_v54, %v4279_v53  ;;  %v8810_v51 = vpack.c.bf16 %v4285_v59, %v4281_v10  ;;  %v4310_v54 = vld [vmem:[#allocation7 + $0x880] sm:$0xff]  ;;  %v4312_v59 = vld [vmem:[#allocation7 + $0x890] sm:$0xff] }
 0x403   :  { %v4314_v10 = vld [vmem:[#allocation7 + $0x8a0] sm:$0xff] }
 0x404   :  { %8601 = vmatpush1.bf16.msra.mxu0 %v8600_v30  ;;  %v4287_v30 = vld [vmem:[#allocation7 + $0x7c8] sm:$0xff] }
 0x405   :  { %8793 = vmatpush1.bf16.msra.mxu1 %v8792_v6  ;;  %8603 = vmatprep.subr.bf16.mxu0 %v8602_v46  ;;  %v4291_v6 = vld [vmem:[#allocation7 + $0x7e8] sm:$0xff]  ;;  %v4289_v46 = vld [vmem:[#allocation7 + $0x7d8] sm:$0xff] }
 0x406   :  { %8795 = vmatprep.subr.bf16.mxu1 %v8794_v52  ;;  %v8622_v52 = vpack.c.bf16 %v4291_v6, %v4287_v30  ;;  %v8814_v18 = vpack.c.bf16 %v4293_v38, %v4289_v46  ;;  %v4318_v6 = vld [vmem:[#allocation7 + $0x8c0] sm:$0xff]  ;;  %v4320_v38 = vld [vmem:[#allocation7 + $0x8d0] sm:$0xff] }
 0x407   :  { %v4322_v46 = vld [vmem:[#allocation7 + $0x8e0] sm:$0xff] }
 0x408   :  { %8605 = vmatpush1.bf16.msra.mxu0 %v8604_v57  ;;  %v4295_v57 = vld [vmem:[#allocation7 + $0x808] sm:$0xff] }
 0x409   :  { %8797 = vmatpush1.bf16.msra.mxu1 %v8796_v58  ;;  %8607 = vmatprep.subr.bf16.mxu0 %v8606_v26  ;;  %v4299_v58 = vld [vmem:[#allocation7 + $0x828] sm:$0xff]  ;;  %v4297_v26 = vld [vmem:[#allocation7 + $0x818] sm:$0xff] }
 0x40a   :  { %8799 = vmatprep.subr.bf16.mxu1 %v8798_v47  ;;  %v8626_v47 = vpack.c.bf16 %v4299_v58, %v4295_v57  ;;  %v8818_v56 = vpack.c.bf16 %v4301_v4, %v4297_v26  ;;  %v4326_v58 = vld [vmem:[#allocation7 + $0x900] sm:$0xff]  ;;  %v4328_v4 = vld [vmem:[#allocation7 + $0x910] sm:$0xff] }
 0x40b   :  { %v4330_v26 = vld [vmem:[#allocation7 + $0x920] sm:$0xff] }
 0x40c   :  { %8609 = vmatpush1.bf16.msra.mxu0 %v8608_v28  ;;  %v11352_v28 = vld [vmem:[#allocation5] ss:$0 sm:$0xff]  ;;  %v8644_v55 = vpack.c.bf16 %v4330_v26, %v4326_v58 }
 0x40d   :  { %8801 = vmatpush1.bf16.msra.mxu1 %v8800_v20  ;;  %8611 = vmatprep.subr.bf16.mxu0 %v8610_v27  ;;  %v2182_v20 = vadd.f32 %v11352_v28, %v11311_v2  ;;  %v4303_v27 = vld [vmem:[#allocation7 + $0x848] sm:$0xff]  ;;  %v4369_v58 = vld [vmem:[#allocation7 + $0xa58] sm:$0xff] }
 0x40e   :  { %8803 = vmatprep.subr.bf16.mxu1 %v8802_v36  ;;  %v4309_v36 = vld [vmem:[#allocation7 + $0x878] sm:$0xff]  ;;  %v8630_v9 = vpack.c.bf16 %v4307_v0, %v4303_v27  ;;  %v4334_v27 = vld [vmem:[#allocation7 + $0x940] sm:$0xff] }
 0x40f   :  { %v11356_v62 = vmax.f32 %v2182_v20, 0.0  ;;  %v8822_v2 = vpack.c.bf16 %v4309_v36, %v4305_v7  ;;  %v4338_v0 = vld [vmem:[#allocation7 + $0x960] sm:$0xff]  ;;  %v4340_v36 = vld [vmem:[#allocation7 + $0x970] sm:$0xff]  ;;  %v4373_v26 = vld [vmem:[#allocation7 + $0xa78] sm:$0xff] }
 0x410   :  { %8613 = vmatpush1.bf16.msra.mxu0 %v8612_v3  ;;  %v4308_v3 = vld [vmem:[#allocation7 + $0x870] sm:$0xff] }
 0x411   :  { %8805 = vmatpush1.bf16.msra.mxu1 %v8804_v61  ;;  %8615 = vmatprep.subr.bf16.mxu0 %v8614_v44  ;;  %v4311_v61 = vld [vmem:[#allocation7 + $0x888] sm:$0xff]  ;;  %v8824_v16 = vpack.c.bf16 %v4308_v3, %v4304_v43  ;;  %v4349_v43 = vld [vmem:[#allocation7 + $0x9b8] sm:$0xff] }
 0x412   :  { %8807 = vmatprep.subr.bf16.mxu1 %v8806_v40  ;;  %v4315_v44 = vld [vmem:[#allocation7 + $0x8a8] sm:$0xff]  ;;  %v8632_v40 = vpack.c.bf16 %v4306_v34, %v4302_v19  ;;  %v4345_v34 = vld [vmem:[#allocation7 + $0x998] sm:$0xff] }
 0x413   :  { %v8634_v53 = vpack.c.bf16 %v4315_v44, %v4311_v61  ;;  %v4347_v19 = vld [vmem:[#allocation7 + $0x9a8] sm:$0xff]  ;;  %v4342_v44 = vld [vmem:[#allocation7 + $0x980] sm:$0xff] }
 0x414   :  { %8617 = vmatpush1.bf16.msra.mxu0 %v8616_v29  ;;  %v8826_v29 = vpack.c.bf16 %v4317_v14, %v4313_v12  ;;  %v4344_v12 = vld [vmem:[#allocation7 + $0x990] sm:$0xff]  ;;  %v8842_v14 = vpack.c.bf16 %v4349_v43, %v4345_v34 }
 0x415   :  { %8809 = vmatpush1.bf16.msra.mxu1 %v8808_v21  ;;  %8619 = vmatprep.subr.bf16.mxu0 %v8618_v31  ;;  %v4316_v21 = vld [vmem:[#allocation7 + $0x8b0] sm:$0xff]  ;;  %v4319_v31 = vld [vmem:[#allocation7 + $0x8c8] sm:$0xff] }
 0x416   :  { %8811 = vmatprep.subr.bf16.mxu1 %v8810_v51  ;;  %v8636_v51 = vpack.c.bf16 %v4314_v10, %v4310_v54  ;;  %v8828_v22 = vpack.c.bf16 %v4316_v21, %v4312_v59  ;;  %v8638_v30 = vpack.c.bf16 %v4323_v1, %v4319_v31  ;;  %v4353_v54 = vld [vmem:[#allocation7 + $0x9d8] sm:$0xff]  ;;  %v4350_v31 = vld [vmem:[#allocation7 + $0x9c0] sm:$0xff]  ;;  %v4376_v34 = vld [vmem:[#allocation7 + $0xa90] sm:$0xff] }
 0x417   :  { %v4357_v10 = vld [vmem:[#allocation7 + $0x9f8] sm:$0xff]  ;;  %v4354_v1 = vld [vmem:[#allocation7 + $0x9e0] sm:$0xff] }
 0x418   :  { %8621 = vmatpush1.bf16.msra.mxu0 %v8620_v8  ;;  %v8830_v8 = vpack.c.bf16 %v4325_v49, %v4321_v48  ;;  %v4352_v48 = vld [vmem:[#allocation7 + $0x9d0] sm:$0xff]  ;;  %v8846_v49 = vpack.c.bf16 %v4357_v10, %v4353_v54 }
 0x419   :  { %8813 = vmatpush1.bf16.msra.mxu1 %v8812_v41  ;;  %8623 = vmatprep.subr.bf16.mxu0 %v8622_v52  ;;  %v4324_v41 = vld [vmem:[#allocation7 + $0x8f0] sm:$0xff]  ;;  %v4327_v52 = vld [vmem:[#allocation7 + $0x908] sm:$0xff] }
 0x41a   :  { %8815 = vmatprep.subr.bf16.mxu1 %v8814_v18  ;;  %v8640_v18 = vpack.c.bf16 %v4322_v46, %v4318_v6  ;;  %v8832_v33 = vpack.c.bf16 %v4324_v41, %v4320_v38  ;;  %v8642_v57 = vpack.c.bf16 %v4331_v32, %v4327_v52  ;;  %v4361_v6 = vld [vmem:[#allocation7 + $0xa18] sm:$0xff]  ;;  %v8656_v38 = vpack.c.bf16 %v4354_v1, %v4350_v31  ;;  %v4358_v52 = vld [vmem:[#allocation7 + $0xa00] sm:$0xff]  ;;  %v4384_v54 = vld [vmem:[#allocation7 + $0xad0] sm:$0xff] }
 0x41b   :  { %v4365_v46 = vld [vmem:[#allocation7 + $0xa38] sm:$0xff]  ;;  %v4362_v32 = vld [vmem:[#allocation7 + $0xa20] sm:$0xff] }
 0x41c   :  { %8625 = vmatpush1.bf16.msra.mxu0 %v8624_v5  ;;  %v8834_v5 = vpack.c.bf16 %v4333_v15, %v4329_v23  ;;  %v4360_v23 = vld [vmem:[#allocation7 + $0xa10] sm:$0xff]  ;;  %v8850_v15 = vpack.c.bf16 %v4365_v46, %v4361_v6  ;;  %v4393_v31 = vld [vmem:[#allocation7 + $0xb18] sm:$0xff] }
 0x41d   :  { %8817 = vmatpush1.bf16.msra.mxu1 %v8816_v17  ;;  %8627 = vmatprep.subr.bf16.mxu0 %v8626_v47  ;;  %v4332_v17 = vld [vmem:[#allocation7 + $0x930] sm:$0xff]  ;;  %v4335_v47 = vld [vmem:[#allocation7 + $0x948] sm:$0xff]  ;;  %v4397_v1 = vld [vmem:[#allocation7 + $0xb38] sm:$0xff] }
 0x41e   :  { %8819 = vmatprep.subr.bf16.mxu1 %v8818_v56  ;;  %v4341_v56 = vld [vmem:[#allocation7 + $0x978] sm:$0xff]  ;;  %v8836_v60 = vpack.c.bf16 %v4332_v17, %v4328_v4  ;;  %v8646_v20 = vpack.c.bf16 %v4339_v39, %v4335_v47  ;;  %v8660_v4 = vpack.c.bf16 %v4362_v32, %v4358_v52  ;;  %v4366_v47 = vld [vmem:[#allocation7 + $0xa40] sm:$0xff]  ;;  %v4392_v6 = vld [vmem:[#allocation7 + $0xb10] sm:$0xff]  ;;  %v8866_v46 = vpack.c.bf16 %v4397_v1, %v4393_v31 }
 0x41f   :  { %4558 = vmatmul.mubr.f32.vlgmr.msra.gmra.mrb[26].mxu0 %v11340_v42  ;;  %v8838_v7 = vpack.c.bf16 %v4341_v56, %v4337_v63  ;;  %v4370_v39 = vld [vmem:[#allocation7 + $0xa60] sm:$0xff]  ;;  %v4368_v63 = vld [vmem:[#allocation7 + $0xa50] sm:$0xff]  ;;  %v8854_v56 = vpack.c.bf16 %v4373_v26, %v4369_v58  ;;  %v4401_v52 = vld [vmem:[#allocation7 + $0xb58] sm:$0xff] }
 0x420   :  { %4771 = vmatmul.mubr.f32.vlgmr.msra.gmra.mrb[26].mxu1 %v11340_v42  ;;  %8629 = vmatpush1.bf16.msra.mxu0 %v8628_v25  ;;  %v4336_v25 = vld [vmem:[#allocation7 + $0x950] sm:$0xff]  ;;  %v4405_v32 = vld [vmem:[#allocation7 + $0xb78] sm:$0xff]  ;;  %v4871_v31 = vld [vmem:[#allocation7 + $0x20] sm:$0xff] }
 0x421   :  { %4628 = vmatprep.mubr.f32.mxu0 %v11356_v62  ;;  %8821 = vmatpush1.bf16.msra.mxu1 %v8820_v45  ;;  %v4343_v45 = vld [vmem:[#allocation7 + $0x988] sm:$0xff]  ;;  %v8840_v3 = vpack.c.bf16 %v4340_v36, %v4336_v25  ;;  %v8664_v25 = vpack.c.bf16 %v4370_v39, %v4366_v47  ;;  %v4400_v58 = vld [vmem:[#allocation7 + $0xb50] sm:$0xff]  ;;  %v8870_v26 = vpack.c.bf16 %v4405_v32, %v4401_v52  ;;  %v4409_v47 = vld [vmem:[#allocation7 + $0xb98] sm:$0xff] }
 0x422   :  { %4841 = vmatprep.mubr.f32.mxu1 %v11356_v62  ;;  %8631 = vmatprep.subr.bf16.mxu0 %v8630_v9  ;;  %v8648_v9 = vpack.c.bf16 %v4338_v0, %v4334_v27  ;;  %v8650_v61 = vpack.c.bf16 %v4347_v19, %v4343_v45  ;;  %v4377_v27 = vld [vmem:[#allocation7 + $0xa98] sm:$0xff]  ;;  %v4374_v45 = vld [vmem:[#allocation7 + $0xa80] sm:$0xff]  ;;  %v4881_v32 = vld [vmem:[#allocation7 + $0x70] sm:$0xff] }
 0x423   :  { %8823 = vmatprep.subr.bf16.mxu1 %v8822_v2  ;;  %v4346_v2 = vld [vmem:[#allocation7 + $0x9a0] sm:$0xff]  ;;  %v4381_v0 = vld [vmem:[#allocation7 + $0xab8] sm:$0xff] }
 0x424   :  { %8633 = vmatpush1.bf16.msra.mxu0 %v8632_v40  ;;  %v4348_v40 = vld [vmem:[#allocation7 + $0x9b0] sm:$0xff]  ;;  %v8652_v59 = vpack.c.bf16 %v4346_v2, %v4342_v44  ;;  %v4378_v19 = vld [vmem:[#allocation7 + $0xaa0] sm:$0xff]  ;;  %v8858_v43 = vpack.c.bf16 %v4381_v0, %v4377_v27  ;;  %v4385_v44 = vld [vmem:[#allocation7 + $0xad8] sm:$0xff] }
 0x425   :  { %8825 = vmatpush1.bf16.msra.mxu1 %v8824_v16  ;;  %8635 = vmatprep.subr.bf16.mxu0 %v8634_v53  ;;  %v4351_v16 = vld [vmem:[#allocation7 + $0x9c8] sm:$0xff]  ;;  %v4389_v2 = vld [vmem:[#allocation7 + $0xaf8] sm:$0xff]  ;;  %v4408_v27 = vld [vmem:[#allocation7 + $0xb90] sm:$0xff] }
 0x426   :  { %8827 = vmatprep.subr.bf16.mxu1 %v8826_v29  ;;  %v4355_v53 = vld [vmem:[#allocation7 + $0x9e8] sm:$0xff]  ;;  %v8844_v29 = vpack.c.bf16 %v4348_v40, %v4344_v12  ;;  %v8668_v12 = vpack.c.bf16 %v4378_v19, %v4374_v45  ;;  %v8862_v10 = vpack.c.bf16 %v4389_v2, %v4385_v44  ;;  %v4413_v39 = vld [vmem:[#allocation7 + $0xbb8] sm:$0xff]  ;;  %v4416_v44 = vld [vmem:[#allocation7 + $0xbd0] sm:$0xff] }
 0x427   :  { %v8654_v21 = vpack.c.bf16 %v4355_v53, %v4351_v16  ;;  %v4382_v16 = vld [vmem:[#allocation7 + $0xac0] sm:$0xff]  ;;  %v8874_v0 = vpack.c.bf16 %v4413_v39, %v4409_v47  ;;  %v4417_v45 = vld [vmem:[#allocation7 + $0xbd8] sm:$0xff]  ;;  %v4885_v47 = vld [vmem:[#allocation7 + $0x90] sm:$0xff] }
 0x428   :  { %8637 = vmatpush1.bf16.msra.mxu0 %v8636_v51  ;;  %v4356_v51 = vld [vmem:[#allocation7 + $0x9f0] sm:$0xff]  ;;  %v4386_v53 = vld [vmem:[#allocation7 + $0xae0] sm:$0xff]  ;;  %v4421_v19 = vld [vmem:[#allocation7 + $0xbf8] sm:$0xff] }
 0x429   :  { %8829 = vmatpush1.bf16.msra.mxu1 %v8828_v22  ;;  %8639 = vmatprep.subr.bf16.mxu0 %v8638_v30  ;;  %v4359_v22 = vld [vmem:[#allocation7 + $0xa08] sm:$0xff]  ;;  %v8878_v2 = vpack.c.bf16 %v4421_v19, %v4417_v45  ;;  %v4893_v45 = vld [vmem:[#allocation7 + $0xd0] sm:$0xff] }
 0x42a   :  { %8831 = vmatprep.subr.bf16.mxu1 %v8830_v8  ;;  %v4363_v30 = vld [vmem:[#allocation7 + $0xa28] sm:$0xff]  ;;  %v8848_v8 = vpack.c.bf16 %v4356_v51, %v4352_v48  ;;  %v8672_v48 = vpack.c.bf16 %v4386_v53, %v4382_v16  ;;  %v4870_v16 = vld [vmem:[#allocation7 + $0x18] sm:$0xff] }
 0x42b   :  { %v8658_v41 = vpack.c.bf16 %v4363_v30, %v4359_v22  ;;  %v4390_v22 = vld [vmem:[#allocation7 + $0xb00] sm:$0xff]  ;;  %v4874_v53 = vld [vmem:[#allocation7 + $0x38] sm:$0xff] }
 0x42c   :  { %8641 = vmatpush1.bf16.msra.mxu0 %v8640_v18  ;;  %v4364_v18 = vld [vmem:[#allocation7 + $0xa30] sm:$0xff]  ;;  %v4394_v30 = vld [vmem:[#allocation7 + $0xb20] sm:$0xff]  ;;  %v9074_v1 = vpack.c.bf16 %v4874_v53, %v4870_v16 }
 0x42d   :  { %8833 = vmatpush1.bf16.msra.mxu1 %v8832_v33  ;;  %8643 = vmatprep.subr.bf16.mxu0 %v8642_v57  ;;  %v4367_v33 = vld [vmem:[#allocation7 + $0xa48] sm:$0xff]  ;;  %v4905_v53 = vld [vmem:[#allocation7 + $0x130] sm:$0xff] }
 0x42e   :  { %8835 = vmatprep.subr.bf16.mxu1 %v8834_v5  ;;  %v4371_v57 = vld [vmem:[#allocation7 + $0xa68] sm:$0xff]  ;;  %v8852_v5 = vpack.c.bf16 %v4364_v18, %v4360_v23  ;;  %v8676_v23 = vpack.c.bf16 %v4394_v30, %v4390_v22 }
 0x42f   :  { %v8662_v17 = vpack.c.bf16 %v4371_v57, %v4367_v33  ;;  %v4398_v33 = vld [vmem:[#allocation7 + $0xb40] sm:$0xff]  ;;  %v4880_v22 = vld [vmem:[#allocation7 + $0x68] sm:$0xff] }
 0x430   :  { %8645 = vmatpush1.bf16.msra.mxu0 %v8644_v55  ;;  %v4372_v55 = vld [vmem:[#allocation7 + $0xa70] sm:$0xff]  ;;  %v4402_v57 = vld [vmem:[#allocation7 + $0xb60] sm:$0xff] }
 0x431   :  { %8837 = vmatpush1.bf16.msra.mxu1 %v8836_v60  ;;  %8647 = vmatprep.subr.bf16.mxu0 %v8646_v20  ;;  %v4375_v60 = vld [vmem:[#allocation7 + $0xa88] sm:$0xff] }
 0x432   :  { %8839 = vmatprep.subr.bf16.mxu1 %v8838_v7  ;;  %v4379_v20 = vld [vmem:[#allocation7 + $0xaa8] sm:$0xff]  ;;  %v8856_v7 = vpack.c.bf16 %v4372_v55, %v4368_v63  ;;  %v8680_v63 = vpack.c.bf16 %v4402_v57, %v4398_v33  ;;  %v4886_v33 = vld [vmem:[#allocation7 + $0x98] sm:$0xff] }
 0x433   :  { %v8666_v36 = vpack.c.bf16 %v4379_v20, %v4375_v60  ;;  %v4406_v60 = vld [vmem:[#allocation7 + $0xb80] sm:$0xff]  ;;  %v4890_v57 = vld [vmem:[#allocation7 + $0xb8] sm:$0xff] }
 0x434   :  { %8649 = vmatpush1.bf16.msra.mxu0 %v8648_v9  ;;  %v4380_v9 = vld [vmem:[#allocation7 + $0xab0] sm:$0xff]  ;;  %v4410_v20 = vld [vmem:[#allocation7 + $0xba0] sm:$0xff]  ;;  %v9082_v39 = vpack.c.bf16 %v4890_v57, %v4886_v33 }
 0x435   :  { %8841 = vmatpush1.bf16.msra.mxu1 %v8840_v3  ;;  %8651 = vmatprep.subr.bf16.mxu0 %v8650_v61  ;;  %v4383_v3 = vld [vmem:[#allocation7 + $0xac8] sm:$0xff]  ;;  %v4921_v57 = vld [vmem:[#allocation7 + $0x1b0] sm:$0xff] }
 0x436   :  { %8843 = vmatprep.subr.bf16.mxu1 %v8842_v14  ;;  %v4387_v61 = vld [vmem:[#allocation7 + $0xae8] sm:$0xff]  ;;  %v8860_v14 = vpack.c.bf16 %v4380_v9, %v4376_v34  ;;  %v8684_v34 = vpack.c.bf16 %v4410_v20, %v4406_v60  ;;  %v4894_v60 = vld [vmem:[#allocation7 + $0xd8] sm:$0xff] }
 0x437   :  { %v8670_v40 = vpack.c.bf16 %v4387_v61, %v4383_v3  ;;  %v4414_v3 = vld [vmem:[#allocation7 + $0xbc0] sm:$0xff]  ;;  %v4898_v20 = vld [vmem:[#allocation7 + $0xf8] sm:$0xff] }
 0x438   :  { %8653 = vmatpush1.bf16.msra.mxu0 %v8652_v59  ;;  %v4388_v59 = vld [vmem:[#allocation7 + $0xaf0] sm:$0xff]  ;;  %v4418_v61 = vld [vmem:[#allocation7 + $0xbe0] sm:$0xff]  ;;  %v9086_v19 = vpack.c.bf16 %v4898_v20, %v4894_v60 }
 0x439   :  { %8845 = vmatpush1.bf16.msra.mxu1 %v8844_v29  ;;  %8655 = vmatprep.subr.bf16.mxu0 %v8654_v21  ;;  %v4391_v29 = vld [vmem:[#allocation7 + $0xb08] sm:$0xff] }
 0x43a   :  { %8847 = vmatprep.subr.bf16.mxu1 %v8846_v49  ;;  %v4395_v21 = vld [vmem:[#allocation7 + $0xb28] sm:$0xff]  ;;  %v8864_v49 = vpack.c.bf16 %v4388_v59, %v4384_v54  ;;  %v8688_v54 = vpack.c.bf16 %v4418_v61, %v4414_v3  ;;  %v4906_v3 = vld [vmem:[#allocation7 + $0x138] sm:$0xff] }
 0x43b   :  { %v8674_v51 = vpack.c.bf16 %v4395_v21, %v4391_v29  ;;  %v4867_v21 = vld [vmem:[#allocation7] sm:$0xff] }
 0x43c   :  { %8657 = vmatpush1.bf16.msra.mxu0 %v8656_v38  ;;  %v4396_v38 = vld [vmem:[#allocation7 + $0xb30] sm:$0xff]  ;;  %v8884_v30 = vpack.c.bf16 %v4871_v31, %v4867_v21 }
 0x43d   :  { %8849 = vmatpush1.bf16.msra.mxu1 %v8848_v8  ;;  %8659 = vmatprep.subr.bf16.mxu0 %v8658_v41  ;;  %v4399_v8 = vld [vmem:[#allocation7 + $0xb48] sm:$0xff] }
 0x43e   :  { %8851 = vmatprep.subr.bf16.mxu1 %v8850_v15  ;;  %v4403_v41 = vld [vmem:[#allocation7 + $0xb68] sm:$0xff]  ;;  %v8868_v15 = vpack.c.bf16 %v4396_v38, %v4392_v6  ;;  %v4878_v6 = vld [vmem:[#allocation7 + $0x58] sm:$0xff] }
 0x43f   :  { %v8678_v18 = vpack.c.bf16 %v4403_v41, %v4399_v8  ;;  %v4879_v8 = vld [vmem:[#allocation7 + $0x60] sm:$0xff]  ;;  %v4877_v41 = vld [vmem:[#allocation7 + $0x50] sm:$0xff] }
 0x440   :  { %8661 = vmatpush1.bf16.msra.mxu0 %v8660_v4  ;;  %v4404_v4 = vld [vmem:[#allocation7 + $0xb70] sm:$0xff] }
 0x441   :  { %8853 = vmatpush1.bf16.msra.mxu1 %v8852_v5  ;;  %8663 = vmatprep.subr.bf16.mxu0 %v8662_v17  ;;  %v4407_v5 = vld [vmem:[#allocation7 + $0xb88] sm:$0xff] }
 0x442   :  { %8855 = vmatprep.subr.bf16.mxu1 %v8854_v56  ;;  %v4411_v17 = vld [vmem:[#allocation7 + $0xba8] sm:$0xff]  ;;  %v8872_v56 = vpack.c.bf16 %v4404_v4, %v4400_v58 }
 0x443   :  { %v8682_v55 = vpack.c.bf16 %v4411_v17, %v4407_v5  ;;  %v4883_v5 = vld [vmem:[#allocation7 + $0x80] sm:$0xff] }
 0x444   :  { %8665 = vmatpush1.bf16.msra.mxu0 %v8664_v25  ;;  %v4412_v25 = vld [vmem:[#allocation7 + $0xbb0] sm:$0xff]  ;;  %v4887_v17 = vld [vmem:[#allocation7 + $0xa0] sm:$0xff] }
 0x445   :  { %8857 = vmatpush1.bf16.msra.mxu1 %v8856_v7  ;;  %8667 = vmatprep.subr.bf16.mxu0 %v8666_v36  ;;  %v4415_v7 = vld [vmem:[#allocation7 + $0xbc8] sm:$0xff] }
 0x446   :  { %8859 = vmatprep.subr.bf16.mxu1 %v8858_v43  ;;  %v4419_v36 = vld [vmem:[#allocation7 + $0xbe8] sm:$0xff]  ;;  %v8876_v43 = vpack.c.bf16 %v4412_v25, %v4408_v27  ;;  %v8892_v27 = vpack.c.bf16 %v4887_v17, %v4883_v5  ;;  %v4926_v17 = vld [vmem:[#allocation7 + $0x1d8] sm:$0xff] }
 0x447   :  { %v8686_v9 = vpack.c.bf16 %v4419_v36, %v4415_v7  ;;  %v4891_v7 = vld [vmem:[#allocation7 + $0xc0] sm:$0xff] }
 0x448   :  { %8669 = vmatpush1.bf16.msra.mxu0 %v8668_v12  ;;  %v4420_v12 = vld [vmem:[#allocation7 + $0xbf0] sm:$0xff]  ;;  %v4895_v36 = vld [vmem:[#allocation7 + $0xe0] sm:$0xff] }
 0x449   :  { %8861 = vmatpush1.bf16.msra.mxu1 %v8860_v14  ;;  %8671 = vmatprep.subr.bf16.mxu0 %v8670_v40  ;;  %v4868_v14 = vld [vmem:[#allocation7 + $0x8] sm:$0xff]  ;;  %v8880_v59 = vpack.c.bf16 %v4420_v12, %v4416_v44  ;;  %v8896_v61 = vpack.c.bf16 %v4895_v36, %v4891_v7  ;;  %v4899_v12 = vld [vmem:[#allocation7 + $0x100] sm:$0xff]  ;;  %v4925_v7 = vld [vmem:[#allocation7 + $0x1d0] sm:$0xff] }
 0x44a   :  { %8863 = vmatprep.subr.bf16.mxu1 %v8862_v10  ;;  %v4872_v40 = vld [vmem:[#allocation7 + $0x28] sm:$0xff]  ;;  %v1930_v10 = vadd.f32 %v11352_v28, %v11309_v37  ;;  %v4875_v28 = vld [vmem:[#allocation7 + $0x40] sm:$0xff] }
 0x44b   :  { %v8882_v29 = vpack.c.bf16 %v4872_v40, %v4868_v14  ;;  %v8888_v58 = vpack.c.bf16 %v4879_v8, %v4875_v28  ;;  %v4903_v14 = vld [vmem:[#allocation7 + $0x120] sm:$0xff]  ;;  %v4901_v40 = vld [vmem:[#allocation7 + $0x110] sm:$0xff]  ;;  %v4922_v28 = vld [vmem:[#allocation7 + $0x1b8] sm:$0xff] }
 0x44c   :  { %8673 = vmatpush1.bf16.msra.mxu0 %v8672_v48  ;;  %v4869_v48 = vld [vmem:[#allocation7 + $0x10] sm:$0xff]  ;;  %v11364_v38 = vmax.f32 %v1930_v10, 0.0  ;;  %v4912_v10 = vld [vmem:[#allocation7 + $0x168] sm:$0xff]  ;;  %v8900_v21 = vpack.c.bf16 %v4903_v14, %v4899_v12  ;;  %v9092_v31 = vpack.c.bf16 %v4905_v53, %v4901_v40  ;;  %v4931_v12 = vld [vmem:[#allocation7 + $0x200] sm:$0xff] }
 0x44d   :  { %8865 = vmatpush1.bf16.msra.mxu1 %v8864_v49  ;;  %8675 = vmatprep.subr.bf16.mxu0 %v8674_v51  ;;  %v4873_v49 = vld [vmem:[#allocation7 + $0x30] sm:$0xff]  ;;  %v4876_v51 = vld [vmem:[#allocation7 + $0x48] sm:$0xff]  ;;  %v4935_v14 = vld [vmem:[#allocation7 + $0x220] sm:$0xff] }
 0x44e   :  { %8867 = vmatprep.subr.bf16.mxu1 %v8866_v46  ;;  %v4882_v46 = vld [vmem:[#allocation7 + $0x78] sm:$0xff]  ;;  %v9076_v37 = vpack.c.bf16 %v4873_v49, %v4869_v48  ;;  %v8886_v52 = vpack.c.bf16 %v4880_v22, %v4876_v51  ;;  %v4907_v48 = vld [vmem:[#allocation7 + $0x140] sm:$0xff]  ;;  %v4909_v51 = vld [vmem:[#allocation7 + $0x150] sm:$0xff] }
 0x44f   :  { %v4911_v49 = vld [vmem:[#allocation7 + $0x160] sm:$0xff]  ;;  %v4933_v40 = vld [vmem:[#allocation7 + $0x210] sm:$0xff] }
 0x450   :  { %8677 = vmatpush1.bf16.msra.mxu0 %v8676_v23  ;;  %v4884_v23 = vld [vmem:[#allocation7 + $0x88] sm:$0xff]  ;;  %v8904_v8 = vpack.c.bf16 %v4911_v49, %v4907_v48  ;;  %v4937_v53 = vld [vmem:[#allocation7 + $0x230] sm:$0xff]  ;;  %v4939_v49 = vld [vmem:[#allocation7 + $0x240] sm:$0xff] }
 0x451   :  { %8869 = vmatpush1.bf16.msra.mxu1 %v8868_v15  ;;  %8679 = vmatprep.subr.bf16.mxu0 %v8678_v18  ;;  %v4888_v15 = vld [vmem:[#allocation7 + $0xa8] sm:$0xff]  ;;  %v9078_v18 = vpack.c.bf16 %v4882_v46, %v4878_v6 }
 0x452   :  { %8871 = vmatprep.subr.bf16.mxu1 %v8870_v26  ;;  %v9080_v26 = vpack.c.bf16 %v4881_v32, %v4877_v41  ;;  %v8890_v4 = vpack.c.bf16 %v4888_v15, %v4884_v23  ;;  %v4916_v6 = vld [vmem:[#allocation7 + $0x188] sm:$0xff]  ;;  %v4915_v32 = vld [vmem:[#allocation7 + $0x180] sm:$0xff]  ;;  %v4917_v15 = vld [vmem:[#allocation7 + $0x190] sm:$0xff] }
 0x453   :  { %v4920_v46 = vld [vmem:[#allocation7 + $0x1a8] sm:$0xff]  ;;  %v4919_v23 = vld [vmem:[#allocation7 + $0x1a0] sm:$0xff]  ;;  %v9100_v20 = vpack.c.bf16 %v4921_v57, %v4917_v15  ;;  %v4953_v57 = vld [vmem:[#allocation7 + $0x2b0] sm:$0xff] }
 0x454   :  { %8681 = vmatpush1.bf16.msra.mxu0 %v8680_v63  ;;  %v4889_v63 = vld [vmem:[#allocation7 + $0xb0] sm:$0xff]  ;;  %v4951_v15 = vld [vmem:[#allocation7 + $0x2a0] sm:$0xff] }
 0x455   :  { %8873 = vmatpush1.bf16.msra.mxu1 %v8872_v56  ;;  %8683 = vmatprep.subr.bf16.mxu0 %v8682_v55  ;;  %v4892_v56 = vld [vmem:[#allocation7 + $0xc8] sm:$0xff] }
 0x456   :  { %8875 = vmatprep.subr.bf16.mxu1 %v8874_v0  ;;  %v4896_v55 = vld [vmem:[#allocation7 + $0xe8] sm:$0xff]  ;;  %v9084_v0 = vpack.c.bf16 %v4889_v63, %v4885_v47  ;;  %v4930_v47 = vld [vmem:[#allocation7 + $0x1f8] sm:$0xff] }
 0x457   :  { %v8894_v25 = vpack.c.bf16 %v4896_v55, %v4892_v56  ;;  %v6973_v56 = vld [vmem:[#allocation8] ss:$0 sm:$0xff]  ;;  %v8908_v55 = vpack.c.bf16 %v4919_v23, %v4915_v32  ;;  %v9102_v36 = vpack.c.bf16 %v4930_v47, %v4926_v17 }
 0x458   :  { %8685 = vmatpush1.bf16.msra.mxu0 %v8684_v34  ;;  %v4900_v34 = vld [vmem:[#allocation7 + $0x108] sm:$0xff]  ;;  %v4947_v23 = vld [vmem:[#allocation7 + $0x280] sm:$0xff] }
 0x459   :  { %8877 = vmatpush1.bf16.msra.mxu1 %v8876_v43  ;;  %8687 = vmatprep.subr.bf16.mxu0 %v8686_v9  ;;  %v4904_v43 = vld [vmem:[#allocation7 + $0x128] sm:$0xff]  ;;  %v4902_v9 = vld [vmem:[#allocation7 + $0x118] sm:$0xff]  ;;  %v8924_v17 = vpack.c.bf16 %v4951_v15, %v4947_v23 }
 0x45a   :  { %8879 = vmatprep.subr.bf16.mxu1 %v8878_v2  ;;  %v8898_v2 = vpack.c.bf16 %v4904_v43, %v4900_v34  ;;  %v9090_v16 = vpack.c.bf16 %v4906_v3, %v4902_v9  ;;  %v4934_v43 = vld [vmem:[#allocation7 + $0x218] sm:$0xff] }
 0x45b   :  { %v4938_v9 = vld [vmem:[#allocation7 + $0x238] sm:$0xff] }
 0x45c   :  { %8689 = vmatpush1.bf16.msra.mxu0 %v8688_v54  ;;  %v4908_v54 = vld [vmem:[#allocation7 + $0x148] sm:$0xff] }
 0x45d   :  { %8881 = vmatpush1.bf16.msra.mxu1 %v8880_v59  ;;  %8883 = vmatprep.subr.bf16.mxu0 %v8882_v29  ;;  %v4910_v59 = vld [vmem:[#allocation7 + $0x158] sm:$0xff] }
 0x45e   :  { %9075 = vmatprep.subr.bf16.mxu1 %v9074_v1  ;;  %v4914_v29 = vld [vmem:[#allocation7 + $0x178] sm:$0xff]  ;;  %v8902_v1 = vpack.c.bf16 %v4912_v10, %v4908_v54  ;;  %v4940_v54 = vld [vmem:[#allocation7 + $0x248] sm:$0xff] }
 0x45f   :  { %4629 = vmatmul.mubr.f32.vlgmr.msra.gmra.mrb[26].mxu0 %v11364_v38  ;;  %v9094_v22 = vpack.c.bf16 %v4914_v29, %v4910_v59  ;;  %v4944_v10 = vld [vmem:[#allocation7 + $0x268] sm:$0xff]  ;;  %v4942_v29 = vld [vmem:[#allocation7 + $0x258] sm:$0xff] }
 0x460   :  { %4842 = vmatmul.mubr.f32.vlgmr.msra.gmra.mrb[26].mxu1 %v11364_v38  ;;  %8885 = vmatpush1.bf16.msra.mxu0 %v8884_v30  ;;  %v4913_v30 = vld [vmem:[#allocation7 + $0x170] sm:$0xff]  ;;  %v8918_v48 = vpack.c.bf16 %v4944_v10, %v4940_v54  ;;  %v4975_v54 = vld [vmem:[#allocation7 + $0x360] sm:$0xff] }
 0x461   :  { %5315 = vmatprep.mubr.f32.mxu0 %v11329_v50  ;;  %9077 = vmatpush1.bf16.msra.mxu1 %v9076_v37  ;;  %v4918_v37 = vld [vmem:[#allocation7 + $0x198] sm:$0xff]  ;;  %v9096_v41 = vpack.c.bf16 %v4913_v30, %v4909_v51  ;;  %v4943_v51 = vld [vmem:[#allocation7 + $0x260] sm:$0xff]  ;;  %v4973_v10 = vld [vmem:[#allocation7 + $0x350] sm:$0xff] }
 0x462   :  { %5528 = vmatprep.mubr.f32.mxu1 %v11329_v50  ;;  %8887 = vmatprep.subr.bf16.mxu0 %v8886_v52  ;;  %v4897_v50 = vld [vmem:[#allocation7 + $0xf0] sm:$0xff]  ;;  %v8906_v52 = vpack.c.bf16 %v4920_v46, %v4916_v6  ;;  %v9098_v33 = vpack.c.bf16 %v4922_v28, %v4918_v37  ;;  %v4948_v46 = vld [vmem:[#allocation7 + $0x288] sm:$0xff]  ;;  %v4950_v28 = vld [vmem:[#allocation7 + $0x298] sm:$0xff] }
 0x463   :  { %9079 = vmatprep.subr.bf16.mxu1 %v9078_v18  ;;  %v9088_v44 = vpack.c.bf16 %v4897_v50, %v4893_v45  ;;  %v4929_v45 = vld [vmem:[#allocation7 + $0x1f0] sm:$0xff]  ;;  %v4936_v50 = vld [vmem:[#allocation7 + $0x228] sm:$0xff] }
 0x464   :  { %8889 = vmatpush1.bf16.msra.mxu0 %v8888_v58  ;;  %v4924_v58 = vld [vmem:[#allocation7 + $0x1c8] sm:$0xff]  ;;  %v4945_v6 = vld [vmem:[#allocation7 + $0x270] sm:$0xff] }
 0x465   :  { %9081 = vmatpush1.bf16.msra.mxu1 %v9080_v26  ;;  %8891 = vmatprep.subr.bf16.mxu0 %v8890_v4  ;;  %v4928_v26 = vld [vmem:[#allocation7 + $0x1e8] sm:$0xff] }
 0x466   :  { %9083 = vmatprep.subr.bf16.mxu1 %v9082_v39  ;;  %v4952_v37 = vld [vmem:[#allocation7 + $0x2a8] sm:$0xff] }
 0x467   :  { %v8922_v32 = vpack.c.bf16 %v4952_v37, %v4948_v46  ;;  %v4981_v46 = vld [vmem:[#allocation7 + $0x390] sm:$0xff] }
 0x468   :  { %8893 = vmatpush1.bf16.msra.mxu0 %v8892_v27  ;;  %v8910_v27 = vpack.c.bf16 %v4928_v26, %v4924_v58  ;;  %v4956_v58 = vld [vmem:[#allocation7 + $0x2c8] sm:$0xff] }
 0x469   :  { %9085 = vmatpush1.bf16.msra.mxu1 %v9084_v0  ;;  %8895 = vmatprep.subr.bf16.mxu0 %v8894_v25  ;;  %v4923_v0 = vld [vmem:[#allocation7 + $0x1c0] sm:$0xff]  ;;  %v4960_v26 = vld [vmem:[#allocation7 + $0x2e8] sm:$0xff] }
 0x46a   :  { %9087 = vmatprep.subr.bf16.mxu1 %v9086_v19  ;;  %v4927_v25 = vld [vmem:[#allocation7 + $0x1e0] sm:$0xff]  ;;  %v4932_v19 = vld [vmem:[#allocation7 + $0x208] sm:$0xff] }
 0x46b   :  { %v8912_v3 = vpack.c.bf16 %v4927_v25, %v4923_v0  ;;  %v4968_v0 = vld [vmem:[#allocation7 + $0x328] sm:$0xff]  ;;  %v4966_v25 = vld [vmem:[#allocation7 + $0x318] sm:$0xff] }
 0x46c   :  { %8897 = vmatpush1.bf16.msra.mxu0 %v8896_v61 }
 0x46d   :  { %9089 = vmatpush1.bf16.msra.mxu1 %v9088_v44  ;;  %8899 = vmatprep.subr.bf16.mxu0 %v8898_v2  ;;  %v9104_v44 = vpack.c.bf16 %v4929_v45, %v4925_v7  ;;  %v8914_v2 = vpack.c.bf16 %v4936_v50, %v4932_v19  ;;  %v4970_v7 = vld [vmem:[#allocation7 + $0x338] sm:$0xff]  ;;  %v4963_v50 = vld [vmem:[#allocation7 + $0x300] sm:$0xff] }
 0x46e   :  { %9091 = vmatprep.subr.bf16.mxu1 %v9090_v16  ;;  %v9106_v16 = vpack.c.bf16 %v4938_v9, %v4934_v43  ;;  %v4965_v43 = vld [vmem:[#allocation7 + $0x310] sm:$0xff]  ;;  %v9122_v9 = vpack.c.bf16 %v4970_v7, %v4966_v25  ;;  %v5004_v7 = vld [vmem:[#allocation7 + $0x448] sm:$0xff] }
 0x46f   :  { %v5001_v25 = vld [vmem:[#allocation7 + $0x430] sm:$0xff] }
 0x470   :  { %8901 = vmatpush1.bf16.msra.mxu0 %v8900_v21  ;;  %v4946_v21 = vld [vmem:[#allocation7 + $0x278] sm:$0xff] }
 0x471   :  { %9093 = vmatpush1.bf16.msra.mxu1 %v9092_v31  ;;  %8903 = vmatprep.subr.bf16.mxu0 %v8902_v1  ;;  %v8916_v31 = vpack.c.bf16 %v4935_v14, %v4931_v12  ;;  %v9108_v1 = vpack.c.bf16 %v4937_v53, %v4933_v40  ;;  %v9110_v30 = vpack.c.bf16 %v4946_v21, %v4942_v29  ;;  %v4978_v12 = vld [vmem:[#allocation7 + $0x378] sm:$0xff]  ;;  %v4971_v53 = vld [vmem:[#allocation7 + $0x340] sm:$0xff]  ;;  %v4977_v29 = vld [vmem:[#allocation7 + $0x370] sm:$0xff] }
 0x472   :  { %v3801_v18 = vpop.f32.mrb[24].mxu0  ;;  %9095 = vmatprep.subr.bf16.mxu1 %v9094_v22  ;;  %v4941_v22 = vld [vmem:[#allocation7 + $0x250] sm:$0xff]  ;;  %v4980_v21 = vld [vmem:[#allocation7 + $0x388] sm:$0xff] }
 0x473   :  { %v4014_v4 = vpop.f32.mrb[24].mxu1  ;;  %v3803_v5 = vpop.f32.mrb[25].mxu0 }
 0x474   :  { %v4020_v39 = vmax.f32 %v3801_v18, %v3803_v5  ;;  %v4016_v63 = vpop.f32.mrb[25].mxu1  ;;  %8905 = vmatpush1.bf16.msra.mxu0 %v8904_v8  ;;  %v4954_v8 = vld [vmem:[#allocation7 + $0x2b8] sm:$0xff]  ;;  %v4949_v18 = vld [vmem:[#allocation7 + $0x290] sm:$0xff] }
 0x475   :  { %v4021_v60 = vmax.f32 %v4014_v4, %v4016_v63  ;;  %9097 = vmatpush1.bf16.msra.mxu1 %v9096_v41  ;;  %8907 = vmatprep.subr.bf16.mxu0 %v8906_v52  ;;  %v8920_v41 = vpack.c.bf16 %v4943_v51, %v4939_v49  ;;  %v9112_v52 = vpack.c.bf16 %v4945_v6, %v4941_v22  ;;  %v4958_v4 = vld [vmem:[#allocation7 + $0x2d8] sm:$0xff]  ;;  %v4955_v63 = vld [vmem:[#allocation7 + $0x2c0] sm:$0xff] }
 0x476   :  { %9099 = vmatprep.subr.bf16.mxu1 %v9098_v33  ;;  %v9114_v33 = vpack.c.bf16 %v4954_v8, %v4950_v28  ;;  %v4962_v5 = vld [vmem:[#allocation7 + $0x2f8] sm:$0xff]  ;;  %v9116_v47 = vpack.c.bf16 %v4953_v57, %v4949_v18  ;;  %v8936_v49 = vpack.c.bf16 %v4975_v54, %v4971_v53  ;;  %v9128_v51 = vpack.c.bf16 %v4977_v29, %v4973_v10  ;;  %v4983_v6 = vld [vmem:[#allocation7 + $0x3a0] sm:$0xff]  ;;  %v4985_v28 = vld [vmem:[#allocation7 + $0x3b0] sm:$0xff] }
 0x477   :  { %v4022_v34 = vmax.f32 %v4020_v39, %v4021_v60  ;;  %v8926_v39 = vpack.c.bf16 %v4960_v26, %v4956_v58  ;;  %v9118_v60 = vpack.c.bf16 %v4962_v5, %v4958_v4  ;;  %v4988_v8 = vld [vmem:[#allocation7 + $0x3c8] sm:$0xff]  ;;  %v9132_v15 = vpack.c.bf16 %v4985_v28, %v4981_v46  ;;  %v4991_v57 = vld [vmem:[#allocation7 + $0x3e0] sm:$0xff]  ;;  %v4989_v58 = vld [vmem:[#allocation7 + $0x3d0] sm:$0xff] }
 0x478   :  { %8909 = vmatpush1.bf16.msra.mxu0 %v8908_v55  ;;  %v4957_v55 = vld [vmem:[#allocation7 + $0x2d0] sm:$0xff]  ;;  %v4996_v5 = vld [vmem:[#allocation7 + $0x408] sm:$0xff]  ;;  %v5015_v29 = vld [vmem:[#allocation7 + $0x4a0] sm:$0xff] }
 0x479   :  { %v4029_v61 = vadd.f32 %v6973_v56, %v4022_v34  ;;  %9101 = vmatpush1.bf16.msra.mxu1 %v9100_v20  ;;  %8911 = vmatprep.subr.bf16.mxu0 %v8910_v27  ;;  %v4959_v56 = vld [vmem:[#allocation7 + $0x2e0] sm:$0xff]  ;;  %v4961_v20 = vld [vmem:[#allocation7 + $0x2f0] sm:$0xff]  ;;  %v4964_v27 = vld [vmem:[#allocation7 + $0x308] sm:$0xff] }
 0x47a   :  { %9103 = vmatprep.subr.bf16.mxu1 %v9102_v36  ;;  %v8928_v36 = vpack.c.bf16 %v4959_v56, %v4955_v63  ;;  %v9120_v45 = vpack.c.bf16 %v4961_v20, %v4957_v55  ;;  %v8930_v19 = vpack.c.bf16 %v4968_v0, %v4964_v27  ;;  %v4967_v34 = vld [vmem:[#allocation7 + $0x320] sm:$0xff]  ;;  %v4993_v4 = vld [vmem:[#allocation7 + $0x3f0] sm:$0xff] }
 0x47b   :  { %v4030_v59 = vmax.f32 %v4029_v61, 0.0  ;;  %v4972_v61 = vld [vmem:[#allocation7 + $0x348] sm:$0xff]  ;;  %v8932_v14 = vpack.c.bf16 %v4967_v34, %v4963_v50  ;;  %v9136_v56 = vpack.c.bf16 %v4993_v4, %v4989_v58  ;;  %v4999_v20 = vld [vmem:[#allocation7 + $0x420] sm:$0xff]  ;;  %v4997_v0 = vld [vmem:[#allocation7 + $0x410] sm:$0xff] }
 0x47c   :  { %8913 = vmatpush1.bf16.msra.mxu0 %v8912_v3  ;;  %v4969_v3 = vld [vmem:[#allocation7 + $0x330] sm:$0xff]  ;;  %v5010_v50 = vld [vmem:[#allocation7 + $0x478] sm:$0xff]  ;;  %v9140_v34 = vpack.c.bf16 %v5001_v25, %v4997_v0  ;;  %v5019_v46 = vld [vmem:[#allocation7 + $0x4c0] sm:$0xff] }
 0x47d   :  { %4031 = vst [vmem:[%s11456_s12] sm:$0xff] %v4030_v59  ;;  %9105 = vmatpush1.bf16.msra.mxu1 %v9104_v44  ;;  %8915 = vmatprep.subr.bf16.mxu0 %v8914_v2  ;;  %v4976_v44 = vld [vmem:[#allocation7 + $0x368] sm:$0xff]  ;;  %v4974_v2 = vld [vmem:[#allocation7 + $0x358] sm:$0xff]  ;;  %v9124_v40 = vpack.c.bf16 %v4969_v3, %v4965_v43  ;;  %v5003_v43 = vld [vmem:[#allocation7 + $0x440] sm:$0xff] }
 0x47e   :  { %9107 = vmatprep.subr.bf16.mxu1 %v9106_v16  ;;  %v8934_v16 = vpack.c.bf16 %v4976_v44, %v4972_v61  ;;  %v9126_v59 = vpack.c.bf16 %v4978_v12, %v4974_v2  ;;  %v5005_v3 = vld [vmem:[#allocation7 + $0x450] sm:$0xff]  ;;  %v5012_v2 = vld [vmem:[#allocation7 + $0x488] sm:$0xff]  ;;  %v5027_v58 = vld [vmem:[#allocation7 + $0x500] sm:$0xff] }
 0x47f   :  { %v5009_v44 = vld [vmem:[#allocation7 + $0x470] sm:$0xff]  ;;  %v5016_v12 = vld [vmem:[#allocation7 + $0x4a8] sm:$0xff]  ;;  %v5039_v0 = vld [vmem:[#allocation7 + $0x560] sm:$0xff] }
 0x480   :  { %8917 = vmatpush1.bf16.msra.mxu0 %v8916_v31  ;;  %v4984_v31 = vld [vmem:[#allocation7 + $0x3a8] sm:$0xff]  ;;  %v9144_v54 = vpack.c.bf16 %v5009_v44, %v5005_v3  ;;  %v8954_v10 = vpack.c.bf16 %v5016_v12, %v5012_v2  ;;  %v5021_v28 = vld [vmem:[#allocation7 + $0x4d0] sm:$0xff]  ;;  %v5047_v44 = vld [vmem:[#allocation7 + $0x5a0] sm:$0xff] }
 0x481   :  { %9109 = vmatpush1.bf16.msra.mxu1 %v9108_v1  ;;  %8919 = vmatprep.subr.bf16.mxu0 %v8918_v48  ;;  %v4982_v1 = vld [vmem:[#allocation7 + $0x398] sm:$0xff]  ;;  %v8938_v22 = vpack.c.bf16 %v4984_v31, %v4980_v21  ;;  %v5013_v21 = vld [vmem:[#allocation7 + $0x490] sm:$0xff] }
 0x482   :  { %9111 = vmatprep.subr.bf16.mxu1 %v9110_v30  ;;  %v4986_v48 = vld [vmem:[#allocation7 + $0x3b8] sm:$0xff]  ;;  %v4979_v30 = vld [vmem:[#allocation7 + $0x380] sm:$0xff]  ;;  %v5029_v4 = vld [vmem:[#allocation7 + $0x510] sm:$0xff] }
 0x483   :  { %v9130_v37 = vpack.c.bf16 %v4986_v48, %v4982_v1  ;;  %v8940_v23 = vpack.c.bf16 %v4983_v6, %v4979_v30  ;;  %v5017_v1 = vld [vmem:[#allocation7 + $0x4b0] sm:$0xff]  ;;  %v5020_v48 = vld [vmem:[#allocation7 + $0x4c8] sm:$0xff] }
 0x484   :  { %8921 = vmatpush1.bf16.msra.mxu0 %v8920_v41  ;;  %v4992_v41 = vld [vmem:[#allocation7 + $0x3e8] sm:$0xff]  ;;  %v9148_v30 = vpack.c.bf16 %v5017_v1, %v5013_v21  ;;  %v5037_v25 = vld [vmem:[#allocation7 + $0x550] sm:$0xff]  ;;  %v5051_v21 = vld [vmem:[#allocation7 + $0x5c0] sm:$0xff] }
 0x485   :  { %9113 = vmatpush1.bf16.msra.mxu1 %v9112_v52  ;;  %8923 = vmatprep.subr.bf16.mxu0 %v8922_v32  ;;  %v4990_v52 = vld [vmem:[#allocation7 + $0x3d8] sm:$0xff]  ;;  %v8942_v18 = vpack.c.bf16 %v4992_v41, %v4988_v8  ;;  %v5025_v41 = vld [vmem:[#allocation7 + $0x4f0] sm:$0xff] }
 0x486   :  { %9115 = vmatprep.subr.bf16.mxu1 %v9114_v33  ;;  %v4994_v32 = vld [vmem:[#allocation7 + $0x3f8] sm:$0xff]  ;;  %v4987_v33 = vld [vmem:[#allocation7 + $0x3c0] sm:$0xff]  ;;  %v5045_v2 = vld [vmem:[#allocation7 + $0x590] sm:$0xff] }
 0x487   :  { %v9134_v26 = vpack.c.bf16 %v4994_v32, %v4990_v52  ;;  %v8944_v63 = vpack.c.bf16 %v4991_v57, %v4987_v33  ;;  %v5028_v52 = vld [vmem:[#allocation7 + $0x508] sm:$0xff]  ;;  %v9152_v33 = vpack.c.bf16 %v5025_v41, %v5021_v28  ;;  %v5053_v1 = vld [vmem:[#allocation7 + $0x5d0] sm:$0xff]  ;;  %v5059_v28 = vld [vmem:[#allocation7 + $0x600] sm:$0xff] }
 0x488   :  { %8925 = vmatpush1.bf16.msra.mxu0 %v8924_v17  ;;  %v5000_v17 = vld [vmem:[#allocation7 + $0x428] sm:$0xff]  ;;  %v5061_v41 = vld [vmem:[#allocation7 + $0x610] sm:$0xff] }
 0x489   :  { %9117 = vmatpush1.bf16.msra.mxu1 %v9116_v47  ;;  %8927 = vmatprep.subr.bf16.mxu0 %v8926_v39  ;;  %v4998_v47 = vld [vmem:[#allocation7 + $0x418] sm:$0xff]  ;;  %v8946_v55 = vpack.c.bf16 %v5000_v17, %v4996_v5  ;;  %v5032_v32 = vld [vmem:[#allocation7 + $0x528] sm:$0xff]  ;;  %v5033_v17 = vld [vmem:[#allocation7 + $0x530] sm:$0xff] }
 0x48a   :  { %9119 = vmatprep.subr.bf16.mxu1 %v9118_v60  ;;  %v5002_v39 = vld [vmem:[#allocation7 + $0x438] sm:$0xff]  ;;  %v4995_v60 = vld [vmem:[#allocation7 + $0x400] sm:$0xff]  ;;  %v8962_v57 = vpack.c.bf16 %v5032_v32, %v5028_v52  ;;  %v5065_v32 = vld [vmem:[#allocation7 + $0x630] sm:$0xff] }
 0x48b   :  { %v9138_v27 = vpack.c.bf16 %v5002_v39, %v4998_v47  ;;  %v5036_v47 = vld [vmem:[#allocation7 + $0x548] sm:$0xff] }
 0x48c   :  { %8929 = vmatpush1.bf16.msra.mxu0 %v8928_v36  ;;  %v5008_v36 = vld [vmem:[#allocation7 + $0x468] sm:$0xff] }
 0x48d   :  { %9121 = vmatpush1.bf16.msra.mxu1 %v9120_v45  ;;  %8931 = vmatprep.subr.bf16.mxu0 %v8930_v19  ;;  %v8948_v45 = vpack.c.bf16 %v4999_v20, %v4995_v60  ;;  %v5006_v19 = vld [vmem:[#allocation7 + $0x458] sm:$0xff]  ;;  %v8950_v61 = vpack.c.bf16 %v5008_v36, %v5004_v7  ;;  %v5040_v39 = vld [vmem:[#allocation7 + $0x568] sm:$0xff]  ;;  %v9156_v60 = vpack.c.bf16 %v5033_v17, %v5029_v4  ;;  %v5041_v36 = vld [vmem:[#allocation7 + $0x570] sm:$0xff] }
 0x48e   :  { %9123 = vmatprep.subr.bf16.mxu1 %v9122_v9  ;;  %v5007_v9 = vld [vmem:[#allocation7 + $0x460] sm:$0xff]  ;;  %v8966_v20 = vpack.c.bf16 %v5040_v39, %v5036_v47  ;;  %v5069_v17 = vld [vmem:[#allocation7 + $0x650] sm:$0xff] }
 0x48f   :  { %v8952_v53 = vpack.c.bf16 %v5007_v9, %v5003_v43  ;;  %v9160_v9 = vpack.c.bf16 %v5041_v36, %v5037_v25  ;;  %v5067_v4 = vld [vmem:[#allocation7 + $0x640] sm:$0xff]  ;;  %v5073_v39 = vld [vmem:[#allocation7 + $0x670] sm:$0xff] }
 0x490   :  { %8933 = vmatpush1.bf16.msra.mxu0 %v8932_v14  ;;  %v9142_v14 = vpack.c.bf16 %v5010_v50, %v5006_v19  ;;  %v5048_v19 = vld [vmem:[#allocation7 + $0x5a8] sm:$0xff]  ;;  %v5046_v50 = vld [vmem:[#allocation7 + $0x598] sm:$0xff]  ;;  %v5075_v25 = vld [vmem:[#allocation7 + $0x680] sm:$0xff] }
 0x491   :  { %9125 = vmatpush1.bf16.msra.mxu1 %v9124_v40  ;;  %8935 = vmatprep.subr.bf16.mxu0 %v8934_v16  ;;  %v5014_v40 = vld [vmem:[#allocation7 + $0x498] sm:$0xff]  ;;  %v5077_v36 = vld [vmem:[#allocation7 + $0x690] sm:$0xff] }
 0x492   :  { %9127 = vmatprep.subr.bf16.mxu1 %v9126_v59  ;;  %v5018_v16 = vld [vmem:[#allocation7 + $0x4b8] sm:$0xff]  ;;  %v5011_v59 = vld [vmem:[#allocation7 + $0x480] sm:$0xff] }
 0x493   :  { %v9146_v31 = vpack.c.bf16 %v5018_v16, %v5014_v40  ;;  %v5052_v40 = vld [vmem:[#allocation7 + $0x5c8] sm:$0xff] }
 0x494   :  { %8937 = vmatpush1.bf16.msra.mxu0 %v8936_v49  ;;  %v5024_v49 = vld [vmem:[#allocation7 + $0x4e8] sm:$0xff] }
 0x495   :  { %9129 = vmatpush1.bf16.msra.mxu1 %v9128_v51  ;;  %8939 = vmatprep.subr.bf16.mxu0 %v8938_v22  ;;  %v5022_v51 = vld [vmem:[#allocation7 + $0x4d8] sm:$0xff]  ;;  %v8956_v22 = vpack.c.bf16 %v5015_v29, %v5011_v59  ;;  %v8958_v6 = vpack.c.bf16 %v5024_v49, %v5020_v48  ;;  %v5056_v16 = vld [vmem:[#allocation7 + $0x5e8] sm:$0xff]  ;;  %v5057_v49 = vld [vmem:[#allocation7 + $0x5f0] sm:$0xff] }
 0x496   :  { %9131 = vmatprep.subr.bf16.mxu1 %v9130_v37  ;;  %v5023_v37 = vld [vmem:[#allocation7 + $0x4e0] sm:$0xff]  ;;  %v8974_v29 = vpack.c.bf16 %v5056_v16, %v5052_v40  ;;  %v5089_v16 = vld [vmem:[#allocation7 + $0x6f0] sm:$0xff] }
 0x498   :  { %8941 = vmatpush1.bf16.msra.mxu0 %v8940_v23  ;;  %v5030_v23 = vld [vmem:[#allocation7 + $0x518] sm:$0xff] }
 0x499   :  { %9133 = vmatpush1.bf16.msra.mxu1 %v9132_v15  ;;  %8943 = vmatprep.subr.bf16.mxu0 %v8942_v18  ;;  %v5034_v15 = vld [vmem:[#allocation7 + $0x538] sm:$0xff]  ;;  %v8960_v18 = vpack.c.bf16 %v5023_v37, %v5019_v46  ;;  %v9168_v46 = vpack.c.bf16 %v5057_v49, %v5053_v1  ;;  %v5091_v1 = vld [vmem:[#allocation7 + $0x700] sm:$0xff]  ;;  %v5093_v49 = vld [vmem:[#allocation7 + $0x710] sm:$0xff] }
 0x49a   :  { %9135 = vmatprep.subr.bf16.mxu1 %v9134_v26  ;;  %v5031_v26 = vld [vmem:[#allocation7 + $0x520] sm:$0xff]  ;;  %v9154_v5 = vpack.c.bf16 %v5034_v15, %v5030_v23  ;;  %v5068_v23 = vld [vmem:[#allocation7 + $0x648] sm:$0xff] }
 0x49b   :  { %v5072_v15 = vld [vmem:[#allocation7 + $0x668] sm:$0xff] }
 0x49c   :  { %8945 = vmatpush1.bf16.msra.mxu0 %v8944_v63  ;;  %v5038_v63 = vld [vmem:[#allocation7 + $0x558] sm:$0xff] }
 0x49d   :  { %9137 = vmatpush1.bf16.msra.mxu1 %v9136_v56  ;;  %8947 = vmatprep.subr.bf16.mxu0 %v8946_v55  ;;  %v5042_v56 = vld [vmem:[#allocation7 + $0x578] sm:$0xff]  ;;  %v8964_v55 = vpack.c.bf16 %v5031_v26, %v5027_v58  ;;  %v9172_v58 = vpack.c.bf16 %v5065_v32, %v5061_v41  ;;  %v8982_v26 = vpack.c.bf16 %v5072_v15, %v5068_v23  ;;  %v5099_v41 = vld [vmem:[#allocation7 + $0x740] sm:$0xff]  ;;  %v5101_v32 = vld [vmem:[#allocation7 + $0x750] sm:$0xff] }
 0x49e   :  { %9139 = vmatprep.subr.bf16.mxu1 %v9138_v27  ;;  %v5035_v27 = vld [vmem:[#allocation7 + $0x540] sm:$0xff]  ;;  %v9158_v7 = vpack.c.bf16 %v5042_v56, %v5038_v63  ;;  %v5076_v63 = vld [vmem:[#allocation7 + $0x688] sm:$0xff]  ;;  %v5105_v15 = vld [vmem:[#allocation7 + $0x770] sm:$0xff] }
 0x49f   :  { %5316 = vmatmul.mubr.f32.vlgmr.msra.gmra.mrb[28].mxu0 %v11340_v42  ;;  %v8968_v43 = vpack.c.bf16 %v5039_v0, %v5035_v27  ;;  %v5080_v56 = vld [vmem:[#allocation7 + $0x6a8] sm:$0xff]  ;;  %v9176_v27 = vpack.c.bf16 %v5073_v39, %v5069_v17  ;;  %v5107_v17 = vld [vmem:[#allocation7 + $0x780] sm:$0xff]  ;;  %v5109_v39 = vld [vmem:[#allocation7 + $0x790] sm:$0xff] }
 0x4a0   :  { %5529 = vmatmul.mubr.f32.vlgmr.msra.gmra.mrb[28].mxu1 %v11340_v42  ;;  %8949 = vmatpush1.bf16.msra.mxu0 %v8948_v45  ;;  %v5026_v42 = vld [vmem:[#allocation7 + $0x4f8] sm:$0xff]  ;;  %v5044_v45 = vld [vmem:[#allocation7 + $0x588] sm:$0xff]  ;;  %v8986_v0 = vpack.c.bf16 %v5080_v56, %v5076_v63  ;;  %v5113_v56 = vld [vmem:[#allocation7 + $0x7b0] sm:$0xff] }
 0x4a1   :  { %5386 = vmatprep.mubr.f32.mxu0 %v11356_v62  ;;  %9141 = vmatpush1.bf16.msra.mxu1 %v9140_v34  ;;  %v9150_v8 = vpack.c.bf16 %v5026_v42, %v5022_v51  ;;  %v5050_v34 = vld [vmem:[#allocation7 + $0x5b8] sm:$0xff]  ;;  %v8970_v3 = vpack.c.bf16 %v5048_v19, %v5044_v45  ;;  %v5060_v51 = vld [vmem:[#allocation7 + $0x608] sm:$0xff]  ;;  %v5081_v19 = vld [vmem:[#allocation7 + $0x6b0] sm:$0xff] }
 0x4a2   :  { %5599 = vmatprep.mubr.f32.mxu1 %v11356_v62  ;;  %8951 = vmatprep.subr.bf16.mxu0 %v8950_v61  ;;  %v5043_v61 = vld [vmem:[#allocation7 + $0x580] sm:$0xff]  ;;  %v9162_v12 = vpack.c.bf16 %v5050_v34, %v5046_v50  ;;  %v5064_v42 = vld [vmem:[#allocation7 + $0x628] sm:$0xff] }
 0x4a3   :  { %9143 = vmatprep.subr.bf16.mxu1 %v9142_v14  ;;  %v5049_v14 = vld [vmem:[#allocation7 + $0x5b0] sm:$0xff]  ;;  %v8978_v37 = vpack.c.bf16 %v5064_v42, %v5060_v51  ;;  %v5084_v50 = vld [vmem:[#allocation7 + $0x6c8] sm:$0xff] }
 0x4a4   :  { %8953 = vmatpush1.bf16.msra.mxu0 %v8952_v53  ;;  %v5054_v53 = vld [vmem:[#allocation7 + $0x5d8] sm:$0xff]  ;;  %v9164_v59 = vpack.c.bf16 %v5049_v14, %v5045_v2  ;;  %v5088_v34 = vld [vmem:[#allocation7 + $0x6e8] sm:$0xff]  ;;  %v5083_v2 = vld [vmem:[#allocation7 + $0x6c0] sm:$0xff] }
 0x4a5   :  { %9145 = vmatpush1.bf16.msra.mxu1 %v9144_v54  ;;  %8955 = vmatprep.subr.bf16.mxu0 %v8954_v10  ;;  %v5058_v54 = vld [vmem:[#allocation7 + $0x5f8] sm:$0xff]  ;;  %v8972_v10 = vpack.c.bf16 %v5047_v44, %v5043_v61  ;;  %v9180_v61 = vpack.c.bf16 %v5081_v19, %v5077_v36  ;;  %v8990_v44 = vpack.c.bf16 %v5088_v34, %v5084_v50  ;;  %v5085_v14 = vld [vmem:[#allocation7 + $0x6d0] sm:$0xff]  ;;  %v5115_v36 = vld [vmem:[#allocation7 + $0x7c0] sm:$0xff] }
 0x4a6   :  { %9147 = vmatprep.subr.bf16.mxu1 %v9146_v31  ;;  %v5055_v31 = vld [vmem:[#allocation7 + $0x5e0] sm:$0xff]  ;;  %v9166_v48 = vpack.c.bf16 %v5058_v54, %v5054_v53  ;;  %v5092_v53 = vld [vmem:[#allocation7 + $0x708] sm:$0xff]  ;;  %v5097_v42 = vld [vmem:[#allocation7 + $0x730] sm:$0xff] }
 0x4a7   :  { %v5096_v54 = vld [vmem:[#allocation7 + $0x728] sm:$0xff]  ;;  %v5117_v19 = vld [vmem:[#allocation7 + $0x7d0] sm:$0xff] }
 0x4a8   :  { %8957 = vmatpush1.bf16.msra.mxu0 %v8956_v22  ;;  %v5062_v22 = vld [vmem:[#allocation7 + $0x618] sm:$0xff]  ;;  %v5121_v34 = vld [vmem:[#allocation7 + $0x7f0] sm:$0xff] }
 0x4a9   :  { %9149 = vmatpush1.bf16.msra.mxu1 %v9148_v30  ;;  %8959 = vmatprep.subr.bf16.mxu0 %v8958_v6  ;;  %v5066_v30 = vld [vmem:[#allocation7 + $0x638] sm:$0xff]  ;;  %v8976_v6 = vpack.c.bf16 %v5055_v31, %v5051_v21  ;;  %v9184_v21 = vpack.c.bf16 %v5089_v16, %v5085_v14  ;;  %v8994_v31 = vpack.c.bf16 %v5096_v54, %v5092_v53  ;;  %v5123_v14 = vld [vmem:[#allocation7 + $0x800] sm:$0xff]  ;;  %v5125_v53 = vld [vmem:[#allocation7 + $0x810] sm:$0xff] }
 0x4aa   :  { %9151 = vmatprep.subr.bf16.mxu1 %v9150_v8  ;;  %v5063_v8 = vld [vmem:[#allocation7 + $0x620] sm:$0xff]  ;;  %v9170_v52 = vpack.c.bf16 %v5066_v30, %v5062_v22  ;;  %v5100_v22 = vld [vmem:[#allocation7 + $0x748] sm:$0xff]  ;;  %v5129_v54 = vld [vmem:[#allocation7 + $0x830] sm:$0xff] }
 0x4ab   :  { %v5104_v30 = vld [vmem:[#allocation7 + $0x768] sm:$0xff] }
 0x4ac   :  { %8961 = vmatpush1.bf16.msra.mxu0 %v8960_v18  ;;  %v5070_v18 = vld [vmem:[#allocation7 + $0x658] sm:$0xff] }
 0x4ad   :  { %9153 = vmatpush1.bf16.msra.mxu1 %v9152_v33  ;;  %8963 = vmatprep.subr.bf16.mxu0 %v8962_v57  ;;  %v5074_v33 = vld [vmem:[#allocation7 + $0x678] sm:$0xff]  ;;  %v8980_v57 = vpack.c.bf16 %v5063_v8, %v5059_v28  ;;  %v9188_v28 = vpack.c.bf16 %v5097_v42, %v5093_v49  ;;  %v8998_v8 = vpack.c.bf16 %v5104_v30, %v5100_v22  ;;  %v5135_v42 = vld [vmem:[#allocation7 + $0x860] sm:$0xff]  ;;  %v5133_v22 = vld [vmem:[#allocation7 + $0x850] sm:$0xff] }
 0x4ae   :  { %9155 = vmatprep.subr.bf16.mxu1 %v9154_v5  ;;  %v5071_v5 = vld [vmem:[#allocation7 + $0x660] sm:$0xff]  ;;  %v9174_v47 = vpack.c.bf16 %v5074_v33, %v5070_v18  ;;  %v5108_v18 = vld [vmem:[#allocation7 + $0x788] sm:$0xff]  ;;  %v9204_v49 = vpack.c.bf16 %v5129_v54, %v5125_v53 }
 0x4af   :  { %v5112_v33 = vld [vmem:[#allocation7 + $0x7a8] sm:$0xff]  ;;  %v5163_v54 = vld [vmem:[#allocation7 + $0x940] sm:$0xff] }
 0x4b0   :  { %8965 = vmatpush1.bf16.msra.mxu0 %v8964_v55  ;;  %v5078_v55 = vld [vmem:[#allocation7 + $0x698] sm:$0xff] }
 0x4b1   :  { %9157 = vmatpush1.bf16.msra.mxu1 %v9156_v60  ;;  %8967 = vmatprep.subr.bf16.mxu0 %v8966_v20  ;;  %v5082_v60 = vld [vmem:[#allocation7 + $0x6b8] sm:$0xff]  ;;  %v8984_v20 = vpack.c.bf16 %v5071_v5, %v5067_v4  ;;  %v9192_v4 = vpack.c.bf16 %v5105_v15, %v5101_v32  ;;  %v9002_v5 = vpack.c.bf16 %v5112_v33, %v5108_v18  ;;  %v5139_v15 = vld [vmem:[#allocation7 + $0x880] sm:$0xff]  ;;  %v5141_v33 = vld [vmem:[#allocation7 + $0x890] sm:$0xff] }
 0x4b2   :  { %9159 = vmatprep.subr.bf16.mxu1 %v9158_v7  ;;  %v5079_v7 = vld [vmem:[#allocation7 + $0x6a0] sm:$0xff]  ;;  %v9178_v45 = vpack.c.bf16 %v5082_v60, %v5078_v55  ;;  %v5116_v55 = vld [vmem:[#allocation7 + $0x7c8] sm:$0xff] }
 0x4b3   :  { %v5120_v60 = vld [vmem:[#allocation7 + $0x7e8] sm:$0xff]  ;;  %v5143_v18 = vld [vmem:[#allocation7 + $0x8a0] sm:$0xff] }
 0x4b4   :  { %8969 = vmatpush1.bf16.msra.mxu0 %v8968_v43  ;;  %v5086_v43 = vld [vmem:[#allocation7 + $0x6d8] sm:$0xff] }
 0x4b5   :  { %9161 = vmatpush1.bf16.msra.mxu1 %v9160_v9  ;;  %8971 = vmatprep.subr.bf16.mxu0 %v8970_v3  ;;  %v5090_v9 = vld [vmem:[#allocation7 + $0x6f8] sm:$0xff]  ;;  %v8988_v3 = vpack.c.bf16 %v5079_v7, %v5075_v25  ;;  %v9196_v25 = vpack.c.bf16 %v5113_v56, %v5109_v39  ;;  %v9006_v7 = vpack.c.bf16 %v5120_v60, %v5116_v55  ;;  %v5147_v56 = vld [vmem:[#allocation7 + $0x8c0] sm:$0xff]  ;;  %v5149_v60 = vld [vmem:[#allocation7 + $0x8d0] sm:$0xff] }
 0x4b6   :  { %9163 = vmatprep.subr.bf16.mxu1 %v9162_v12  ;;  %v5087_v12 = vld [vmem:[#allocation7 + $0x6e0] sm:$0xff]  ;;  %v9182_v40 = vpack.c.bf16 %v5090_v9, %v5086_v43  ;;  %v5124_v43 = vld [vmem:[#allocation7 + $0x808] sm:$0xff] }
 0x4b7   :  { %v5128_v9 = vld [vmem:[#allocation7 + $0x828] sm:$0xff]  ;;  %v5151_v55 = vld [vmem:[#allocation7 + $0x8e0] sm:$0xff] }
 0x4b8   :  { %8973 = vmatpush1.bf16.msra.mxu0 %v8972_v10  ;;  %v5094_v10 = vld [vmem:[#allocation7 + $0x718] sm:$0xff] }
 0x4b9   :  { %9165 = vmatpush1.bf16.msra.mxu1 %v9164_v59  ;;  %8975 = vmatprep.subr.bf16.mxu0 %v8974_v29  ;;  %v5098_v59 = vld [vmem:[#allocation7 + $0x738] sm:$0xff]  ;;  %v8992_v29 = vpack.c.bf16 %v5087_v12, %v5083_v2  ;;  %v9200_v2 = vpack.c.bf16 %v5121_v34, %v5117_v19  ;;  %v9010_v12 = vpack.c.bf16 %v5128_v9, %v5124_v43  ;;  %v5155_v34 = vld [vmem:[#allocation7 + $0x900] sm:$0xff]  ;;  %v5157_v9 = vld [vmem:[#allocation7 + $0x910] sm:$0xff] }
 0x4ba   :  { %9167 = vmatprep.subr.bf16.mxu1 %v9166_v48  ;;  %v5095_v48 = vld [vmem:[#allocation7 + $0x720] sm:$0xff]  ;;  %v9186_v51 = vpack.c.bf16 %v5098_v59, %v5094_v10  ;;  %v9823_v10 = vld [vmem:[#allocation5] ss:$0 sm:$0xff] }
 0x4bb   :  { %v2691_v59 = vadd.f32 %v9823_v10, %v11331_v35  ;;  %v5159_v43 = vld [vmem:[#allocation7 + $0x920] sm:$0xff] }
 0x4bc   :  { %8977 = vmatpush1.bf16.msra.mxu0 %v8976_v6  ;;  %v5102_v6 = vld [vmem:[#allocation7 + $0x758] sm:$0xff]  ;;  %v5167_v10 = vld [vmem:[#allocation7 + $0x960] sm:$0xff] }
 0x4bd   :  { %9169 = vmatpush1.bf16.msra.mxu1 %v9168_v46  ;;  %8979 = vmatprep.subr.bf16.mxu0 %v8978_v37  ;;  %v5106_v46 = vld [vmem:[#allocation7 + $0x778] sm:$0xff]  ;;  %v8996_v37 = vpack.c.bf16 %v5095_v48, %v5091_v1 }
 0x4be   :  { %9171 = vmatprep.subr.bf16.mxu1 %v9170_v52  ;;  %v5103_v52 = vld [vmem:[#allocation7 + $0x760] sm:$0xff]  ;;  %v9190_v23 = vpack.c.bf16 %v5106_v46, %v5102_v6  ;;  %v5134_v1 = vld [vmem:[#allocation7 + $0x858] sm:$0xff]  ;;  %v5137_v6 = vld [vmem:[#allocation7 + $0x870] sm:$0xff] }
 0x4bf   :  { %v5138_v48 = vld [vmem:[#allocation7 + $0x878] sm:$0xff]  ;;  %v5140_v46 = vld [vmem:[#allocation7 + $0x888] sm:$0xff]  ;;  %v9208_v32 = vpack.c.bf16 %v5137_v6, %v5133_v22  ;;  %v5175_v6 = vld [vmem:[#allocation7 + $0x9a0] sm:$0xff] }
 0x4c0   :  { %8981 = vmatpush1.bf16.msra.mxu0 %v8980_v57  ;;  %v5110_v57 = vld [vmem:[#allocation7 + $0x798] sm:$0xff]  ;;  %v9206_v35 = vpack.c.bf16 %v5138_v48, %v5134_v1  ;;  %v5176_v1 = vld [vmem:[#allocation7 + $0x9a8] sm:$0xff] }
 0x4c1   :  { %9173 = vmatpush1.bf16.msra.mxu1 %v9172_v58  ;;  %8983 = vmatprep.subr.bf16.mxu0 %v8982_v26  ;;  %v5114_v58 = vld [vmem:[#allocation7 + $0x7b8] sm:$0xff]  ;;  %v9000_v26 = vpack.c.bf16 %v5103_v52, %v5099_v41 }
 0x4c2   :  { %9175 = vmatprep.subr.bf16.mxu1 %v9174_v47  ;;  %v5111_v47 = vld [vmem:[#allocation7 + $0x7a0] sm:$0xff]  ;;  %v9194_v63 = vpack.c.bf16 %v5114_v58, %v5110_v57  ;;  %v5146_v41 = vld [vmem:[#allocation7 + $0x8b8] sm:$0xff]  ;;  %v5145_v58 = vld [vmem:[#allocation7 + $0x8b0] sm:$0xff] }
 0x4c3   :  { %v9212_v39 = vpack.c.bf16 %v5145_v58, %v5141_v33  ;;  %v5174_v48 = vld [vmem:[#allocation7 + $0x998] sm:$0xff]  ;;  %v5179_v33 = vld [vmem:[#allocation7 + $0x9c0] sm:$0xff]  ;;  %v5181_v58 = vld [vmem:[#allocation7 + $0x9d0] sm:$0xff] }
 0x4c4   :  { %8985 = vmatpush1.bf16.msra.mxu0 %v8984_v20  ;;  %v5118_v20 = vld [vmem:[#allocation7 + $0x7d8] sm:$0xff] }
 0x4c5   :  { %9177 = vmatpush1.bf16.msra.mxu1 %v9176_v27  ;;  %8987 = vmatprep.subr.bf16.mxu0 %v8986_v0  ;;  %v5122_v27 = vld [vmem:[#allocation7 + $0x7f8] sm:$0xff]  ;;  %v9004_v0 = vpack.c.bf16 %v5111_v47, %v5107_v17  ;;  %v9020_v47 = vpack.c.bf16 %v5143_v18, %v5139_v15 }
 0x4c6   :  { %9179 = vmatprep.subr.bf16.mxu1 %v9178_v45  ;;  %v5119_v45 = vld [vmem:[#allocation7 + $0x7e0] sm:$0xff]  ;;  %v9198_v50 = vpack.c.bf16 %v5122_v27, %v5118_v20  ;;  %v5154_v17 = vld [vmem:[#allocation7 + $0x8f8] sm:$0xff]  ;;  %v5153_v27 = vld [vmem:[#allocation7 + $0x8f0] sm:$0xff] }
 0x4c7   :  { %v9216_v19 = vpack.c.bf16 %v5153_v27, %v5149_v60  ;;  %v5187_v60 = vld [vmem:[#allocation7 + $0xa00] sm:$0xff]  ;;  %v5189_v27 = vld [vmem:[#allocation7 + $0xa10] sm:$0xff] }
 0x4c8   :  { %8989 = vmatpush1.bf16.msra.mxu0 %v8988_v3  ;;  %v5126_v3 = vld [vmem:[#allocation7 + $0x818] sm:$0xff] }
 0x4c9   :  { %9181 = vmatpush1.bf16.msra.mxu1 %v9180_v61  ;;  %8991 = vmatprep.subr.bf16.mxu0 %v8990_v44  ;;  %v5130_v61 = vld [vmem:[#allocation7 + $0x838] sm:$0xff]  ;;  %v9008_v44 = vpack.c.bf16 %v5119_v45, %v5115_v36  ;;  %v9024_v45 = vpack.c.bf16 %v5151_v55, %v5147_v56 }
 0x4ca   :  { %9183 = vmatprep.subr.bf16.mxu1 %v9182_v40  ;;  %v5127_v40 = vld [vmem:[#allocation7 + $0x820] sm:$0xff]  ;;  %v9202_v16 = vpack.c.bf16 %v5130_v61, %v5126_v3  ;;  %v5162_v36 = vld [vmem:[#allocation7 + $0x938] sm:$0xff]  ;;  %v5161_v61 = vld [vmem:[#allocation7 + $0x930] sm:$0xff] }
 0x4cc   :  { %8993 = vmatpush1.bf16.msra.mxu0 %v8992_v29  ;;  %v5132_v29 = vld [vmem:[#allocation7 + $0x848] sm:$0xff] }
 0x4cd   :  { %9185 = vmatpush1.bf16.msra.mxu1 %v9184_v21  ;;  %8995 = vmatprep.subr.bf16.mxu0 %v8994_v31  ;;  %v5136_v21 = vld [vmem:[#allocation7 + $0x868] sm:$0xff]  ;;  %v9012_v31 = vpack.c.bf16 %v5127_v40, %v5123_v14  ;;  %v5170_v14 = vld [vmem:[#allocation7 + $0x978] sm:$0xff]  ;;  %v9028_v40 = vpack.c.bf16 %v5159_v43, %v5155_v34 }
 0x4ce   :  { %9187 = vmatprep.subr.bf16.mxu1 %v9186_v51  ;;  %v5131_v51 = vld [vmem:[#allocation7 + $0x840] sm:$0xff]  ;;  %v9014_v30 = vpack.c.bf16 %v5136_v21, %v5132_v29  ;;  %v5169_v21 = vld [vmem:[#allocation7 + $0x970] sm:$0xff] }
 0x4cf   :  { %v9016_v52 = vpack.c.bf16 %v5135_v42, %v5131_v51  ;;  %v9032_v51 = vpack.c.bf16 %v5167_v10, %v5163_v54 }
 0x4d0   :  { %8997 = vmatpush1.bf16.msra.mxu0 %v8996_v37  ;;  %v5144_v37 = vld [vmem:[#allocation7 + $0x8a8] sm:$0xff] }
 0x4d1   :  { %9189 = vmatpush1.bf16.msra.mxu1 %v9188_v28  ;;  %8999 = vmatprep.subr.bf16.mxu0 %v8998_v8  ;;  %v11378_v28 = vmax.f32 %v2691_v59, 0.0  ;;  %v5142_v8 = vld [vmem:[#allocation7 + $0x898] sm:$0xff]  ;;  %v5165_v59 = vld [vmem:[#allocation7 + $0x950] sm:$0xff] }
 0x4d2   :  { %9191 = vmatprep.subr.bf16.mxu1 %v9190_v23  ;;  %v9018_v23 = vpack.c.bf16 %v5144_v37, %v5140_v46  ;;  %v9210_v57 = vpack.c.bf16 %v5146_v41, %v5142_v8  ;;  %v9224_v42 = vpack.c.bf16 %v5169_v21, %v5165_v59  ;;  %v5173_v46 = vld [vmem:[#allocation7 + $0x990] sm:$0xff]  ;;  %v5180_v8 = vld [vmem:[#allocation7 + $0x9c8] sm:$0xff]  ;;  %v5203_v59 = vld [vmem:[#allocation7 + $0xa80] sm:$0xff] }
 0x4d3   :  { %v5184_v41 = vld [vmem:[#allocation7 + $0x9e8] sm:$0xff]  ;;  %v5205_v21 = vld [vmem:[#allocation7 + $0xa90] sm:$0xff] }
 0x4d4   :  { %9001 = vmatpush1.bf16.msra.mxu0 %v9000_v26  ;;  %v5148_v26 = vld [vmem:[#allocation7 + $0x8c8] sm:$0xff]  ;;  %v9038_v18 = vpack.c.bf16 %v5184_v41, %v5180_v8  ;;  %v5217_v41 = vld [vmem:[#allocation7 + $0xaf0] sm:$0xff] }
 0x4d5   :  { %9193 = vmatpush1.bf16.msra.mxu1 %v9192_v4  ;;  %9003 = vmatprep.subr.bf16.mxu0 %v9002_v5  ;;  %v5152_v4 = vld [vmem:[#allocation7 + $0x8e8] sm:$0xff]  ;;  %v5150_v5 = vld [vmem:[#allocation7 + $0x8d8] sm:$0xff] }
 0x4d6   :  { %9195 = vmatprep.subr.bf16.mxu1 %v9194_v63  ;;  %v9022_v63 = vpack.c.bf16 %v5152_v4, %v5148_v26  ;;  %v9214_v20 = vpack.c.bf16 %v5154_v17, %v5150_v5  ;;  %v5185_v4 = vld [vmem:[#allocation7 + $0x9f0] sm:$0xff]  ;;  %v5188_v5 = vld [vmem:[#allocation7 + $0xa08] sm:$0xff] }
 0x4d7   :  { %v5192_v17 = vld [vmem:[#allocation7 + $0xa28] sm:$0xff]  ;;  %v9232_v56 = vpack.c.bf16 %v5185_v4, %v5181_v58  ;;  %v5219_v58 = vld [vmem:[#allocation7 + $0xb00] sm:$0xff]  ;;  %v5221_v4 = vld [vmem:[#allocation7 + $0xb10] sm:$0xff] }
 0x4d8   :  { %9005 = vmatpush1.bf16.msra.mxu0 %v9004_v0  ;;  %v5156_v0 = vld [vmem:[#allocation7 + $0x908] sm:$0xff]  ;;  %v9042_v55 = vpack.c.bf16 %v5192_v17, %v5188_v5  ;;  %v5225_v17 = vld [vmem:[#allocation7 + $0xb30] sm:$0xff] }
 0x4d9   :  { %9197 = vmatpush1.bf16.msra.mxu1 %v9196_v25  ;;  %9007 = vmatprep.subr.bf16.mxu0 %v9006_v7  ;;  %v5160_v25 = vld [vmem:[#allocation7 + $0x928] sm:$0xff]  ;;  %v5158_v7 = vld [vmem:[#allocation7 + $0x918] sm:$0xff] }
 0x4da   :  { %9199 = vmatprep.subr.bf16.mxu1 %v9198_v50  ;;  %v9026_v50 = vpack.c.bf16 %v5160_v25, %v5156_v0  ;;  %v9218_v3 = vpack.c.bf16 %v5162_v36, %v5158_v7  ;;  %v5193_v25 = vld [vmem:[#allocation7 + $0xa30] sm:$0xff]  ;;  %v5196_v7 = vld [vmem:[#allocation7 + $0xa48] sm:$0xff] }
 0x4db   :  { %v5200_v36 = vld [vmem:[#allocation7 + $0xa68] sm:$0xff]  ;;  %v9236_v34 = vpack.c.bf16 %v5193_v25, %v5189_v27  ;;  %v5227_v27 = vld [vmem:[#allocation7 + $0xb40] sm:$0xff]  ;;  %v5229_v25 = vld [vmem:[#allocation7 + $0xb50] sm:$0xff] }
 0x4dc   :  { %9009 = vmatpush1.bf16.msra.mxu0 %v9008_v44  ;;  %v5164_v44 = vld [vmem:[#allocation7 + $0x948] sm:$0xff]  ;;  %v9046_v43 = vpack.c.bf16 %v5200_v36, %v5196_v7  ;;  %v5233_v36 = vld [vmem:[#allocation7 + $0xb70] sm:$0xff] }
 0x4dd   :  { %9201 = vmatpush1.bf16.msra.mxu1 %v9200_v2  ;;  %9011 = vmatprep.subr.bf16.mxu0 %v9010_v12  ;;  %v5168_v2 = vld [vmem:[#allocation7 + $0x968] sm:$0xff]  ;;  %v5166_v12 = vld [vmem:[#allocation7 + $0x958] sm:$0xff] }
 0x4de   :  { %9203 = vmatprep.subr.bf16.mxu1 %v9202_v16  ;;  %v9220_v16 = vpack.c.bf16 %v5161_v61, %v5157_v9  ;;  %v9030_v53 = vpack.c.bf16 %v5168_v2, %v5164_v44  ;;  %v9222_v29 = vpack.c.bf16 %v5170_v14, %v5166_v12  ;;  %v5195_v9 = vld [vmem:[#allocation7 + $0xa40] sm:$0xff]  ;;  %v5197_v61 = vld [vmem:[#allocation7 + $0xa50] sm:$0xff]  ;;  %v5204_v12 = vld [vmem:[#allocation7 + $0xa88] sm:$0xff] }
 0x4df   :  { %5387 = vmatmul.mubr.f32.vlgmr.msra.gmra.mrb[28].mxu0 %v11364_v38  ;;  %v5201_v2 = vld [vmem:[#allocation7 + $0xa70] sm:$0xff]  ;;  %v5208_v14 = vld [vmem:[#allocation7 + $0xaa8] sm:$0xff] }
 0x4e0   :  { %5600 = vmatmul.mubr.f32.vlgmr.msra.gmra.mrb[28].mxu1 %v11364_v38  ;;  %9013 = vmatpush1.bf16.msra.mxu0 %v9012_v31  ;;  %v5172_v31 = vld [vmem:[#allocation7 + $0x988] sm:$0xff]  ;;  %v9240_v54 = vpack.c.bf16 %v5201_v2, %v5197_v61  ;;  %v9050_v10 = vpack.c.bf16 %v5208_v14, %v5204_v12  ;;  %v5235_v61 = vld [vmem:[#allocation7 + $0xb80] sm:$0xff]  ;;  %v5237_v2 = vld [vmem:[#allocation7 + $0xb90] sm:$0xff] }
 0x4e1   :  { %5457 = vmatprep.mubr.f32.mxu0 %v11378_v28  ;;  %9205 = vmatpush1.bf16.msra.mxu1 %v9204_v49  ;;  %v5178_v49 = vld [vmem:[#allocation7 + $0x9b8] sm:$0xff]  ;;  %v9034_v22 = vpack.c.bf16 %v5176_v1, %v5172_v31  ;;  %v5209_v1 = vld [vmem:[#allocation7 + $0xab0] sm:$0xff] }
 0x4e2   :  { %5670 = vmatprep.mubr.f32.mxu1 %v11378_v28  ;;  %9015 = vmatprep.subr.bf16.mxu0 %v9014_v30  ;;  %v5171_v30 = vld [vmem:[#allocation7 + $0x980] sm:$0xff]  ;;  %v9226_v37 = vpack.c.bf16 %v5178_v49, %v5174_v48  ;;  %v5212_v48 = vld [vmem:[#allocation7 + $0xac8] sm:$0xff]  ;;  %v5241_v14 = vld [vmem:[#allocation7 + $0xbb0] sm:$0xff] }
 0x4e3   :  { %9207 = vmatprep.subr.bf16.mxu1 %v9206_v35  ;;  %v5177_v35 = vld [vmem:[#allocation7 + $0x9b0] sm:$0xff]  ;;  %v5216_v49 = vld [vmem:[#allocation7 + $0xae8] sm:$0xff] }
 0x4e4   :  { %9017 = vmatpush1.bf16.msra.mxu0 %v9016_v52  ;;  %v5182_v52 = vld [vmem:[#allocation7 + $0x9d8] sm:$0xff]  ;;  %v9228_v15 = vpack.c.bf16 %v5177_v35, %v5173_v46  ;;  %v5211_v46 = vld [vmem:[#allocation7 + $0xac0] sm:$0xff]  ;;  %v5213_v35 = vld [vmem:[#allocation7 + $0xad0] sm:$0xff] }
 0x4e5   :  { %9209 = vmatpush1.bf16.msra.mxu1 %v9208_v32  ;;  %9019 = vmatprep.subr.bf16.mxu0 %v9018_v23  ;;  %v5186_v32 = vld [vmem:[#allocation7 + $0x9f8] sm:$0xff]  ;;  %v9036_v23 = vpack.c.bf16 %v5175_v6, %v5171_v30  ;;  %v9244_v30 = vpack.c.bf16 %v5209_v1, %v5205_v21  ;;  %v9054_v6 = vpack.c.bf16 %v5216_v49, %v5212_v48  ;;  %v5243_v21 = vld [vmem:[#allocation7 + $0xbc0] sm:$0xff]  ;;  %v5245_v1 = vld [vmem:[#allocation7 + $0xbd0] sm:$0xff] }
 0x4e6   :  { %9211 = vmatprep.subr.bf16.mxu1 %v9210_v57  ;;  %v5183_v57 = vld [vmem:[#allocation7 + $0x9e0] sm:$0xff]  ;;  %v9230_v26 = vpack.c.bf16 %v5186_v32, %v5182_v52  ;;  %v5220_v52 = vld [vmem:[#allocation7 + $0xb08] sm:$0xff]  ;;  %v5249_v49 = vld [vmem:[#allocation7 + $0xbf0] sm:$0xff] }
 0x4e7   :  { %v5224_v32 = vld [vmem:[#allocation7 + $0xb28] sm:$0xff] }
 0x4e8   :  { %9021 = vmatpush1.bf16.msra.mxu0 %v9020_v47  ;;  %v5190_v47 = vld [vmem:[#allocation7 + $0xa18] sm:$0xff] }
 0x4e9   :  { %9213 = vmatpush1.bf16.msra.mxu1 %v9212_v39  ;;  %9023 = vmatprep.subr.bf16.mxu0 %v9022_v63  ;;  %v5194_v39 = vld [vmem:[#allocation7 + $0xa38] sm:$0xff]  ;;  %v9040_v63 = vpack.c.bf16 %v5183_v57, %v5179_v33  ;;  %v9248_v33 = vpack.c.bf16 %v5217_v41, %v5213_v35  ;;  %v9058_v57 = vpack.c.bf16 %v5224_v32, %v5220_v52  ;;  %v5696_v41 = vld [vmem:[#allocation7] sm:$0xff] }
 0x4ea   :  { %9215 = vmatprep.subr.bf16.mxu1 %v9214_v20  ;;  %v5191_v20 = vld [vmem:[#allocation7 + $0xa20] sm:$0xff]  ;;  %v9234_v0 = vpack.c.bf16 %v5194_v39, %v5190_v47  ;;  %v5228_v47 = vld [vmem:[#allocation7 + $0xb48] sm:$0xff]  ;;  %v9264_v35 = vpack.c.bf16 %v5249_v49, %v5245_v1 }
 0x4eb   :  { %v5232_v39 = vld [vmem:[#allocation7 + $0xb68] sm:$0xff]  ;;  %v5700_v52 = vld [vmem:[#allocation7 + $0x20] sm:$0xff] }
 0x4ec   :  { %9025 = vmatpush1.bf16.msra.mxu0 %v9024_v45  ;;  %v5198_v45 = vld [vmem:[#allocation7 + $0xa58] sm:$0xff]  ;;  %v5732_v49 = vld [vmem:[#allocation7 + $0x120] sm:$0xff] }
 0x4ed   :  { %9217 = vmatpush1.bf16.msra.mxu1 %v9216_v19  ;;  %9027 = vmatprep.subr.bf16.mxu0 %v9026_v50  ;;  %v5202_v19 = vld [vmem:[#allocation7 + $0xa78] sm:$0xff]  ;;  %v9044_v50 = vpack.c.bf16 %v5191_v20, %v5187_v60  ;;  %v9252_v60 = vpack.c.bf16 %v5225_v17, %v5221_v4  ;;  %v9062_v20 = vpack.c.bf16 %v5232_v39, %v5228_v47  ;;  %v5708_v17 = vld [vmem:[#allocation7 + $0x60] sm:$0xff]  ;;  %v5706_v47 = vld [vmem:[#allocation7 + $0x50] sm:$0xff] }
 0x4ee   :  { %9219 = vmatprep.subr.bf16.mxu1 %v9218_v3  ;;  %v5199_v3 = vld [vmem:[#allocation7 + $0xa60] sm:$0xff]  ;;  %v9238_v44 = vpack.c.bf16 %v5202_v19, %v5198_v45  ;;  %v5236_v45 = vld [vmem:[#allocation7 + $0xb88] sm:$0xff] }
 0x4ef   :  { %v5240_v19 = vld [vmem:[#allocation7 + $0xba8] sm:$0xff] }
 0x4f0   :  { %9029 = vmatpush1.bf16.msra.mxu0 %v9028_v40  ;;  %v5206_v40 = vld [vmem:[#allocation7 + $0xa98] sm:$0xff] }
 0x4f1   :  { %9221 = vmatpush1.bf16.msra.mxu1 %v9220_v16  ;;  %9031 = vmatprep.subr.bf16.mxu0 %v9030_v53  ;;  %v5210_v16 = vld [vmem:[#allocation7 + $0xab8] sm:$0xff]  ;;  %v9048_v53 = vpack.c.bf16 %v5199_v3, %v5195_v9  ;;  %v9256_v9 = vpack.c.bf16 %v5233_v36, %v5229_v25  ;;  %v9066_v3 = vpack.c.bf16 %v5240_v19, %v5236_v45  ;;  %v5712_v36 = vld [vmem:[#allocation7 + $0x80] sm:$0xff]  ;;  %v5714_v19 = vld [vmem:[#allocation7 + $0x90] sm:$0xff] }
 0x4f2   :  { %9223 = vmatprep.subr.bf16.mxu1 %v9222_v29  ;;  %v5207_v29 = vld [vmem:[#allocation7 + $0xaa0] sm:$0xff]  ;;  %v9242_v31 = vpack.c.bf16 %v5210_v16, %v5206_v40  ;;  %v5244_v40 = vld [vmem:[#allocation7 + $0xbc8] sm:$0xff] }
 0x4f3   :  { %v5248_v16 = vld [vmem:[#allocation7 + $0xbe8] sm:$0xff]  ;;  %v5716_v45 = vld [vmem:[#allocation7 + $0xa0] sm:$0xff] }
 0x4f4   :  { %9033 = vmatpush1.bf16.msra.mxu0 %v9032_v51  ;;  %v5214_v51 = vld [vmem:[#allocation7 + $0xad8] sm:$0xff] }
 0x4f5   :  { %9225 = vmatpush1.bf16.msra.mxu1 %v9224_v42  ;;  %9035 = vmatprep.subr.bf16.mxu0 %v9034_v22  ;;  %v5218_v42 = vld [vmem:[#allocation7 + $0xaf8] sm:$0xff]  ;;  %v9052_v22 = vpack.c.bf16 %v5207_v29, %v5203_v59  ;;  %v9260_v59 = vpack.c.bf16 %v5241_v14, %v5237_v2  ;;  %v9070_v29 = vpack.c.bf16 %v5248_v16, %v5244_v40  ;;  %v5720_v14 = vld [vmem:[#allocation7 + $0xc0] sm:$0xff]  ;;  %v5722_v16 = vld [vmem:[#allocation7 + $0xd0] sm:$0xff] }
 0x4f6   :  { %9227 = vmatprep.subr.bf16.mxu1 %v9226_v37  ;;  %v5215_v37 = vld [vmem:[#allocation7 + $0xae0] sm:$0xff]  ;;  %v9246_v8 = vpack.c.bf16 %v5218_v42, %v5214_v51  ;;  %v5697_v51 = vld [vmem:[#allocation7 + $0x8] sm:$0xff] }
 0x4f7   :  { %v5701_v42 = vld [vmem:[#allocation7 + $0x28] sm:$0xff]  ;;  %v5724_v40 = vld [vmem:[#allocation7 + $0xe0] sm:$0xff] }
 0x4f8   :  { %9037 = vmatpush1.bf16.msra.mxu0 %v9036_v23  ;;  %v5222_v23 = vld [vmem:[#allocation7 + $0xb18] sm:$0xff] }
 0x4f9   :  { %9229 = vmatpush1.bf16.msra.mxu1 %v9228_v15  ;;  %9039 = vmatprep.subr.bf16.mxu0 %v9038_v18  ;;  %v5226_v15 = vld [vmem:[#allocation7 + $0xb38] sm:$0xff]  ;;  %v9056_v18 = vpack.c.bf16 %v5215_v37, %v5211_v46 }
 0x4fa   :  { %9231 = vmatprep.subr.bf16.mxu1 %v9230_v26  ;;  %v5223_v26 = vld [vmem:[#allocation7 + $0xb20] sm:$0xff]  ;;  %v9250_v5 = vpack.c.bf16 %v5226_v15, %v5222_v23  ;;  %v9824_v46 = vld [vmem:[#allocation5] ss:$0 sm:$0xff]  ;;  %v5698_v23 = vld [vmem:[#allocation7 + $0x10] sm:$0xff] }
 0x4fb   :  { %v2434_v37 = vadd.f32 %v9824_v46, %v11322_v13  ;;  %v5702_v15 = vld [vmem:[#allocation7 + $0x30] sm:$0xff]  ;;  %v5739_v46 = vld [vmem:[#allocation7 + $0x158] sm:$0xff] }
 0x4fc   :  { %9041 = vmatpush1.bf16.msra.mxu0 %v9040_v63  ;;  %v5230_v63 = vld [vmem:[#allocation7 + $0xb58] sm:$0xff]  ;;  %v9460_v13 = vpack.c.bf16 %v5702_v15, %v5698_v23  ;;  %v5738_v23 = vld [vmem:[#allocation7 + $0x150] sm:$0xff] }
 0x4fd   :  { %9233 = vmatpush1.bf16.msra.mxu1 %v9232_v56  ;;  %9043 = vmatprep.subr.bf16.mxu0 %v9042_v55  ;;  %v5234_v56 = vld [vmem:[#allocation7 + $0xb78] sm:$0xff]  ;;  %v9060_v55 = vpack.c.bf16 %v5223_v26, %v5219_v58  ;;  %v11385_v4 = vmax.f32 %v2434_v37, 0.0 }
 0x4fe   :  { %9235 = vmatprep.subr.bf16.mxu1 %v9234_v0  ;;  %v5231_v0 = vld [vmem:[#allocation7 + $0xb60] sm:$0xff]  ;;  %v9254_v7 = vpack.c.bf16 %v5234_v56, %v5230_v63  ;;  %v5707_v58 = vld [vmem:[#allocation7 + $0x58] sm:$0xff]  ;;  %v5710_v63 = vld [vmem:[#allocation7 + $0x70] sm:$0xff] }
 0x4ff   :  { %v5711_v26 = vld [vmem:[#allocation7 + $0x78] sm:$0xff]  ;;  %v5713_v56 = vld [vmem:[#allocation7 + $0x88] sm:$0xff]  ;;  %v9464_v25 = vpack.c.bf16 %v5710_v63, %v5706_v47  ;;  %v5744_v47 = vld [vmem:[#allocation7 + $0x180] sm:$0xff] }
 0x500   :  { %9045 = vmatpush1.bf16.msra.mxu0 %v9044_v50  ;;  %v5238_v50 = vld [vmem:[#allocation7 + $0xb98] sm:$0xff]  ;;  %v5746_v63 = vld [vmem:[#allocation7 + $0x190] sm:$0xff] }
 0x501   :  { %9237 = vmatpush1.bf16.msra.mxu1 %v9236_v34  ;;  %9047 = vmatprep.subr.bf16.mxu0 %v9046_v43  ;;  %v5242_v34 = vld [vmem:[#allocation7 + $0xbb8] sm:$0xff]  ;;  %v9064_v43 = vpack.c.bf16 %v5231_v0, %v5227_v27 }
 0x502   :  { %9239 = vmatprep.subr.bf16.mxu1 %v9238_v44  ;;  %v5239_v44 = vld [vmem:[#allocation7 + $0xba0] sm:$0xff]  ;;  %v9258_v12 = vpack.c.bf16 %v5242_v34, %v5238_v50  ;;  %v5719_v27 = vld [vmem:[#allocation7 + $0xb8] sm:$0xff]  ;;  %v5718_v34 = vld [vmem:[#allocation7 + $0xb0] sm:$0xff] }
 0x503   :  { %v9468_v2 = vpack.c.bf16 %v5718_v34, %v5714_v19  ;;  %v5743_v37 = vld [vmem:[#allocation7 + $0x178] sm:$0xff] }
 0x504   :  { %9049 = vmatpush1.bf16.msra.mxu0 %v9048_v53  ;;  %v5246_v53 = vld [vmem:[#allocation7 + $0xbd8] sm:$0xff]  ;;  %v9478_v15 = vpack.c.bf16 %v5743_v37, %v5739_v46 }
 0x505   :  { %9241 = vmatpush1.bf16.msra.mxu1 %v9240_v54  ;;  %9051 = vmatprep.subr.bf16.mxu0 %v9050_v10  ;;  %v5250_v54 = vld [vmem:[#allocation7 + $0xbf8] sm:$0xff]  ;;  %v9068_v10 = vpack.c.bf16 %v5239_v44, %v5235_v61  ;;  %v9276_v44 = vpack.c.bf16 %v5716_v45, %v5712_v36 }
 0x506   :  { %9243 = vmatprep.subr.bf16.mxu1 %v9242_v31  ;;  %v5247_v31 = vld [vmem:[#allocation7 + $0xbe0] sm:$0xff]  ;;  %v9262_v48 = vpack.c.bf16 %v5250_v54, %v5246_v53  ;;  %v5727_v61 = vld [vmem:[#allocation7 + $0xf8] sm:$0xff]  ;;  %v5729_v54 = vld [vmem:[#allocation7 + $0x108] sm:$0xff] }
 0x507   :  { %v5759_v36 = vld [vmem:[#allocation7 + $0x1f8] sm:$0xff] }
 0x508   :  { %9053 = vmatpush1.bf16.msra.mxu0 %v9052_v22  ;;  %v5699_v22 = vld [vmem:[#allocation7 + $0x18] sm:$0xff] }
 0x509   :  { %9245 = vmatpush1.bf16.msra.mxu1 %v9244_v30  ;;  %9055 = vmatprep.subr.bf16.mxu0 %v9054_v6  ;;  %v5703_v30 = vld [vmem:[#allocation7 + $0x38] sm:$0xff]  ;;  %v9072_v6 = vpack.c.bf16 %v5247_v31, %v5243_v21  ;;  %v9280_v21 = vpack.c.bf16 %v5724_v40, %v5720_v14  ;;  %v5758_v14 = vld [vmem:[#allocation7 + $0x1f0] sm:$0xff]  ;;  %v5761_v40 = vld [vmem:[#allocation7 + $0x208] sm:$0xff] }
 0x50a   :  { %9247 = vmatprep.subr.bf16.mxu1 %v9246_v8  ;;  %v9266_v8 = vpack.c.bf16 %v5701_v42, %v5697_v51  ;;  %v9458_v32 = vpack.c.bf16 %v5703_v30, %v5699_v22  ;;  %v5730_v51 = vld [vmem:[#allocation7 + $0x110] sm:$0xff]  ;;  %v5737_v30 = vld [vmem:[#allocation7 + $0x148] sm:$0xff]  ;;  %v5775_v46 = vld [vmem:[#allocation7 + $0x278] sm:$0xff] }
 0x50b   :  { %v5734_v22 = vld [vmem:[#allocation7 + $0x130] sm:$0xff] }
 0x50c   :  { %9057 = vmatpush1.bf16.msra.mxu0 %v9056_v18  ;;  %v5705_v18 = vld [vmem:[#allocation7 + $0x48] sm:$0xff] }
 0x50d   :  { %9249 = vmatpush1.bf16.msra.mxu1 %v9248_v33  ;;  %9059 = vmatprep.subr.bf16.mxu0 %v9058_v57  ;;  %v5709_v33 = vld [vmem:[#allocation7 + $0x68] sm:$0xff]  ;;  %v9268_v57 = vpack.c.bf16 %v5700_v52, %v5696_v41  ;;  %v5736_v52 = vld [vmem:[#allocation7 + $0x140] sm:$0xff] }
 0x50e   :  { %9251 = vmatprep.subr.bf16.mxu1 %v9250_v5  ;;  %v5704_v5 = vld [vmem:[#allocation7 + $0x40] sm:$0xff]  ;;  %v9270_v39 = vpack.c.bf16 %v5709_v33, %v5705_v18  ;;  %v5742_v18 = vld [vmem:[#allocation7 + $0x170] sm:$0xff]  ;;  %v5745_v33 = vld [vmem:[#allocation7 + $0x188] sm:$0xff] }
 0x50f   :  { %v9272_v0 = vpack.c.bf16 %v5708_v17, %v5704_v5  ;;  %v9480_v5 = vpack.c.bf16 %v5742_v18, %v5738_v23  ;;  %v5777_v18 = vld [vmem:[#allocation7 + $0x288] sm:$0xff] }
 0x510   :  { %9061 = vmatpush1.bf16.msra.mxu0 %v9060_v55  ;;  %v5717_v55 = vld [vmem:[#allocation7 + $0xa8] sm:$0xff] }
 0x511   :  { %9253 = vmatpush1.bf16.msra.mxu1 %v9252_v60  ;;  %9063 = vmatprep.subr.bf16.mxu0 %v9062_v20  ;;  %v9462_v60 = vpack.c.bf16 %v5711_v26, %v5707_v58  ;;  %v5715_v20 = vld [vmem:[#allocation7 + $0x98] sm:$0xff] }
 0x512   :  { %9255 = vmatprep.subr.bf16.mxu1 %v9254_v7  ;;  %v9274_v7 = vpack.c.bf16 %v5717_v55, %v5713_v56  ;;  %v9466_v50 = vpack.c.bf16 %v5719_v27, %v5715_v20  ;;  %v5747_v58 = vld [vmem:[#allocation7 + $0x198] sm:$0xff]  ;;  %v5753_v20 = vld [vmem:[#allocation7 + $0x1c8] sm:$0xff] }
 0x513   :  { %v5751_v26 = vld [vmem:[#allocation7 + $0x1b8] sm:$0xff]  ;;  %v5757_v27 = vld [vmem:[#allocation7 + $0x1e8] sm:$0xff] }
 0x514   :  { %9065 = vmatpush1.bf16.msra.mxu0 %v9064_v43  ;;  %v5721_v43 = vld [vmem:[#allocation7 + $0xc8] sm:$0xff]  ;;  %v9482_v55 = vpack.c.bf16 %v5751_v26, %v5747_v58  ;;  %v5783_v58 = vld [vmem:[#allocation7 + $0x2b8] sm:$0xff] }
 0x515   :  { %9257 = vmatpush1.bf16.msra.mxu1 %v9256_v9  ;;  %9067 = vmatprep.subr.bf16.mxu0 %v9066_v3  ;;  %v5725_v9 = vld [vmem:[#allocation7 + $0xe8] sm:$0xff]  ;;  %v5723_v3 = vld [vmem:[#allocation7 + $0xd8] sm:$0xff] }
 0x516   :  { %9259 = vmatprep.subr.bf16.mxu1 %v9258_v12  ;;  %v9278_v12 = vpack.c.bf16 %v5725_v9, %v5721_v43  ;;  %v9470_v53 = vpack.c.bf16 %v5727_v61, %v5723_v3  ;;  %v9294_v3 = vpack.c.bf16 %v5757_v27, %v5753_v20  ;;  %v5752_v61 = vld [vmem:[#allocation7 + $0x1c0] sm:$0xff]  ;;  %v5787_v20 = vld [vmem:[#allocation7 + $0x2d8] sm:$0xff] }
 0x517   :  { %v5791_v27 = vld [vmem:[#allocation7 + $0x2f8] sm:$0xff] }
 0x518   :  { %9069 = vmatpush1.bf16.msra.mxu0 %v9068_v10  ;;  %v5733_v10 = vld [vmem:[#allocation7 + $0x128] sm:$0xff] }
 0x519   :  { %9261 = vmatpush1.bf16.msra.mxu1 %v9260_v59  ;;  %9071 = vmatprep.subr.bf16.mxu0 %v9070_v29  ;;  %v5731_v59 = vld [vmem:[#allocation7 + $0x118] sm:$0xff]  ;;  %v9282_v1 = vpack.c.bf16 %v5733_v10, %v5729_v54 }
 0x51a   :  { %9263 = vmatprep.subr.bf16.mxu1 %v9262_v48  ;;  %v5735_v29 = vld [vmem:[#allocation7 + $0x138] sm:$0xff]  ;;  %v5728_v48 = vld [vmem:[#allocation7 + $0x100] sm:$0xff] }
 0x51b   :  { %v9474_v42 = vpack.c.bf16 %v5735_v29, %v5731_v59  ;;  %v5767_v54 = vld [vmem:[#allocation7 + $0x238] sm:$0xff] }
 0x51c   :  { %9073 = vmatpush1.bf16.msra.mxu0 %v9072_v6  ;;  %v5741_v6 = vld [vmem:[#allocation7 + $0x168] sm:$0xff] }
 0x51d   :  { %9265 = vmatpush1.bf16.msra.mxu1 %v9264_v35  ;;  %9267 = vmatprep.subr.bf16.mxu0 %v9266_v8  ;;  %v9284_v35 = vpack.c.bf16 %v5732_v49, %v5728_v48  ;;  %v9476_v8 = vpack.c.bf16 %v5734_v22, %v5730_v51  ;;  %v9286_v41 = vpack.c.bf16 %v5741_v6, %v5737_v30  ;;  %v5762_v48 = vld [vmem:[#allocation7 + $0x210] sm:$0xff]  ;;  %v5773_v22 = vld [vmem:[#allocation7 + $0x268] sm:$0xff]  ;;  %v5771_v6 = vld [vmem:[#allocation7 + $0x258] sm:$0xff] }
 0x51e   :  { %9459 = vmatprep.subr.bf16.mxu1 %v9458_v32  ;;  %v5740_v32 = vld [vmem:[#allocation7 + $0x160] sm:$0xff]  ;;  %v5766_v51 = vld [vmem:[#allocation7 + $0x230] sm:$0xff]  ;;  %v9494_v23 = vpack.c.bf16 %v5775_v46, %v5771_v6  ;;  %v5813_v6 = vld [vmem:[#allocation7 + $0x3a8] sm:$0xff] }
 0x51f   :  { %5458 = vmatmul.mubr.f32.vlgmr.msra.gmra.mrb[28].mxu0 %v11385_v4  ;;  %v5811_v46 = vld [vmem:[#allocation7 + $0x398] sm:$0xff] }
 0x520   :  { %5671 = vmatmul.mubr.f32.vlgmr.msra.gmra.mrb[28].mxu1 %v11385_v4  ;;  %9269 = vmatpush1.bf16.msra.mxu0 %v9268_v57  ;;  %v5749_v57 = vld [vmem:[#allocation7 + $0x1a8] sm:$0xff] }
 0x521   :  { %6144 = vmatprep.mubr.f32.mxu0 %v11356_v62  ;;  %9461 = vmatpush1.bf16.msra.mxu1 %v9460_v13  ;;  %v9288_v13 = vpack.c.bf16 %v5740_v32, %v5736_v52  ;;  %v9290_v17 = vpack.c.bf16 %v5749_v57, %v5745_v33  ;;  %v5772_v52 = vld [vmem:[#allocation7 + $0x260] sm:$0xff]  ;;  %v5770_v32 = vld [vmem:[#allocation7 + $0x250] sm:$0xff]  ;;  %v5781_v33 = vld [vmem:[#allocation7 + $0x2a8] sm:$0xff] }
 0x522   :  { %6357 = vmatprep.mubr.f32.mxu1 %v11356_v62  ;;  %9271 = vmatprep.subr.bf16.mxu0 %v9270_v39  ;;  %v5726_v62 = vld [vmem:[#allocation7 + $0xf0] sm:$0xff]  ;;  %v5748_v39 = vld [vmem:[#allocation7 + $0x1a0] sm:$0xff]  ;;  %v5779_v57 = vld [vmem:[#allocation7 + $0x298] sm:$0xff] }
 0x523   :  { %9463 = vmatprep.subr.bf16.mxu1 %v9462_v60  ;;  %v9472_v31 = vpack.c.bf16 %v5726_v62, %v5722_v16  ;;  %v5750_v60 = vld [vmem:[#allocation7 + $0x1b0] sm:$0xff]  ;;  %v9292_v34 = vpack.c.bf16 %v5748_v39, %v5744_v47  ;;  %v5765_v16 = vld [vmem:[#allocation7 + $0x228] sm:$0xff]  ;;  %v5763_v62 = vld [vmem:[#allocation7 + $0x218] sm:$0xff] }
 0x524   :  { %9273 = vmatpush1.bf16.msra.mxu0 %v9272_v0  ;;  %v9484_v9 = vpack.c.bf16 %v5750_v60, %v5746_v63  ;;  %v9490_v49 = vpack.c.bf16 %v5767_v54, %v5763_v62  ;;  %v5780_v47 = vld [vmem:[#allocation7 + $0x2a0] sm:$0xff]  ;;  %v5778_v39 = vld [vmem:[#allocation7 + $0x290] sm:$0xff]  ;;  %v9498_v63 = vpack.c.bf16 %v5783_v58, %v5779_v57  ;;  %v5789_v60 = vld [vmem:[#allocation7 + $0x2e8] sm:$0xff] }
 0x525   :  { %9465 = vmatpush1.bf16.msra.mxu1 %v9464_v25  ;;  %9275 = vmatprep.subr.bf16.mxu0 %v9274_v7  ;;  %v5755_v7 = vld [vmem:[#allocation7 + $0x1d8] sm:$0xff]  ;;  %v5798_v62 = vld [vmem:[#allocation7 + $0x330] sm:$0xff]  ;;  %v5801_v54 = vld [vmem:[#allocation7 + $0x348] sm:$0xff] }
 0x526   :  { %9467 = vmatprep.subr.bf16.mxu1 %v9466_v50  ;;  %v6974_v50 = vld [vmem:[#allocation8] ss:$0 sm:$0xff]  ;;  %v5821_v57 = vld [vmem:[#allocation7 + $0x3e8] sm:$0xff]  ;;  %v5819_v58 = vld [vmem:[#allocation7 + $0x3d8] sm:$0xff] }
 0x528   :  { %9277 = vmatpush1.bf16.msra.mxu0 %v9276_v44  ;;  %v5756_v44 = vld [vmem:[#allocation7 + $0x1e0] sm:$0xff] }
 0x529   :  { %9469 = vmatpush1.bf16.msra.mxu1 %v9468_v2  ;;  %9279 = vmatprep.subr.bf16.mxu0 %v9278_v12  ;;  %v5754_v2 = vld [vmem:[#allocation7 + $0x1d0] sm:$0xff]  ;;  %v9486_v12 = vpack.c.bf16 %v5759_v36, %v5755_v7  ;;  %v9296_v10 = vpack.c.bf16 %v5756_v44, %v5752_v61  ;;  %v5784_v36 = vld [vmem:[#allocation7 + $0x2c0] sm:$0xff]  ;;  %v5799_v61 = vld [vmem:[#allocation7 + $0x338] sm:$0xff] }
 0x52a   :  { %9471 = vmatprep.subr.bf16.mxu1 %v9470_v53  ;;  %v9488_v29 = vpack.c.bf16 %v5758_v14, %v5754_v2  ;;  %v5792_v14 = vld [vmem:[#allocation7 + $0x300] sm:$0xff] }
 0x52c   :  { %9281 = vmatpush1.bf16.msra.mxu0 %v9280_v21  ;;  %v9298_v21 = vpack.c.bf16 %v5765_v16, %v5761_v40  ;;  %v5796_v40 = vld [vmem:[#allocation7 + $0x320] sm:$0xff]  ;;  %v5794_v16 = vld [vmem:[#allocation7 + $0x310] sm:$0xff] }
 0x52d   :  { %9473 = vmatpush1.bf16.msra.mxu1 %v9472_v31  ;;  %9283 = vmatprep.subr.bf16.mxu0 %v9282_v1  ;;  %v5760_v31 = vld [vmem:[#allocation7 + $0x200] sm:$0xff] }
 0x52e   :  { %9475 = vmatprep.subr.bf16.mxu1 %v9474_v42  ;;  %v5764_v1 = vld [vmem:[#allocation7 + $0x220] sm:$0xff]  ;;  %v5769_v42 = vld [vmem:[#allocation7 + $0x248] sm:$0xff] }
 0x52f   :  { %v9300_v37 = vpack.c.bf16 %v5764_v1, %v5760_v31  ;;  %v9508_v31 = vpack.c.bf16 %v5798_v62, %v5794_v16  ;;  %v5834_v16 = vld [vmem:[#allocation7 + $0x450] sm:$0xff] }
 0x530   :  { %9285 = vmatpush1.bf16.msra.mxu0 %v9284_v35  ;;  %v9492_v35 = vpack.c.bf16 %v5766_v51, %v5762_v48  ;;  %v5800_v48 = vld [vmem:[#allocation7 + $0x340] sm:$0xff]  ;;  %v5802_v51 = vld [vmem:[#allocation7 + $0x350] sm:$0xff] }
 0x531   :  { %9477 = vmatpush1.bf16.msra.mxu1 %v9476_v8  ;;  %9287 = vmatprep.subr.bf16.mxu0 %v9286_v41  ;;  %v9302_v8 = vpack.c.bf16 %v5773_v22, %v5769_v42  ;;  %v5768_v41 = vld [vmem:[#allocation7 + $0x240] sm:$0xff]  ;;  %v5806_v22 = vld [vmem:[#allocation7 + $0x370] sm:$0xff] }
 0x532   :  { %v4630_v56 = vpop.f32.mrb[26].mxu0  ;;  %9479 = vmatprep.subr.bf16.mxu1 %v9478_v15  ;;  %v5774_v15 = vld [vmem:[#allocation7 + $0x270] sm:$0xff]  ;;  %v9304_v26 = vpack.c.bf16 %v5772_v52, %v5768_v41  ;;  %v5808_v52 = vld [vmem:[#allocation7 + $0x380] sm:$0xff] }
 0x533   :  { %v4843_v0 = vpop.f32.mrb[26].mxu1  ;;  %v4632_v25 = vpop.f32.mrb[27].mxu0  ;;  %v5838_v62 = vld [vmem:[#allocation7 + $0x470] sm:$0xff] }
 0x534   :  { %v4849_v45 = vmax.f32 %v4630_v56, %v4632_v25  ;;  %v4845_v19 = vpop.f32.mrb[27].mxu1  ;;  %9289 = vmatpush1.bf16.msra.mxu0 %v9288_v13  ;;  %v9496_v13 = vpack.c.bf16 %v5774_v15, %v5770_v32  ;;  %v5782_v56 = vld [vmem:[#allocation7 + $0x2b0] sm:$0xff]  ;;  %v5812_v32 = vld [vmem:[#allocation7 + $0x3a0] sm:$0xff] }
 0x535   :  { %v4850_v43 = vmax.f32 %v4843_v0, %v4845_v19  ;;  %9481 = vmatpush1.bf16.msra.mxu1 %v9480_v5  ;;  %9291 = vmatprep.subr.bf16.mxu0 %v9290_v17  ;;  %v9306_v5 = vpack.c.bf16 %v5781_v33, %v5777_v18  ;;  %v5776_v17 = vld [vmem:[#allocation7 + $0x280] sm:$0xff]  ;;  %v9500_v25 = vpack.c.bf16 %v5782_v56, %v5778_v39  ;;  %v5786_v19 = vld [vmem:[#allocation7 + $0x2d0] sm:$0xff]  ;;  %v5817_v33 = vld [vmem:[#allocation7 + $0x3c8] sm:$0xff] }
 0x536   :  { %9483 = vmatprep.subr.bf16.mxu1 %v9482_v55  ;;  %v5785_v55 = vld [vmem:[#allocation7 + $0x2c8] sm:$0xff]  ;;  %v9308_v0 = vpack.c.bf16 %v5780_v47, %v5776_v17  ;;  %v5814_v18 = vld [vmem:[#allocation7 + $0x3b0] sm:$0xff]  ;;  %v9326_v17 = vpack.c.bf16 %v5821_v57, %v5817_v33  ;;  %v5816_v47 = vld [vmem:[#allocation7 + $0x3c0] sm:$0xff] }
 0x537   :  { %v4851_v53 = vmax.f32 %v4849_v45, %v4850_v43  ;;  %v9310_v7 = vpack.c.bf16 %v5789_v60, %v5785_v55  ;;  %v5788_v45 = vld [vmem:[#allocation7 + $0x2e0] sm:$0xff]  ;;  %v5793_v43 = vld [vmem:[#allocation7 + $0x308] sm:$0xff]  ;;  %v5822_v55 = vld [vmem:[#allocation7 + $0x3f0] sm:$0xff] }
 0x538   :  { %9293 = vmatpush1.bf16.msra.mxu0 %v9292_v34  ;;  %v5790_v34 = vld [vmem:[#allocation7 + $0x2f0] sm:$0xff]  ;;  %v9312_v44 = vpack.c.bf16 %v5788_v45, %v5784_v36  ;;  %v5820_v39 = vld [vmem:[#allocation7 + $0x3e0] sm:$0xff]  ;;  %v5825_v60 = vld [vmem:[#allocation7 + $0x408] sm:$0xff] }
 0x539   :  { %v4858_v59 = vadd.f32 %v6974_v50, %v4851_v53  ;;  %9485 = vmatpush1.bf16.msra.mxu1 %v9484_v9  ;;  %9295 = vmatprep.subr.bf16.mxu0 %v9294_v3  ;;  %v9502_v50 = vpack.c.bf16 %v5791_v27, %v5787_v20  ;;  %v5797_v9 = vld [vmem:[#allocation7 + $0x328] sm:$0xff]  ;;  %v5795_v3 = vld [vmem:[#allocation7 + $0x318] sm:$0xff]  ;;  %v9504_v2 = vpack.c.bf16 %v5790_v34, %v5786_v19  ;;  %v5824_v45 = vld [vmem:[#allocation7 + $0x400] sm:$0xff] }
 0x53a   :  { %9487 = vmatprep.subr.bf16.mxu1 %v9486_v12  ;;  %v9314_v12 = vpack.c.bf16 %v5797_v9, %v5793_v43  ;;  %v9506_v53 = vpack.c.bf16 %v5799_v61, %v5795_v3  ;;  %v5829_v20 = vld [vmem:[#allocation7 + $0x428] sm:$0xff]  ;;  %v5827_v27 = vld [vmem:[#allocation7 + $0x418] sm:$0xff]  ;;  %v5828_v19 = vld [vmem:[#allocation7 + $0x420] sm:$0xff] }
 0x53b   :  { %v4859_v30 = vmax.f32 %v4858_v59, 0.0  ;;  %v5803_v59 = vld [vmem:[#allocation7 + $0x358] sm:$0xff]  ;;  %v9330_v36 = vpack.c.bf16 %v5829_v20, %v5825_v60  ;;  %v5826_v34 = vld [vmem:[#allocation7 + $0x410] sm:$0xff]  ;;  %v5833_v9 = vld [vmem:[#allocation7 + $0x448] sm:$0xff]  ;;  %v9332_v61 = vpack.c.bf16 %v5828_v19, %v5824_v45 }
 0x53c   :  { %9297 = vmatpush1.bf16.msra.mxu0 %v9296_v10  ;;  %v5805_v10 = vld [vmem:[#allocation7 + $0x368] sm:$0xff]  ;;  %v5830_v43 = vld [vmem:[#allocation7 + $0x430] sm:$0xff]  ;;  %v5859_v57 = vld [vmem:[#allocation7 + $0x518] sm:$0xff] }
 0x53d   :  { %4860 = vst [vmem:[%s11456_s12 + $0x8] sm:$0xff] %v4859_v30  ;;  %9489 = vmatpush1.bf16.msra.mxu1 %v9488_v29  ;;  %9299 = vmatprep.subr.bf16.mxu0 %v9298_v21  ;;  %v5807_v29 = vld [vmem:[#allocation7 + $0x378] sm:$0xff]  ;;  %v9316_v21 = vpack.c.bf16 %v5796_v40, %v5792_v14  ;;  %v9318_v1 = vpack.c.bf16 %v5805_v10, %v5801_v54  ;;  %v5809_v30 = vld [vmem:[#allocation7 + $0x388] sm:$0xff]  ;;  %v5832_v14 = vld [vmem:[#allocation7 + $0x440] sm:$0xff] }
 0x53e   :  { %9491 = vmatprep.subr.bf16.mxu1 %v9490_v49  ;;  %v5804_v49 = vld [vmem:[#allocation7 + $0x360] sm:$0xff]  ;;  %v9510_v42 = vpack.c.bf16 %v5807_v29, %v5803_v59  ;;  %v9322_v41 = vpack.c.bf16 %v5813_v6, %v5809_v30  ;;  %v5837_v3 = vld [vmem:[#allocation7 + $0x468] sm:$0xff]  ;;  %v5843_v29 = vld [vmem:[#allocation7 + $0x498] sm:$0xff] }
 0x53f   :  { %v5836_v40 = vld [vmem:[#allocation7 + $0x460] sm:$0xff]  ;;  %v5841_v54 = vld [vmem:[#allocation7 + $0x488] sm:$0xff]  ;;  %v5846_v30 = vld [vmem:[#allocation7 + $0x4b0] sm:$0xff] }
 0x540   :  { %9301 = vmatpush1.bf16.msra.mxu0 %v9300_v37  ;;  %v5815_v37 = vld [vmem:[#allocation7 + $0x3b8] sm:$0xff]  ;;  %v5845_v10 = vld [vmem:[#allocation7 + $0x4a8] sm:$0xff]  ;;  %v5868_v45 = vld [vmem:[#allocation7 + $0x560] sm:$0xff] }
 0x541   :  { %9493 = vmatpush1.bf16.msra.mxu1 %v9492_v35  ;;  %9303 = vmatprep.subr.bf16.mxu0 %v9302_v8  ;;  %v9320_v35 = vpack.c.bf16 %v5804_v49, %v5800_v48  ;;  %v9512_v8 = vpack.c.bf16 %v5806_v22, %v5802_v51  ;;  %v9514_v15 = vpack.c.bf16 %v5815_v37, %v5811_v46  ;;  %v5840_v49 = vld [vmem:[#allocation7 + $0x480] sm:$0xff]  ;;  %v5849_v6 = vld [vmem:[#allocation7 + $0x4c8] sm:$0xff]  ;;  %v5851_v37 = vld [vmem:[#allocation7 + $0x4d8] sm:$0xff] }
 0x542   :  { %9495 = vmatprep.subr.bf16.mxu1 %v9494_v23  ;;  %v5810_v23 = vld [vmem:[#allocation7 + $0x390] sm:$0xff]  ;;  %v9338_v48 = vpack.c.bf16 %v5845_v10, %v5841_v54  ;;  %v5844_v51 = vld [vmem:[#allocation7 + $0x4a0] sm:$0xff]  ;;  %v5853_v46 = vld [vmem:[#allocation7 + $0x4e8] sm:$0xff] }
 0x543   :  { %v5861_v33 = vld [vmem:[#allocation7 + $0x528] sm:$0xff]  ;;  %v5867_v20 = vld [vmem:[#allocation7 + $0x558] sm:$0xff]  ;;  %v5866_v19 = vld [vmem:[#allocation7 + $0x550] sm:$0xff] }
 0x544   :  { %9305 = vmatpush1.bf16.msra.mxu0 %v9304_v26  ;;  %v5823_v26 = vld [vmem:[#allocation7 + $0x3f8] sm:$0xff]  ;;  %v5869_v60 = vld [vmem:[#allocation7 + $0x568] sm:$0xff] }
 0x545   :  { %9497 = vmatpush1.bf16.msra.mxu1 %v9496_v13  ;;  %9307 = vmatprep.subr.bf16.mxu0 %v9306_v5  ;;  %v9324_v13 = vpack.c.bf16 %v5812_v32, %v5808_v52  ;;  %v9516_v5 = vpack.c.bf16 %v5814_v18, %v5810_v23  ;;  %v9518_v56 = vpack.c.bf16 %v5823_v26, %v5819_v58  ;;  %v5848_v52 = vld [vmem:[#allocation7 + $0x4c0] sm:$0xff]  ;;  %v5850_v23 = vld [vmem:[#allocation7 + $0x4d0] sm:$0xff]  ;;  %v5857_v18 = vld [vmem:[#allocation7 + $0x508] sm:$0xff] }
 0x546   :  { %9499 = vmatprep.subr.bf16.mxu1 %v9498_v63  ;;  %v5818_v63 = vld [vmem:[#allocation7 + $0x3d0] sm:$0xff]  ;;  %v5852_v32 = vld [vmem:[#allocation7 + $0x4e0] sm:$0xff]  ;;  %v5863_v58 = vld [vmem:[#allocation7 + $0x538] sm:$0xff] }
 0x547   :  { %v9344_v26 = vpack.c.bf16 %v5852_v32, %v5848_v52  ;;  %v5881_v54 = vld [vmem:[#allocation7 + $0x5c8] sm:$0xff]  ;;  %v5892_v52 = vld [vmem:[#allocation7 + $0x620] sm:$0xff]  ;;  %v5890_v32 = vld [vmem:[#allocation7 + $0x610] sm:$0xff] }
 0x548   :  { %9309 = vmatpush1.bf16.msra.mxu0 %v9308_v0  ;;  %v5831_v0 = vld [vmem:[#allocation7 + $0x438] sm:$0xff]  ;;  %v5885_v10 = vld [vmem:[#allocation7 + $0x5e8] sm:$0xff] }
 0x549   :  { %9501 = vmatpush1.bf16.msra.mxu1 %v9500_v25  ;;  %9311 = vmatprep.subr.bf16.mxu0 %v9310_v7  ;;  %v9328_v25 = vpack.c.bf16 %v5820_v39, %v5816_v47  ;;  %v9520_v7 = vpack.c.bf16 %v5822_v55, %v5818_v63  ;;  %v5860_v47 = vld [vmem:[#allocation7 + $0x520] sm:$0xff]  ;;  %v5858_v39 = vld [vmem:[#allocation7 + $0x510] sm:$0xff]  ;;  %v9538_v63 = vpack.c.bf16 %v5863_v58, %v5859_v57  ;;  %v5865_v55 = vld [vmem:[#allocation7 + $0x548] sm:$0xff] }
 0x54a   :  { %9503 = vmatprep.subr.bf16.mxu1 %v9502_v50  ;;  %v9522_v50 = vpack.c.bf16 %v5831_v0, %v5827_v27  ;;  %v5871_v27 = vld [vmem:[#allocation7 + $0x578] sm:$0xff] }
 0x54b   :  { %v5903_v57 = vld [vmem:[#allocation7 + $0x678] sm:$0xff] }
 0x54c   :  { %9313 = vmatpush1.bf16.msra.mxu0 %v9312_v44  ;;  %v5835_v44 = vld [vmem:[#allocation7 + $0x458] sm:$0xff] }
 0x54d   :  { %9505 = vmatpush1.bf16.msra.mxu1 %v9504_v2  ;;  %9315 = vmatprep.subr.bf16.mxu0 %v9314_v12  ;;  %v5839_v2 = vld [vmem:[#allocation7 + $0x478] sm:$0xff]  ;;  %v9524_v12 = vpack.c.bf16 %v5830_v43, %v5826_v34  ;;  %v5870_v34 = vld [vmem:[#allocation7 + $0x570] sm:$0xff]  ;;  %v5873_v43 = vld [vmem:[#allocation7 + $0x588] sm:$0xff] }
 0x54e   :  { %9507 = vmatprep.subr.bf16.mxu1 %v9506_v53  ;;  %v9334_v53 = vpack.c.bf16 %v5837_v3, %v5833_v9  ;;  %v9526_v59 = vpack.c.bf16 %v5839_v2, %v5835_v44  ;;  %v5877_v9 = vld [vmem:[#allocation7 + $0x5a8] sm:$0xff]  ;;  %v5875_v3 = vld [vmem:[#allocation7 + $0x598] sm:$0xff]  ;;  %v9544_v2 = vpack.c.bf16 %v5870_v34, %v5866_v19 }
 0x54f   :  { %v5913_v34 = vld [vmem:[#allocation7 + $0x6c8] sm:$0xff] }
 0x550   :  { %9317 = vmatpush1.bf16.msra.mxu0 %v9316_v21  ;;  %v5847_v21 = vld [vmem:[#allocation7 + $0x4b8] sm:$0xff] }
 0x551   :  { %9509 = vmatpush1.bf16.msra.mxu1 %v9508_v31  ;;  %9319 = vmatprep.subr.bf16.mxu0 %v9318_v1  ;;  %v9336_v31 = vpack.c.bf16 %v5836_v40, %v5832_v14  ;;  %v9528_v1 = vpack.c.bf16 %v5838_v62, %v5834_v16  ;;  %v9530_v22 = vpack.c.bf16 %v5847_v21, %v5843_v29  ;;  %v5872_v14 = vld [vmem:[#allocation7 + $0x580] sm:$0xff]  ;;  %v5874_v16 = vld [vmem:[#allocation7 + $0x590] sm:$0xff]  ;;  %v5887_v29 = vld [vmem:[#allocation7 + $0x5f8] sm:$0xff] }
 0x552   :  { %9511 = vmatprep.subr.bf16.mxu1 %v9510_v42  ;;  %v5842_v42 = vld [vmem:[#allocation7 + $0x490] sm:$0xff]  ;;  %v5876_v40 = vld [vmem:[#allocation7 + $0x5a0] sm:$0xff] }
 0x553   :  { %v5878_v62 = vld [vmem:[#allocation7 + $0x5b0] sm:$0xff]  ;;  %v9356_v21 = vpack.c.bf16 %v5876_v40, %v5872_v14  ;;  %v5916_v14 = vld [vmem:[#allocation7 + $0x6e0] sm:$0xff] }
 0x554   :  { %9321 = vmatpush1.bf16.msra.mxu0 %v9320_v35  ;;  %v9340_v35 = vpack.c.bf16 %v5844_v51, %v5840_v49  ;;  %v5884_v49 = vld [vmem:[#allocation7 + $0x5e0] sm:$0xff]  ;;  %v5882_v51 = vld [vmem:[#allocation7 + $0x5d0] sm:$0xff] }
 0x555   :  { %9513 = vmatpush1.bf16.msra.mxu1 %v9512_v8  ;;  %9323 = vmatprep.subr.bf16.mxu0 %v9322_v41  ;;  %v9532_v8 = vpack.c.bf16 %v5846_v30, %v5842_v42  ;;  %v9342_v41 = vpack.c.bf16 %v5853_v46, %v5849_v6  ;;  %v5889_v30 = vld [vmem:[#allocation7 + $0x608] sm:$0xff]  ;;  %v5891_v46 = vld [vmem:[#allocation7 + $0x618] sm:$0xff]  ;;  %v5914_v40 = vld [vmem:[#allocation7 + $0x6d0] sm:$0xff] }
 0x556   :  { %9515 = vmatprep.subr.bf16.mxu1 %v9514_v15  ;;  %v5893_v6 = vld [vmem:[#allocation7 + $0x628] sm:$0xff] }
 0x558   :  { %9325 = vmatpush1.bf16.msra.mxu0 %v9324_v13 }
 0x559   :  { %9517 = vmatpush1.bf16.msra.mxu1 %v9516_v5  ;;  %9327 = vmatprep.subr.bf16.mxu0 %v9326_v17  ;;  %v9346_v5 = vpack.c.bf16 %v5861_v33, %v5857_v18  ;;  %v5856_v17 = vld [vmem:[#allocation7 + $0x500] sm:$0xff]  ;;  %v5901_v18 = vld [vmem:[#allocation7 + $0x668] sm:$0xff]  ;;  %v5899_v33 = vld [vmem:[#allocation7 + $0x658] sm:$0xff] }
 0x55a   :  { %9519 = vmatprep.subr.bf16.mxu1 %v9518_v56  ;;  %v5862_v56 = vld [vmem:[#allocation7 + $0x530] sm:$0xff]  ;;  %v9348_v0 = vpack.c.bf16 %v5860_v47, %v5856_v17  ;;  %v5900_v17 = vld [vmem:[#allocation7 + $0x660] sm:$0xff] }
 0x55b   :  { %v5898_v47 = vld [vmem:[#allocation7 + $0x650] sm:$0xff] }
 0x55c   :  { %9329 = vmatpush1.bf16.msra.mxu0 %v9328_v25  ;;  %v9540_v25 = vpack.c.bf16 %v5862_v56, %v5858_v39  ;;  %v9558_v39 = vpack.c.bf16 %v5903_v57, %v5899_v33  ;;  %v5905_v56 = vld [vmem:[#allocation7 + $0x688] sm:$0xff]  ;;  %v5943_v33 = vld [vmem:[#allocation7 + $0x7b8] sm:$0xff] }
 0x55d   :  { %9521 = vmatpush1.bf16.msra.mxu1 %v9520_v7  ;;  %9331 = vmatprep.subr.bf16.mxu0 %v9330_v36  ;;  %v9350_v7 = vpack.c.bf16 %v5869_v60, %v5865_v55  ;;  %v5864_v36 = vld [vmem:[#allocation7 + $0x540] sm:$0xff]  ;;  %v5909_v55 = vld [vmem:[#allocation7 + $0x6a8] sm:$0xff]  ;;  %v5907_v60 = vld [vmem:[#allocation7 + $0x698] sm:$0xff] }
 0x55e   :  { %9523 = vmatprep.subr.bf16.mxu1 %v9522_v50  ;;  %v9542_v50 = vpack.c.bf16 %v5871_v27, %v5867_v20  ;;  %v9352_v44 = vpack.c.bf16 %v5868_v45, %v5864_v36  ;;  %v5911_v20 = vld [vmem:[#allocation7 + $0x6b8] sm:$0xff]  ;;  %v5908_v36 = vld [vmem:[#allocation7 + $0x6a0] sm:$0xff]  ;;  %v5906_v45 = vld [vmem:[#allocation7 + $0x690] sm:$0xff] }
 0x55f   :  { %6145 = vmatmul.mubr.f32.vlgmr.msra.gmra.mrb[30].mxu0 %v11364_v38  ;;  %v9562_v19 = vpack.c.bf16 %v5911_v20, %v5907_v60  ;;  %v5951_v60 = vld [vmem:[#allocation7 + $0x7f8] sm:$0xff] }
 0x560   :  { %6358 = vmatmul.mubr.f32.vlgmr.msra.gmra.mrb[30].mxu1 %v11364_v38  ;;  %9333 = vmatpush1.bf16.msra.mxu0 %v9332_v61  ;;  %v5855_v38 = vld [vmem:[#allocation7 + $0x4f8] sm:$0xff] }
 0x561   :  { %6215 = vmatprep.mubr.f32.mxu0 %v11378_v28  ;;  %9525 = vmatpush1.bf16.msra.mxu1 %v9524_v12  ;;  %v9534_v15 = vpack.c.bf16 %v5855_v38, %v5851_v37  ;;  %v5879_v61 = vld [vmem:[#allocation7 + $0x5b8] sm:$0xff]  ;;  %v9354_v12 = vpack.c.bf16 %v5877_v9, %v5873_v43  ;;  %v5917_v43 = vld [vmem:[#allocation7 + $0x6e8] sm:$0xff] }
 0x562   :  { %6428 = vmatprep.mubr.f32.mxu1 %v11378_v28  ;;  %9335 = vmatprep.subr.bf16.mxu0 %v9334_v53  ;;  %v5854_v28 = vld [vmem:[#allocation7 + $0x4f0] sm:$0xff]  ;;  %v9546_v53 = vpack.c.bf16 %v5879_v61, %v5875_v3  ;;  %v5895_v37 = vld [vmem:[#allocation7 + $0x638] sm:$0xff] }
 0x563   :  { %9527 = vmatprep.subr.bf16.mxu1 %v9526_v59  ;;  %v9536_v13 = vpack.c.bf16 %v5854_v28, %v5850_v23  ;;  %v5883_v59 = vld [vmem:[#allocation7 + $0x5d8] sm:$0xff]  ;;  %v9554_v23 = vpack.c.bf16 %v5895_v37, %v5891_v46  ;;  %v5897_v28 = vld [vmem:[#allocation7 + $0x648] sm:$0xff] }
 0x564   :  { %9337 = vmatpush1.bf16.msra.mxu0 %v9336_v31  ;;  %v9548_v31 = vpack.c.bf16 %v5878_v62, %v5874_v16  ;;  %v9550_v42 = vpack.c.bf16 %v5887_v29, %v5883_v59  ;;  %v5915_v9 = vld [vmem:[#allocation7 + $0x6d8] sm:$0xff]  ;;  %v5921_v62 = vld [vmem:[#allocation7 + $0x708] sm:$0xff] }
 0x565   :  { %9529 = vmatpush1.bf16.msra.mxu1 %v9528_v1  ;;  %9339 = vmatprep.subr.bf16.mxu0 %v9338_v48  ;;  %v9358_v1 = vpack.c.bf16 %v5885_v10, %v5881_v54  ;;  %v5880_v48 = vld [vmem:[#allocation7 + $0x5c0] sm:$0xff]  ;;  %v5919_v3 = vld [vmem:[#allocation7 + $0x6f8] sm:$0xff]  ;;  %v5925_v54 = vld [vmem:[#allocation7 + $0x728] sm:$0xff] }
 0x566   :  { %9531 = vmatprep.subr.bf16.mxu1 %v9530_v22  ;;  %v5886_v22 = vld [vmem:[#allocation7 + $0x5f0] sm:$0xff]  ;;  %v9360_v38 = vpack.c.bf16 %v5884_v49, %v5880_v48  ;;  %v9566_v16 = vpack.c.bf16 %v5919_v3, %v5915_v9  ;;  %v5923_v10 = vld [vmem:[#allocation7 + $0x718] sm:$0xff]  ;;  %v5924_v48 = vld [vmem:[#allocation7 + $0x720] sm:$0xff] }
 0x567   :  { %v5927_v59 = vld [vmem:[#allocation7 + $0x738] sm:$0xff]  ;;  %v5922_v49 = vld [vmem:[#allocation7 + $0x710] sm:$0xff] }
 0x568   :  { %9341 = vmatpush1.bf16.msra.mxu0 %v9340_v35  ;;  %v9552_v35 = vpack.c.bf16 %v5886_v22, %v5882_v51  ;;  %v9570_v51 = vpack.c.bf16 %v5927_v59, %v5923_v10  ;;  %v5929_v22 = vld [vmem:[#allocation7 + $0x748] sm:$0xff]  ;;  %v5935_v46 = vld [vmem:[#allocation7 + $0x778] sm:$0xff] }
 0x569   :  { %9533 = vmatpush1.bf16.msra.mxu1 %v9532_v8  ;;  %9343 = vmatprep.subr.bf16.mxu0 %v9342_v41  ;;  %v9362_v8 = vpack.c.bf16 %v5893_v6, %v5889_v30  ;;  %v5888_v41 = vld [vmem:[#allocation7 + $0x600] sm:$0xff]  ;;  %v5933_v30 = vld [vmem:[#allocation7 + $0x768] sm:$0xff]  ;;  %v5931_v6 = vld [vmem:[#allocation7 + $0x758] sm:$0xff] }
 0x56a   :  { %9535 = vmatprep.subr.bf16.mxu1 %v9534_v15  ;;  %v5894_v15 = vld [vmem:[#allocation7 + $0x630] sm:$0xff]  ;;  %v9364_v58 = vpack.c.bf16 %v5892_v52, %v5888_v41  ;;  %v5932_v41 = vld [vmem:[#allocation7 + $0x760] sm:$0xff]  ;;  %v5959_v9 = vld [vmem:[#allocation7 + $0x838] sm:$0xff] }
 0x56b   :  { %v5930_v52 = vld [vmem:[#allocation7 + $0x750] sm:$0xff]  ;;  %v5965_v10 = vld [vmem:[#allocation7 + $0x868] sm:$0xff] }
 0x56c   :  { %9345 = vmatpush1.bf16.msra.mxu0 %v9344_v26  ;;  %v9556_v26 = vpack.c.bf16 %v5894_v15, %v5890_v32  ;;  %v9574_v32 = vpack.c.bf16 %v5935_v46, %v5931_v6  ;;  %v5937_v15 = vld [vmem:[#allocation7 + $0x788] sm:$0xff]  ;;  %v5971_v46 = vld [vmem:[#allocation7 + $0x898] sm:$0xff] }
 0x56d   :  { %9537 = vmatpush1.bf16.msra.mxu1 %v9536_v13  ;;  %9347 = vmatprep.subr.bf16.mxu0 %v9346_v5  ;;  %v9366_v13 = vpack.c.bf16 %v5901_v18, %v5897_v28  ;;  %v5896_v5 = vld [vmem:[#allocation7 + $0x640] sm:$0xff]  ;;  %v5941_v28 = vld [vmem:[#allocation7 + $0x7a8] sm:$0xff]  ;;  %v5939_v18 = vld [vmem:[#allocation7 + $0x798] sm:$0xff] }
 0x56e   :  { %9539 = vmatprep.subr.bf16.mxu1 %v9538_v63  ;;  %v5902_v63 = vld [vmem:[#allocation7 + $0x670] sm:$0xff]  ;;  %v9368_v27 = vpack.c.bf16 %v5900_v17, %v5896_v5  ;;  %v5940_v5 = vld [vmem:[#allocation7 + $0x7a0] sm:$0xff] }
 0x56f   :  { %v5938_v17 = vld [vmem:[#allocation7 + $0x790] sm:$0xff] }
 0x570   :  { %9349 = vmatpush1.bf16.msra.mxu0 %v9348_v0  ;;  %v9560_v0 = vpack.c.bf16 %v5902_v63, %v5898_v47  ;;  %v9578_v47 = vpack.c.bf16 %v5943_v33, %v5939_v18  ;;  %v5945_v63 = vld [vmem:[#allocation7 + $0x7c8] sm:$0xff]  ;;  %v5979_v33 = vld [vmem:[#allocation7 + $0x8d8] sm:$0xff] }
 0x571   :  { %9541 = vmatpush1.bf16.msra.mxu1 %v9540_v25  ;;  %9351 = vmatprep.subr.bf16.mxu0 %v9350_v7  ;;  %v9370_v25 = vpack.c.bf16 %v5909_v55, %v5905_v56  ;;  %v5904_v7 = vld [vmem:[#allocation7 + $0x680] sm:$0xff]  ;;  %v5949_v56 = vld [vmem:[#allocation7 + $0x7e8] sm:$0xff]  ;;  %v5947_v55 = vld [vmem:[#allocation7 + $0x7d8] sm:$0xff] }
 0x572   :  { %9543 = vmatprep.subr.bf16.mxu1 %v9542_v50  ;;  %v5910_v50 = vld [vmem:[#allocation7 + $0x6b0] sm:$0xff]  ;;  %v9372_v61 = vpack.c.bf16 %v5908_v36, %v5904_v7  ;;  %v5948_v7 = vld [vmem:[#allocation7 + $0x7e0] sm:$0xff]  ;;  %v5981_v18 = vld [vmem:[#allocation7 + $0x8e8] sm:$0xff] }
 0x573   :  { %v5946_v36 = vld [vmem:[#allocation7 + $0x7d0] sm:$0xff] }
 0x574   :  { %9353 = vmatpush1.bf16.msra.mxu0 %v9352_v44  ;;  %v9564_v44 = vpack.c.bf16 %v5910_v50, %v5906_v45  ;;  %v9582_v45 = vpack.c.bf16 %v5951_v60, %v5947_v55  ;;  %v5953_v50 = vld [vmem:[#allocation7 + $0x808] sm:$0xff]  ;;  %v5987_v55 = vld [vmem:[#allocation7 + $0x918] sm:$0xff] }
 0x575   :  { %9545 = vmatpush1.bf16.msra.mxu1 %v9544_v2  ;;  %9355 = vmatprep.subr.bf16.mxu0 %v9354_v12  ;;  %v9374_v2 = vpack.c.bf16 %v5917_v43, %v5913_v34  ;;  %v5912_v12 = vld [vmem:[#allocation7 + $0x6c0] sm:$0xff]  ;;  %v5957_v34 = vld [vmem:[#allocation7 + $0x828] sm:$0xff]  ;;  %v5955_v43 = vld [vmem:[#allocation7 + $0x818] sm:$0xff] }
 0x576   :  { %9547 = vmatprep.subr.bf16.mxu1 %v9546_v53  ;;  %v5918_v53 = vld [vmem:[#allocation7 + $0x6f0] sm:$0xff]  ;;  %v9376_v29 = vpack.c.bf16 %v5916_v14, %v5912_v12  ;;  %v5952_v12 = vld [vmem:[#allocation7 + $0x800] sm:$0xff]  ;;  %v5991_v60 = vld [vmem:[#allocation7 + $0x938] sm:$0xff] }
 0x577   :  { %v5956_v14 = vld [vmem:[#allocation7 + $0x820] sm:$0xff] }
 0x578   :  { %9357 = vmatpush1.bf16.msra.mxu0 %v9356_v21  ;;  %v9568_v21 = vpack.c.bf16 %v5918_v53, %v5914_v40  ;;  %v9586_v40 = vpack.c.bf16 %v5959_v9, %v5955_v43  ;;  %v5958_v53 = vld [vmem:[#allocation7 + $0x830] sm:$0xff]  ;;  %v9396_v59 = vpack.c.bf16 %v5956_v14, %v5952_v12  ;;  %v5995_v43 = vld [vmem:[#allocation7 + $0x958] sm:$0xff]  ;;  %v5996_v12 = vld [vmem:[#allocation7 + $0x960] sm:$0xff] }
 0x579   :  { %9549 = vmatpush1.bf16.msra.mxu1 %v9548_v31  ;;  %9359 = vmatprep.subr.bf16.mxu0 %v9358_v1  ;;  %v9378_v31 = vpack.c.bf16 %v5925_v54, %v5921_v62  ;;  %v5920_v1 = vld [vmem:[#allocation7 + $0x700] sm:$0xff]  ;;  %v5961_v54 = vld [vmem:[#allocation7 + $0x848] sm:$0xff]  ;;  %v5999_v9 = vld [vmem:[#allocation7 + $0x978] sm:$0xff] }
 0x57a   :  { %9551 = vmatprep.subr.bf16.mxu1 %v9550_v42  ;;  %v5926_v42 = vld [vmem:[#allocation7 + $0x730] sm:$0xff]  ;;  %v9380_v37 = vpack.c.bf16 %v5924_v48, %v5920_v1  ;;  %v5960_v1 = vld [vmem:[#allocation7 + $0x840] sm:$0xff] }
 0x57b   :  { %v5964_v48 = vld [vmem:[#allocation7 + $0x860] sm:$0xff]  ;;  %v5994_v14 = vld [vmem:[#allocation7 + $0x950] sm:$0xff] }
 0x57c   :  { %9361 = vmatpush1.bf16.msra.mxu0 %v9360_v38  ;;  %v9572_v38 = vpack.c.bf16 %v5926_v42, %v5922_v49  ;;  %v5962_v49 = vld [vmem:[#allocation7 + $0x850] sm:$0xff] }
 0x57d   :  { %9553 = vmatpush1.bf16.msra.mxu1 %v9552_v35  ;;  %9363 = vmatprep.subr.bf16.mxu0 %v9362_v8  ;;  %v9382_v35 = vpack.c.bf16 %v5933_v30, %v5929_v22  ;;  %v5928_v8 = vld [vmem:[#allocation7 + $0x740] sm:$0xff]  ;;  %v5966_v42 = vld [vmem:[#allocation7 + $0x870] sm:$0xff]  ;;  %v5969_v22 = vld [vmem:[#allocation7 + $0x888] sm:$0xff] }
 0x57e   :  { %9555 = vmatprep.subr.bf16.mxu1 %v9554_v23  ;;  %v5934_v23 = vld [vmem:[#allocation7 + $0x770] sm:$0xff]  ;;  %v9384_v57 = vpack.c.bf16 %v5932_v41, %v5928_v8  ;;  %v5973_v30 = vld [vmem:[#allocation7 + $0x8a8] sm:$0xff]  ;;  %v5968_v41 = vld [vmem:[#allocation7 + $0x880] sm:$0xff] }
 0x57f   :  { %v9402_v8 = vpack.c.bf16 %v5973_v30, %v5969_v22  ;;  %v6013_v22 = vld [vmem:[#allocation7 + $0x9e8] sm:$0xff]  ;;  %v6011_v30 = vld [vmem:[#allocation7 + $0x9d8] sm:$0xff] }
 0x580   :  { %9365 = vmatpush1.bf16.msra.mxu0 %v9364_v58  ;;  %v9576_v58 = vpack.c.bf16 %v5934_v23, %v5930_v52  ;;  %v5972_v52 = vld [vmem:[#allocation7 + $0x8a0] sm:$0xff] }
 0x581   :  { %9557 = vmatpush1.bf16.msra.mxu1 %v9556_v26  ;;  %9367 = vmatprep.subr.bf16.mxu0 %v9366_v13  ;;  %v9386_v26 = vpack.c.bf16 %v5941_v28, %v5937_v15  ;;  %v5936_v13 = vld [vmem:[#allocation7 + $0x780] sm:$0xff]  ;;  %v5974_v15 = vld [vmem:[#allocation7 + $0x8b0] sm:$0xff]  ;;  %v5977_v28 = vld [vmem:[#allocation7 + $0x8c8] sm:$0xff] }
 0x582   :  { %9559 = vmatprep.subr.bf16.mxu1 %v9558_v39  ;;  %v5942_v39 = vld [vmem:[#allocation7 + $0x7b0] sm:$0xff]  ;;  %v9388_v20 = vpack.c.bf16 %v5940_v5, %v5936_v13  ;;  %v5976_v13 = vld [vmem:[#allocation7 + $0x8c0] sm:$0xff] }
 0x583   :  { %v5980_v5 = vld [vmem:[#allocation7 + $0x8e0] sm:$0xff] }
 0x584   :  { %9369 = vmatpush1.bf16.msra.mxu0 %v9368_v27  ;;  %v9580_v27 = vpack.c.bf16 %v5942_v39, %v5938_v17  ;;  %v5978_v17 = vld [vmem:[#allocation7 + $0x8d0] sm:$0xff] }
 0x585   :  { %9561 = vmatpush1.bf16.msra.mxu1 %v9560_v0  ;;  %9371 = vmatprep.subr.bf16.mxu0 %v9370_v25  ;;  %v9390_v0 = vpack.c.bf16 %v5949_v56, %v5945_v63  ;;  %v5944_v25 = vld [vmem:[#allocation7 + $0x7c0] sm:$0xff]  ;;  %v5982_v39 = vld [vmem:[#allocation7 + $0x8f0] sm:$0xff]  ;;  %v5985_v63 = vld [vmem:[#allocation7 + $0x908] sm:$0xff] }
 0x586   :  { %9563 = vmatprep.subr.bf16.mxu1 %v9562_v19  ;;  %v5950_v19 = vld [vmem:[#allocation7 + $0x7f0] sm:$0xff]  ;;  %v9392_v3 = vpack.c.bf16 %v5948_v7, %v5944_v25  ;;  %v5989_v56 = vld [vmem:[#allocation7 + $0x928] sm:$0xff]  ;;  %v5984_v25 = vld [vmem:[#allocation7 + $0x900] sm:$0xff] }
 0x587   :  { %v5988_v7 = vld [vmem:[#allocation7 + $0x920] sm:$0xff] }
 0x588   :  { %9373 = vmatpush1.bf16.msra.mxu0 %v9372_v61  ;;  %v6972_v61 = vld [vmem:[#allocation5] ss:$0 sm:$0xff] }
 0x589   :  { %9565 = vmatpush1.bf16.msra.mxu1 %v9564_v44  ;;  %9375 = vmatprep.subr.bf16.mxu0 %v9374_v2  ;;  %v9584_v44 = vpack.c.bf16 %v5950_v19, %v5946_v36  ;;  %v9394_v2 = vpack.c.bf16 %v5957_v34, %v5953_v50  ;;  %v3200_v62 = vadd.f32 %v6972_v61, %v11346_v11  ;;  %v5986_v36 = vld [vmem:[#allocation7 + $0x910] sm:$0xff]  ;;  %v5993_v50 = vld [vmem:[#allocation7 + $0x948] sm:$0xff] }
 0x58a   :  { %9567 = vmatprep.subr.bf16.mxu1 %v9566_v16  ;;  %v5954_v16 = vld [vmem:[#allocation7 + $0x810] sm:$0xff]  ;;  %v5997_v34 = vld [vmem:[#allocation7 + $0x968] sm:$0xff] }
 0x58b   :  { %v3201_v11 = vmax.f32 %v3200_v62, 0.0  ;;  %v5990_v19 = vld [vmem:[#allocation7 + $0x930] sm:$0xff]  ;;  %v6005_v62 = vld [vmem:[#allocation7 + $0x9a8] sm:$0xff] }
 0x58c   :  { %9377 = vmatpush1.bf16.msra.mxu0 %v9376_v29  ;;  %v5963_v29 = vld [vmem:[#allocation7 + $0x858] sm:$0xff]  ;;  %v9604_v61 = vpack.c.bf16 %v5990_v19, %v5986_v36  ;;  %v6033_v36 = vld [vmem:[#allocation7 + $0xa88] sm:$0xff] }
 0x58d   :  { %9569 = vmatpush1.bf16.msra.mxu1 %v9568_v21  ;;  %9379 = vmatprep.subr.bf16.mxu0 %v9378_v31  ;;  %v5967_v21 = vld [vmem:[#allocation7 + $0x878] sm:$0xff]  ;;  %v9588_v31 = vpack.c.bf16 %v5958_v53, %v5954_v16  ;;  %v5998_v16 = vld [vmem:[#allocation7 + $0x970] sm:$0xff]  ;;  %v6001_v53 = vld [vmem:[#allocation7 + $0x988] sm:$0xff] }
 0x58e   :  { %9571 = vmatprep.subr.bf16.mxu1 %v9570_v51  ;;  %v9398_v51 = vpack.c.bf16 %v5965_v10, %v5961_v54  ;;  %v9590_v6 = vpack.c.bf16 %v5967_v21, %v5963_v29  ;;  %v6003_v54 = vld [vmem:[#allocation7 + $0x998] sm:$0xff]  ;;  %v9608_v29 = vpack.c.bf16 %v5998_v16, %v5994_v14  ;;  %v9418_v21 = vpack.c.bf16 %v6005_v62, %v6001_v53  ;;  %v6041_v14 = vld [vmem:[#allocation7 + $0xac8] sm:$0xff] }
 0x58f   :  { %v6007_v10 = vld [vmem:[#allocation7 + $0x9b8] sm:$0xff] }
 0x590   :  { %9381 = vmatpush1.bf16.msra.mxu0 %v9380_v37  ;;  %v5975_v37 = vld [vmem:[#allocation7 + $0x8b8] sm:$0xff] }
 0x591   :  { %9573 = vmatpush1.bf16.msra.mxu1 %v9572_v38  ;;  %9383 = vmatprep.subr.bf16.mxu0 %v9382_v35  ;;  %v9400_v38 = vpack.c.bf16 %v5964_v48, %v5960_v1  ;;  %v9592_v35 = vpack.c.bf16 %v5966_v42, %v5962_v49  ;;  %v9594_v23 = vpack.c.bf16 %v5975_v37, %v5971_v46  ;;  %v6004_v1 = vld [vmem:[#allocation7 + $0x9a0] sm:$0xff]  ;;  %v6002_v48 = vld [vmem:[#allocation7 + $0x990] sm:$0xff]  ;;  %v6009_v42 = vld [vmem:[#allocation7 + $0x9c8] sm:$0xff] }
 0x592   :  { %9575 = vmatprep.subr.bf16.mxu1 %v9574_v32  ;;  %v5970_v32 = vld [vmem:[#allocation7 + $0x890] sm:$0xff]  ;;  %v9610_v49 = vpack.c.bf16 %v6007_v10, %v6003_v54  ;;  %v9422_v37 = vpack.c.bf16 %v6013_v22, %v6009_v42  ;;  %v6035_v19 = vld [vmem:[#allocation7 + $0xa98] sm:$0xff] }
 0x593   :  { %v6043_v16 = vld [vmem:[#allocation7 + $0xad8] sm:$0xff] }
 0x594   :  { %9385 = vmatpush1.bf16.msra.mxu0 %v9384_v57  ;;  %v5983_v57 = vld [vmem:[#allocation7 + $0x8f8] sm:$0xff] }
 0x595   :  { %9577 = vmatpush1.bf16.msra.mxu1 %v9576_v58  ;;  %9387 = vmatprep.subr.bf16.mxu0 %v9386_v26  ;;  %v9596_v58 = vpack.c.bf16 %v5974_v15, %v5970_v32  ;;  %v9406_v26 = vpack.c.bf16 %v5981_v18, %v5977_v28  ;;  %v6017_v32 = vld [vmem:[#allocation7 + $0xa08] sm:$0xff]  ;;  %v6019_v15 = vld [vmem:[#allocation7 + $0xa18] sm:$0xff] }
 0x596   :  { %9579 = vmatprep.subr.bf16.mxu1 %v9578_v47  ;;  %v9598_v47 = vpack.c.bf16 %v5983_v57, %v5979_v33  ;;  %v6023_v28 = vld [vmem:[#allocation7 + $0xa38] sm:$0xff] }
 0x597   :  { %v6047_v53 = vld [vmem:[#allocation7 + $0xaf8] sm:$0xff] }
 0x598   :  { %9389 = vmatpush1.bf16.msra.mxu0 %v9388_v20  ;;  %v9408_v20 = vpack.c.bf16 %v5980_v5, %v5976_v13  ;;  %v9618_v13 = vpack.c.bf16 %v6023_v28, %v6019_v15  ;;  %v6022_v5 = vld [vmem:[#allocation7 + $0xa30] sm:$0xff]  ;;  %v6055_v42 = vld [vmem:[#allocation7 + $0xb38] sm:$0xff] }
 0x599   :  { %9581 = vmatpush1.bf16.msra.mxu1 %v9580_v27  ;;  %9391 = vmatprep.subr.bf16.mxu0 %v9390_v0  ;;  %v9600_v27 = vpack.c.bf16 %v5982_v39, %v5978_v17  ;;  %v9410_v0 = vpack.c.bf16 %v5989_v56, %v5985_v63  ;;  %v6025_v17 = vld [vmem:[#allocation7 + $0xa48] sm:$0xff]  ;;  %v6027_v39 = vld [vmem:[#allocation7 + $0xa58] sm:$0xff] }
 0x59a   :  { %9583 = vmatprep.subr.bf16.mxu1 %v9582_v45  ;;  %v9602_v45 = vpack.c.bf16 %v5991_v60, %v5987_v55  ;;  %v6031_v63 = vld [vmem:[#allocation7 + $0xa78] sm:$0xff] }
 0x59c   :  { %9393 = vmatpush1.bf16.msra.mxu0 %v9392_v3  ;;  %v9412_v3 = vpack.c.bf16 %v5988_v7, %v5984_v25  ;;  %v9622_v25 = vpack.c.bf16 %v6031_v63, %v6027_v39  ;;  %v6030_v7 = vld [vmem:[#allocation7 + $0xa70] sm:$0xff] }
 0x59d   :  { %9585 = vmatpush1.bf16.msra.mxu1 %v9584_v44  ;;  %9395 = vmatprep.subr.bf16.mxu0 %v9394_v2  ;;  %v9414_v44 = vpack.c.bf16 %v5997_v34, %v5993_v50  ;;  %v5992_v2 = vld [vmem:[#allocation7 + $0x940] sm:$0xff]  ;;  %v6039_v50 = vld [vmem:[#allocation7 + $0xab8] sm:$0xff] }
 0x59e   :  { %9587 = vmatprep.subr.bf16.mxu1 %v9586_v40  ;;  %v9606_v40 = vpack.c.bf16 %v5999_v9, %v5995_v43 }
 0x59f   :  { %6216 = vmatmul.mubr.f32.vlgmr.msra.gmra.mrb[30].mxu0 %v11385_v4 }
 0x5a0   :  { %6429 = vmatmul.mubr.f32.vlgmr.msra.gmra.mrb[30].mxu1 %v11385_v4  ;;  %9397 = vmatpush1.bf16.msra.mxu0 %v9396_v59  ;;  %v9404_v4 = vpack.c.bf16 %v5972_v52, %v5968_v41  ;;  %v9416_v59 = vpack.c.bf16 %v5996_v12, %v5992_v2  ;;  %v6014_v52 = vld [vmem:[#allocation7 + $0x9f0] sm:$0xff]  ;;  %v9626_v2 = vpack.c.bf16 %v6039_v50, %v6035_v19 }
 0x5a1   :  { %6286 = vmatprep.mubr.f32.mxu0 %v3201_v11  ;;  %9589 = vmatpush1.bf16.msra.mxu1 %v9588_v31  ;;  %v6000_v31 = vld [vmem:[#allocation7 + $0x980] sm:$0xff]  ;;  %v6038_v12 = vld [vmem:[#allocation7 + $0xab0] sm:$0xff] }
 0x5a2   :  { %6499 = vmatprep.mubr.f32.mxu1 %v3201_v11  ;;  %9399 = vmatprep.subr.bf16.mxu0 %v9398_v51  ;;  %v6006_v51 = vld [vmem:[#allocation7 + $0x9b0] sm:$0xff]  ;;  %v6015_v11 = vld [vmem:[#allocation7 + $0x9f8] sm:$0xff] }
 0x5a3   :  { %9591 = vmatprep.subr.bf16.mxu1 %v9590_v6  ;;  %v9420_v6 = vpack.c.bf16 %v6004_v1, %v6000_v31  ;;  %v9612_v46 = vpack.c.bf16 %v6006_v51, %v6002_v48  ;;  %v9614_v41 = vpack.c.bf16 %v6015_v11, %v6011_v30  ;;  %v9630_v31 = vpack.c.bf16 %v6047_v53, %v6043_v16  ;;  %v6046_v1 = vld [vmem:[#allocation7 + $0xaf0] sm:$0xff]  ;;  %v6049_v48 = vld [vmem:[#allocation7 + $0xb08] sm:$0xff]  ;;  %v6051_v51 = vld [vmem:[#allocation7 + $0xb18] sm:$0xff] }
 0x5a4   :  { %9401 = vmatpush1.bf16.msra.mxu0 %v9400_v38  ;;  %v6008_v38 = vld [vmem:[#allocation7 + $0x9c0] sm:$0xff] }
 0x5a5   :  { %9593 = vmatpush1.bf16.msra.mxu1 %v9592_v35  ;;  %9403 = vmatprep.subr.bf16.mxu0 %v9402_v8  ;;  %v6012_v35 = vld [vmem:[#allocation7 + $0x9e0] sm:$0xff]  ;;  %v6010_v8 = vld [vmem:[#allocation7 + $0x9d0] sm:$0xff] }
 0x5a6   :  { %9595 = vmatprep.subr.bf16.mxu1 %v9594_v23  ;;  %v6021_v23 = vld [vmem:[#allocation7 + $0xa28] sm:$0xff]  ;;  %v9424_v18 = vpack.c.bf16 %v6012_v35, %v6008_v38  ;;  %v9616_v33 = vpack.c.bf16 %v6014_v52, %v6010_v8  ;;  %v9634_v38 = vpack.c.bf16 %v6055_v42, %v6051_v51  ;;  %v6054_v35 = vld [vmem:[#allocation7 + $0xb30] sm:$0xff]  ;;  %v6059_v52 = vld [vmem:[#allocation7 + $0xb58] sm:$0xff]  ;;  %v2944_v51 = vmax.f32 %v11337_v24, 0.0 }
 0x5a7   :  { %v9426_v57 = vpack.c.bf16 %v6021_v23, %v6017_v32  ;;  %v6057_v8 = vld [vmem:[#allocation7 + $0xb48] sm:$0xff]  ;;  %v6063_v32 = vld [vmem:[#allocation7 + $0xb78] sm:$0xff] }
 0x5a8   :  { %9405 = vmatpush1.bf16.msra.mxu0 %v9404_v4  ;;  %v6016_v4 = vld [vmem:[#allocation7 + $0xa00] sm:$0xff] }
 0x5a9   :  { %9597 = vmatpush1.bf16.msra.mxu1 %v9596_v58  ;;  %9407 = vmatprep.subr.bf16.mxu0 %v9406_v26  ;;  %v6020_v58 = vld [vmem:[#allocation7 + $0xa20] sm:$0xff]  ;;  %v6018_v26 = vld [vmem:[#allocation7 + $0xa10] sm:$0xff] }
 0x5aa   :  { %9599 = vmatprep.subr.bf16.mxu1 %v9598_v47  ;;  %v6029_v47 = vld [vmem:[#allocation7 + $0xa68] sm:$0xff]  ;;  %v9428_v56 = vpack.c.bf16 %v6020_v58, %v6016_v4  ;;  %v9620_v55 = vpack.c.bf16 %v6022_v5, %v6018_v26  ;;  %v9638_v4 = vpack.c.bf16 %v6063_v32, %v6059_v52  ;;  %v6062_v58 = vld [vmem:[#allocation7 + $0xb70] sm:$0xff]  ;;  %v6067_v5 = vld [vmem:[#allocation7 + $0xb98] sm:$0xff] }
 0x5ab   :  { %v9430_v60 = vpack.c.bf16 %v6029_v47, %v6025_v17  ;;  %v6065_v26 = vld [vmem:[#allocation7 + $0xb88] sm:$0xff]  ;;  %v6071_v17 = vld [vmem:[#allocation7 + $0xbb8] sm:$0xff] }
 0x5ac   :  { %9409 = vmatpush1.bf16.msra.mxu0 %v9408_v20  ;;  %v6024_v20 = vld [vmem:[#allocation7 + $0xa40] sm:$0xff]  ;;  %v6576_v52 = vld [vmem:[#allocation10 + $0x1a8] sm:$0xff] }
 0x5ad   :  { %9601 = vmatpush1.bf16.msra.mxu1 %v9600_v27  ;;  %9411 = vmatprep.subr.bf16.mxu0 %v9410_v0  ;;  %v6028_v27 = vld [vmem:[#allocation7 + $0xa60] sm:$0xff]  ;;  %v6026_v0 = vld [vmem:[#allocation7 + $0xa50] sm:$0xff] }
 0x5ae   :  { %9603 = vmatprep.subr.bf16.mxu1 %v9602_v45  ;;  %v6037_v45 = vld [vmem:[#allocation7 + $0xaa8] sm:$0xff]  ;;  %v9432_v34 = vpack.c.bf16 %v6028_v27, %v6024_v20  ;;  %v9624_v43 = vpack.c.bf16 %v6030_v7, %v6026_v0  ;;  %v9642_v20 = vpack.c.bf16 %v6071_v17, %v6067_v5  ;;  %v6070_v27 = vld [vmem:[#allocation7 + $0xbb0] sm:$0xff]  ;;  %v6075_v7 = vld [vmem:[#allocation7 + $0xbd8] sm:$0xff] }
 0x5af   :  { %v9434_v9 = vpack.c.bf16 %v6037_v45, %v6033_v36  ;;  %v6073_v0 = vld [vmem:[#allocation7 + $0xbc8] sm:$0xff]  ;;  %v6079_v36 = vld [vmem:[#allocation7 + $0xbf8] sm:$0xff] }
 0x5b0   :  { %9413 = vmatpush1.bf16.msra.mxu0 %v9412_v3  ;;  %v6032_v3 = vld [vmem:[#allocation7 + $0xa80] sm:$0xff] }
 0x5b1   :  { %9605 = vmatpush1.bf16.msra.mxu1 %v9604_v61  ;;  %9415 = vmatprep.subr.bf16.mxu0 %v9414_v44  ;;  %v6036_v61 = vld [vmem:[#allocation7 + $0xaa0] sm:$0xff]  ;;  %v6034_v44 = vld [vmem:[#allocation7 + $0xa90] sm:$0xff] }
 0x5b2   :  { %9607 = vmatprep.subr.bf16.mxu1 %v9606_v40  ;;  %v6045_v40 = vld [vmem:[#allocation7 + $0xae8] sm:$0xff]  ;;  %v9436_v62 = vpack.c.bf16 %v6036_v61, %v6032_v3  ;;  %v9628_v54 = vpack.c.bf16 %v6038_v12, %v6034_v44  ;;  %v9646_v3 = vpack.c.bf16 %v6079_v36, %v6075_v7  ;;  %v6078_v61 = vld [vmem:[#allocation7 + $0xbf0] sm:$0xff]  ;;  %v6578_v5 = vld [vmem:[#allocation10 + $0x1b8] sm:$0xff] }
 0x5b3   :  { %v9438_v10 = vpack.c.bf16 %v6045_v40, %v6041_v14  ;;  %v6539_v44 = vld [vmem:[#allocation10 + $0x80] sm:$0xff]  ;;  %v6572_v14 = vld [vmem:[#allocation10 + $0x188] sm:$0xff]  ;;  %v6549_v7 = vld [vmem:[#allocation10 + $0xd0] sm:$0xff] }
 0x5b4   :  { %9417 = vmatpush1.bf16.msra.mxu0 %v9416_v59  ;;  %v6040_v59 = vld [vmem:[#allocation7 + $0xac0] sm:$0xff] }
 0x5b5   :  { %9609 = vmatpush1.bf16.msra.mxu1 %v9608_v29  ;;  %9419 = vmatprep.subr.bf16.mxu0 %v9418_v21  ;;  %v6044_v29 = vld [vmem:[#allocation7 + $0xae0] sm:$0xff]  ;;  %v6042_v21 = vld [vmem:[#allocation7 + $0xad0] sm:$0xff] }
 0x5b6   :  { %9611 = vmatprep.subr.bf16.mxu1 %v9610_v49  ;;  %v6053_v49 = vld [vmem:[#allocation7 + $0xb28] sm:$0xff]  ;;  %v9440_v22 = vpack.c.bf16 %v6044_v29, %v6040_v59  ;;  %v9632_v30 = vpack.c.bf16 %v6046_v1, %v6042_v21  ;;  %v6542_v59 = vld [vmem:[#allocation10 + $0x98] sm:$0xff] }
 0x5b7   :  { %v9442_v11 = vpack.c.bf16 %v6053_v49, %v6049_v48  ;;  %v6571_v12 = vld [vmem:[#allocation10 + $0x180] sm:$0xff]  ;;  %v6573_v48 = vld [vmem:[#allocation10 + $0x190] sm:$0xff]  ;;  %v6574_v49 = vld [vmem:[#allocation10 + $0x198] sm:$0xff] }
 0x5b8   :  { %9421 = vmatpush1.bf16.msra.mxu0 %v9420_v6  ;;  %v6048_v6 = vld [vmem:[#allocation7 + $0xb00] sm:$0xff]  ;;  %v9682_v29 = vpack.c.bf16 %v6572_v14, %v6571_v12  ;;  %v6553_v14 = vld [vmem:[#allocation10 + $0xf0] sm:$0xff] }
 0x5b9   :  { %9613 = vmatpush1.bf16.msra.mxu1 %v9612_v46  ;;  %9423 = vmatprep.subr.bf16.mxu0 %v9422_v37  ;;  %v6052_v46 = vld [vmem:[#allocation7 + $0xb20] sm:$0xff]  ;;  %v6050_v37 = vld [vmem:[#allocation7 + $0xb10] sm:$0xff] }
 0x5ba   :  { %9615 = vmatprep.subr.bf16.mxu1 %v9614_v41  ;;  %v6061_v41 = vld [vmem:[#allocation7 + $0xb68] sm:$0xff]  ;;  %v9444_v23 = vpack.c.bf16 %v6052_v46, %v6048_v6  ;;  %v9636_v15 = vpack.c.bf16 %v6054_v35, %v6050_v37  ;;  %v9686_v37 = vpack.c.bf16 %v6574_v49, %v6573_v48  ;;  %v6558_v35 = vld [vmem:[#allocation10 + $0x118] sm:$0xff] }
 0x5bb   :  { %v9446_v28 = vpack.c.bf16 %v6061_v41, %v6057_v8  ;;  %v6555_v21 = vld [vmem:[#allocation10 + $0x100] sm:$0xff]  ;;  %v6544_v6 = vld [vmem:[#allocation10 + $0xa8] sm:$0xff]  ;;  %v6550_v36 = vld [vmem:[#allocation10 + $0xd8] sm:$0xff] }
 0x5bc   :  { %9425 = vmatpush1.bf16.msra.mxu0 %v9424_v18  ;;  %v6056_v18 = vld [vmem:[#allocation7 + $0xb40] sm:$0xff] }
 0x5bd   :  { %9617 = vmatpush1.bf16.msra.mxu1 %v9616_v33  ;;  %9427 = vmatprep.subr.bf16.mxu0 %v9426_v57  ;;  %v6060_v33 = vld [vmem:[#allocation7 + $0xb60] sm:$0xff]  ;;  %v6058_v57 = vld [vmem:[#allocation7 + $0xb50] sm:$0xff] }
 0x5be   :  { %9619 = vmatprep.subr.bf16.mxu1 %v9618_v13  ;;  %v6069_v13 = vld [vmem:[#allocation7 + $0xba8] sm:$0xff]  ;;  %v9448_v47 = vpack.c.bf16 %v6060_v33, %v6056_v18  ;;  %v9640_v39 = vpack.c.bf16 %v6062_v58, %v6058_v57  ;;  %v6546_v18 = vld [vmem:[#allocation10 + $0xb8] sm:$0xff] }
 0x5bf   :  { %v9450_v63 = vpack.c.bf16 %v6069_v13, %v6065_v26  ;;  %v6520_v8 = vld [vmem:[%s11456_s12 + $0x8] sm:$0xff]  ;;  %v6577_v13 = vld [vmem:[#allocation10 + $0x1b0] sm:$0xff] }
 0x5c0   :  { %9429 = vmatpush1.bf16.msra.mxu0 %v9428_v56  ;;  %v6064_v56 = vld [vmem:[#allocation7 + $0xb80] sm:$0xff]  ;;  %v6560_v58 = vld [vmem:[#allocation10 + $0x128] sm:$0xff] }
 0x5c1   :  { %9621 = vmatpush1.bf16.msra.mxu1 %v9620_v55  ;;  %9431 = vmatprep.subr.bf16.mxu0 %v9430_v60  ;;  %v6068_v55 = vld [vmem:[#allocation7 + $0xba0] sm:$0xff]  ;;  %v6066_v60 = vld [vmem:[#allocation7 + $0xb90] sm:$0xff] }
 0x5c2   :  { %9623 = vmatprep.subr.bf16.mxu1 %v9622_v25  ;;  %v6077_v25 = vld [vmem:[#allocation7 + $0xbe8] sm:$0xff]  ;;  %v9452_v45 = vpack.c.bf16 %v6068_v55, %v6064_v56  ;;  %v9644_v19 = vpack.c.bf16 %v6070_v27, %v6066_v60  ;;  %v9694_v60 = vpack.c.bf16 %v6578_v5, %v6577_v13  ;;  %v6585_v13 = vld [vmem:[#allocation10 + $0x1f0] sm:$0xff]  ;;  %v6586_v5 = vld [vmem:[#allocation10 + $0x1f8] sm:$0xff] }
 0x5c3   :  { %v9454_v50 = vpack.c.bf16 %v6077_v25, %v6073_v0  ;;  %v6575_v41 = vld [vmem:[#allocation10 + $0x1a0] sm:$0xff]  ;;  %v6548_v56 = vld [vmem:[#allocation10 + $0xc8] sm:$0xff] }
 0x5c4   :  { %9433 = vmatpush1.bf16.msra.mxu0 %v9432_v34  ;;  %v6072_v34 = vld [vmem:[#allocation7 + $0xbc0] sm:$0xff]  ;;  %v9690_v57 = vpack.c.bf16 %v6576_v52, %v6575_v41  ;;  %v6532_v25 = vld [vmem:[#allocation10 + $0x48] sm:$0xff]  ;;  %v6581_v41 = vld [vmem:[#allocation10 + $0x1d0] sm:$0xff] }
 0x5c5   :  { %9625 = vmatpush1.bf16.msra.mxu1 %v9624_v43  ;;  %9435 = vmatprep.subr.bf16.mxu0 %v9434_v9  ;;  %v6076_v43 = vld [vmem:[#allocation7 + $0xbe0] sm:$0xff]  ;;  %v6074_v9 = vld [vmem:[#allocation7 + $0xbd0] sm:$0xff] }
 0x5c6   :  { %9627 = vmatprep.subr.bf16.mxu1 %v9626_v2  ;;  %v6540_v2 = vld [vmem:[#allocation10 + $0x88] sm:$0xff]  ;;  %v9456_v40 = vpack.c.bf16 %v6076_v43, %v6072_v34  ;;  %v9648_v16 = vpack.c.bf16 %v6078_v61, %v6074_v9  ;;  %v6531_v0 = vld [vmem:[#allocation10 + $0x40] sm:$0xff]  ;;  %v6534_v34 = vld [vmem:[#allocation10 + $0x58] sm:$0xff] }
 0x5c7   :  { %v9650_v53 = vpack.c.bf16 %v6540_v2, %v6539_v44  ;;  %v6551_v43 = vld [vmem:[#allocation10 + $0xe0] sm:$0xff]  ;;  %v6552_v9 = vld [vmem:[#allocation10 + $0xe8] sm:$0xff]  ;;  %v6582_v52 = vld [vmem:[#allocation10 + $0x1d8] sm:$0xff] }
 0x5c8   :  { %9437 = vmatpush1.bf16.msra.mxu0 %v9436_v62  ;;  %v6523_v62 = vld [vmem:[#allocation10] sm:$0xff]  ;;  %v9674_v61 = vpack.c.bf16 %v6552_v9, %v6551_v43  ;;  %v6536_v2 = vld [vmem:[#allocation10 + $0x68] sm:$0xff] }
 0x5c9   :  { %9629 = vmatpush1.bf16.msra.mxu1 %v9628_v54  ;;  %9439 = vmatprep.subr.bf16.mxu0 %v9438_v10  ;;  %v6524_v54 = vld [vmem:[#allocation10 + $0x8] sm:$0xff]  ;;  %v6541_v10 = vld [vmem:[#allocation10 + $0x90] sm:$0xff]  ;;  %v6535_v44 = vld [vmem:[#allocation10 + $0x60] sm:$0xff] }
 0x5ca   :  { %9631 = vmatprep.subr.bf16.mxu1 %v9630_v31  ;;  %v6556_v31 = vld [vmem:[#allocation10 + $0x108] sm:$0xff]  ;;  %v9652_v1 = vpack.c.bf16 %v6524_v54, %v6523_v62  ;;  %v9654_v42 = vpack.c.bf16 %v6542_v59, %v6541_v10  ;;  %v9676_v10 = vpack.c.bf16 %v6536_v2, %v6535_v44  ;;  %v6746_v44 = vld [vmem:[#allocation13 + $0x58] sm:$0xff] }
 0x5cb   :  { %v9684_v46 = vpack.c.bf16 %v6556_v31, %v6555_v21  ;;  %v6537_v21 = vld [vmem:[#allocation10 + $0x70] sm:$0xff]  ;;  %v6538_v31 = vld [vmem:[#allocation10 + $0x78] sm:$0xff]  ;;  %v6743_v43 = vld [vmem:[#allocation13 + $0x40] sm:$0xff] }
 0x5cc   :  { %9441 = vmatpush1.bf16.msra.mxu0 %v9440_v22  ;;  %v6525_v22 = vld [vmem:[#allocation10 + $0x10] sm:$0xff]  ;;  %v9680_v49 = vpack.c.bf16 %v6538_v31, %v6537_v21 }
 0x5cd   :  { %9633 = vmatpush1.bf16.msra.mxu1 %v9632_v30  ;;  %9443 = vmatprep.subr.bf16.mxu0 %v9442_v11  ;;  %v6526_v30 = vld [vmem:[#allocation10 + $0x18] sm:$0xff]  ;;  %v6543_v11 = vld [vmem:[#allocation10 + $0xa0] sm:$0xff]  ;;  %v6744_v9 = vld [vmem:[#allocation13 + $0x48] sm:$0xff] }
 0x5ce   :  { %9635 = vmatprep.subr.bf16.mxu1 %v9634_v38  ;;  %v6557_v38 = vld [vmem:[#allocation10 + $0x110] sm:$0xff]  ;;  %v9656_v24 = vpack.c.bf16 %v6526_v30, %v6525_v22  ;;  %v9658_v32 = vpack.c.bf16 %v6544_v6, %v6543_v11  ;;  %v6519_v22 = vld [vmem:[%s11456_s12] sm:$0xff] }
 0x5cf   :  { %v9688_v33 = vpack.c.bf16 %v6558_v35, %v6557_v38  ;;  %v6561_v30 = vld [vmem:[#allocation10 + $0x130] sm:$0xff]  ;;  %v6562_v11 = vld [vmem:[#allocation10 + $0x138] sm:$0xff]  ;;  %v6563_v35 = vld [vmem:[#allocation10 + $0x140] sm:$0xff] }
 0x5d0   :  { %9445 = vmatpush1.bf16.msra.mxu0 %v9444_v23  ;;  %v6527_v23 = vld [vmem:[#allocation10 + $0x20] sm:$0xff]  ;;  %v9696_v6 = vpack.c.bf16 %v6562_v11, %v6561_v30  ;;  %v6749_v30 = vld [vmem:[#allocation13 + $0x70] sm:$0xff] }
 0x5d1   :  { %9637 = vmatpush1.bf16.msra.mxu1 %v9636_v15  ;;  %9447 = vmatprep.subr.bf16.mxu0 %v9446_v28  ;;  %v6528_v15 = vld [vmem:[#allocation10 + $0x28] sm:$0xff]  ;;  %v6545_v28 = vld [vmem:[#allocation10 + $0xb0] sm:$0xff] }
 0x5d2   :  { %9639 = vmatprep.subr.bf16.mxu1 %v9638_v4  ;;  %v6559_v4 = vld [vmem:[#allocation10 + $0x120] sm:$0xff]  ;;  %v9660_v26 = vpack.c.bf16 %v6528_v15, %v6527_v23  ;;  %v9662_v17 = vpack.c.bf16 %v6546_v18, %v6545_v28  ;;  %v6565_v23 = vld [vmem:[#allocation10 + $0x150] sm:$0xff]  ;;  %v6566_v15 = vld [vmem:[#allocation10 + $0x158] sm:$0xff] }
 0x5d3   :  { %v9692_v55 = vpack.c.bf16 %v6560_v58, %v6559_v4  ;;  %v9704_v28 = vpack.c.bf16 %v6566_v15, %v6565_v23  ;;  %v6583_v18 = vld [vmem:[#allocation10 + $0x1e0] sm:$0xff]  ;;  %v6568_v58 = vld [vmem:[#allocation10 + $0x168] sm:$0xff] }
 0x5d4   :  { %9449 = vmatpush1.bf16.msra.mxu0 %v9448_v47  ;;  %v6529_v47 = vld [vmem:[#allocation10 + $0x30] sm:$0xff]  ;;  %v6567_v4 = vld [vmem:[#allocation10 + $0x160] sm:$0xff] }
 0x5d5   :  { %9641 = vmatpush1.bf16.msra.mxu1 %v9640_v39  ;;  %9451 = vmatprep.subr.bf16.mxu0 %v9450_v63  ;;  %v6530_v39 = vld [vmem:[#allocation10 + $0x38] sm:$0xff]  ;;  %v6547_v63 = vld [vmem:[#allocation10 + $0xc0] sm:$0xff] }
 0x5d6   :  { %9643 = vmatprep.subr.bf16.mxu1 %v9642_v20  ;;  %v9664_v20 = vpack.c.bf16 %v6530_v39, %v6529_v47  ;;  %v9666_v27 = vpack.c.bf16 %v6548_v56, %v6547_v63  ;;  %v6569_v47 = vld [vmem:[#allocation10 + $0x170] sm:$0xff]  ;;  %v6570_v39 = vld [vmem:[#allocation10 + $0x178] sm:$0xff]  ;;  %v6735_v56 = vld [vmem:[#allocation13] sm:$0xff] }
 0x5d7   :  { %v9712_v63 = vpack.c.bf16 %v6570_v39, %v6569_v47  ;;  %v6837_v15 = vld [vmem:[#allocation16 + $0x40] sm:$0xff] }
 0x5d8   :  { %9453 = vmatpush1.bf16.msra.mxu0 %v9452_v45  ;;  %v9668_v45 = vpack.c.bf16 %v6532_v25, %v6531_v0  ;;  %v6738_v0 = vld [vmem:[#allocation13 + $0x18] sm:$0xff] }
 0x5d9   :  { %9645 = vmatpush1.bf16.msra.mxu1 %v9644_v19  ;;  %9455 = vmatprep.subr.bf16.mxu0 %v9454_v50  ;;  %v9670_v19 = vpack.c.bf16 %v6550_v36, %v6549_v7  ;;  %v6533_v50 = vld [vmem:[#allocation10 + $0x50] sm:$0xff]  ;;  %v6739_v7 = vld [vmem:[#allocation13 + $0x20] sm:$0xff] }
 0x5da   :  { %9647 = vmatprep.subr.bf16.mxu1 %v9646_v3  ;;  %v9672_v3 = vpack.c.bf16 %v6534_v34, %v6533_v50  ;;  %v6740_v36 = vld [vmem:[#allocation13 + $0x28] sm:$0xff]  ;;  %v6742_v50 = vld [vmem:[#allocation13 + $0x38] sm:$0xff] }
 0x5dc   :  { %9457 = vmatpush1.bf16.msra.mxu0 %v9456_v40  ;;  %v6554_v40 = vld [vmem:[#allocation10 + $0xf8] sm:$0xff] }
 0x5dd   :  { %9649 = vmatpush1.bf16.msra.mxu1 %v9648_v16  ;;  %9651 = vmatprep.subr.bf16.mxu0 %v9650_v53 }
 0x5de   :  { %9683 = vmatprep.subr.bf16.mxu1 %v9682_v29  ;;  %v9678_v29 = vpack.c.bf16 %v6554_v40, %v6553_v14 }
 0x5df   :  { %6287 = vmatmul.mubr.f32.vlgmr.msra.gmra.mrb[30].mxu0 %v2944_v51 }
 0x5e0   :  { %6500 = vmatmul.mubr.f32.vlgmr.msra.gmra.mrb[30].mxu1 %v2944_v51  ;;  %9653 = vmatpush3.bf16.msra.mxu0 %v9652_v1  ;;  %v11405_v1 = vld [vmem:[#allocation8] ss:$0 sm:$0xff] }
 0x5e1   :  { %6658 = vmatprep.mubr.f32.mxu0 %v6520_v8  ;;  %9655 = vmatprep.subr.bf16.mxu0 %v9654_v42  ;;  %v6564_v8 = vld [vmem:[#allocation10 + $0x148] sm:$0xff] }
 0x5e2   :  { %9685 = vmatpush3.bf16.msra.mxu1 %v9684_v46  ;;  %v6579_v46 = vld [vmem:[#allocation10 + $0x1c0] sm:$0xff] }
 0x5e3   :  { %9687 = vmatprep.subr.bf16.mxu1 %v9686_v37  ;;  %v6580_v37 = vld [vmem:[#allocation10 + $0x1c8] sm:$0xff] }
 0x5e4   :  { %9657 = vmatpush3.bf16.msra.mxu0 %v9656_v24  ;;  %v9698_v38 = vpack.c.bf16 %v6580_v37, %v6579_v46  ;;  %v9700_v24 = vpack.c.bf16 %v6564_v8, %v6563_v35  ;;  %v6829_v46 = vld [vmem:[#allocation16] sm:$0xff] }
 0x5e5   :  { %9659 = vmatprep.subr.bf16.mxu0 %v9658_v32  ;;  %v9702_v32 = vpack.c.bf16 %v6582_v52, %v6581_v41  ;;  %v6833_v8 = vld [vmem:[#allocation16 + $0x20] sm:$0xff]  ;;  %v6835_v52 = vld [vmem:[#allocation16 + $0x30] sm:$0xff] }
 0x5e6   :  { %9689 = vmatpush3.bf16.msra.mxu1 %v9688_v33  ;;  %v6584_v33 = vld [vmem:[#allocation10 + $0x1e8] sm:$0xff] }
 0x5e7   :  { %9691 = vmatprep.subr.bf16.mxu1 %v9690_v57  ;;  %v9706_v57 = vpack.c.bf16 %v6584_v33, %v6583_v18  ;;  %v6839_v33 = vld [vmem:[#allocation16 + $0x50] sm:$0xff] }
 0x5e8   :  { %9661 = vmatpush3.bf16.msra.mxu0 %v9660_v26  ;;  %v9708_v26 = vpack.c.bf16 %v6568_v58, %v6567_v4  ;;  %v6841_v58 = vld [vmem:[#allocation16 + $0x60] sm:$0xff] }
 0x5e9   :  { %9663 = vmatprep.subr.bf16.mxu0 %v9662_v17  ;;  %v9710_v17 = vpack.c.bf16 %v6586_v5, %v6585_v13  ;;  %v6977_v5 = vld [vmem:[#allocation11] ss:$0 sm:$0xff] }
 0x5ea   :  { %9693 = vmatpush3.bf16.msra.mxu1 %v9692_v55  ;;  %v6736_v55 = vld [vmem:[#allocation13 + $0x8] sm:$0xff] }
 0x5eb   :  { %9695 = vmatprep.subr.bf16.mxu1 %v9694_v60  ;;  %v6737_v60 = vld [vmem:[#allocation13 + $0x10] sm:$0xff] }
 0x5ec   :  { %9665 = vmatpush3.bf16.msra.mxu0 %v9664_v20  ;;  %v10080_v20 = vmov 0.0|0.0   ;;  %v9718_v25 = vpack.c.bf16 %v6738_v0, %v6737_v60  ;;  %v6843_v60 = vld [vmem:[#allocation16 + $0x70] sm:$0xff] }
 0x5ed   :  { %9667 = vmatprep.subr.bf16.mxu0 %v9666_v27  ;;  %v9715_v27 = vpack.c.bf16 %v6736_v55, %v6735_v56 }
 0x5ee   :  { %9697 = vmatpush3.bf16.msra.mxu1 %v9696_v6  ;;  %v10082_v6 = vmov 0.0  }
 0x5ef   :  { %9699 = vmatprep.subr.bf16.mxu1 %v9698_v38  ;;  %v6832_v38 = vld [vmem:[#allocation16 + $0x18] sm:$0xff] }
 0x5f0   :  { %9669 = vmatpush3.bf16.msra.mxu0 %v9668_v45  ;;  %v9721_v45 = vpack.c.bf16 %v6740_v36, %v6739_v7 }
 0x5f1   :  { %9671 = vmatprep.subr.bf16.mxu0 %v9670_v19  ;;  %v6741_v19 = vld [vmem:[#allocation13 + $0x30] sm:$0xff] }
 0x5f2   :  { %v5459_v12 = vpop.f32.mrb[28].mxu0  ;;  %9701 = vmatpush3.bf16.msra.mxu1 %v9700_v24  ;;  %v9724_v34 = vpack.c.bf16 %v6742_v50, %v6741_v19  ;;  %v6834_v24 = vld [vmem:[#allocation16 + $0x28] sm:$0xff]  ;;  %v6979_v50 = vld [vmem:[#allocation17] ss:$0 sm:$0xff] }
 0x5f3   :  { %v5672_v16 = vpop.f32.mrb[28].mxu1  ;;  %v5461_v53 = vpop.f32.mrb[29].mxu0  ;;  %9703 = vmatprep.subr.bf16.mxu1 %v9702_v32  ;;  %v9745_v41 = vpack.c.bf16 %v6834_v24, %v6833_v8  ;;  %v6836_v32 = vld [vmem:[#allocation16 + $0x38] sm:$0xff] }
 0x5f4   :  { %v5678_v62 = vmax.f32 %v5459_v12, %v5461_v53  ;;  %v5674_v54 = vpop.f32.mrb[29].mxu1  ;;  %9673 = vmatpush3.bf16.msra.mxu0 %v9672_v3  ;;  %v9727_v3 = vpack.c.bf16 %v6744_v9, %v6743_v43  ;;  %v9748_v23 = vpack.c.bf16 %v6836_v32, %v6835_v52 }
 0x5f5   :  { %v5679_v59 = vmax.f32 %v5672_v16, %v5674_v54  ;;  %9675 = vmatprep.subr.bf16.mxu0 %v9674_v61  ;;  %v6745_v61 = vld [vmem:[#allocation13 + $0x50] sm:$0xff] }
 0x5f6   :  { %9705 = vmatpush3.bf16.msra.mxu1 %v9704_v28  ;;  %v9730_v2 = vpack.c.bf16 %v6746_v44, %v6745_v61  ;;  %v6838_v28 = vld [vmem:[#allocation16 + $0x48] sm:$0xff] }
 0x5f7   :  { %v5680_v48 = vmax.f32 %v5678_v62, %v5679_v59  ;;  %9707 = vmatprep.subr.bf16.mxu1 %v9706_v57  ;;  %v9751_v18 = vpack.c.bf16 %v6838_v28, %v6837_v15  ;;  %v6840_v57 = vld [vmem:[#allocation16 + $0x58] sm:$0xff] }
 0x5f8   :  { %9677 = vmatpush3.bf16.msra.mxu0 %v9676_v10  ;;  %v9754_v4 = vpack.c.bf16 %v6840_v57, %v6839_v33 }
 0x5f9   :  { %v11408_v51 = vadd.f32 %v11405_v1, %v5680_v48  ;;  %9679 = vmatprep.subr.bf16.mxu0 %v9678_v29  ;;  %v6747_v48 = vld [vmem:[#allocation13 + $0x60] sm:$0xff] }
 0x5fa   :  { %9709 = vmatpush3.bf16.msra.mxu1 %v9708_v26  ;;  %v6842_v26 = vld [vmem:[#allocation16 + $0x68] sm:$0xff] }
 0x5fb   :  { %v5688_v42 = vmax.f32 %v11408_v51, 0.0  ;;  %9711 = vmatprep.subr.bf16.mxu1 %v9710_v17  ;;  %v6830_v51 = vld [vmem:[#allocation16 + $0x8] sm:$0xff]  ;;  %v9757_v13 = vpack.c.bf16 %v6842_v26, %v6841_v58 }
 0x5fc   :  { %9681 = vmatpush3.bf16.msra.mxu0 %v9680_v49  ;;  %v6748_v49 = vld [vmem:[#allocation13 + $0x68] sm:$0xff]  ;;  %v9739_v37 = vpack.c.bf16 %v6830_v51, %v6829_v46 }
 0x5fd   :  { %5689 = vst [vmem:[%s11456_s12 + $0x10] sm:$0xff] %v5688_v42  ;;  %9714 = vmatprep.subr.bf16.mxu0 %v10080_v20 }
 0x5fe   :  { %9713 = vmatpush3.bf16.msra.mxu1 %v9712_v63 }
 0x5ff   :  { %6659 = vmatmul.mubr.f32.vlgmr.msra.gmra.mrb[32].mxu0 %v6519_v22  ;;  %9738 = vmatprep.subr.bf16.mxu1 %v10080_v20  ;;  %v9733_v22 = vpack.c.bf16 %v6748_v49, %v6747_v48 }
 0x600   :  { %9716 = vmatpush3.bf16.msra.mxu0 %v9715_v27  ;;  %7116 = vmatprep.mubr.msk.f32.mxu0 %vm10081_vm12, %v10082_v6  ;;  %v6844_v27 = vld [vmem:[#allocation16 + $0x78] sm:$0xff] }
 0x601   :  { %9717 = vmatprep.subr.bf16.mxu0 %v10080_v20  ;;  %v9760_v0 = vpack.c.bf16 %v6844_v27, %v6843_v60 }
 0x604   :  { %9719 = vmatpush3.bf16.msra.mxu0 %v9718_v25  ;;  %v6978_v25 = vld [vmem:[#allocation14] ss:$0 sm:$0xff] }
 0x605   :  { %9720 = vmatprep.subr.bf16.mxu0 %v10080_v20 }
 0x608   :  { %9722 = vmatpush3.bf16.msra.mxu0 %v9721_v45 }
 0x609   :  { %9723 = vmatprep.subr.bf16.mxu0 %v10080_v20 }
 0x60c   :  { %9725 = vmatpush3.bf16.msra.mxu0 %v9724_v34 }
 0x60d   :  { %9726 = vmatprep.subr.bf16.mxu0 %v10080_v20 }
 0x610   :  { %9728 = vmatpush3.bf16.msra.mxu0 %v9727_v3 }
 0x611   :  { %9729 = vmatprep.subr.bf16.mxu0 %v10080_v20 }
 0x614   :  { %9731 = vmatpush3.bf16.msra.mxu0 %v9730_v2 }
 0x615   :  { %9732 = vmatprep.subr.bf16.mxu0 %v10080_v20 }
 0x618   :  { %9734 = vmatpush3.bf16.msra.mxu0 %v9733_v22 }
 0x619   :  { %9735 = vmatprep.subr.bf16.mxu0 %v10080_v20 }
 0x6b2   :  { %v6288_v12 = vpop.f32.mrb[30].mxu0 }
 0x6b3   :  { %v6501_v14 = vpop.f32.mrb[30].mxu1  ;;  %v6290_v40 = vpop.f32.mrb[31].mxu0 }
 0x6b4   :  { %v6507_v16 = vmax.f32 %v6288_v12, %v6290_v40  ;;  %v6503_v53 = vpop.f32.mrb[31].mxu1 }
 0x6b5   :  { %v6508_v62 = vmax.f32 %v6501_v14, %v6503_v53 }
 0x6b7   :  { %v6509_v54 = vmax.f32 %v6507_v16, %v6508_v62 }
 0x6b9   :  { %v6516_v10 = vadd.f32 %v11405_v1, %v6509_v54  ;;  %v6750_v1 = vld [vmem:[#allocation13 + $0x78] sm:$0xff] }
 0x6ba   :  { %v9736_v11 = vpack.c.bf16 %v6750_v1, %v6749_v30 }
 0x6bb   :  { %v6517_v59 = vmax.f32 %v6516_v10, 0.0 }
 0x6bc   :  { %9737 = vmatpush3.bf16.msra.mxu0 %v9736_v11 }
 0x6bd   :  { %6518 = vst [vmem:[%s11456_s12 + $0x18] sm:$0xff] %v6517_v59  ;;  %6728 = vmatprep.mubr.f32.mxu1 %v6517_v59 }
 0x6be   :  { %6729 = vmatmul.mubr.f32.vlgmr.msra.gmra.mrb[32].mxu1 %v5688_v42  ;;  %v6831_v42 = vld [vmem:[#allocation16 + $0x10] sm:$0xff] }
 0x6bf   :  { %7151 = vmatprep.mubr.msk.f32.mxu1 %vm10081_vm12, %v10082_v6  ;;  %9740 = vmatpush3.bf16.msra.mxu1 %v9739_v37  ;;  %v9742_v35 = vpack.c.bf16 %v6832_v38, %v6831_v42 }
 0x6c0   :  { %9741 = vmatprep.subr.bf16.mxu1 %v10080_v20 }
 0x6c3   :  { %9743 = vmatpush3.bf16.msra.mxu1 %v9742_v35 }
 0x6c4   :  { %9744 = vmatprep.subr.bf16.mxu1 %v10080_v20 }
 0x6c7   :  { %9746 = vmatpush3.bf16.msra.mxu1 %v9745_v41 }
 0x6c8   :  { %9747 = vmatprep.subr.bf16.mxu1 %v10080_v20 }
 0x6cb   :  { %9749 = vmatpush3.bf16.msra.mxu1 %v9748_v23 }
 0x6cc   :  { %9750 = vmatprep.subr.bf16.mxu1 %v10080_v20 }
 0x6cf   :  { %9752 = vmatpush3.bf16.msra.mxu1 %v9751_v18 }
 0x6d0   :  { %9753 = vmatprep.subr.bf16.mxu1 %v10080_v20 }
 0x6d2   :  { %v7012_v29 = vpop.f32.mrb[32].mxu0 }
 0x6d3   :  { %v7013_v21 = vpop.f32.mrb[33].mxu0  ;;  %9755 = vmatpush3.bf16.msra.mxu1 %v9754_v4 }
 0x6d4   :  { %v7014_v31 = vadd.f32 %v7013_v21, %v7012_v29  ;;  %9756 = vmatprep.subr.bf16.mxu1 %v10080_v20 }
 0x6d6   :  { %v6661_v39 = vadd.f32 %v7014_v31, %v6977_v5 }
 0x6d7   :  { %9758 = vmatpush3.bf16.msra.mxu1 %v9757_v13 }
 0x6d8   :  { %9759 = vmatprep.subr.bf16.mxu1 %v10080_v20 }
 0x6db   :  { %9761 = vmatpush3.bf16.msra.mxu1 %v9760_v0 }
 0x791   :  { %v7047_v17 = vpop.f32.mrb[32].mxu1 }
 0x792   :  { %v7048_v47 = vpop.f32.mrb[33].mxu1 }
 0x793   :  { %v7049_v63 = vadd.f32 %v7048_v47, %v7047_v17 }
 0x795   :  { %v6731_v56 = vadd.f32 %v7049_v63, %v6661_v39 }
 0x797   :  { %v6734_v55 = vmax.f32 %v6731_v56, 0.0 }
 0x799   :  { %7117 = vmatmul.mubr.f32.vlgmr.msra.gmra.mrb[34].mxu0 %v6734_v55 }
 0x86c   :  { %v6824_v7 = vpop.f32.mrb[34].mxu0 }
 0x86d   :  { %v6825_v36 = vadd.f32 %v6978_v25, %v6824_v7  ;;  %v7118_v45 = vpop.f32.mrb[35].mxu0 }
 0x86f   :  { %v6828_v19 = vmax.f32 %v6825_v36, 0.0 }
 0x871   :  { %7152 = vmatmul.mubr.f32.vlgmr.msra.gmra.mrb[34].mxu1 %v6828_v19 }
 0x944   :  { %v6918_v20 = vpop.f32.mrb[34].mxu1 }
 0x945   :  { %v6919_v34 = vadd.f32 %v6979_v50, %v6918_v20  ;;  %v7153_v43 = vpop.f32.mrb[35].mxu1 }
 0x947   :  { %6922 = vst [vmem:[%s11455_s11] sm:$0xff] %v6919_v34 }
 0x948   :  { %6931 = vsyncpa [#allocation4], 1 }
 0x949   :  { %6932 = vsyncpa [#allocation6], 1 }
 0x94a   :  { %6933 = vsyncpa [#allocation9], 1 }
 0x94b   :  { %6934 = vsyncpa [#allocation12], 1 }
 0x94c   :  { %6935 = vsyncpa [#allocation15], 1 }
 0x94d   :  { %6936 = vsyncpa [#allocation18], 1 }

</bundles_post_ra>
